<compile_context>
chip_gen: v7x
topology: tpu7x:2x2x1
jax: 0.10.0
libtpu: 0.0.40
codegen_flags: <defaults>
</compile_context>

<pallas_src>
import functools

import jax
import jax.numpy as jnp
from jax import lax
from jax.experimental import pallas as pl
from jax.experimental.pallas import tpu as pltpu

BN_EPS = 1e-5


# --------------------- conv3x3 + bias + ReLU + BN stats ---------------------

def _conv_kernel(x_ref, w_ref, b_ref, y_ref, s_ref, q_ref, *, W, HW):
    """3x3 conv as 3 row-tap matmuls on the MXU (bf16 in, f32 accumulate).

    x_ref : (1, (H+2)*W, 3*Cin)  bf16  -- dx taps pre-folded into channels,
                                          rows flattened as (padded_h * W + w)
    w_ref : (3, 3*Cin, Cout)     bf16  -- one (3*Cin, Cout) slab per dy tap
    b_ref : (1, Cout)            f32
    y_ref : (1, H*W, Cout)       f32   -- ReLU(conv + bias)
    s_ref : (1, 1, Cout)         f32   -- per-channel sum   (BatchNorm stats)
    q_ref : (1, 1, Cout)         f32   -- per-channel sumsq (BatchNorm stats)
    """
    acc = jnp.dot(x_ref[0, 0:HW, :], w_ref[0],
                  preferred_element_type=jnp.float32)
    for dy in (1, 2):
        acc = acc + jnp.dot(x_ref[0, dy * W: dy * W + HW, :], w_ref[dy],
                            preferred_element_type=jnp.float32)
    acc = jnp.maximum(acc + b_ref[...], 0.0)
    y_ref[0] = acc
    s_ref[0] = jnp.sum(acc, axis=0, keepdims=True)
    q_ref[0] = jnp.sum(acc * acc, axis=0, keepdims=True)


def conv3x3_relu_stats(x_nhwc, w_hwio, b, scale=None, shift=None):
    """Conv2d(3x3, stride 1, pad 1) + bias + ReLU; returns (y, sum, sumsq).

    Optional per-channel (scale, shift) — the folded BatchNorm of the previous
    layer — is applied to the input *before* zero padding; XLA fuses it into
    the dx-fold / bf16-cast glue, so the normalized tensor never hits HBM.
    """
    N, H, Wd, Cin = x_nhwc.shape
    Cout = w_hwio.shape[-1]
    if scale is not None:
        x_nhwc = (x_nhwc * scale.reshape(1, 1, 1, Cin)
                  + shift.reshape(1, 1, 1, Cin))
    xp = jnp.pad(x_nhwc, ((0, 0), (1, 1), (1, 1), (0, 0)))
    # fold the 3 horizontal (dx) taps into channels: (N, H+2, W, 3*Cin)
    xcat = jnp.concatenate([xp[:, :, dx:dx + Wd, :] for dx in range(3)],
                           axis=-1)
    xcat = xcat.astype(jnp.bfloat16).reshape(N, (H + 2) * Wd, 3 * Cin)
    wk = w_hwio.reshape(3, 3 * Cin, Cout).astype(jnp.bfloat16)
    bk = b.reshape(1, Cout).astype(jnp.float32)

    HW = H * Wd
    flops = 2 * N * HW * (9 * Cin) * Cout
    bytes_accessed = (xcat.size * 2 + wk.size * 2 + bk.size * 4
                      + N * HW * Cout * 4 + 2 * N * Cout * 4)

    y, ps, pq = pl.pallas_call(
        functools.partial(_conv_kernel, W=Wd, HW=HW),
        out_shape=(
            jax.ShapeDtypeStruct((N, HW, Cout), jnp.float32),
            jax.ShapeDtypeStruct((N, 1, Cout), jnp.float32),
            jax.ShapeDtypeStruct((N, 1, Cout), jnp.float32),
        ),
        grid=(N,),
        in_specs=[
            pl.BlockSpec((1, (H + 2) * Wd, 3 * Cin), lambda n: (n, 0, 0)),
            pl.BlockSpec((3, 3 * Cin, Cout), lambda n: (0, 0, 0)),
            pl.BlockSpec((1, Cout), lambda n: (0, 0)),
        ],
        out_specs=(
            pl.BlockSpec((1, HW, Cout), lambda n: (n, 0, 0)),
            pl.BlockSpec((1, 1, Cout), lambda n: (n, 0, 0)),
            pl.BlockSpec((1, 1, Cout), lambda n: (n, 0, 0)),
        ),
        compiler_params=pltpu.CompilerParams(
            dimension_semantics=("parallel",)),
        cost_estimate=pl.CostEstimate(
            flops=flops, transcendentals=0, bytes_accessed=bytes_accessed),
    )(xcat, wk, bk)
    return y.reshape(N, H, Wd, Cout), ps.reshape(N, Cout), pq.reshape(N, Cout)


def bn_scale_shift(psum, psumsq, count, gamma, beta):
    """Finish BatchNorm stats (tiny per-channel glue) and return the folded
    affine: scale = gamma/sqrt(var+eps), shift = beta - mean*scale."""
    s = jnp.sum(psum, axis=0)
    q = jnp.sum(psumsq, axis=0)
    mean = s / count
    var = jnp.maximum(q / count - mean * mean, 0.0)   # biased var (training)
    inv = lax.rsqrt(var + BN_EPS)
    scale = gamma * inv
    shift = beta - mean * scale
    return scale, shift


# ------------------------- maxpool (with folded BN) -------------------------

def _maxpool_affine_kernel(x_ref, sc_ref, sh_ref, o_ref, *, k, Wo):
    """MaxPool(k,k) of one output row; the previous BN's per-channel affine is
    applied elementwise to the input block before the max (in VMEM)."""
    x = x_ref[0] * sc_ref[...] + sh_ref[...]          # (k, W, C) * (1,1,C)
    v = jnp.max(x, axis=0)                            # vertical max -> (W, C)
    cols = [jnp.max(v[j * k:(j + 1) * k, :], axis=0, keepdims=True)
            for j in range(Wo)]                       # horizontal max
    o_ref[0, 0] = jnp.concatenate(cols, axis=0)       # (Wo, C)


def maxpool2d_affine(x_nhwc, k, scale, shift):
    N, H, Wd, C = x_nhwc.shape
    Ho, Wo = H // k, Wd // k
    sc = scale.reshape(1, 1, C).astype(jnp.float32)
    sh = shift.reshape(1, 1, C).astype(jnp.float32)
    return pl.pallas_call(
        functools.partial(_maxpool_affine_kernel, k=k, Wo=Wo),
        out_shape=jax.ShapeDtypeStruct((N, Ho, Wo, C), jnp.float32),
        grid=(N, Ho),
        in_specs=[
            pl.BlockSpec((1, k, Wd, C), lambda n, r: (n, r, 0, 0)),
            pl.BlockSpec((1, 1, C), lambda n, r: (0, 0, 0)),
            pl.BlockSpec((1, 1, C), lambda n, r: (0, 0, 0)),
        ],
        out_specs=pl.BlockSpec((1, 1, Wo, C), lambda n, r: (n, r, 0, 0)),
        compiler_params=pltpu.CompilerParams(
            dimension_semantics=("parallel", "parallel")),
    )(x_nhwc, sc, sh)


# ------------------------------- parameters --------------------------------

CONV_CHANNELS = [(1, 32), (32, 32), (32, 64), (64, 64),      # layer1 convs
                 (64, 128), (128, 128), (128, 256)]          # layer2 convs
BN_CHANNELS = [32, 32, 64, 64, 128, 128]                     # BN after convs 1..6


def init_params(key):
    convs, bns = [], []
    keys = jax.random.split(key, len(CONV_CHANNELS) + len(BN_CHANNELS))
    for i, (cin, cout) in enumerate(CONV_CHANNELS):
        kw, kb = jax.random.split(keys[i])
        w = jax.random.normal(kw, (3, 3, cin, cout), jnp.float32) / jnp.sqrt(9.0 * cin)
        b = 0.01 * jax.random.normal(kb, (cout,), jnp.float32)
        convs.append((w, b))
    for j, c in enumerate(BN_CHANNELS):
        kg, kb = jax.random.split(keys[len(CONV_CHANNELS) + j])
        g = 1.0 + 0.1 * jax.random.normal(kg, (c,), jnp.float32)
        bt = 0.1 * jax.random.normal(kb, (c,), jnp.float32)
        bns.append((g, bt))
    return {"convs": convs, "bns": bns}


# ------------------------------- forward pass -------------------------------

def encoder_forward(params, x_nchw):
    N = x_nchw.shape[0]
    convs, bns = params["convs"], params["bns"]
    y = jnp.transpose(x_nchw, (0, 2, 3, 1)).astype(jnp.float32)   # NCHW -> NHWC

    # layer1: conv1..conv4 (each: conv+ReLU, BN folded into the consumer), pool 5x5
    scale = shift = None
    for i in range(4):
        y, ps, pq = conv3x3_relu_stats(y, convs[i][0], convs[i][1], scale, shift)
        count = float(y.shape[0] * y.shape[1] * y.shape[2])
        scale, shift = bn_scale_shift(ps, pq, count, bns[i][0], bns[i][1])
    y = maxpool2d_affine(y, 5, scale, shift)          # BN4 folded into the pool

    # layer2: conv5, conv6 (+BN), pool 2x2, conv7 (+ReLU, no BN)
    scale = shift = None
    for i in (4, 5):
        y, ps, pq = conv3x3_relu_stats(y, convs[i][0], convs[i][1], scale, shift)
        count = float(y.shape[0] * y.shape[1] * y.shape[2])
        scale, shift = bn_scale_shift(ps, pq, count, bns[i][0], bns[i][1])
    y = maxpool2d_affine(y, 2, scale, shift)          # BN6 folded into the pool
    y, _, _ = conv3x3_relu_stats(y, convs[6][0], convs[6][1], None, None)

    # out.view(batch, -1) in PyTorch flattens NCHW order
    return jnp.transpose(y, (0, 3, 1, 2)).reshape(N, -1)


# ---------------------------- pure-JAX reference ----------------------------

def encoder_reference(params, x_nchw):
    x = jnp.transpose(x_nchw, (0, 2, 3, 1)).astype(jnp.float32)

    def conv(x, w, b):
        y = lax.conv_general_dilated(
            x.astype(jnp.bfloat16), w.astype(jnp.bfloat16),
            window_strides=(1, 1), padding="SAME",
            dimension_numbers=("NHWC", "HWIO", "NHWC"),
            preferred_element_type=jnp.float32)
        return y + b

    def bn(x, g, bt):
        m = jnp.mean(x, axis=(0, 1, 2), keepdims=True)
        v = jnp.mean(jnp.square(x - m), axis=(0, 1, 2), keepdims=True)
        return (x - m) * lax.rsqrt(v + BN_EPS) * g + bt

    def pool(x, k):
        return lax.reduce_window(x, -jnp.inf, lax.max,
                                 (1, k, k, 1), (1, k, k, 1), "VALID")

    convs, bns = params["convs"], params["bns"]
    for i in range(4):
        x = bn(jnp.maximum(conv(x, *convs[i]), 0.0), *bns[i])
    x = pool(x, 5)
    for i in (4, 5):
        x = bn(jnp.maximum(conv(x, *convs[i]), 0.0), *bns[i])
    x = pool(x, 2)
    x = jnp.maximum(conv(x, *convs[6]), 0.0)
    return jnp.transpose(x, (0, 3, 1, 2)).reshape(x.shape[0], -1)


# ----------------------------------- main ------------------------------------

if __name__ == "__main__":
    key = jax.random.PRNGKey(0)
    kp, kx = jax.random.split(key)
    params = init_params(kp)

    # Module targets (batch, 1, 100, 50); use a small spatially compatible
    # input (divisible by 5 then by 2): batch=2, 1 x 20 x 10.
    x = jax.random.normal(kx, (2, 1, 20, 10), jnp.float32)

    fwd = jax.jit(encoder_forward)
    out = jax.block_until_ready(fwd(params, x))
    ref = jax.block_until_ready(encoder_reference(params, x))

    assert out.shape == (2, 256 * (20 // 5 // 2) * (10 // 5 // 2)), out.shape  # (2, 512)
    if not jnp.allclose(out, ref, atol=3e-2, rtol=3e-2):
        err = float(jnp.max(jnp.abs(out - ref)))
        raise AssertionError(f"Pallas output mismatch vs JAX reference, max abs err={err}")

    print("KERNEL_OK")
</pallas_src>

<mosaic_0001>
module attributes {stable_mosaic.version = 11 : i64} {
  func.func @_conv_kernel(%arg0: i32, %arg1: memref<1x220x3xbf16, #tpu.memory_space<vmem>>, %arg2: memref<3x3x32xbf16, #tpu.memory_space<vmem>>, %arg3: memref<1x32xf32, #tpu.memory_space<vmem>>, %arg4: memref<1x200x32xf32, #tpu.memory_space<vmem>>, %arg5: memref<1x1x32xf32, #tpu.memory_space<vmem>>, %arg6: memref<1x1x32xf32, #tpu.memory_space<vmem>>) attributes {dimension_semantics = [#tpu.dimension_semantics<parallel>], iteration_bounds = array<i64: 2>, scalar_prefetch = 0 : i64, scratch_operands = 0 : i64, tpu.core_type = #tpu.core_type<tc>, window_params = [{transform_indices = @transform_0, window_bounds = array<i64: 1, 220, 3>}, {pipeline_mode = #tpu.pipeline_mode<synchronous>, transform_indices = @transform_1, window_bounds = array<i64: 3, 3, 32>}, {pipeline_mode = #tpu.pipeline_mode<synchronous>, transform_indices = @transform_2, window_bounds = array<i64: 1, 32>}, {transform_indices = @transform_3, window_bounds = array<i64: 1, 200, 32>}, {transform_indices = @transform_4, window_bounds = array<i64: 1, 1, 32>}, {transform_indices = @transform_5, window_bounds = array<i64: 1, 1, 32>}]} {
    %c0 = arith.constant 0 : index
    %c0_0 = arith.constant 0 : index
    %c0_1 = arith.constant 0 : index
    %0 = vector.load %arg1[%c0, %c0_0, %c0_1] : memref<1x220x3xbf16, #tpu.memory_space<vmem>>, vector<1x200x3xbf16>
    %1 = vector.shape_cast %0 : vector<1x200x3xbf16> to vector<200x3xbf16>
    %c0_2 = arith.constant 0 : index
    %c0_3 = arith.constant 0 : index
    %c0_4 = arith.constant 0 : index
    %2 = vector.load %arg2[%c0_2, %c0_3, %c0_4] : memref<3x3x32xbf16, #tpu.memory_space<vmem>>, vector<1x3x32xbf16>
    %3 = vector.shape_cast %2 : vector<1x3x32xbf16> to vector<3x32xbf16>
    %cst = arith.constant dense<0.000000e+00> : vector<200x32xf32>
    %4 = tpu.matmul %1, %3, %cst {dimension_numbers = #tpu.dot_dimension_numbers<[1], [0], [0], [1], [0, 0, 1, 1], [], []>} : vector<200x3xbf16>, vector<3x32xbf16>, vector<200x32xf32> -> vector<200x32xf32>
    %c0_5 = arith.constant 0 : index
    %c10 = arith.constant 10 : index
    %c0_6 = arith.constant 0 : index
    %5 = vector.load %arg1[%c0_5, %c10, %c0_6] : memref<1x220x3xbf16, #tpu.memory_space<vmem>>, vector<1x200x3xbf16>
    %6 = vector.shape_cast %5 : vector<1x200x3xbf16> to vector<200x3xbf16>
    %c1 = arith.constant 1 : index
    %c0_7 = arith.constant 0 : index
    %c0_8 = arith.constant 0 : index
    %7 = vector.load %arg2[%c1, %c0_7, %c0_8] : memref<3x3x32xbf16, #tpu.memory_space<vmem>>, vector<1x3x32xbf16>
    %8 = vector.shape_cast %7 : vector<1x3x32xbf16> to vector<3x32xbf16>
    %cst_9 = arith.constant dense<0.000000e+00> : vector<200x32xf32>
    %9 = tpu.matmul %6, %8, %cst_9 {dimension_numbers = #tpu.dot_dimension_numbers<[1], [0], [0], [1], [0, 0, 1, 1], [], []>} : vector<200x3xbf16>, vector<3x32xbf16>, vector<200x32xf32> -> vector<200x32xf32>
    %10 = arith.addf %4, %9 : vector<200x32xf32>
    %c0_10 = arith.constant 0 : index
    %c20 = arith.constant 20 : index
    %c0_11 = arith.constant 0 : index
    %11 = vector.load %arg1[%c0_10, %c20, %c0_11] : memref<1x220x3xbf16, #tpu.memory_space<vmem>>, vector<1x200x3xbf16>
    %12 = vector.shape_cast %11 : vector<1x200x3xbf16> to vector<200x3xbf16>
    %c2 = arith.constant 2 : index
    %c0_12 = arith.constant 0 : index
    %c0_13 = arith.constant 0 : index
    %13 = vector.load %arg2[%c2, %c0_12, %c0_13] : memref<3x3x32xbf16, #tpu.memory_space<vmem>>, vector<1x3x32xbf16>
    %14 = vector.shape_cast %13 : vector<1x3x32xbf16> to vector<3x32xbf16>
    %cst_14 = arith.constant dense<0.000000e+00> : vector<200x32xf32>
    %15 = tpu.matmul %12, %14, %cst_14 {dimension_numbers = #tpu.dot_dimension_numbers<[1], [0], [0], [1], [0, 0, 1, 1], [], []>} : vector<200x3xbf16>, vector<3x32xbf16>, vector<200x32xf32> -> vector<200x32xf32>
    %16 = arith.addf %10, %15 : vector<200x32xf32>
    %c0_15 = arith.constant 0 : index
    %c0_16 = arith.constant 0 : index
    %17 = vector.load %arg3[%c0_15, %c0_16] : memref<1x32xf32, #tpu.memory_space<vmem>>, vector<1x32xf32>
    %18 = vector.broadcast %17 : vector<1x32xf32> to vector<200x32xf32>
    %19 = arith.addf %16, %18 : vector<200x32xf32>
    %cst_17 = arith.constant 0.000000e+00 : f32
    %20 = vector.broadcast %cst_17 : f32 to vector<200x32xf32>
    %21 = arith.maximumf %19, %20 : vector<200x32xf32>
    %c0_18 = arith.constant 0 : index
    %c0_19 = arith.constant 0 : index
    %c0_20 = arith.constant 0 : index
    %22 = vector.load %arg4[%c0_18, %c0_19, %c0_20] : memref<1x200x32xf32, #tpu.memory_space<vmem>>, vector<1x200x32xf32>
    %23 = vector.shape_cast %22 : vector<1x200x32xf32> to vector<200x32xf32>
    %24 = vector.shape_cast %21 : vector<200x32xf32> to vector<1x200x32xf32>
    tpu.vector_store %arg4[%c0_18, %c0_19, %c0_20], %24 {strides = array<i32>} : memref<1x200x32xf32, #tpu.memory_space<vmem>>, vector<1x200x32xf32>,
    %cst_21 = arith.constant dense<0.000000e+00> : vector<32xf32>
    %25 = vector.multi_reduction <add>, %21, %cst_21 [0] : vector<200x32xf32> to vector<32xf32>
    %26 = vector.shape_cast %25 : vector<32xf32> to vector<1x32xf32>
    %c0_22 = arith.constant 0 : index
    %c0_23 = arith.constant 0 : index
    %c0_24 = arith.constant 0 : index
    %27 = vector.load %arg5[%c0_22, %c0_23, %c0_24] : memref<1x1x32xf32, #tpu.memory_space<vmem>>, vector<1x1x32xf32>
    %28 = vector.shape_cast %27 : vector<1x1x32xf32> to vector<1x32xf32>
    %29 = vector.shape_cast %26 : vector<1x32xf32> to vector<1x1x32xf32>
    tpu.vector_store %arg5[%c0_22, %c0_23, %c0_24], %29 {strides = array<i32>} : memref<1x1x32xf32, #tpu.memory_space<vmem>>, vector<1x1x32xf32>,
    %30 = arith.mulf %21, %21 : vector<200x32xf32>
    %cst_25 = arith.constant dense<0.000000e+00> : vector<32xf32>
    %31 = vector.multi_reduction <add>, %30, %cst_25 [0] : vector<200x32xf32> to vector<32xf32>
    %32 = vector.shape_cast %31 : vector<32xf32> to vector<1x32xf32>
    %c0_26 = arith.constant 0 : index
    %c0_27 = arith.constant 0 : index
    %c0_28 = arith.constant 0 : index
    %33 = vector.load %arg6[%c0_26, %c0_27, %c0_28] : memref<1x1x32xf32, #tpu.memory_space<vmem>>, vector<1x1x32xf32>
    %34 = vector.shape_cast %33 : vector<1x1x32xf32> to vector<1x32xf32>
    %35 = vector.shape_cast %32 : vector<1x32xf32> to vector<1x1x32xf32>
    tpu.vector_store %arg6[%c0_26, %c0_27, %c0_28], %35 {strides = array<i32>} : memref<1x1x32xf32, #tpu.memory_space<vmem>>, vector<1x1x32xf32>,
    return
  }
  func.func @transform_0(%arg0: i32) -> (i32, i32, i32) {
    %c0_i32 = arith.constant 0 : i32
    %c0_i32_0 = arith.constant 0 : i32
    %c0_i32_1 = arith.constant 0 : i32
    return %arg0, %c0_i32, %c0_i32_0 : i32, i32, i32
  }
  func.func @transform_1(%arg0: i32) -> (i32, i32, i32) {
    %c0_i32 = arith.constant 0 : i32
    %c0_i32_0 = arith.constant 0 : i32
    %c0_i32_1 = arith.constant 0 : i32
    %c0_i32_2 = arith.constant 0 : i32
    return %c0_i32, %c0_i32_0, %c0_i32_1 : i32, i32, i32
  }
  func.func @transform_2(%arg0: i32) -> (i32, i32) {
    %c0_i32 = arith.constant 0 : i32
    %c0_i32_0 = arith.constant 0 : i32
    %c0_i32_1 = arith.constant 0 : i32
    return %c0_i32, %c0_i32_0 : i32, i32
  }
  func.func @transform_3(%arg0: i32) -> (i32, i32, i32) {
    %c0_i32 = arith.constant 0 : i32
    %c0_i32_0 = arith.constant 0 : i32
    %c0_i32_1 = arith.constant 0 : i32
    return %arg0, %c0_i32, %c0_i32_0 : i32, i32, i32
  }
  func.func @transform_4(%arg0: i32) -> (i32, i32, i32) {
    %c0_i32 = arith.constant 0 : i32
    %c0_i32_0 = arith.constant 0 : i32
    %c0_i32_1 = arith.constant 0 : i32
    return %arg0, %c0_i32, %c0_i32_0 : i32, i32, i32
  }
  func.func @transform_5(%arg0: i32) -> (i32, i32, i32) {
    %c0_i32 = arith.constant 0 : i32
    %c0_i32_0 = arith.constant 0 : i32
    %c0_i32_1 = arith.constant 0 : i32
    return %arg0, %c0_i32, %c0_i32_0 : i32, i32, i32
  }
}

module attributes {stable_mosaic.version = 11 : i64} {
  func.func @_conv_kernel(%arg0: i32, %arg1: memref<1x220x96xbf16, #tpu.memory_space<vmem>>, %arg2: memref<3x96x32xbf16, #tpu.memory_space<vmem>>, %arg3: memref<1x32xf32, #tpu.memory_space<vmem>>, %arg4: memref<1x200x32xf32, #tpu.memory_space<vmem>>, %arg5: memref<1x1x32xf32, #tpu.memory_space<vmem>>, %arg6: memref<1x1x32xf32, #tpu.memory_space<vmem>>) attributes {dimension_semantics = [#tpu.dimension_semantics<parallel>], iteration_bounds = array<i64: 2>, scalar_prefetch = 0 : i64, scratch_operands = 0 : i64, tpu.core_type = #tpu.core_type<tc>, window_params = [{transform_indices = @transform_0, window_bounds = array<i64: 1, 220, 96>}, {pipeline_mode = #tpu.pipeline_mode<synchronous>, transform_indices = @transform_1, window_bounds = array<i64: 3, 96, 32>}, {pipeline_mode = #tpu.pipeline_mode<synchronous>, transform_indices = @transform_2, window_bounds = array<i64: 1, 32>}, {transform_indices = @transform_3, window_bounds = array<i64: 1, 200, 32>}, {transform_indices = @transform_4, window_bounds = array<i64: 1, 1, 32>}, {transform_indices = @transform_5, window_bounds = array<i64: 1, 1, 32>}]} {
    %c0 = arith.constant 0 : index
    %c0_0 = arith.constant 0 : index
    %c0_1 = arith.constant 0 : index
    %0 = vector.load %arg1[%c0, %c0_0, %c0_1] : memref<1x220x96xbf16, #tpu.memory_space<vmem>>, vector<1x200x96xbf16>
    %1 = vector.shape_cast %0 : vector<1x200x96xbf16> to vector<200x96xbf16>
    %c0_2 = arith.constant 0 : index
    %c0_3 = arith.constant 0 : index
    %c0_4 = arith.constant 0 : index
    %2 = vector.load %arg2[%c0_2, %c0_3, %c0_4] : memref<3x96x32xbf16, #tpu.memory_space<vmem>>, vector<1x96x32xbf16>
    %3 = vector.shape_cast %2 : vector<1x96x32xbf16> to vector<96x32xbf16>
    %cst = arith.constant dense<0.000000e+00> : vector<200x32xf32>
    %4 = tpu.matmul %1, %3, %cst {dimension_numbers = #tpu.dot_dimension_numbers<[1], [0], [0], [1], [0, 0, 1, 1], [], []>} : vector<200x96xbf16>, vector<96x32xbf16>, vector<200x32xf32> -> vector<200x32xf32>
    %c0_5 = arith.constant 0 : index
    %c10 = arith.constant 10 : index
    %c0_6 = arith.constant 0 : index
    %5 = vector.load %arg1[%c0_5, %c10, %c0_6] : memref<1x220x96xbf16, #tpu.memory_space<vmem>>, vector<1x200x96xbf16>
    %6 = vector.shape_cast %5 : vector<1x200x96xbf16> to vector<200x96xbf16>
    %c1 = arith.constant 1 : index
    %c0_7 = arith.constant 0 : index
    %c0_8 = arith.constant 0 : index
    %7 = vector.load %arg2[%c1, %c0_7, %c0_8] : memref<3x96x32xbf16, #tpu.memory_space<vmem>>, vector<1x96x32xbf16>
    %8 = vector.shape_cast %7 : vector<1x96x32xbf16> to vector<96x32xbf16>
    %cst_9 = arith.constant dense<0.000000e+00> : vector<200x32xf32>
    %9 = tpu.matmul %6, %8, %cst_9 {dimension_numbers = #tpu.dot_dimension_numbers<[1], [0], [0], [1], [0, 0, 1, 1], [], []>} : vector<200x96xbf16>, vector<96x32xbf16>, vector<200x32xf32> -> vector<200x32xf32>
    %10 = arith.addf %4, %9 : vector<200x32xf32>
    %c0_10 = arith.constant 0 : index
    %c20 = arith.constant 20 : index
    %c0_11 = arith.constant 0 : index
    %11 = vector.load %arg1[%c0_10, %c20, %c0_11] : memref<1x220x96xbf16, #tpu.memory_space<vmem>>, vector<1x200x96xbf16>
    %12 = vector.shape_cast %11 : vector<1x200x96xbf16> to vector<200x96xbf16>
    %c2 = arith.constant 2 : index
    %c0_12 = arith.constant 0 : index
    %c0_13 = arith.constant 0 : index
    %13 = vector.load %arg2[%c2, %c0_12, %c0_13] : memref<3x96x32xbf16, #tpu.memory_space<vmem>>, vector<1x96x32xbf16>
    %14 = vector.shape_cast %13 : vector<1x96x32xbf16> to vector<96x32xbf16>
    %cst_14 = arith.constant dense<0.000000e+00> : vector<200x32xf32>
    %15 = tpu.matmul %12, %14, %cst_14 {dimension_numbers = #tpu.dot_dimension_numbers<[1], [0], [0], [1], [0, 0, 1, 1], [], []>} : vector<200x96xbf16>, vector<96x32xbf16>, vector<200x32xf32> -> vector<200x32xf32>
    %16 = arith.addf %10, %15 : vector<200x32xf32>
    %c0_15 = arith.constant 0 : index
    %c0_16 = arith.constant 0 : index
    %17 = vector.load %arg3[%c0_15, %c0_16] : memref<1x32xf32, #tpu.memory_space<vmem>>, vector<1x32xf32>
    %18 = vector.broadcast %17 : vector<1x32xf32> to vector<200x32xf32>
    %19 = arith.addf %16, %18 : vector<200x32xf32>
    %cst_17 = arith.constant 0.000000e+00 : f32
    %20 = vector.broadcast %cst_17 : f32 to vector<200x32xf32>
    %21 = arith.maximumf %19, %20 : vector<200x32xf32>
    %c0_18 = arith.constant 0 : index
    %c0_19 = arith.constant 0 : index
    %c0_20 = arith.constant 0 : index
    %22 = vector.load %arg4[%c0_18, %c0_19, %c0_20] : memref<1x200x32xf32, #tpu.memory_space<vmem>>, vector<1x200x32xf32>
    %23 = vector.shape_cast %22 : vector<1x200x32xf32> to vector<200x32xf32>
    %24 = vector.shape_cast %21 : vector<200x32xf32> to vector<1x200x32xf32>
    tpu.vector_store %arg4[%c0_18, %c0_19, %c0_20], %24 {strides = array<i32>} : memref<1x200x32xf32, #tpu.memory_space<vmem>>, vector<1x200x32xf32>,
    %cst_21 = arith.constant dense<0.000000e+00> : vector<32xf32>
    %25 = vector.multi_reduction <add>, %21, %cst_21 [0] : vector<200x32xf32> to vector<32xf32>
    %26 = vector.shape_cast %25 : vector<32xf32> to vector<1x32xf32>
    %c0_22 = arith.constant 0 : index
    %c0_23 = arith.constant 0 : index
    %c0_24 = arith.constant 0 : index
    %27 = vector.load %arg5[%c0_22, %c0_23, %c0_24] : memref<1x1x32xf32, #tpu.memory_space<vmem>>, vector<1x1x32xf32>
    %28 = vector.shape_cast %27 : vector<1x1x32xf32> to vector<1x32xf32>
    %29 = vector.shape_cast %26 : vector<1x32xf32> to vector<1x1x32xf32>
    tpu.vector_store %arg5[%c0_22, %c0_23, %c0_24], %29 {strides = array<i32>} : memref<1x1x32xf32, #tpu.memory_space<vmem>>, vector<1x1x32xf32>,
    %30 = arith.mulf %21, %21 : vector<200x32xf32>
    %cst_25 = arith.constant dense<0.000000e+00> : vector<32xf32>
    %31 = vector.multi_reduction <add>, %30, %cst_25 [0] : vector<200x32xf32> to vector<32xf32>
    %32 = vector.shape_cast %31 : vector<32xf32> to vector<1x32xf32>
    %c0_26 = arith.constant 0 : index
    %c0_27 = arith.constant 0 : index
    %c0_28 = arith.constant 0 : index
    %33 = vector.load %arg6[%c0_26, %c0_27, %c0_28] : memref<1x1x32xf32, #tpu.memory_space<vmem>>, vector<1x1x32xf32>
    %34 = vector.shape_cast %33 : vector<1x1x32xf32> to vector<1x32xf32>
    %35 = vector.shape_cast %32 : vector<1x32xf32> to vector<1x1x32xf32>
    tpu.vector_store %arg6[%c0_26, %c0_27, %c0_28], %35 {strides = array<i32>} : memref<1x1x32xf32, #tpu.memory_space<vmem>>, vector<1x1x32xf32>,
    return
  }
  func.func @transform_0(%arg0: i32) -> (i32, i32, i32) {
    %c0_i32 = arith.constant 0 : i32
    %c0_i32_0 = arith.constant 0 : i32
    %c0_i32_1 = arith.constant 0 : i32
    return %arg0, %c0_i32, %c0_i32_0 : i32, i32, i32
  }
  func.func @transform_1(%arg0: i32) -> (i32, i32, i32) {
    %c0_i32 = arith.constant 0 : i32
    %c0_i32_0 = arith.constant 0 : i32
    %c0_i32_1 = arith.constant 0 : i32
    %c0_i32_2 = arith.constant 0 : i32
    return %c0_i32, %c0_i32_0, %c0_i32_1 : i32, i32, i32
  }
  func.func @transform_2(%arg0: i32) -> (i32, i32) {
    %c0_i32 = arith.constant 0 : i32
    %c0_i32_0 = arith.constant 0 : i32
    %c0_i32_1 = arith.constant 0 : i32
    return %c0_i32, %c0_i32_0 : i32, i32
  }
  func.func @transform_3(%arg0: i32) -> (i32, i32, i32) {
    %c0_i32 = arith.constant 0 : i32
    %c0_i32_0 = arith.constant 0 : i32
    %c0_i32_1 = arith.constant 0 : i32
    return %arg0, %c0_i32, %c0_i32_0 : i32, i32, i32
  }
  func.func @transform_4(%arg0: i32) -> (i32, i32, i32) {
    %c0_i32 = arith.constant 0 : i32
    %c0_i32_0 = arith.constant 0 : i32
    %c0_i32_1 = arith.constant 0 : i32
    return %arg0, %c0_i32, %c0_i32_0 : i32, i32, i32
  }
  func.func @transform_5(%arg0: i32) -> (i32, i32, i32) {
    %c0_i32 = arith.constant 0 : i32
    %c0_i32_0 = arith.constant 0 : i32
    %c0_i32_1 = arith.constant 0 : i32
    return %arg0, %c0_i32, %c0_i32_0 : i32, i32, i32
  }
}

module attributes {stable_mosaic.version = 11 : i64} {
  func.func @_conv_kernel(%arg0: i32, %arg1: memref<1x220x96xbf16, #tpu.memory_space<vmem>>, %arg2: memref<3x96x64xbf16, #tpu.memory_space<vmem>>, %arg3: memref<1x64xf32, #tpu.memory_space<vmem>>, %arg4: memref<1x200x64xf32, #tpu.memory_space<vmem>>, %arg5: memref<1x1x64xf32, #tpu.memory_space<vmem>>, %arg6: memref<1x1x64xf32, #tpu.memory_space<vmem>>) attributes {dimension_semantics = [#tpu.dimension_semantics<parallel>], iteration_bounds = array<i64: 2>, scalar_prefetch = 0 : i64, scratch_operands = 0 : i64, tpu.core_type = #tpu.core_type<tc>, window_params = [{transform_indices = @transform_0, window_bounds = array<i64: 1, 220, 96>}, {pipeline_mode = #tpu.pipeline_mode<synchronous>, transform_indices = @transform_1, window_bounds = array<i64: 3, 96, 64>}, {pipeline_mode = #tpu.pipeline_mode<synchronous>, transform_indices = @transform_2, window_bounds = array<i64: 1, 64>}, {transform_indices = @transform_3, window_bounds = array<i64: 1, 200, 64>}, {transform_indices = @transform_4, window_bounds = array<i64: 1, 1, 64>}, {transform_indices = @transform_5, window_bounds = array<i64: 1, 1, 64>}]} {
    %c0 = arith.constant 0 : index
    %c0_0 = arith.constant 0 : index
    %c0_1 = arith.constant 0 : index
    %0 = vector.load %arg1[%c0, %c0_0, %c0_1] : memref<1x220x96xbf16, #tpu.memory_space<vmem>>, vector<1x200x96xbf16>
    %1 = vector.shape_cast %0 : vector<1x200x96xbf16> to vector<200x96xbf16>
    %c0_2 = arith.constant 0 : index
    %c0_3 = arith.constant 0 : index
    %c0_4 = arith.constant 0 : index
    %2 = vector.load %arg2[%c0_2, %c0_3, %c0_4] : memref<3x96x64xbf16, #tpu.memory_space<vmem>>, vector<1x96x64xbf16>
    %3 = vector.shape_cast %2 : vector<1x96x64xbf16> to vector<96x64xbf16>
    %cst = arith.constant dense<0.000000e+00> : vector<200x64xf32>
    %4 = tpu.matmul %1, %3, %cst {dimension_numbers = #tpu.dot_dimension_numbers<[1], [0], [0], [1], [0, 0, 1, 1], [], []>} : vector<200x96xbf16>, vector<96x64xbf16>, vector<200x64xf32> -> vector<200x64xf32>
    %c0_5 = arith.constant 0 : index
    %c10 = arith.constant 10 : index
    %c0_6 = arith.constant 0 : index
    %5 = vector.load %arg1[%c0_5, %c10, %c0_6] : memref<1x220x96xbf16, #tpu.memory_space<vmem>>, vector<1x200x96xbf16>
    %6 = vector.shape_cast %5 : vector<1x200x96xbf16> to vector<200x96xbf16>
    %c1 = arith.constant 1 : index
    %c0_7 = arith.constant 0 : index
    %c0_8 = arith.constant 0 : index
    %7 = vector.load %arg2[%c1, %c0_7, %c0_8] : memref<3x96x64xbf16, #tpu.memory_space<vmem>>, vector<1x96x64xbf16>
    %8 = vector.shape_cast %7 : vector<1x96x64xbf16> to vector<96x64xbf16>
    %cst_9 = arith.constant dense<0.000000e+00> : vector<200x64xf32>
    %9 = tpu.matmul %6, %8, %cst_9 {dimension_numbers = #tpu.dot_dimension_numbers<[1], [0], [0], [1], [0, 0, 1, 1], [], []>} : vector<200x96xbf16>, vector<96x64xbf16>, vector<200x64xf32> -> vector<200x64xf32>
    %10 = arith.addf %4, %9 : vector<200x64xf32>
    %c0_10 = arith.constant 0 : index
    %c20 = arith.constant 20 : index
    %c0_11 = arith.constant 0 : index
    %11 = vector.load %arg1[%c0_10, %c20, %c0_11] : memref<1x220x96xbf16, #tpu.memory_space<vmem>>, vector<1x200x96xbf16>
    %12 = vector.shape_cast %11 : vector<1x200x96xbf16> to vector<200x96xbf16>
    %c2 = arith.constant 2 : index
    %c0_12 = arith.constant 0 : index
    %c0_13 = arith.constant 0 : index
    %13 = vector.load %arg2[%c2, %c0_12, %c0_13] : memref<3x96x64xbf16, #tpu.memory_space<vmem>>, vector<1x96x64xbf16>
    %14 = vector.shape_cast %13 : vector<1x96x64xbf16> to vector<96x64xbf16>
    %cst_14 = arith.constant dense<0.000000e+00> : vector<200x64xf32>
    %15 = tpu.matmul %12, %14, %cst_14 {dimension_numbers = #tpu.dot_dimension_numbers<[1], [0], [0], [1], [0, 0, 1, 1], [], []>} : vector<200x96xbf16>, vector<96x64xbf16>, vector<200x64xf32> -> vector<200x64xf32>
    %16 = arith.addf %10, %15 : vector<200x64xf32>
    %c0_15 = arith.constant 0 : index
    %c0_16 = arith.constant 0 : index
    %17 = vector.load %arg3[%c0_15, %c0_16] : memref<1x64xf32, #tpu.memory_space<vmem>>, vector<1x64xf32>
    %18 = vector.broadcast %17 : vector<1x64xf32> to vector<200x64xf32>
    %19 = arith.addf %16, %18 : vector<200x64xf32>
    %cst_17 = arith.constant 0.000000e+00 : f32
    %20 = vector.broadcast %cst_17 : f32 to vector<200x64xf32>
    %21 = arith.maximumf %19, %20 : vector<200x64xf32>
    %c0_18 = arith.constant 0 : index
    %c0_19 = arith.constant 0 : index
    %c0_20 = arith.constant 0 : index
    %22 = vector.load %arg4[%c0_18, %c0_19, %c0_20] : memref<1x200x64xf32, #tpu.memory_space<vmem>>, vector<1x200x64xf32>
    %23 = vector.shape_cast %22 : vector<1x200x64xf32> to vector<200x64xf32>
    %24 = vector.shape_cast %21 : vector<200x64xf32> to vector<1x200x64xf32>
    tpu.vector_store %arg4[%c0_18, %c0_19, %c0_20], %24 {strides = array<i32>} : memref<1x200x64xf32, #tpu.memory_space<vmem>>, vector<1x200x64xf32>,
    %cst_21 = arith.constant dense<0.000000e+00> : vector<64xf32>
    %25 = vector.multi_reduction <add>, %21, %cst_21 [0] : vector<200x64xf32> to vector<64xf32>
    %26 = vector.shape_cast %25 : vector<64xf32> to vector<1x64xf32>
    %c0_22 = arith.constant 0 : index
    %c0_23 = arith.constant 0 : index
    %c0_24 = arith.constant 0 : index
    %27 = vector.load %arg5[%c0_22, %c0_23, %c0_24] : memref<1x1x64xf32, #tpu.memory_space<vmem>>, vector<1x1x64xf32>
    %28 = vector.shape_cast %27 : vector<1x1x64xf32> to vector<1x64xf32>
    %29 = vector.shape_cast %26 : vector<1x64xf32> to vector<1x1x64xf32>
    tpu.vector_store %arg5[%c0_22, %c0_23, %c0_24], %29 {strides = array<i32>} : memref<1x1x64xf32, #tpu.memory_space<vmem>>, vector<1x1x64xf32>,
    %30 = arith.mulf %21, %21 : vector<200x64xf32>
    %cst_25 = arith.constant dense<0.000000e+00> : vector<64xf32>
    %31 = vector.multi_reduction <add>, %30, %cst_25 [0] : vector<200x64xf32> to vector<64xf32>
    %32 = vector.shape_cast %31 : vector<64xf32> to vector<1x64xf32>
    %c0_26 = arith.constant 0 : index
    %c0_27 = arith.constant 0 : index
    %c0_28 = arith.constant 0 : index
    %33 = vector.load %arg6[%c0_26, %c0_27, %c0_28] : memref<1x1x64xf32, #tpu.memory_space<vmem>>, vector<1x1x64xf32>
    %34 = vector.shape_cast %33 : vector<1x1x64xf32> to vector<1x64xf32>
    %35 = vector.shape_cast %32 : vector<1x64xf32> to vector<1x1x64xf32>
    tpu.vector_store %arg6[%c0_26, %c0_27, %c0_28], %35 {strides = array<i32>} : memref<1x1x64xf32, #tpu.memory_space<vmem>>, vector<1x1x64xf32>,
    return
  }
  func.func @transform_0(%arg0: i32) -> (i32, i32, i32) {
    %c0_i32 = arith.constant 0 : i32
    %c0_i32_0 = arith.constant 0 : i32
    %c0_i32_1 = arith.constant 0 : i32
    return %arg0, %c0_i32, %c0_i32_0 : i32, i32, i32
  }
  func.func @transform_1(%arg0: i32) -> (i32, i32, i32) {
    %c0_i32 = arith.constant 0 : i32
    %c0_i32_0 = arith.constant 0 : i32
    %c0_i32_1 = arith.constant 0 : i32
    %c0_i32_2 = arith.constant 0 : i32
    return %c0_i32, %c0_i32_0, %c0_i32_1 : i32, i32, i32
  }
  func.func @transform_2(%arg0: i32) -> (i32, i32) {
    %c0_i32 = arith.constant 0 : i32
    %c0_i32_0 = arith.constant 0 : i32
    %c0_i32_1 = arith.constant 0 : i32
    return %c0_i32, %c0_i32_0 : i32, i32
  }
  func.func @transform_3(%arg0: i32) -> (i32, i32, i32) {
    %c0_i32 = arith.constant 0 : i32
    %c0_i32_0 = arith.constant 0 : i32
    %c0_i32_1 = arith.constant 0 : i32
    return %arg0, %c0_i32, %c0_i32_0 : i32, i32, i32
  }
  func.func @transform_4(%arg0: i32) -> (i32, i32, i32) {
    %c0_i32 = arith.constant 0 : i32
    %c0_i32_0 = arith.constant 0 : i32
    %c0_i32_1 = arith.constant 0 : i32
    return %arg0, %c0_i32, %c0_i32_0 : i32, i32, i32
  }
  func.func @transform_5(%arg0: i32) -> (i32, i32, i32) {
    %c0_i32 = arith.constant 0 : i32
    %c0_i32_0 = arith.constant 0 : i32
    %c0_i32_1 = arith.constant 0 : i32
    return %arg0, %c0_i32, %c0_i32_0 : i32, i32, i32
  }
}

module attributes {stable_mosaic.version = 11 : i64} {
  func.func @_conv_kernel(%arg0: i32, %arg1: memref<1x220x192xbf16, #tpu.memory_space<vmem>>, %arg2: memref<3x192x64xbf16, #tpu.memory_space<vmem>>, %arg3: memref<1x64xf32, #tpu.memory_space<vmem>>, %arg4: memref<1x200x64xf32, #tpu.memory_space<vmem>>, %arg5: memref<1x1x64xf32, #tpu.memory_space<vmem>>, %arg6: memref<1x1x64xf32, #tpu.memory_space<vmem>>) attributes {dimension_semantics = [#tpu.dimension_semantics<parallel>], iteration_bounds = array<i64: 2>, scalar_prefetch = 0 : i64, scratch_operands = 0 : i64, tpu.core_type = #tpu.core_type<tc>, window_params = [{transform_indices = @transform_0, window_bounds = array<i64: 1, 220, 192>}, {pipeline_mode = #tpu.pipeline_mode<synchronous>, transform_indices = @transform_1, window_bounds = array<i64: 3, 192, 64>}, {pipeline_mode = #tpu.pipeline_mode<synchronous>, transform_indices = @transform_2, window_bounds = array<i64: 1, 64>}, {transform_indices = @transform_3, window_bounds = array<i64: 1, 200, 64>}, {transform_indices = @transform_4, window_bounds = array<i64: 1, 1, 64>}, {transform_indices = @transform_5, window_bounds = array<i64: 1, 1, 64>}]} {
    %c0 = arith.constant 0 : index
    %c0_0 = arith.constant 0 : index
    %c0_1 = arith.constant 0 : index
    %0 = vector.load %arg1[%c0, %c0_0, %c0_1] : memref<1x220x192xbf16, #tpu.memory_space<vmem>>, vector<1x200x192xbf16>
    %1 = vector.shape_cast %0 : vector<1x200x192xbf16> to vector<200x192xbf16>
    %c0_2 = arith.constant 0 : index
    %c0_3 = arith.constant 0 : index
    %c0_4 = arith.constant 0 : index
    %2 = vector.load %arg2[%c0_2, %c0_3, %c0_4] : memref<3x192x64xbf16, #tpu.memory_space<vmem>>, vector<1x192x64xbf16>
    %3 = vector.shape_cast %2 : vector<1x192x64xbf16> to vector<192x64xbf16>
    %cst = arith.constant dense<0.000000e+00> : vector<200x64xf32>
    %4 = tpu.matmul %1, %3, %cst {dimension_numbers = #tpu.dot_dimension_numbers<[1], [0], [0], [1], [0, 0, 1, 1], [], []>} : vector<200x192xbf16>, vector<192x64xbf16>, vector<200x64xf32> -> vector<200x64xf32>
    %c0_5 = arith.constant 0 : index
    %c10 = arith.constant 10 : index
    %c0_6 = arith.constant 0 : index
    %5 = vector.load %arg1[%c0_5, %c10, %c0_6] : memref<1x220x192xbf16, #tpu.memory_space<vmem>>, vector<1x200x192xbf16>
    %6 = vector.shape_cast %5 : vector<1x200x192xbf16> to vector<200x192xbf16>
    %c1 = arith.constant 1 : index
    %c0_7 = arith.constant 0 : index
    %c0_8 = arith.constant 0 : index
    %7 = vector.load %arg2[%c1, %c0_7, %c0_8] : memref<3x192x64xbf16, #tpu.memory_space<vmem>>, vector<1x192x64xbf16>
    %8 = vector.shape_cast %7 : vector<1x192x64xbf16> to vector<192x64xbf16>
    %cst_9 = arith.constant dense<0.000000e+00> : vector<200x64xf32>
    %9 = tpu.matmul %6, %8, %cst_9 {dimension_numbers = #tpu.dot_dimension_numbers<[1], [0], [0], [1], [0, 0, 1, 1], [], []>} : vector<200x192xbf16>, vector<192x64xbf16>, vector<200x64xf32> -> vector<200x64xf32>
    %10 = arith.addf %4, %9 : vector<200x64xf32>
    %c0_10 = arith.constant 0 : index
    %c20 = arith.constant 20 : index
    %c0_11 = arith.constant 0 : index
    %11 = vector.load %arg1[%c0_10, %c20, %c0_11] : memref<1x220x192xbf16, #tpu.memory_space<vmem>>, vector<1x200x192xbf16>
    %12 = vector.shape_cast %11 : vector<1x200x192xbf16> to vector<200x192xbf16>
    %c2 = arith.constant 2 : index
    %c0_12 = arith.constant 0 : index
    %c0_13 = arith.constant 0 : index
    %13 = vector.load %arg2[%c2, %c0_12, %c0_13] : memref<3x192x64xbf16, #tpu.memory_space<vmem>>, vector<1x192x64xbf16>
    %14 = vector.shape_cast %13 : vector<1x192x64xbf16> to vector<192x64xbf16>
    %cst_14 = arith.constant dense<0.000000e+00> : vector<200x64xf32>
    %15 = tpu.matmul %12, %14, %cst_14 {dimension_numbers = #tpu.dot_dimension_numbers<[1], [0], [0], [1], [0, 0, 1, 1], [], []>} : vector<200x192xbf16>, vector<192x64xbf16>, vector<200x64xf32> -> vector<200x64xf32>
    %16 = arith.addf %10, %15 : vector<200x64xf32>
    %c0_15 = arith.constant 0 : index
    %c0_16 = arith.constant 0 : index
    %17 = vector.load %arg3[%c0_15, %c0_16] : memref<1x64xf32, #tpu.memory_space<vmem>>, vector<1x64xf32>
    %18 = vector.broadcast %17 : vector<1x64xf32> to vector<200x64xf32>
    %19 = arith.addf %16, %18 : vector<200x64xf32>
    %cst_17 = arith.constant 0.000000e+00 : f32
    %20 = vector.broadcast %cst_17 : f32 to vector<200x64xf32>
    %21 = arith.maximumf %19, %20 : vector<200x64xf32>
    %c0_18 = arith.constant 0 : index
    %c0_19 = arith.constant 0 : index
    %c0_20 = arith.constant 0 : index
    %22 = vector.load %arg4[%c0_18, %c0_19, %c0_20] : memref<1x200x64xf32, #tpu.memory_space<vmem>>, vector<1x200x64xf32>
    %23 = vector.shape_cast %22 : vector<1x200x64xf32> to vector<200x64xf32>
    %24 = vector.shape_cast %21 : vector<200x64xf32> to vector<1x200x64xf32>
    tpu.vector_store %arg4[%c0_18, %c0_19, %c0_20], %24 {strides = array<i32>} : memref<1x200x64xf32, #tpu.memory_space<vmem>>, vector<1x200x64xf32>,
    %cst_21 = arith.constant dense<0.000000e+00> : vector<64xf32>
    %25 = vector.multi_reduction <add>, %21, %cst_21 [0] : vector<200x64xf32> to vector<64xf32>
    %26 = vector.shape_cast %25 : vector<64xf32> to vector<1x64xf32>
    %c0_22 = arith.constant 0 : index
    %c0_23 = arith.constant 0 : index
    %c0_24 = arith.constant 0 : index
    %27 = vector.load %arg5[%c0_22, %c0_23, %c0_24] : memref<1x1x64xf32, #tpu.memory_space<vmem>>, vector<1x1x64xf32>
    %28 = vector.shape_cast %27 : vector<1x1x64xf32> to vector<1x64xf32>
    %29 = vector.shape_cast %26 : vector<1x64xf32> to vector<1x1x64xf32>
    tpu.vector_store %arg5[%c0_22, %c0_23, %c0_24], %29 {strides = array<i32>} : memref<1x1x64xf32, #tpu.memory_space<vmem>>, vector<1x1x64xf32>,
    %30 = arith.mulf %21, %21 : vector<200x64xf32>
    %cst_25 = arith.constant dense<0.000000e+00> : vector<64xf32>
    %31 = vector.multi_reduction <add>, %30, %cst_25 [0] : vector<200x64xf32> to vector<64xf32>
    %32 = vector.shape_cast %31 : vector<64xf32> to vector<1x64xf32>
    %c0_26 = arith.constant 0 : index
    %c0_27 = arith.constant 0 : index
    %c0_28 = arith.constant 0 : index
    %33 = vector.load %arg6[%c0_26, %c0_27, %c0_28] : memref<1x1x64xf32, #tpu.memory_space<vmem>>, vector<1x1x64xf32>
    %34 = vector.shape_cast %33 : vector<1x1x64xf32> to vector<1x64xf32>
    %35 = vector.shape_cast %32 : vector<1x64xf32> to vector<1x1x64xf32>
    tpu.vector_store %arg6[%c0_26, %c0_27, %c0_28], %35 {strides = array<i32>} : memref<1x1x64xf32, #tpu.memory_space<vmem>>, vector<1x1x64xf32>,
    return
  }
  func.func @transform_0(%arg0: i32) -> (i32, i32, i32) {
    %c0_i32 = arith.constant 0 : i32
    %c0_i32_0 = arith.constant 0 : i32
    %c0_i32_1 = arith.constant 0 : i32
    return %arg0, %c0_i32, %c0_i32_0 : i32, i32, i32
  }
  func.func @transform_1(%arg0: i32) -> (i32, i32, i32) {
    %c0_i32 = arith.constant 0 : i32
    %c0_i32_0 = arith.constant 0 : i32
    %c0_i32_1 = arith.constant 0 : i32
    %c0_i32_2 = arith.constant 0 : i32
    return %c0_i32, %c0_i32_0, %c0_i32_1 : i32, i32, i32
  }
  func.func @transform_2(%arg0: i32) -> (i32, i32) {
    %c0_i32 = arith.constant 0 : i32
    %c0_i32_0 = arith.constant 0 : i32
    %c0_i32_1 = arith.constant 0 : i32
    return %c0_i32, %c0_i32_0 : i32, i32
  }
  func.func @transform_3(%arg0: i32) -> (i32, i32, i32) {
    %c0_i32 = arith.constant 0 : i32
    %c0_i32_0 = arith.constant 0 : i32
    %c0_i32_1 = arith.constant 0 : i32
    return %arg0, %c0_i32, %c0_i32_0 : i32, i32, i32
  }
  func.func @transform_4(%arg0: i32) -> (i32, i32, i32) {
    %c0_i32 = arith.constant 0 : i32
    %c0_i32_0 = arith.constant 0 : i32
    %c0_i32_1 = arith.constant 0 : i32
    return %arg0, %c0_i32, %c0_i32_0 : i32, i32, i32
  }
  func.func @transform_5(%arg0: i32) -> (i32, i32, i32) {
    %c0_i32 = arith.constant 0 : i32
    %c0_i32_0 = arith.constant 0 : i32
    %c0_i32_1 = arith.constant 0 : i32
    return %arg0, %c0_i32, %c0_i32_0 : i32, i32, i32
  }
}

module attributes {stable_mosaic.version = 11 : i64} {
  func.func @_maxpool_affine_kernel(%arg0: i32, %arg1: i32, %arg2: memref<1x5x10x64xf32, #tpu.memory_space<vmem>>, %arg3: memref<1x1x64xf32, #tpu.memory_space<vmem>>, %arg4: memref<1x1x64xf32, #tpu.memory_space<vmem>>, %arg5: memref<1x1x2x64xf32, #tpu.memory_space<vmem>>) attributes {dimension_semantics = [#tpu.dimension_semantics<parallel>, #tpu.dimension_semantics<parallel>], iteration_bounds = array<i64: 2, 4>, scalar_prefetch = 0 : i64, scratch_operands = 0 : i64, tpu.core_type = #tpu.core_type<tc>, window_params = [{transform_indices = @transform_0, window_bounds = array<i64: 1, 5, 10, 64>}, {pipeline_mode = #tpu.pipeline_mode<synchronous>, transform_indices = @transform_1, window_bounds = array<i64: 1, 1, 64>}, {pipeline_mode = #tpu.pipeline_mode<synchronous>, transform_indices = @transform_2, window_bounds = array<i64: 1, 1, 64>}, {transform_indices = @transform_3, window_bounds = array<i64: 1, 1, 2, 64>}]} {
    %c0 = arith.constant 0 : index
    %c0_0 = arith.constant 0 : index
    %c0_1 = arith.constant 0 : index
    %c0_2 = arith.constant 0 : index
    %0 = vector.load %arg2[%c0, %c0_0, %c0_1, %c0_2] : memref<1x5x10x64xf32, #tpu.memory_space<vmem>>, vector<1x5x10x64xf32>
    %1 = vector.shape_cast %0 : vector<1x5x10x64xf32> to vector<5x10x64xf32>
    %c0_3 = arith.constant 0 : index
    %c0_4 = arith.constant 0 : index
    %c0_5 = arith.constant 0 : index
    %2 = vector.load %arg3[%c0_3, %c0_4, %c0_5] : memref<1x1x64xf32, #tpu.memory_space<vmem>>, vector<1x1x64xf32>
    %3 = vector.broadcast %2 : vector<1x1x64xf32> to vector<5x10x64xf32>
    %4 = arith.mulf %1, %3 : vector<5x10x64xf32>
    %c0_6 = arith.constant 0 : index
    %c0_7 = arith.constant 0 : index
    %c0_8 = arith.constant 0 : index
    %5 = vector.load %arg4[%c0_6, %c0_7, %c0_8] : memref<1x1x64xf32, #tpu.memory_space<vmem>>, vector<1x1x64xf32>
    %6 = vector.broadcast %5 : vector<1x1x64xf32> to vector<5x10x64xf32>
    %7 = arith.addf %4, %6 : vector<5x10x64xf32>
    %cst = arith.constant dense<0xFF800000> : vector<10x64xf32>
    %8 = vector.multi_reduction <maximumf>, %7, %cst [0] : vector<5x10x64xf32> to vector<10x64xf32>
    %9 = vector.extract_strided_slice %8 {offsets = [0, 0], sizes = [5, 64], strides = [1, 1]} : vector<10x64xf32> to vector<5x64xf32>
    %cst_9 = arith.constant dense<0xFF800000> : vector<64xf32>
    %10 = vector.multi_reduction <maximumf>, %9, %cst_9 [0] : vector<5x64xf32> to vector<64xf32>
    %11 = vector.shape_cast %10 : vector<64xf32> to vector<1x64xf32>
    %12 = vector.extract_strided_slice %8 {offsets = [5, 0], sizes = [5, 64], strides = [1, 1]} : vector<10x64xf32> to vector<5x64xf32>
    %cst_10 = arith.constant dense<0xFF800000> : vector<64xf32>
    %13 = vector.multi_reduction <maximumf>, %12, %cst_10 [0] : vector<5x64xf32> to vector<64xf32>
    %14 = vector.shape_cast %13 : vector<64xf32> to vector<1x64xf32>
    %15 = tpu.concatenate %11, %14 in 0 : vector<1x64xf32>, vector<1x64xf32> -> vector<2x64xf32>
    %c0_11 = arith.constant 0 : index
    %c0_12 = arith.constant 0 : index
    %c0_13 = arith.constant 0 : index
    %c0_14 = arith.constant 0 : index
    %16 = vector.load %arg5[%c0_11, %c0_12, %c0_13, %c0_14] : memref<1x1x2x64xf32, #tpu.memory_space<vmem>>, vector<1x1x2x64xf32>
    %17 = vector.shape_cast %16 : vector<1x1x2x64xf32> to vector<2x64xf32>
    %18 = vector.shape_cast %15 : vector<2x64xf32> to vector<1x1x2x64xf32>
    tpu.vector_store %arg5[%c0_11, %c0_12, %c0_13, %c0_14], %18 {strides = array<i32>} : memref<1x1x2x64xf32, #tpu.memory_space<vmem>>, vector<1x1x2x64xf32>,
    return
  }
  func.func @transform_0(%arg0: i32, %arg1: i32) -> (i32, i32, i32, i32) {
    %c0_i32 = arith.constant 0 : i32
    %c0_i32_0 = arith.constant 0 : i32
    %c0_i32_1 = arith.constant 0 : i32
    return %arg0, %arg1, %c0_i32, %c0_i32_0 : i32, i32, i32, i32
  }
  func.func @transform_1(%arg0: i32, %arg1: i32) -> (i32, i32, i32) {
    %c0_i32 = arith.constant 0 : i32
    %c0_i32_0 = arith.constant 0 : i32
    %c0_i32_1 = arith.constant 0 : i32
    %c0_i32_2 = arith.constant 0 : i32
    return %c0_i32, %c0_i32_0, %c0_i32_1 : i32, i32, i32
  }
  func.func @transform_2(%arg0: i32, %arg1: i32) -> (i32, i32, i32) {
    %c0_i32 = arith.constant 0 : i32
    %c0_i32_0 = arith.constant 0 : i32
    %c0_i32_1 = arith.constant 0 : i32
    %c0_i32_2 = arith.constant 0 : i32
    return %c0_i32, %c0_i32_0, %c0_i32_1 : i32, i32, i32
  }
  func.func @transform_3(%arg0: i32, %arg1: i32) -> (i32, i32, i32, i32) {
    %c0_i32 = arith.constant 0 : i32
    %c0_i32_0 = arith.constant 0 : i32
    %c0_i32_1 = arith.constant 0 : i32
    return %arg0, %arg1, %c0_i32, %c0_i32_0 : i32, i32, i32, i32
  }
}

module attributes {stable_mosaic.version = 11 : i64} {
  func.func @_conv_kernel(%arg0: i32, %arg1: memref<1x12x192xbf16, #tpu.memory_space<vmem>>, %arg2: memref<3x192x128xbf16, #tpu.memory_space<vmem>>, %arg3: memref<1x128xf32, #tpu.memory_space<vmem>>, %arg4: memref<1x8x128xf32, #tpu.memory_space<vmem>>, %arg5: memref<1x1x128xf32, #tpu.memory_space<vmem>>, %arg6: memref<1x1x128xf32, #tpu.memory_space<vmem>>) attributes {dimension_semantics = [#tpu.dimension_semantics<parallel>], iteration_bounds = array<i64: 2>, scalar_prefetch = 0 : i64, scratch_operands = 0 : i64, tpu.core_type = #tpu.core_type<tc>, window_params = [{transform_indices = @transform_0, window_bounds = array<i64: 1, 12, 192>}, {pipeline_mode = #tpu.pipeline_mode<synchronous>, transform_indices = @transform_1, window_bounds = array<i64: 3, 192, 128>}, {pipeline_mode = #tpu.pipeline_mode<synchronous>, transform_indices = @transform_2, window_bounds = array<i64: 1, 128>}, {transform_indices = @transform_3, window_bounds = array<i64: 1, 8, 128>}, {transform_indices = @transform_4, window_bounds = array<i64: 1, 1, 128>}, {transform_indices = @transform_5, window_bounds = array<i64: 1, 1, 128>}]} {
    %c0 = arith.constant 0 : index
    %c0_0 = arith.constant 0 : index
    %c0_1 = arith.constant 0 : index
    %0 = vector.load %arg1[%c0, %c0_0, %c0_1] : memref<1x12x192xbf16, #tpu.memory_space<vmem>>, vector<1x8x192xbf16>
    %1 = vector.shape_cast %0 : vector<1x8x192xbf16> to vector<8x192xbf16>
    %c0_2 = arith.constant 0 : index
    %c0_3 = arith.constant 0 : index
    %c0_4 = arith.constant 0 : index
    %2 = vector.load %arg2[%c0_2, %c0_3, %c0_4] : memref<3x192x128xbf16, #tpu.memory_space<vmem>>, vector<1x192x128xbf16>
    %3 = vector.shape_cast %2 : vector<1x192x128xbf16> to vector<192x128xbf16>
    %cst = arith.constant dense<0.000000e+00> : vector<8x128xf32>
    %4 = tpu.matmul %1, %3, %cst {dimension_numbers = #tpu.dot_dimension_numbers<[1], [0], [0], [1], [0, 0, 1, 1], [], []>} : vector<8x192xbf16>, vector<192x128xbf16>, vector<8x128xf32> -> vector<8x128xf32>
    %c0_5 = arith.constant 0 : index
    %c2 = arith.constant 2 : index
    %c0_6 = arith.constant 0 : index
    %5 = vector.load %arg1[%c0_5, %c2, %c0_6] : memref<1x12x192xbf16, #tpu.memory_space<vmem>>, vector<1x8x192xbf16>
    %6 = vector.shape_cast %5 : vector<1x8x192xbf16> to vector<8x192xbf16>
    %c1 = arith.constant 1 : index
    %c0_7 = arith.constant 0 : index
    %c0_8 = arith.constant 0 : index
    %7 = vector.load %arg2[%c1, %c0_7, %c0_8] : memref<3x192x128xbf16, #tpu.memory_space<vmem>>, vector<1x192x128xbf16>
    %8 = vector.shape_cast %7 : vector<1x192x128xbf16> to vector<192x128xbf16>
    %cst_9 = arith.constant dense<0.000000e+00> : vector<8x128xf32>
    %9 = tpu.matmul %6, %8, %cst_9 {dimension_numbers = #tpu.dot_dimension_numbers<[1], [0], [0], [1], [0, 0, 1, 1], [], []>} : vector<8x192xbf16>, vector<192x128xbf16>, vector<8x128xf32> -> vector<8x128xf32>
    %10 = arith.addf %4, %9 : vector<8x128xf32>
    %c0_10 = arith.constant 0 : index
    %c4 = arith.constant 4 : index
    %c0_11 = arith.constant 0 : index
    %11 = vector.load %arg1[%c0_10, %c4, %c0_11] : memref<1x12x192xbf16, #tpu.memory_space<vmem>>, vector<1x8x192xbf16>
    %12 = vector.shape_cast %11 : vector<1x8x192xbf16> to vector<8x192xbf16>
    %c2_12 = arith.constant 2 : index
    %c0_13 = arith.constant 0 : index
    %c0_14 = arith.constant 0 : index
    %13 = vector.load %arg2[%c2_12, %c0_13, %c0_14] : memref<3x192x128xbf16, #tpu.memory_space<vmem>>, vector<1x192x128xbf16>
    %14 = vector.shape_cast %13 : vector<1x192x128xbf16> to vector<192x128xbf16>
    %cst_15 = arith.constant dense<0.000000e+00> : vector<8x128xf32>
    %15 = tpu.matmul %12, %14, %cst_15 {dimension_numbers = #tpu.dot_dimension_numbers<[1], [0], [0], [1], [0, 0, 1, 1], [], []>} : vector<8x192xbf16>, vector<192x128xbf16>, vector<8x128xf32> -> vector<8x128xf32>
    %16 = arith.addf %10, %15 : vector<8x128xf32>
    %c0_16 = arith.constant 0 : index
    %c0_17 = arith.constant 0 : index
    %17 = vector.load %arg3[%c0_16, %c0_17] : memref<1x128xf32, #tpu.memory_space<vmem>>, vector<1x128xf32>
    %18 = vector.broadcast %17 : vector<1x128xf32> to vector<8x128xf32>
    %19 = arith.addf %16, %18 : vector<8x128xf32>
    %cst_18 = arith.constant 0.000000e+00 : f32
    %20 = vector.broadcast %cst_18 : f32 to vector<8x128xf32>
    %21 = arith.maximumf %19, %20 : vector<8x128xf32>
    %c0_19 = arith.constant 0 : index
    %c0_20 = arith.constant 0 : index
    %c0_21 = arith.constant 0 : index
    %22 = vector.load %arg4[%c0_19, %c0_20, %c0_21] : memref<1x8x128xf32, #tpu.memory_space<vmem>>, vector<1x8x128xf32>
    %23 = vector.shape_cast %22 : vector<1x8x128xf32> to vector<8x128xf32>
    %24 = vector.shape_cast %21 : vector<8x128xf32> to vector<1x8x128xf32>
    tpu.vector_store %arg4[%c0_19, %c0_20, %c0_21], %24 {strides = array<i32>} : memref<1x8x128xf32, #tpu.memory_space<vmem>>, vector<1x8x128xf32>,
    %cst_22 = arith.constant dense<0.000000e+00> : vector<128xf32>
    %25 = vector.multi_reduction <add>, %21, %cst_22 [0] : vector<8x128xf32> to vector<128xf32>
    %26 = vector.shape_cast %25 : vector<128xf32> to vector<1x128xf32>
    %c0_23 = arith.constant 0 : index
    %c0_24 = arith.constant 0 : index
    %c0_25 = arith.constant 0 : index
    %27 = vector.load %arg5[%c0_23, %c0_24, %c0_25] : memref<1x1x128xf32, #tpu.memory_space<vmem>>, vector<1x1x128xf32>
    %28 = vector.shape_cast %27 : vector<1x1x128xf32> to vector<1x128xf32>
    %29 = vector.shape_cast %26 : vector<1x128xf32> to vector<1x1x128xf32>
    tpu.vector_store %arg5[%c0_23, %c0_24, %c0_25], %29 {strides = array<i32>} : memref<1x1x128xf32, #tpu.memory_space<vmem>>, vector<1x1x128xf32>,
    %30 = arith.mulf %21, %21 : vector<8x128xf32>
    %cst_26 = arith.constant dense<0.000000e+00> : vector<128xf32>
    %31 = vector.multi_reduction <add>, %30, %cst_26 [0] : vector<8x128xf32> to vector<128xf32>
    %32 = vector.shape_cast %31 : vector<128xf32> to vector<1x128xf32>
    %c0_27 = arith.constant 0 : index
    %c0_28 = arith.constant 0 : index
    %c0_29 = arith.constant 0 : index
    %33 = vector.load %arg6[%c0_27, %c0_28, %c0_29] : memref<1x1x128xf32, #tpu.memory_space<vmem>>, vector<1x1x128xf32>
    %34 = vector.shape_cast %33 : vector<1x1x128xf32> to vector<1x128xf32>
    %35 = vector.shape_cast %32 : vector<1x128xf32> to vector<1x1x128xf32>
    tpu.vector_store %arg6[%c0_27, %c0_28, %c0_29], %35 {strides = array<i32>} : memref<1x1x128xf32, #tpu.memory_space<vmem>>, vector<1x1x128xf32>,
    return
  }
  func.func @transform_0(%arg0: i32) -> (i32, i32, i32) {
    %c0_i32 = arith.constant 0 : i32
    %c0_i32_0 = arith.constant 0 : i32
    %c0_i32_1 = arith.constant 0 : i32
    return %arg0, %c0_i32, %c0_i32_0 : i32, i32, i32
  }
  func.func @transform_1(%arg0: i32) -> (i32, i32, i32) {
    %c0_i32 = arith.constant 0 : i32
    %c0_i32_0 = arith.constant 0 : i32
    %c0_i32_1 = arith.constant 0 : i32
    %c0_i32_2 = arith.constant 0 : i32
    return %c0_i32, %c0_i32_0, %c0_i32_1 : i32, i32, i32
  }
  func.func @transform_2(%arg0: i32) -> (i32, i32) {
    %c0_i32 = arith.constant 0 : i32
    %c0_i32_0 = arith.constant 0 : i32
    %c0_i32_1 = arith.constant 0 : i32
    return %c0_i32, %c0_i32_0 : i32, i32
  }
  func.func @transform_3(%arg0: i32) -> (i32, i32, i32) {
    %c0_i32 = arith.constant 0 : i32
    %c0_i32_0 = arith.constant 0 : i32
    %c0_i32_1 = arith.constant 0 : i32
    return %arg0, %c0_i32, %c0_i32_0 : i32, i32, i32
  }
  func.func @transform_4(%arg0: i32) -> (i32, i32, i32) {
    %c0_i32 = arith.constant 0 : i32
    %c0_i32_0 = arith.constant 0 : i32
    %c0_i32_1 = arith.constant 0 : i32
    return %arg0, %c0_i32, %c0_i32_0 : i32, i32, i32
  }
  func.func @transform_5(%arg0: i32) -> (i32, i32, i32) {
    %c0_i32 = arith.constant 0 : i32
    %c0_i32_0 = arith.constant 0 : i32
    %c0_i32_1 = arith.constant 0 : i32
    return %arg0, %c0_i32, %c0_i32_0 : i32, i32, i32
  }
}

module attributes {stable_mosaic.version = 11 : i64} {
  func.func @_conv_kernel(%arg0: i32, %arg1: memref<1x12x384xbf16, #tpu.memory_space<vmem>>, %arg2: memref<3x384x128xbf16, #tpu.memory_space<vmem>>, %arg3: memref<1x128xf32, #tpu.memory_space<vmem>>, %arg4: memref<1x8x128xf32, #tpu.memory_space<vmem>>, %arg5: memref<1x1x128xf32, #tpu.memory_space<vmem>>, %arg6: memref<1x1x128xf32, #tpu.memory_space<vmem>>) attributes {dimension_semantics = [#tpu.dimension_semantics<parallel>], iteration_bounds = array<i64: 2>, scalar_prefetch = 0 : i64, scratch_operands = 0 : i64, tpu.core_type = #tpu.core_type<tc>, window_params = [{transform_indices = @transform_0, window_bounds = array<i64: 1, 12, 384>}, {pipeline_mode = #tpu.pipeline_mode<synchronous>, transform_indices = @transform_1, window_bounds = array<i64: 3, 384, 128>}, {pipeline_mode = #tpu.pipeline_mode<synchronous>, transform_indices = @transform_2, window_bounds = array<i64: 1, 128>}, {transform_indices = @transform_3, window_bounds = array<i64: 1, 8, 128>}, {transform_indices = @transform_4, window_bounds = array<i64: 1, 1, 128>}, {transform_indices = @transform_5, window_bounds = array<i64: 1, 1, 128>}]} {
    %c0 = arith.constant 0 : index
    %c0_0 = arith.constant 0 : index
    %c0_1 = arith.constant 0 : index
    %0 = vector.load %arg1[%c0, %c0_0, %c0_1] : memref<1x12x384xbf16, #tpu.memory_space<vmem>>, vector<1x8x384xbf16>
    %1 = vector.shape_cast %0 : vector<1x8x384xbf16> to vector<8x384xbf16>
    %c0_2 = arith.constant 0 : index
    %c0_3 = arith.constant 0 : index
    %c0_4 = arith.constant 0 : index
    %2 = vector.load %arg2[%c0_2, %c0_3, %c0_4] : memref<3x384x128xbf16, #tpu.memory_space<vmem>>, vector<1x384x128xbf16>
    %3 = vector.shape_cast %2 : vector<1x384x128xbf16> to vector<384x128xbf16>
    %cst = arith.constant dense<0.000000e+00> : vector<8x128xf32>
    %4 = tpu.matmul %1, %3, %cst {dimension_numbers = #tpu.dot_dimension_numbers<[1], [0], [0], [1], [0, 0, 1, 1], [], []>} : vector<8x384xbf16>, vector<384x128xbf16>, vector<8x128xf32> -> vector<8x128xf32>
    %c0_5 = arith.constant 0 : index
    %c2 = arith.constant 2 : index
    %c0_6 = arith.constant 0 : index
    %5 = vector.load %arg1[%c0_5, %c2, %c0_6] : memref<1x12x384xbf16, #tpu.memory_space<vmem>>, vector<1x8x384xbf16>
    %6 = vector.shape_cast %5 : vector<1x8x384xbf16> to vector<8x384xbf16>
    %c1 = arith.constant 1 : index
    %c0_7 = arith.constant 0 : index
    %c0_8 = arith.constant 0 : index
    %7 = vector.load %arg2[%c1, %c0_7, %c0_8] : memref<3x384x128xbf16, #tpu.memory_space<vmem>>, vector<1x384x128xbf16>
    %8 = vector.shape_cast %7 : vector<1x384x128xbf16> to vector<384x128xbf16>
    %cst_9 = arith.constant dense<0.000000e+00> : vector<8x128xf32>
    %9 = tpu.matmul %6, %8, %cst_9 {dimension_numbers = #tpu.dot_dimension_numbers<[1], [0], [0], [1], [0, 0, 1, 1], [], []>} : vector<8x384xbf16>, vector<384x128xbf16>, vector<8x128xf32> -> vector<8x128xf32>
    %10 = arith.addf %4, %9 : vector<8x128xf32>
    %c0_10 = arith.constant 0 : index
    %c4 = arith.constant 4 : index
    %c0_11 = arith.constant 0 : index
    %11 = vector.load %arg1[%c0_10, %c4, %c0_11] : memref<1x12x384xbf16, #tpu.memory_space<vmem>>, vector<1x8x384xbf16>
    %12 = vector.shape_cast %11 : vector<1x8x384xbf16> to vector<8x384xbf16>
    %c2_12 = arith.constant 2 : index
    %c0_13 = arith.constant 0 : index
    %c0_14 = arith.constant 0 : index
    %13 = vector.load %arg2[%c2_12, %c0_13, %c0_14] : memref<3x384x128xbf16, #tpu.memory_space<vmem>>, vector<1x384x128xbf16>
    %14 = vector.shape_cast %13 : vector<1x384x128xbf16> to vector<384x128xbf16>
    %cst_15 = arith.constant dense<0.000000e+00> : vector<8x128xf32>
    %15 = tpu.matmul %12, %14, %cst_15 {dimension_numbers = #tpu.dot_dimension_numbers<[1], [0], [0], [1], [0, 0, 1, 1], [], []>} : vector<8x384xbf16>, vector<384x128xbf16>, vector<8x128xf32> -> vector<8x128xf32>
    %16 = arith.addf %10, %15 : vector<8x128xf32>
    %c0_16 = arith.constant 0 : index
    %c0_17 = arith.constant 0 : index
    %17 = vector.load %arg3[%c0_16, %c0_17] : memref<1x128xf32, #tpu.memory_space<vmem>>, vector<1x128xf32>
    %18 = vector.broadcast %17 : vector<1x128xf32> to vector<8x128xf32>
    %19 = arith.addf %16, %18 : vector<8x128xf32>
    %cst_18 = arith.constant 0.000000e+00 : f32
    %20 = vector.broadcast %cst_18 : f32 to vector<8x128xf32>
    %21 = arith.maximumf %19, %20 : vector<8x128xf32>
    %c0_19 = arith.constant 0 : index
    %c0_20 = arith.constant 0 : index
    %c0_21 = arith.constant 0 : index
    %22 = vector.load %arg4[%c0_19, %c0_20, %c0_21] : memref<1x8x128xf32, #tpu.memory_space<vmem>>, vector<1x8x128xf32>
    %23 = vector.shape_cast %22 : vector<1x8x128xf32> to vector<8x128xf32>
    %24 = vector.shape_cast %21 : vector<8x128xf32> to vector<1x8x128xf32>
    tpu.vector_store %arg4[%c0_19, %c0_20, %c0_21], %24 {strides = array<i32>} : memref<1x8x128xf32, #tpu.memory_space<vmem>>, vector<1x8x128xf32>,
    %cst_22 = arith.constant dense<0.000000e+00> : vector<128xf32>
    %25 = vector.multi_reduction <add>, %21, %cst_22 [0] : vector<8x128xf32> to vector<128xf32>
    %26 = vector.shape_cast %25 : vector<128xf32> to vector<1x128xf32>
    %c0_23 = arith.constant 0 : index
    %c0_24 = arith.constant 0 : index
    %c0_25 = arith.constant 0 : index
    %27 = vector.load %arg5[%c0_23, %c0_24, %c0_25] : memref<1x1x128xf32, #tpu.memory_space<vmem>>, vector<1x1x128xf32>
    %28 = vector.shape_cast %27 : vector<1x1x128xf32> to vector<1x128xf32>
    %29 = vector.shape_cast %26 : vector<1x128xf32> to vector<1x1x128xf32>
    tpu.vector_store %arg5[%c0_23, %c0_24, %c0_25], %29 {strides = array<i32>} : memref<1x1x128xf32, #tpu.memory_space<vmem>>, vector<1x1x128xf32>,
    %30 = arith.mulf %21, %21 : vector<8x128xf32>
    %cst_26 = arith.constant dense<0.000000e+00> : vector<128xf32>
    %31 = vector.multi_reduction <add>, %30, %cst_26 [0] : vector<8x128xf32> to vector<128xf32>
    %32 = vector.shape_cast %31 : vector<128xf32> to vector<1x128xf32>
    %c0_27 = arith.constant 0 : index
    %c0_28 = arith.constant 0 : index
    %c0_29 = arith.constant 0 : index
    %33 = vector.load %arg6[%c0_27, %c0_28, %c0_29] : memref<1x1x128xf32, #tpu.memory_space<vmem>>, vector<1x1x128xf32>
    %34 = vector.shape_cast %33 : vector<1x1x128xf32> to vector<1x128xf32>
    %35 = vector.shape_cast %32 : vector<1x128xf32> to vector<1x1x128xf32>
    tpu.vector_store %arg6[%c0_27, %c0_28, %c0_29], %35 {strides = array<i32>} : memref<1x1x128xf32, #tpu.memory_space<vmem>>, vector<1x1x128xf32>,
    return
  }
  func.func @transform_0(%arg0: i32) -> (i32, i32, i32) {
    %c0_i32 = arith.constant 0 : i32
    %c0_i32_0 = arith.constant 0 : i32
    %c0_i32_1 = arith.constant 0 : i32
    return %arg0, %c0_i32, %c0_i32_0 : i32, i32, i32
  }
  func.func @transform_1(%arg0: i32) -> (i32, i32, i32) {
    %c0_i32 = arith.constant 0 : i32
    %c0_i32_0 = arith.constant 0 : i32
    %c0_i32_1 = arith.constant 0 : i32
    %c0_i32_2 = arith.constant 0 : i32
    return %c0_i32, %c0_i32_0, %c0_i32_1 : i32, i32, i32
  }
  func.func @transform_2(%arg0: i32) -> (i32, i32) {
    %c0_i32 = arith.constant 0 : i32
    %c0_i32_0 = arith.constant 0 : i32
    %c0_i32_1 = arith.constant 0 : i32
    return %c0_i32, %c0_i32_0 : i32, i32
  }
  func.func @transform_3(%arg0: i32) -> (i32, i32, i32) {
    %c0_i32 = arith.constant 0 : i32
    %c0_i32_0 = arith.constant 0 : i32
    %c0_i32_1 = arith.constant 0 : i32
    return %arg0, %c0_i32, %c0_i32_0 : i32, i32, i32
  }
  func.func @transform_4(%arg0: i32) -> (i32, i32, i32) {
    %c0_i32 = arith.constant 0 : i32
    %c0_i32_0 = arith.constant 0 : i32
    %c0_i32_1 = arith.constant 0 : i32
    return %arg0, %c0_i32, %c0_i32_0 : i32, i32, i32
  }
  func.func @transform_5(%arg0: i32) -> (i32, i32, i32) {
    %c0_i32 = arith.constant 0 : i32
    %c0_i32_0 = arith.constant 0 : i32
    %c0_i32_1 = arith.constant 0 : i32
    return %arg0, %c0_i32, %c0_i32_0 : i32, i32, i32
  }
}

module attributes {stable_mosaic.version = 11 : i64} {
  func.func @_maxpool_affine_kernel(%arg0: i32, %arg1: i32, %arg2: memref<1x2x2x128xf32, #tpu.memory_space<vmem>>, %arg3: memref<1x1x128xf32, #tpu.memory_space<vmem>>, %arg4: memref<1x1x128xf32, #tpu.memory_space<vmem>>, %arg5: memref<1x1x1x128xf32, #tpu.memory_space<vmem>>) attributes {dimension_semantics = [#tpu.dimension_semantics<parallel>, #tpu.dimension_semantics<parallel>], iteration_bounds = array<i64: 2, 2>, scalar_prefetch = 0 : i64, scratch_operands = 0 : i64, tpu.core_type = #tpu.core_type<tc>, window_params = [{transform_indices = @transform_0, window_bounds = array<i64: 1, 2, 2, 128>}, {pipeline_mode = #tpu.pipeline_mode<synchronous>, transform_indices = @transform_1, window_bounds = array<i64: 1, 1, 128>}, {pipeline_mode = #tpu.pipeline_mode<synchronous>, transform_indices = @transform_2, window_bounds = array<i64: 1, 1, 128>}, {transform_indices = @transform_3, window_bounds = array<i64: 1, 1, 1, 128>}]} {
    %c0 = arith.constant 0 : index
    %c0_0 = arith.constant 0 : index
    %c0_1 = arith.constant 0 : index
    %c0_2 = arith.constant 0 : index
    %0 = vector.load %arg2[%c0, %c0_0, %c0_1, %c0_2] : memref<1x2x2x128xf32, #tpu.memory_space<vmem>>, vector<1x2x2x128xf32>
    %1 = vector.shape_cast %0 : vector<1x2x2x128xf32> to vector<2x2x128xf32>
    %c0_3 = arith.constant 0 : index
    %c0_4 = arith.constant 0 : index
    %c0_5 = arith.constant 0 : index
    %2 = vector.load %arg3[%c0_3, %c0_4, %c0_5] : memref<1x1x128xf32, #tpu.memory_space<vmem>>, vector<1x1x128xf32>
    %3 = vector.broadcast %2 : vector<1x1x128xf32> to vector<2x2x128xf32>
    %4 = arith.mulf %1, %3 : vector<2x2x128xf32>
    %c0_6 = arith.constant 0 : index
    %c0_7 = arith.constant 0 : index
    %c0_8 = arith.constant 0 : index
    %5 = vector.load %arg4[%c0_6, %c0_7, %c0_8] : memref<1x1x128xf32, #tpu.memory_space<vmem>>, vector<1x1x128xf32>
    %6 = vector.broadcast %5 : vector<1x1x128xf32> to vector<2x2x128xf32>
    %7 = arith.addf %4, %6 : vector<2x2x128xf32>
    %cst = arith.constant dense<0xFF800000> : vector<2x128xf32>
    %8 = vector.multi_reduction <maximumf>, %7, %cst [0] : vector<2x2x128xf32> to vector<2x128xf32>
    %cst_9 = arith.constant dense<0xFF800000> : vector<128xf32>
    %9 = vector.multi_reduction <maximumf>, %8, %cst_9 [0] : vector<2x128xf32> to vector<128xf32>
    %10 = vector.shape_cast %9 : vector<128xf32> to vector<1x128xf32>
    %c0_10 = arith.constant 0 : index
    %c0_11 = arith.constant 0 : index
    %c0_12 = arith.constant 0 : index
    %c0_13 = arith.constant 0 : index
    %11 = vector.load %arg5[%c0_10, %c0_11, %c0_12, %c0_13] : memref<1x1x1x128xf32, #tpu.memory_space<vmem>>, vector<1x1x1x128xf32>
    %12 = vector.shape_cast %11 : vector<1x1x1x128xf32> to vector<1x128xf32>
    %13 = vector.shape_cast %10 : vector<1x128xf32> to vector<1x1x1x128xf32>
    tpu.vector_store %arg5[%c0_10, %c0_11, %c0_12, %c0_13], %13 {strides = array<i32>} : memref<1x1x1x128xf32, #tpu.memory_space<vmem>>, vector<1x1x1x128xf32>,
    return
  }
  func.func @transform_0(%arg0: i32, %arg1: i32) -> (i32, i32, i32, i32) {
    %c0_i32 = arith.constant 0 : i32
    %c0_i32_0 = arith.constant 0 : i32
    %c0_i32_1 = arith.constant 0 : i32
    return %arg0, %arg1, %c0_i32, %c0_i32_0 : i32, i32, i32, i32
  }
  func.func @transform_1(%arg0: i32, %arg1: i32) -> (i32, i32, i32) {
    %c0_i32 = arith.constant 0 : i32
    %c0_i32_0 = arith.constant 0 : i32
    %c0_i32_1 = arith.constant 0 : i32
    %c0_i32_2 = arith.constant 0 : i32
    return %c0_i32, %c0_i32_0, %c0_i32_1 : i32, i32, i32
  }
  func.func @transform_2(%arg0: i32, %arg1: i32) -> (i32, i32, i32) {
    %c0_i32 = arith.constant 0 : i32
    %c0_i32_0 = arith.constant 0 : i32
    %c0_i32_1 = arith.constant 0 : i32
    %c0_i32_2 = arith.constant 0 : i32
    return %c0_i32, %c0_i32_0, %c0_i32_1 : i32, i32, i32
  }
  func.func @transform_3(%arg0: i32, %arg1: i32) -> (i32, i32, i32, i32) {
    %c0_i32 = arith.constant 0 : i32
    %c0_i32_0 = arith.constant 0 : i32
    %c0_i32_1 = arith.constant 0 : i32
    return %arg0, %arg1, %c0_i32, %c0_i32_0 : i32, i32, i32, i32
  }
}

module attributes {stable_mosaic.version = 11 : i64} {
  func.func @_conv_kernel(%arg0: i32, %arg1: memref<1x4x384xbf16, #tpu.memory_space<vmem>>, %arg2: memref<3x384x256xbf16, #tpu.memory_space<vmem>>, %arg3: memref<1x256xf32, #tpu.memory_space<vmem>>, %arg4: memref<1x2x256xf32, #tpu.memory_space<vmem>>, %arg5: memref<1x1x256xf32, #tpu.memory_space<vmem>>, %arg6: memref<1x1x256xf32, #tpu.memory_space<vmem>>) attributes {dimension_semantics = [#tpu.dimension_semantics<parallel>], iteration_bounds = array<i64: 2>, scalar_prefetch = 0 : i64, scratch_operands = 0 : i64, tpu.core_type = #tpu.core_type<tc>, window_params = [{transform_indices = @transform_0, window_bounds = array<i64: 1, 4, 384>}, {pipeline_mode = #tpu.pipeline_mode<synchronous>, transform_indices = @transform_1, window_bounds = array<i64: 3, 384, 256>}, {pipeline_mode = #tpu.pipeline_mode<synchronous>, transform_indices = @transform_2, window_bounds = array<i64: 1, 256>}, {transform_indices = @transform_3, window_bounds = array<i64: 1, 2, 256>}, {transform_indices = @transform_4, window_bounds = array<i64: 1, 1, 256>}, {transform_indices = @transform_5, window_bounds = array<i64: 1, 1, 256>}]} {
    %c0 = arith.constant 0 : index
    %c0_0 = arith.constant 0 : index
    %c0_1 = arith.constant 0 : index
    %0 = vector.load %arg1[%c0, %c0_0, %c0_1] : memref<1x4x384xbf16, #tpu.memory_space<vmem>>, vector<1x2x384xbf16>
    %1 = vector.shape_cast %0 : vector<1x2x384xbf16> to vector<2x384xbf16>
    %c0_2 = arith.constant 0 : index
    %c0_3 = arith.constant 0 : index
    %c0_4 = arith.constant 0 : index
    %2 = vector.load %arg2[%c0_2, %c0_3, %c0_4] : memref<3x384x256xbf16, #tpu.memory_space<vmem>>, vector<1x384x256xbf16>
    %3 = vector.shape_cast %2 : vector<1x384x256xbf16> to vector<384x256xbf16>
    %cst = arith.constant dense<0.000000e+00> : vector<2x256xf32>
    %4 = tpu.matmul %1, %3, %cst {dimension_numbers = #tpu.dot_dimension_numbers<[1], [0], [0], [1], [0, 0, 1, 1], [], []>} : vector<2x384xbf16>, vector<384x256xbf16>, vector<2x256xf32> -> vector<2x256xf32>
    %c0_5 = arith.constant 0 : index
    %c1 = arith.constant 1 : index
    %c0_6 = arith.constant 0 : index
    %5 = vector.load %arg1[%c0_5, %c1, %c0_6] : memref<1x4x384xbf16, #tpu.memory_space<vmem>>, vector<1x2x384xbf16>
    %6 = vector.shape_cast %5 : vector<1x2x384xbf16> to vector<2x384xbf16>
    %c1_7 = arith.constant 1 : index
    %c0_8 = arith.constant 0 : index
    %c0_9 = arith.constant 0 : index
    %7 = vector.load %arg2[%c1_7, %c0_8, %c0_9] : memref<3x384x256xbf16, #tpu.memory_space<vmem>>, vector<1x384x256xbf16>
    %8 = vector.shape_cast %7 : vector<1x384x256xbf16> to vector<384x256xbf16>
    %cst_10 = arith.constant dense<0.000000e+00> : vector<2x256xf32>
    %9 = tpu.matmul %6, %8, %cst_10 {dimension_numbers = #tpu.dot_dimension_numbers<[1], [0], [0], [1], [0, 0, 1, 1], [], []>} : vector<2x384xbf16>, vector<384x256xbf16>, vector<2x256xf32> -> vector<2x256xf32>
    %10 = arith.addf %4, %9 : vector<2x256xf32>
    %c0_11 = arith.constant 0 : index
    %c2 = arith.constant 2 : index
    %c0_12 = arith.constant 0 : index
    %11 = vector.load %arg1[%c0_11, %c2, %c0_12] : memref<1x4x384xbf16, #tpu.memory_space<vmem>>, vector<1x2x384xbf16>
    %12 = vector.shape_cast %11 : vector<1x2x384xbf16> to vector<2x384xbf16>
    %c2_13 = arith.constant 2 : index
    %c0_14 = arith.constant 0 : index
    %c0_15 = arith.constant 0 : index
    %13 = vector.load %arg2[%c2_13, %c0_14, %c0_15] : memref<3x384x256xbf16, #tpu.memory_space<vmem>>, vector<1x384x256xbf16>
    %14 = vector.shape_cast %13 : vector<1x384x256xbf16> to vector<384x256xbf16>
    %cst_16 = arith.constant dense<0.000000e+00> : vector<2x256xf32>
    %15 = tpu.matmul %12, %14, %cst_16 {dimension_numbers = #tpu.dot_dimension_numbers<[1], [0], [0], [1], [0, 0, 1, 1], [], []>} : vector<2x384xbf16>, vector<384x256xbf16>, vector<2x256xf32> -> vector<2x256xf32>
    %16 = arith.addf %10, %15 : vector<2x256xf32>
    %c0_17 = arith.constant 0 : index
    %c0_18 = arith.constant 0 : index
    %17 = vector.load %arg3[%c0_17, %c0_18] : memref<1x256xf32, #tpu.memory_space<vmem>>, vector<1x256xf32>
    %18 = vector.broadcast %17 : vector<1x256xf32> to vector<2x256xf32>
    %19 = arith.addf %16, %18 : vector<2x256xf32>
    %cst_19 = arith.constant 0.000000e+00 : f32
    %20 = vector.broadcast %cst_19 : f32 to vector<2x256xf32>
    %21 = arith.maximumf %19, %20 : vector<2x256xf32>
    %c0_20 = arith.constant 0 : index
    %c0_21 = arith.constant 0 : index
    %c0_22 = arith.constant 0 : index
    %22 = vector.load %arg4[%c0_20, %c0_21, %c0_22] : memref<1x2x256xf32, #tpu.memory_space<vmem>>, vector<1x2x256xf32>
    %23 = vector.shape_cast %22 : vector<1x2x256xf32> to vector<2x256xf32>
    %24 = vector.shape_cast %21 : vector<2x256xf32> to vector<1x2x256xf32>
    tpu.vector_store %arg4[%c0_20, %c0_21, %c0_22], %24 {strides = array<i32>} : memref<1x2x256xf32, #tpu.memory_space<vmem>>, vector<1x2x256xf32>,
    %cst_23 = arith.constant dense<0.000000e+00> : vector<256xf32>
    %25 = vector.multi_reduction <add>, %21, %cst_23 [0] : vector<2x256xf32> to vector<256xf32>
    %26 = vector.shape_cast %25 : vector<256xf32> to vector<1x256xf32>
    %c0_24 = arith.constant 0 : index
    %c0_25 = arith.constant 0 : index
    %c0_26 = arith.constant 0 : index
    %27 = vector.load %arg5[%c0_24, %c0_25, %c0_26] : memref<1x1x256xf32, #tpu.memory_space<vmem>>, vector<1x1x256xf32>
    %28 = vector.shape_cast %27 : vector<1x1x256xf32> to vector<1x256xf32>
    %29 = vector.shape_cast %26 : vector<1x256xf32> to vector<1x1x256xf32>
    tpu.vector_store %arg5[%c0_24, %c0_25, %c0_26], %29 {strides = array<i32>} : memref<1x1x256xf32, #tpu.memory_space<vmem>>, vector<1x1x256xf32>,
    %30 = arith.mulf %21, %21 : vector<2x256xf32>
    %cst_27 = arith.constant dense<0.000000e+00> : vector<256xf32>
    %31 = vector.multi_reduction <add>, %30, %cst_27 [0] : vector<2x256xf32> to vector<256xf32>
    %32 = vector.shape_cast %31 : vector<256xf32> to vector<1x256xf32>
    %c0_28 = arith.constant 0 : index
    %c0_29 = arith.constant 0 : index
    %c0_30 = arith.constant 0 : index
    %33 = vector.load %arg6[%c0_28, %c0_29, %c0_30] : memref<1x1x256xf32, #tpu.memory_space<vmem>>, vector<1x1x256xf32>
    %34 = vector.shape_cast %33 : vector<1x1x256xf32> to vector<1x256xf32>
    %35 = vector.shape_cast %32 : vector<1x256xf32> to vector<1x1x256xf32>
    tpu.vector_store %arg6[%c0_28, %c0_29, %c0_30], %35 {strides = array<i32>} : memref<1x1x256xf32, #tpu.memory_space<vmem>>, vector<1x1x256xf32>,
    return
  }
  func.func @transform_0(%arg0: i32) -> (i32, i32, i32) {
    %c0_i32 = arith.constant 0 : i32
    %c0_i32_0 = arith.constant 0 : i32
    %c0_i32_1 = arith.constant 0 : i32
    return %arg0, %c0_i32, %c0_i32_0 : i32, i32, i32
  }
  func.func @transform_1(%arg0: i32) -> (i32, i32, i32) {
    %c0_i32 = arith.constant 0 : i32
    %c0_i32_0 = arith.constant 0 : i32
    %c0_i32_1 = arith.constant 0 : i32
    %c0_i32_2 = arith.constant 0 : i32
    return %c0_i32, %c0_i32_0, %c0_i32_1 : i32, i32, i32
  }
  func.func @transform_2(%arg0: i32) -> (i32, i32) {
    %c0_i32 = arith.constant 0 : i32
    %c0_i32_0 = arith.constant 0 : i32
    %c0_i32_1 = arith.constant 0 : i32
    return %c0_i32, %c0_i32_0 : i32, i32
  }
  func.func @transform_3(%arg0: i32) -> (i32, i32, i32) {
    %c0_i32 = arith.constant 0 : i32
    %c0_i32_0 = arith.constant 0 : i32
    %c0_i32_1 = arith.constant 0 : i32
    return %arg0, %c0_i32, %c0_i32_0 : i32, i32, i32
  }
  func.func @transform_4(%arg0: i32) -> (i32, i32, i32) {
    %c0_i32 = arith.constant 0 : i32
    %c0_i32_0 = arith.constant 0 : i32
    %c0_i32_1 = arith.constant 0 : i32
    return %arg0, %c0_i32, %c0_i32_0 : i32, i32, i32
  }
  func.func @transform_5(%arg0: i32) -> (i32, i32, i32) {
    %c0_i32 = arith.constant 0 : i32
    %c0_i32_0 = arith.constant 0 : i32
    %c0_i32_1 = arith.constant 0 : i32
    return %arg0, %c0_i32, %c0_i32_0 : i32, i32, i32
  }
}

</mosaic_0001>

<bundles_post_ra>
// kernel: encoder_forward.9
= control target key start
LH: loop header
LB: loop body
LE: loop exit
PB: predicated region body
PF: predicated region fallthrough
CT: control target
= control target key end

     0   :  { %11 = vsyncpa [#allocation3], 0  ;;  %s1851_s18 = smov 0   ;;  %s2444_s0 = inlined_call_operand.vmem [shape: bf16[2,220,3], index: 0, kind: input, shape index: {}]   ;;  %s2445_s1 = inlined_call_operand.vmem [shape: bf16[3,3,32], index: 1, kind: input, shape index: {}]   ;;  %s2446_s2 = inlined_call_operand.hbm [shape: f32[1,32], index: 2, kind: input, shape index: {}]   ;;  %s2447_s3 = inlined_call_operand.vmem [shape: f32[2,200,32], index: 3, kind: output, shape index: {0}]   ;;  %s2448_s4 = inlined_call_operand.vmem [shape: f32[2,1,32], index: 4, kind: output, shape index: {1}]   ;;  %s2449_s5 = inlined_call_operand.vmem [shape: f32[2,1,32], index: 5, kind: output, shape index: {2}]  }
   0x1 LB: > { %s1857_s19 = sadd.s32 4294967295, %s1815_s18   ;;  %p1418_p0 = scmp.ge.s32.totalorder %s1815_s18, 1  ;;  %s1815_s18 = sphi %s1851_s18, %s17_s18  }
   0x2   : > { %p168_p1 = scmp.lt.s32.totalorder %s1815_s18, 3  ;;  %p2450_p3 = scmp.eq.s32.totalorder %s1857_s19, 0 }
   0x3   : > { %s1817_s21 = smov [#allocation2]   ;;  %s1777_s26 = scalar_lea.hbm %s2446_s2, 16 }
   0x4   : > { %p1861_p2 = pnand %p1418_p0, %p168_p1  ;;  %s184_s22 = sshll.u32 %s1817_s21, 4  ;;  %s185_s22 = int_to_ptr.vmem [resolvable:$true] %s184_s22 }
   0x5   : > { %p1778_p6 = scmp.ne.s32.totalorder %s2446_s2, %s1777_s26  ;;  %p1784_p10 = scmp.lt.u32.totalorder %s1777_s26, %s2446_s2 }
   0x6   : > { %s2452_s20 = scalar_select %p1861_p2, 1, 0 }
   0x7   : > { %p1720_p4 = pneg %p1861_p2 }
   0x9   : > { %p1870_p5 = pnand %p2450_p3, %p1720_p4 }
   0xb   : > { %p1779_p7 = pneg %p1870_p5 }
   0xd   : > { %p1780_p8 = pnand %p1779_p7, %p1778_p6 }
   0xf   : > { %p1781_p9 = pneg %p1780_p8 }
  0x11   : > { %p1786_p11 = pnand %p1784_p10, %p1781_p9 }
  0x13   : > { %1789 = shalt.err (!%p1786_p11)
}
  0x14   : > { %s1790_s6 = scalar_lea.vmem %s185_s22, 16  ;;  %s1797_s7 = scalar_lea.vmem %s185_s22, 32 }
  0x15   : > { %p1791_p12 = scmp.ne.s32.totalorder %s185_s22, %s1790_s6  ;;  %p1798_p1 = scmp.lt.s32.totalorder %s185_s22, %s185_s22 }
  0x16   : > { %p1799_p4 = scmp.lt.s32.totalorder %s1797_s7, %s1790_s6 }
  0x17   : > { %p1793_p13 = pnand %p1791_p12, %p1779_p7 }
  0x18   : > { %p1800_p3 = por %p1799_p4, %p1798_p1 }
  0x19   : > { %p1794_p0 = pneg %p1793_p13 }
  0x1b   : > { %p1801_p2 = pnand %p1800_p3, %p1794_p0 }
  0x1d   : > { %1804 = shalt.err (!%p1801_p2)
}
  0x1e   : > { %1723 = dma.hbm_to_vmem [thread:$0]  (!%p1870_p5), %s2446_s2, 16, %s185_s22, [#allocation3]  }
  0x1f   : > { %p2454_p6 = scmp.ne.s32.totalorder %s2452_s20, 0 }
  0x20   : > { %p2455_p8 = scmp.eq.s32.totalorder (!%p2454_p6), %s1857_s19, 0 }
  0x21   : > { %205 = sbr.rel (%p2454_p6) target bundleno = 442 (0x1ba), region = 32 }
  0x28   : > { %1810 = dma.done.wait (%p2455_p8), [#allocation3], 16   ;;  %p2456_p7 = pmov %p2455_p8 }
  0x29   : > { %vm418_vm0 = vcmask 1040384   ;;  %v1818_v0 = vmov 0.0   ;;  %p239_p2 = scmp.lt.s32.totalorder %s1857_s19, 1  ;;  %vm419_vm1 = vcmask 1041408   ;;  %v1819_v1 = vmov 65535  }
  0x2a   : > { %1812 = vsyncadd (%p2456_p7), [#allocation3], 4294967280  ;;  %1550 = vmatprep.subr.bf16.mxu0 %v1818_v0  ;;  %1712 = vmatprep.subr.bf16.mxu1 %v1818_v0  ;;  %v420_v2 = vsel %vm418_vm0, 4294967295, %v1819_v1  ;;  %vm1820_vm2 = vmmov 0   ;;  %v1425_v4 = vld [vmem:[%s2445_s1 + $0x2] sm:$0x3] }
  0x2b   : > { %1552 = vmatprep.mubr.msk.bf16.mxu0 %vm1820_vm2, %v1818_v0  ;;  %1580 = vmatprep.mubr.msk.bf16.mxu1 %vm1820_vm2, %v1818_v0  ;;  %s2458_s19 = smov (!%p239_p2, %s1857_s19), 1  ;;  %v421_v3 = vsel %vm419_vm1, %v420_v2, 0  ;;  %v1478_v5 = vld [vmem:[%s2445_s1 + $0x4] sm:$0x3]  ;;  %vm352_vm3 = vcmask 1046528   ;;  %vm378_vm4 = vcmask 23552  }
  0x2c   : > { %s1714_s10 = smul.u32 112, %s2458_s19  ;;  %v423_v6 = vand.u32 %v1425_v4, %v421_v3  ;;  %v281_v10 = vld [vmem:[%s2445_s1] sm:$0x3]  ;;  %v915_v20 = vand.u32 %v1478_v5, %v421_v3  ;;  %vm849_vm5 = vcmask 1045504   ;;  %vm1135_vm6 = vcmask 261120   ;;  %s251_s28 = scalar_lea.vmem %s2448_s4, %s2458_s19 }
  0x2d   : > { %v618_v34 = vand.u32 %v421_v3, %v281_v10  ;;  %s1715_s22 = smul.u32 200, %s2458_s19  ;;  %vm1216_vm7 = vcmask 253952   ;;  %s254_s6 = scalar_lea.vmem %s2449_s5, %s2458_s19 }
  0x2e   : > { %s1916_s17 = scalar_lea.vmem %s2444_s0, %s1714_s10  ;;  %1551 = vmatpush3.bf16.msra.mxu0 %v423_v6  ;;  %1713 = vmatpush3.bf16.msra.mxu1 %v423_v6 }
  0x2f   : > { %v1919_v7 = vld [vmem:[%s1916_s17 + $0x8] sm:$0xf]  ;;  %v1922_v8 = vld [vmem:[%s1916_s17 + $0xc] sm:$0xf]  ;;  %v1925_v9 = vld [vmem:[%s1916_s17 + $0x10] sm:$0xf]  ;;  %1658 = vmatprep.subr.bf16.mxu0 %v1818_v0  ;;  %1604 = vmatprep.subr.bf16.mxu1 %v1818_v0  ;;  %s2286_s25 = scalar_lea.vmem %s2447_s3, %s1715_s22 }
  0x30   : > { %v282_v11 = vld [vmem:[%s1916_s17 + $0x4] sm:$0xe]  ;;  %v1427_v12 = vcombine.low %v1922_v8, %v1925_v9  ;;  %v1934_v13 = vld [vmem:[%s1916_s17 + $0x3c] sm:$0xf]  ;;  %v1937_v14 = vld [vmem:[%s1916_s17 + $0x40] sm:$0xf] }
  0x31   : > { %v1426_v15 = vcombine.low %v282_v11, %v1919_v7  ;;  %v1941_v16 = vld [vmem:[%s1916_s17 + $0x44] sm:$0xf]  ;;  %v1944_v17 = vld [vmem:[%s1916_s17 + $0x48] sm:$0xf]  ;;  %v1433_v18 = vcombine.low %v1934_v13, %v1937_v14  ;;  %v1949_v19 = vld [vmem:[%s1916_s17 + $0x14] sm:$0xf] }
  0x32   : > { %v354_v21 = vrot.slane %v1427_v12, 1  ;;  %v1434_v22 = vcombine.low %v1941_v16, %v1944_v17  ;;  %v1956_v23 = vld [vmem:[%s1916_s17 + $0x18] sm:$0xf]  ;;  %v1959_v24 = vld [vmem:[%s1916_s17 + $0x4c] sm:$0xf]  ;;  %v1460_v25 = vcombine.low %v1937_v14, %v1941_v16  ;;  %v1770_v61 = vld [vmem:[%s1916_s17 + $0x50] sm:$0xff]  }
  0x33   : > { %v353_v26 = vrot.slane %v1426_v15, 1  ;;  %v1963_v27 = vrot.slane %v1433_v18, 1  ;;  %v1428_v28 = vcombine.low %v1949_v19, %v1956_v23  ;;  %v1968_v29 = vld [vmem:[%s1916_s17 + $0x50] sm:$0xf]  ;;  %v1461_v30 = vcombine.low %v1944_v17, %v1959_v24  ;;  %v1975_v33 = vld [vmem:[%s1916_s17 + $0x54] sm:$0xf] }
  0x34   : > { %v368_v31 = vrot.slane %v1434_v22, 1  ;;  %v1435_v32 = vcombine.low %v1959_v24, %v1968_v29  ;;  %v1462_v36 = vcombine.low %v1968_v29, %v1975_v33  ;;  %v1985_v39 = vld [vmem:[%s1916_s17 + $0x1c] sm:$0xf]  ;;  %v1988_v40 = vld [vmem:[%s1916_s17 + $0x20] sm:$0xf]  ;;  %v2032_v58 = vld [vmem:[%s1916_s17 + $0x48] sm:$0xff]  }
  0x35   : > { %v355_v35 = vsel %vm352_vm3, %v353_v26, %v354_v21  ;;  %v356_v38 = vrot.slane %v1428_v28, 1  ;;  %v1995_v42 = vld [vmem:[%s1916_s17 + $0x58] sm:$0xf]  ;;  %v1429_v44 = vcombine.low %v1985_v39, %v1988_v40  ;;  %v2009_v49 = vld [vmem:[%s1916_s17 + $0x5c] sm:$0xf]  ;;  %v865_v62 = vrot.slane %v2032_v58, 2 }
  0x36   : > { %1553 = vmatmul.mubr.msk.bf16.vlgmr.msra.gmra.mrb[0].mxu0 %vm378_vm4, %v355_v35  ;;  %v369_v37 = vsel %vm352_vm3, %v1963_v27, %v368_v31  ;;  %v370_v41 = vrot.slane %v1435_v32, 1  ;;  %v1436_v45 = vcombine.low %v1975_v33, %v1995_v42  ;;  %v2003_v46 = vld [vmem:[%s1916_s17 + $0x38] sm:$0xf]  ;;  %v2013_v50 = vld [vmem:[%s1916_s17 + $0x24] sm:$0xf]  ;;  %v1463_v52 = vcombine.low %v1995_v42, %v2009_v49 }
  0x37   : > { %1581 = vmatmul.mubr.msk.bf16.vlgmr.msra.gmra.mrb[0].mxu1 %vm378_vm4, %v369_v37  ;;  %1659 = vmatpush3.bf16.msra.mxu0 %v915_v20  ;;  %v357_v43 = vsel %vm352_vm3, %v354_v21, %v356_v38  ;;  %v1459_v48 = vcombine.low %v2003_v46, %v1934_v13  ;;  %v2016_v51 = vld [vmem:[%s1916_s17 + $0x28] sm:$0xf]  ;;  %v358_v53 = vrot.slane %v1429_v44, 1  ;;  %v2026_v55 = vld [vmem:[%s1916_s17 + $0x60] sm:$0xf]  ;;  %v1772_v63 = vld [vmem:[%s1916_s17 + $0x58] sm:$0xff]  }
  0x38   : > { %1556 = vmatprep.mubr.msk.bf16.mxu0 %vm1820_vm2, %v1818_v0  ;;  %1584 = vmatprep.mubr.msk.bf16.mxu1 %vm1820_vm2, %v1818_v0  ;;  %v371_v47 = vsel %vm352_vm3, %v368_v31, %v370_v41  ;;  %v372_v54 = vrot.slane %v1436_v45, 1  ;;  %v1430_v57 = vcombine.low %v2013_v50, %v2016_v51  ;;  %v1437_v60 = vcombine.low %v2009_v49, %v2026_v55  ;;  %v2042_v1 = vld [vmem:[%s1916_s17 + $0x2c] sm:$0xf]  ;;  %v1774_v3 = vld [vmem:[%s1916_s17 + $0x60] sm:$0xff]   ;;  %v2051_v10 = vld [vmem:[%s1916_s17 + $0x30] sm:$0xf] }
  0x39   : > { %1605 = vmatpush3.bf16.msra.mxu1 %v618_v34  ;;  %v359_v56 = vsel %vm352_vm3, %v356_v38, %v358_v53  ;;  %v867_v2 = vrot.slane %v1770_v61, 2  ;;  %v869_v5 = vrot.slane %v1772_v63, 2  ;;  %v871_v12 = vrot.slane %v1774_v3, 2  ;;  %v2059_v15 = vld [vmem:[%s1916_s17 + $0x68] sm:$0x3f]   ;;  %v1756_v61 = vld [vmem:[%s1916_s17 + $0x18] sm:$0xff]  }
  0x3a   : > { %v373_v59 = vsel %vm352_vm3, %v370_v41, %v372_v54  ;;  %v360_v4 = vrot.slane %v1430_v57, 1  ;;  %v374_v6 = vrot.slane %v1437_v60, 1  ;;  %v873_v21 = vrot.slane %v2059_v15, 2  ;;  %v1749_v31 = vld [vmem:[%s1916_s17 + $0x64] sm:$0x1f]  }
  0x3b   : > { %v2056_v11 = vsel %vm849_vm5, %v865_v62, %v867_v2  ;;  %v2062_v18 = vsel %vm849_vm5, %v867_v2, %v869_v5  ;;  %v2065_v20 = vsel %vm849_vm5, %v869_v5, %v871_v12  ;;  %v1431_v26 = vcombine.low %v2042_v1, %v2051_v10  ;;  %v2085_v37 = vld [vmem:[%s1916_s17 + $0x34] sm:$0xf] }
  0x3c   : > { %v361_v22 = vsel %vm352_vm3, %v358_v53, %v360_v4  ;;  %v375_v28 = vsel %vm352_vm3, %v372_v54, %v374_v6  ;;  %v2076_v32 = vsel %vm849_vm5, %v871_v12, %v873_v21  ;;  %v376_v35 = vrot.slane %v1749_v31, 1  ;;  %v1751_v53 = vld [vmem:[%s1916_s17] sm:$0xff]   ;;  %v1753_v54 = vld [vmem:[%s1916_s17 + $0x8] sm:$0xfc]  }
  0x3d   : > { %v362_v34 = vrot.slane %v1431_v26, 1  ;;  %v1432_v41 = vcombine.low %v2085_v37, %v2003_v46  ;;  %v850_v57 = vrot.slane %v1753_v54, 2  ;;  %v1453_v60 = vcombine.low %v1919_v7, %v1922_v8  ;;  %v1758_v8 = vld [vmem:[%s1916_s17 + $0x20] sm:$0xff]  }
  0x3e   : > { %1557 = vmatmul.mubr.msk.bf16.gmra.mrb[4].mxu0 %vm378_vm4, %v357_v43  ;;  %v377_v43 = vsel %vm352_vm3, %v374_v6, %v376_v35  ;;  %v853_v63 = vrot.slane %v1756_v61, 2  ;;  %v1454_v2 = vcombine.low %v1925_v9, %v1949_v19  ;;  %v855_v3 = vrot.slane %v1758_v8, 2  ;;  %v1760_v19 = vld [vmem:[%s1916_s17 + $0x28] sm:$0xff]  }
  0x3f   : > { %1585 = vmatmul.mubr.msk.bf16.gmra.mrb[4].mxu1 %vm378_vm4, %v371_v47  ;;  %1560 = vmatprep.mubr.msk.bf16.mxu0 %vm1820_vm2, %v1818_v0  ;;  %v363_v38 = vsel %vm352_vm3, %v360_v4, %v362_v34  ;;  %v364_v44 = vrot.slane %v1432_v41, 1  ;;  %v1455_v4 = vcombine.low %v1956_v23, %v1985_v39  ;;  %v857_v5 = vrot.slane %v1760_v19, 2  ;;  %v1762_v39 = vld [vmem:[%s1916_s17 + $0x30] sm:$0xff]  }
  0x40   : > { %1588 = vmatprep.mubr.msk.bf16.mxu1 %vm1820_vm2, %v1818_v0  ;;  %v856_v9 = vsel %vm849_vm5, %v853_v63, %v855_v3  ;;  %v1456_v6 = vcombine.low %v1988_v40, %v2013_v50  ;;  %v859_v12 = vrot.slane %v1762_v39, 2  ;;  %v1764_v50 = vld [vmem:[%s1916_s17 + $0x38] sm:$0xff]   ;;  %v1464_v13 = vcombine.low %v2026_v55, %v2026_v55 }
  0x41   : > { %v365_v45 = vsel %vm352_vm3, %v362_v34, %v364_v44  ;;  %v367_v47 = vsel %vm352_vm3, %v364_v44, %v1963_v27  ;;  %v858_v23 = vsel %vm849_vm5, %v855_v3, %v857_v5  ;;  %v861_v26 = vrot.slane %v1764_v50, 2 }
  0x42   : > { %v860_v40 = vsel %vm849_vm5, %v857_v5, %v859_v12 }
  0x43   : > { %v862_v31 = vsel %vm849_vm5, %v859_v12, %v861_v26 }
  0x46   : > { %1561 = vmatmul.mubr.msk.bf16.gmra.mrb[8].mxu0 %vm378_vm4, %v359_v56  ;;  %v1754_v56 = vld [vmem:[%s1916_s17 + $0x10] sm:$0xff]  }
  0x47   : > { %1589 = vmatmul.mubr.msk.bf16.gmra.mrb[8].mxu1 %vm378_vm4, %v373_v59  ;;  %1564 = vmatprep.mubr.msk.bf16.mxu0 %vm1820_vm2, %v1818_v0  ;;  %v851_v59 = vrot.slane %v1754_v56, 2 }
  0x48   : > { %1592 = vmatprep.mubr.msk.bf16.mxu1 %vm1820_vm2, %v1818_v0 }
  0x49   : > { %v852_v27 = vsel %vm849_vm5, %v850_v57, %v851_v59  ;;  %v854_v7 = vsel %vm849_vm5, %v851_v59, %v853_v63 }
  0x4e   : > { %1565 = vmatmul.mubr.msk.bf16.gmra.mrb[12].mxu0 %vm378_vm4, %v361_v22  ;;  %v1457_v22 = vcombine.low %v2016_v51, %v2042_v1  ;;  %v1766_v51 = vld [vmem:[%s1916_s17 + $0x40] sm:$0xff]  }
  0x4f   : > { %1593 = vmatmul.mubr.msk.bf16.gmra.mrb[12].mxu1 %vm378_vm4, %v375_v28  ;;  %1568 = vmatprep.mubr.msk.bf16.mxu0 %vm1820_vm2, %v1818_v0  ;;  %v1458_v28 = vcombine.low %v2051_v10, %v2085_v37  ;;  %v863_v1 = vrot.slane %v1766_v51, 2  ;;  %v2280_v51 = vld [vmem:[#allocation2] ss:$0 sm:$0xff] }
  0x50   : > { %1596 = vmatprep.mubr.msk.bf16.mxu1 %vm1820_vm2, %v1818_v0 }
  0x51   : > { %v864_v34 = vsel %vm849_vm5, %v861_v26, %v863_v1  ;;  %v866_v10 = vsel %vm849_vm5, %v863_v1, %v865_v62 }
  0x56   : > { %1569 = vmatmul.mubr.msk.bf16.gmra.mrb[16].mxu0 %vm378_vm4, %v363_v38 }
  0x57   : > { %1597 = vmatmul.mubr.msk.bf16.gmra.mrb[16].mxu1 %vm378_vm4, %v377_v43  ;;  %1572 = vmatprep.mubr.msk.bf16.mxu0 %vm1820_vm2, %v1818_v0 }
  0x58   : > { %1600 = vmatprep.mubr.msk.bf16.mxu1 %vm1820_vm2, %v1818_v0 }
  0x5e   : > { %1573 = vmatmul.mubr.msk.bf16.gmra.mrb[20].mxu0 %vm378_vm4, %v365_v45 }
  0x5f   : > { %1601 = vmatmul.mubr.msk.bf16.gmra.mrb[20].mxu1 %vm378_vm4, %v376_v35  ;;  %1576 = vmatprep.mubr.msk.bf16.mxu0 %vm1820_vm2, %v1818_v0 }
  0x60   : > { %1606 = vmatprep.mubr.msk.bf16.mxu1 %vm1820_vm2, %v1818_v0 }
  0x66   : > { %1577 = vmatmul.mubr.msk.bf16.gmra.mrb[24].mxu0 %vm378_vm4, %v367_v47 }
  0x67   : > { %1607 = vmatmul.mubr.msk.bf16.vlgmr.msra.gmra.mrb[24].mxu1 %vm378_vm4, %v1751_v53  ;;  %1660 = vmatprep.mubr.msk.bf16.mxu0 %vm1820_vm2, %v1818_v0 }
  0x68   : > { %1610 = vmatprep.mubr.msk.bf16.mxu1 %vm1820_vm2, %v1818_v0 }
  0x6e   : > { %1661 = vmatmul.mubr.msk.bf16.vlgmr.msra.gmra.mrb[28].mxu0 %vm378_vm4, %v852_v27 }
  0x6f   : > { %1611 = vmatmul.mubr.msk.bf16.gmra.mrb[28].mxu1 %vm378_vm4, %v1453_v60  ;;  %1664 = vmatprep.mubr.msk.bf16.mxu0 %vm1820_vm2, %v1818_v0 }
  0x70   : > { %1614 = vmatprep.mubr.msk.bf16.mxu1 %vm1820_vm2, %v1818_v0 }
  0x76   : > { %1665 = vmatmul.mubr.msk.bf16.gmra.mrb[32].mxu0 %vm378_vm4, %v854_v7 }
  0x77   : > { %1615 = vmatmul.mubr.msk.bf16.gmra.mrb[32].mxu1 %vm378_vm4, %v1454_v2  ;;  %1668 = vmatprep.mubr.msk.bf16.mxu0 %vm1820_vm2, %v1818_v0 }
  0x78   : > { %1618 = vmatprep.mubr.msk.bf16.mxu1 %vm1820_vm2, %v1818_v0 }
  0x7e   : > { %1669 = vmatmul.mubr.msk.bf16.gmra.mrb[36].mxu0 %vm378_vm4, %v856_v9 }
  0x7f   : > { %1619 = vmatmul.mubr.msk.bf16.gmra.mrb[36].mxu1 %vm378_vm4, %v1455_v4  ;;  %1672 = vmatprep.mubr.msk.bf16.mxu0 %vm1820_vm2, %v1818_v0 }
  0x80   : > { %1622 = vmatprep.mubr.msk.bf16.mxu1 %vm1820_vm2, %v1818_v0 }
  0x86   : > { %1673 = vmatmul.mubr.msk.bf16.gmra.mrb[40].mxu0 %vm378_vm4, %v858_v23 }
  0x87   : > { %1623 = vmatmul.mubr.msk.bf16.gmra.mrb[40].mxu1 %vm378_vm4, %v1456_v6  ;;  %1676 = vmatprep.mubr.msk.bf16.mxu0 %vm1820_vm2, %v1818_v0 }
  0x88   : > { %1626 = vmatprep.mubr.msk.bf16.mxu1 %vm1820_vm2, %v1818_v0 }
  0x8e   : > { %1677 = vmatmul.mubr.msk.bf16.gmra.mrb[44].mxu0 %vm378_vm4, %v860_v40 }
  0x8f   : > { %1627 = vmatmul.mubr.msk.bf16.gmra.mrb[44].mxu1 %vm378_vm4, %v1457_v22  ;;  %1680 = vmatprep.mubr.msk.bf16.mxu0 %vm1820_vm2, %v1818_v0 }
  0x90   : > { %1630 = vmatprep.mubr.msk.bf16.mxu1 %vm1820_vm2, %v1818_v0 }
  0x96   : > { %1681 = vmatmul.mubr.msk.bf16.gmra.mrb[48].mxu0 %vm378_vm4, %v862_v31 }
  0x97   : > { %1631 = vmatmul.mubr.msk.bf16.gmra.mrb[48].mxu1 %vm378_vm4, %v1458_v28  ;;  %1684 = vmatprep.mubr.msk.bf16.mxu0 %vm1820_vm2, %v1818_v0 }
  0x98   : > { %1634 = vmatprep.mubr.msk.bf16.mxu1 %vm1820_vm2, %v1818_v0 }
  0x9e   : > { %1685 = vmatmul.mubr.msk.bf16.gmra.mrb[52].mxu0 %vm378_vm4, %v864_v34 }
  0x9f   : > { %1635 = vmatmul.mubr.msk.bf16.gmra.mrb[52].mxu1 %vm378_vm4, %v1459_v48  ;;  %1688 = vmatprep.mubr.msk.bf16.mxu0 %vm1820_vm2, %v1818_v0 }
  0xa0   : > { %1638 = vmatprep.mubr.msk.bf16.mxu1 %vm1820_vm2, %v1818_v0 }
  0xa6   : > { %1689 = vmatmul.mubr.msk.bf16.gmra.mrb[56].mxu0 %vm378_vm4, %v866_v10 }
  0xa7   : > { %1639 = vmatmul.mubr.msk.bf16.gmra.mrb[56].mxu1 %vm378_vm4, %v1460_v25  ;;  %1692 = vmatprep.mubr.msk.bf16.mxu0 %vm1820_vm2, %v1818_v0 }
  0xa8   : > { %1642 = vmatprep.mubr.msk.bf16.mxu1 %vm1820_vm2, %v1818_v0 }
  0xae   : > { %1693 = vmatmul.mubr.msk.bf16.gmra.mrb[60].mxu0 %vm378_vm4, %v2056_v11 }
  0xaf   : > { %1643 = vmatmul.mubr.msk.bf16.gmra.mrb[60].mxu1 %vm378_vm4, %v1461_v30  ;;  %1696 = vmatprep.mubr.msk.bf16.mxu0 %vm1820_vm2, %v1818_v0 }
  0xb0   : > { %1646 = vmatprep.mubr.msk.bf16.mxu1 %vm1820_vm2, %v1818_v0 }
  0xb6   : > { %1697 = vmatmul.mubr.msk.bf16.gmra.mrb[64].mxu0 %vm378_vm4, %v2062_v18 }
  0xb7   : > { %1647 = vmatmul.mubr.msk.bf16.gmra.mrb[64].mxu1 %vm378_vm4, %v1462_v36  ;;  %1700 = vmatprep.mubr.msk.bf16.mxu0 %vm1820_vm2, %v1818_v0 }
  0xb8   : > { %1650 = vmatprep.mubr.msk.bf16.mxu1 %vm1820_vm2, %v1818_v0 }
  0xbe   : > { %1701 = vmatmul.mubr.msk.bf16.gmra.mrb[68].mxu0 %vm378_vm4, %v2065_v20 }
  0xbf   : > { %1651 = vmatmul.mubr.msk.bf16.gmra.mrb[68].mxu1 %vm378_vm4, %v1463_v52  ;;  %1704 = vmatprep.mubr.msk.bf16.mxu0 %vm1820_vm2, %v1818_v0 }
  0xc0   : > { %1654 = vmatprep.mubr.msk.bf16.mxu1 %vm1820_vm2, %v1818_v0 }
  0xc6   : > { %1705 = vmatmul.mubr.msk.bf16.gmra.mrb[72].mxu0 %vm378_vm4, %v2076_v32 }
  0xc7   : > { %1655 = vmatmul.mubr.msk.bf16.gmra.mrb[72].mxu1 %vm378_vm4, %v1464_v13  ;;  %1708 = vmatprep.mubr.msk.bf16.mxu0 %vm1820_vm2, %v1818_v0 }
  0xce   : > { %1709 = vmatmul.mubr.msk.bf16.gmra.mrb[76].mxu0 %vm378_vm4, %v873_v21 }
 0x109   : > { %v459_v14 = vpop.f32.mrb[0].mxu0 }
 0x10a   : > { %v1554_v16 = vpop.f32.mrb[1].mxu0  ;;  %v2237_v17 = vpop.f32.mrb[0].mxu1 }
 0x10b   : > { %v462_v24 = vpop.f32.mrb[2].mxu0  ;;  %v1582_v25 = vpop.f32.mrb[1].mxu1 }
 0x10c   : > { %v1555_v29 = vpop.f32.mrb[3].mxu0  ;;  %v2239_v30 = vpop.f32.mrb[2].mxu1 }
 0x10d   : > { %v1583_v33 = vpop.f32.mrb[3].mxu1 }
 0x111   : > { %v467_v36 = vpop.f32.mrb[4].mxu0 }
 0x112   : > { %v1558_v42 = vpop.f32.mrb[5].mxu0  ;;  %v2241_v46 = vpop.f32.mrb[4].mxu1 }
 0x113   : > { %v470_v48 = vpop.f32.mrb[6].mxu0  ;;  %v1586_v0 = vpop.f32.mrb[5].mxu1 }
 0x114   : > { %v1559_v49 = vpop.f32.mrb[7].mxu0  ;;  %v2243_v52 = vpop.f32.mrb[6].mxu1 }
 0x115   : > { %v1587_v55 = vpop.f32.mrb[7].mxu1 }
 0x119   : > { %v2245_v58 = vpop.f32.mrb[8].mxu0 }
 0x11a   : > { %v1562_v62 = vpop.f32.mrb[9].mxu0  ;;  %v2247_v11 = vpop.f32.mrb[8].mxu1 }
 0x11b   : > { %v2249_v15 = vpop.f32.mrb[10].mxu0  ;;  %v1590_v18 = vpop.f32.mrb[9].mxu1 }
 0x11c   : > { %v1563_v20 = vpop.f32.mrb[11].mxu0  ;;  %v2251_v21 = vpop.f32.mrb[10].mxu1 }
 0x11d   : > { %v1591_v32 = vpop.f32.mrb[11].mxu1 }
 0x121   : > { %v2253_v35 = vpop.f32.mrb[12].mxu0 }
 0x122   : > { %v1566_v37 = vpop.f32.mrb[13].mxu0  ;;  %v2255_v38 = vpop.f32.mrb[12].mxu1 }
 0x123   : > { %v2257_v41 = vpop.f32.mrb[14].mxu0  ;;  %v1594_v43 = vpop.f32.mrb[13].mxu1 }
 0x124   : > { %v1567_v44 = vpop.f32.mrb[15].mxu0  ;;  %v2259_v45 = vpop.f32.mrb[14].mxu1 }
 0x125   : > { %v1595_v47 = vpop.f32.mrb[15].mxu1 }
 0x129   : > { %v2261_v53 = vpop.f32.mrb[16].mxu0 }
 0x12a   : > { %v1570_v54 = vpop.f32.mrb[17].mxu0  ;;  %v2263_v56 = vpop.f32.mrb[16].mxu1 }
 0x12b   : > { %v2265_v57 = vpop.f32.mrb[18].mxu0  ;;  %v1598_v59 = vpop.f32.mrb[17].mxu1 }
 0x12c   : > { %v1571_v60 = vpop.f32.mrb[19].mxu0  ;;  %v2267_v27 = vpop.f32.mrb[18].mxu1 }
 0x12d   : > { %v1599_v61 = vpop.f32.mrb[19].mxu1 }
 0x131   : > { %v2269_v63 = vpop.f32.mrb[20].mxu0 }
 0x132   : > { %v1574_v2 = vpop.f32.mrb[21].mxu0  ;;  %v2271_v7 = vpop.f32.mrb[20].mxu1 }
 0x133   : > { %v2273_v8 = vpop.f32.mrb[22].mxu0  ;;  %v1602_v3 = vpop.f32.mrb[21].mxu1 }
 0x134   : > { %v1575_v4 = vpop.f32.mrb[23].mxu0  ;;  %v558_v9 = vpop.f32.mrb[22].mxu1 }
 0x135   : > { %v1603_v19 = vpop.f32.mrb[23].mxu1 }
 0x139   : > { %v2275_v5 = vpop.f32.mrb[24].mxu0 }
 0x13a   : > { %v654_v6 = vpop.f32.mrb[24].mxu1  ;;  %v1578_v23 = vpop.f32.mrb[25].mxu0 }
 0x13b   : > { %v655_v39 = vadd.f32 %v654_v6, %v459_v14  ;;  %v1608_v12 = vpop.f32.mrb[25].mxu1  ;;  %v2277_v22 = vpop.f32.mrb[26].mxu0 }
 0x13c   : > { %v657_v40 = vpop.f32.mrb[26].mxu1  ;;  %v1579_v50 = vpop.f32.mrb[27].mxu0 }
 0x13d   : > { %v658_v26 = vadd.f32 %v657_v40, %v462_v24  ;;  %v1609_v28 = vpop.f32.mrb[27].mxu1 }
 0x141   : > { %v951_v31 = vpop.f32.mrb[28].mxu0 }
 0x142   : > { %v662_v1 = vpop.f32.mrb[28].mxu1  ;;  %v1053_v34 = vadd.f32 %v951_v31, %v655_v39  ;;  %v1662_v10 = vpop.f32.mrb[29].mxu0 }
 0x143   : > { %v663_v13 = vadd.f32 %v662_v1, %v467_v36  ;;  %v1612_v16 = vpop.f32.mrb[29].mxu1  ;;  %v954_v25 = vpop.f32.mrb[30].mxu0 }
 0x144   : > { %v1085_v29 = vadd.f32 %v2280_v51, %v1053_v34  ;;  %v665_v14 = vpop.f32.mrb[30].mxu1  ;;  %v1054_v33 = vadd.f32 %v954_v25, %v658_v26  ;;  %v1663_v42 = vpop.f32.mrb[31].mxu0 }
 0x145   : > { %v666_v24 = vadd.f32 %v665_v14, %v470_v48  ;;  %v1613_v0 = vpop.f32.mrb[31].mxu1 }
 0x146   : > { %v1110_v49 = vmax.f32 %v1085_v29, 0.0  ;;  %v1086_v36 = vadd.f32 %v2280_v51, %v1054_v33 }
 0x148   : > { %1136 = vst.msk [vmem:[%s2286_s25] sm:$0xff] %vm1135_vm6, %v1110_v49  ;;  %v1218_v55 = vmul.f32 %v1110_v49, %v1110_v49  ;;  %v1111_v62 = vmax.f32 %v1086_v36, 0.0  ;;  %v1161_v20 = vsel %vm1135_vm6, %v1110_v49, 0.0 }
 0x149   : > { %v959_v18 = vpop.f32.mrb[32].mxu0 }
 0x14a   : > { %1137 = vst.msk [vmem:[%s2286_s25 + $0x8] sm:$0xff] %vm1135_vm6, %v1111_v62  ;;  %v1162_v32 = vsel %vm1135_vm6, %v1111_v62, 0.0  ;;  %v1219_v37 = vmul.f32 %v1111_v62, %v1111_v62  ;;  %v670_v43 = vpop.f32.mrb[32].mxu1  ;;  %v1055_v44 = vadd.f32 %v959_v18, %v663_v13  ;;  %v1666_v47 = vpop.f32.mrb[33].mxu0  ;;  %v1243_v61 = vsel %vm1135_vm6, %v1218_v55, 0.0 }
 0x14b   : > { %v1163_v48 = vadd.f32 %v1162_v32, %v1161_v20  ;;  %v671_v54 = vadd.f32 %v670_v43, %v2245_v58  ;;  %v1616_v59 = vpop.f32.mrb[33].mxu1  ;;  %v962_v60 = vpop.f32.mrb[34].mxu0 }
 0x14c   : > { %v1244_v2 = vsel %vm1135_vm6, %v1219_v37, 0.0  ;;  %v1087_v3 = vadd.f32 %v2280_v51, %v1055_v44  ;;  %v673_v4 = vpop.f32.mrb[34].mxu1  ;;  %v1056_v9 = vadd.f32 %v962_v60, %v666_v24  ;;  %v1667_v19 = vpop.f32.mrb[35].mxu0 }
 0x14d   : > { %v1245_v6 = vadd.f32 %v1244_v2, %v1243_v61  ;;  %v674_v23 = vadd.f32 %v673_v4, %v2249_v15  ;;  %v1617_v39 = vpop.f32.mrb[35].mxu1 }
 0x14e   : > { %v1112_v12 = vmax.f32 %v1087_v3, 0.0  ;;  %v1088_v40 = vadd.f32 %v2280_v51, %v1056_v9 }
 0x150   : > { %1138 = vst.msk [vmem:[%s2286_s25 + $0x10] sm:$0xff] %vm1135_vm6, %v1112_v12  ;;  %v1164_v58 = vsel %vm1135_vm6, %v1112_v12, 0.0  ;;  %v1220_v50 = vmul.f32 %v1112_v12, %v1112_v12  ;;  %v1113_v26 = vmax.f32 %v1088_v40, 0.0 }
 0x151   : > { %v1165_v28 = vadd.f32 %v1164_v58, %v1163_v48  ;;  %v967_v31 = vpop.f32.mrb[36].mxu0 }
 0x152   : > { %v1246_v1 = vsel %vm1135_vm6, %v1220_v50, 0.0  ;;  %1139 = vst.msk [vmem:[%s2286_s25 + $0x18] sm:$0xff] %vm1135_vm6, %v1113_v26  ;;  %v1166_v34 = vsel %vm1135_vm6, %v1113_v26, 0.0  ;;  %v1221_v10 = vmul.f32 %v1113_v26, %v1113_v26  ;;  %v678_v15 = vpop.f32.mrb[36].mxu1  ;;  %v1057_v13 = vadd.f32 %v967_v31, %v671_v54  ;;  %v1670_v16 = vpop.f32.mrb[37].mxu0 }
 0x153   : > { %v1247_v25 = vadd.f32 %v1246_v1, %v1245_v6  ;;  %v1167_v29 = vadd.f32 %v1166_v34, %v1165_v28  ;;  %v679_v14 = vadd.f32 %v678_v15, %v2253_v35  ;;  %v1620_v33 = vpop.f32.mrb[37].mxu1  ;;  %v970_v42 = vpop.f32.mrb[38].mxu0 }
 0x154   : > { %v1248_v24 = vsel %vm1135_vm6, %v1221_v10, 0.0  ;;  %v1089_v0 = vadd.f32 %v2280_v51, %v1057_v13  ;;  %v681_v49 = vpop.f32.mrb[38].mxu1  ;;  %v1058_v36 = vadd.f32 %v970_v42, %v674_v23  ;;  %v1671_v55 = vpop.f32.mrb[39].mxu0 }
 0x155   : > { %v1249_v62 = vadd.f32 %v1248_v24, %v1247_v25  ;;  %v682_v18 = vadd.f32 %v681_v49, %v2257_v41  ;;  %v1621_v20 = vpop.f32.mrb[39].mxu1 }
 0x156   : > { %v1114_v32 = vmax.f32 %v1089_v0, 0.0  ;;  %v1090_v37 = vadd.f32 %v2280_v51, %v1058_v36 }
 0x158   : > { %1140 = vst.msk [vmem:[%s2286_s25 + $0x20] sm:$0xff] %vm1135_vm6, %v1114_v32  ;;  %v1168_v35 = vsel %vm1135_vm6, %v1114_v32, 0.0  ;;  %v1222_v43 = vmul.f32 %v1114_v32, %v1114_v32  ;;  %v1115_v44 = vmax.f32 %v1090_v37, 0.0 }
 0x159   : > { %v1169_v47 = vadd.f32 %v1168_v35, %v1167_v29  ;;  %v975_v48 = vpop.f32.mrb[40].mxu0 }
 0x15a   : > { %v1250_v54 = vsel %vm1135_vm6, %v1222_v43, 0.0  ;;  %1141 = vst.msk [vmem:[%s2286_s25 + $0x28] sm:$0xff] %vm1135_vm6, %v1115_v44  ;;  %v1170_v59 = vsel %vm1135_vm6, %v1115_v44, 0.0  ;;  %v1223_v60 = vmul.f32 %v1115_v44, %v1115_v44  ;;  %v686_v41 = vpop.f32.mrb[40].mxu1  ;;  %v1059_v61 = vadd.f32 %v975_v48, %v679_v14  ;;  %v1674_v2 = vpop.f32.mrb[41].mxu0 }
 0x15b   : > { %v1251_v3 = vadd.f32 %v1250_v54, %v1249_v62  ;;  %v1171_v4 = vadd.f32 %v1170_v59, %v1169_v47  ;;  %v687_v9 = vadd.f32 %v686_v41, %v2261_v53  ;;  %v1624_v19 = vpop.f32.mrb[41].mxu1  ;;  %v978_v6 = vpop.f32.mrb[42].mxu0 }
 0x15c   : > { %v1252_v23 = vsel %vm1135_vm6, %v1223_v60, 0.0  ;;  %v1091_v39 = vadd.f32 %v2280_v51, %v1059_v61  ;;  %v689_v12 = vpop.f32.mrb[42].mxu1  ;;  %v1060_v40 = vadd.f32 %v978_v6, %v682_v18  ;;  %v1675_v58 = vpop.f32.mrb[43].mxu0 }
 0x15d   : > { %v1253_v50 = vadd.f32 %v1252_v23, %v1251_v3  ;;  %v690_v26 = vadd.f32 %v689_v12, %v2265_v57  ;;  %v1625_v28 = vpop.f32.mrb[43].mxu1 }
 0x15e   : > { %v1116_v31 = vmax.f32 %v1091_v39, 0.0  ;;  %v1092_v1 = vadd.f32 %v2280_v51, %v1060_v40 }
 0x160   : > { %1142 = vst.msk [vmem:[%s2286_s25 + $0x30] sm:$0xff] %vm1135_vm6, %v1116_v31  ;;  %v1172_v53 = vsel %vm1135_vm6, %v1116_v31, 0.0  ;;  %v1224_v34 = vmul.f32 %v1116_v31, %v1116_v31  ;;  %v1117_v10 = vmax.f32 %v1092_v1, 0.0 }
 0x161   : > { %v1173_v15 = vadd.f32 %v1172_v53, %v1171_v4  ;;  %v983_v13 = vpop.f32.mrb[44].mxu0 }
 0x162   : > { %v1254_v16 = vsel %vm1135_vm6, %v1224_v34, 0.0  ;;  %1143 = vst.msk [vmem:[%s2286_s25 + $0x38] sm:$0xff] %vm1135_vm6, %v1117_v10  ;;  %v1174_v25 = vsel %vm1135_vm6, %v1117_v10, 0.0  ;;  %v1225_v29 = vmul.f32 %v1117_v10, %v1117_v10  ;;  %v694_v57 = vpop.f32.mrb[44].mxu1  ;;  %v1061_v14 = vadd.f32 %v983_v13, %v687_v9  ;;  %v1678_v33 = vpop.f32.mrb[45].mxu0 }
 0x163   : > { %v1255_v42 = vadd.f32 %v1254_v16, %v1253_v50  ;;  %v1175_v24 = vadd.f32 %v1174_v25, %v1173_v15  ;;  %v695_v0 = vadd.f32 %v694_v57, %v2269_v63  ;;  %v1628_v49 = vpop.f32.mrb[45].mxu1  ;;  %v986_v36 = vpop.f32.mrb[46].mxu0 }
 0x164   : > { %v1256_v55 = vsel %vm1135_vm6, %v1225_v29, 0.0  ;;  %v1093_v62 = vadd.f32 %v2280_v51, %v1061_v14  ;;  %v697_v18 = vpop.f32.mrb[46].mxu1  ;;  %v1062_v20 = vadd.f32 %v986_v36, %v690_v26  ;;  %v1679_v32 = vpop.f32.mrb[47].mxu0 }
 0x165   : > { %v1257_v37 = vadd.f32 %v1256_v55, %v1255_v42  ;;  %v698_v35 = vadd.f32 %v697_v18, %v2273_v8  ;;  %v1629_v43 = vpop.f32.mrb[47].mxu1 }
 0x166   : > { %v1118_v44 = vmax.f32 %v1093_v62, 0.0  ;;  %v1094_v47 = vadd.f32 %v2280_v51, %v1062_v20 }
 0x168   : > { %1144 = vst.msk [vmem:[%s2286_s25 + $0x40] sm:$0xff] %vm1135_vm6, %v1118_v44  ;;  %v1176_v63 = vsel %vm1135_vm6, %v1118_v44, 0.0  ;;  %v1226_v48 = vmul.f32 %v1118_v44, %v1118_v44  ;;  %v1119_v54 = vmax.f32 %v1094_v47, 0.0 }
 0x169   : > { %v1177_v59 = vadd.f32 %v1176_v63, %v1175_v24  ;;  %v991_v60 = vpop.f32.mrb[48].mxu0 }
 0x16a   : > { %v1258_v41 = vsel %vm1135_vm6, %v1226_v48, 0.0  ;;  %1145 = vst.msk [vmem:[%s2286_s25 + $0x48] sm:$0xff] %vm1135_vm6, %v1119_v54  ;;  %v1178_v61 = vsel %vm1135_vm6, %v1119_v54, 0.0  ;;  %v1227_v2 = vmul.f32 %v1119_v54, %v1119_v54  ;;  %v702_v8 = vpop.f32.mrb[48].mxu1  ;;  %v1063_v3 = vadd.f32 %v991_v60, %v695_v0  ;;  %v1682_v4 = vpop.f32.mrb[49].mxu0 }
 0x16b   : > { %v1259_v9 = vadd.f32 %v1258_v41, %v1257_v37  ;;  %v1179_v19 = vadd.f32 %v1178_v61, %v1177_v59  ;;  %v703_v6 = vadd.f32 %v702_v8, %v2275_v5  ;;  %v1632_v23 = vpop.f32.mrb[49].mxu1  ;;  %v994_v39 = vpop.f32.mrb[50].mxu0 }
 0x16c   : > { %v1260_v12 = vsel %vm1135_vm6, %v1227_v2, 0.0  ;;  %v1095_v40 = vadd.f32 %v2280_v51, %v1063_v3  ;;  %v705_v58 = vpop.f32.mrb[50].mxu1  ;;  %v1064_v50 = vadd.f32 %v994_v39, %v698_v35  ;;  %v1683_v26 = vpop.f32.mrb[51].mxu0 }
 0x16d   : > { %v1261_v28 = vadd.f32 %v1260_v12, %v1259_v9  ;;  %v706_v31 = vadd.f32 %v705_v58, %v2277_v22  ;;  %v1633_v1 = vpop.f32.mrb[51].mxu1 }
 0x16e   : > { %v1120_v53 = vmax.f32 %v1095_v40, 0.0  ;;  %v1096_v34 = vadd.f32 %v2280_v51, %v1064_v50 }
 0x170   : > { %1146 = vst.msk [vmem:[%s2286_s25 + $0x50] sm:$0xff] %vm1135_vm6, %v1120_v53  ;;  %v1180_v5 = vsel %vm1135_vm6, %v1120_v53, 0.0  ;;  %v1228_v10 = vmul.f32 %v1120_v53, %v1120_v53  ;;  %v1121_v15 = vmax.f32 %v1096_v34, 0.0 }
 0x171   : > { %v1181_v13 = vadd.f32 %v1180_v5, %v1179_v19  ;;  %v999_v16 = vpop.f32.mrb[52].mxu0 }
 0x172   : > { %v1262_v25 = vsel %vm1135_vm6, %v1228_v10, 0.0  ;;  %1147 = vst.msk [vmem:[%s2286_s25 + $0x58] sm:$0xff] %vm1135_vm6, %v1121_v15  ;;  %v1182_v29 = vsel %vm1135_vm6, %v1121_v15, 0.0  ;;  %v1229_v57 = vmul.f32 %v1121_v15, %v1121_v15  ;;  %v710_v22 = vpop.f32.mrb[52].mxu1  ;;  %v1065_v14 = vadd.f32 %v999_v16, %v703_v6  ;;  %v1686_v33 = vpop.f32.mrb[53].mxu0 }
 0x173   : > { %v1263_v42 = vadd.f32 %v1262_v25, %v1261_v28  ;;  %v1183_v24 = vadd.f32 %v1182_v29, %v1181_v13  ;;  %v711_v0 = vadd.f32 %v710_v22, %v2237_v17  ;;  %v1636_v49 = vpop.f32.mrb[53].mxu1  ;;  %v1002_v36 = vpop.f32.mrb[54].mxu0 }
 0x174   : > { %v1264_v55 = vsel %vm1135_vm6, %v1229_v57, 0.0  ;;  %v1097_v62 = vadd.f32 %v2280_v51, %v1065_v14  ;;  %v713_v18 = vpop.f32.mrb[54].mxu1  ;;  %v1066_v20 = vadd.f32 %v1002_v36, %v706_v31  ;;  %v1687_v32 = vpop.f32.mrb[55].mxu0 }
 0x175   : > { %v1265_v37 = vadd.f32 %v1264_v55, %v1263_v42  ;;  %v714_v35 = vadd.f32 %v713_v18, %v2239_v30  ;;  %v1637_v43 = vpop.f32.mrb[55].mxu1 }
 0x176   : > { %v1122_v44 = vmax.f32 %v1097_v62, 0.0  ;;  %v1098_v47 = vadd.f32 %v2280_v51, %v1066_v20 }
 0x178   : > { %1148 = vst.msk [vmem:[%s2286_s25 + $0x60] sm:$0xff] %vm1135_vm6, %v1122_v44  ;;  %v1184_v17 = vsel %vm1135_vm6, %v1122_v44, 0.0  ;;  %v1230_v63 = vmul.f32 %v1122_v44, %v1122_v44  ;;  %v1123_v48 = vmax.f32 %v1098_v47, 0.0 }
 0x179   : > { %v1185_v54 = vadd.f32 %v1184_v17, %v1183_v24  ;;  %v1007_v59 = vpop.f32.mrb[56].mxu0 }
 0x17a   : > { %v1266_v60 = vsel %vm1135_vm6, %v1230_v63, 0.0  ;;  %1149 = vst.msk [vmem:[%s2286_s25 + $0x68] sm:$0xff] %vm1135_vm6, %v1123_v48  ;;  %v1186_v41 = vsel %vm1135_vm6, %v1123_v48, 0.0  ;;  %v1231_v61 = vmul.f32 %v1123_v48, %v1123_v48  ;;  %v718_v30 = vpop.f32.mrb[56].mxu1  ;;  %v1067_v2 = vadd.f32 %v1007_v59, %v711_v0  ;;  %v1690_v8 = vpop.f32.mrb[57].mxu0 }
 0x17b   : > { %v1267_v3 = vadd.f32 %v1266_v60, %v1265_v37  ;;  %v1187_v4 = vadd.f32 %v1186_v41, %v1185_v54  ;;  %v719_v9 = vadd.f32 %v718_v30, %v2241_v46  ;;  %v1640_v19 = vpop.f32.mrb[57].mxu1  ;;  %v1010_v6 = vpop.f32.mrb[58].mxu0 }
 0x17c   : > { %v1268_v23 = vsel %vm1135_vm6, %v1231_v61, 0.0  ;;  %v1099_v39 = vadd.f32 %v2280_v51, %v1067_v2  ;;  %v721_v12 = vpop.f32.mrb[58].mxu1  ;;  %v1068_v40 = vadd.f32 %v1010_v6, %v714_v35  ;;  %v1691_v58 = vpop.f32.mrb[59].mxu0 }
 0x17d   : > { %v1269_v50 = vadd.f32 %v1268_v23, %v1267_v3  ;;  %v722_v26 = vadd.f32 %v721_v12, %v2243_v52  ;;  %v1641_v28 = vpop.f32.mrb[59].mxu1 }
 0x17e   : > { %v1124_v31 = vmax.f32 %v1099_v39, 0.0  ;;  %v1100_v1 = vadd.f32 %v2280_v51, %v1068_v40 }
 0x180   : > { %1150 = vst.msk [vmem:[%s2286_s25 + $0x70] sm:$0xff] %vm1135_vm6, %v1124_v31  ;;  %v1188_v46 = vsel %vm1135_vm6, %v1124_v31, 0.0  ;;  %v1232_v53 = vmul.f32 %v1124_v31, %v1124_v31  ;;  %v1125_v34 = vmax.f32 %v1100_v1, 0.0 }
 0x181   : > { %v1189_v5 = vadd.f32 %v1188_v46, %v1187_v4  ;;  %v1015_v10 = vpop.f32.mrb[60].mxu0 }
 0x182   : > { %v1270_v15 = vsel %vm1135_vm6, %v1232_v53, 0.0  ;;  %1151 = vst.msk [vmem:[%s2286_s25 + $0x78] sm:$0xff] %vm1135_vm6, %v1125_v34  ;;  %v1190_v13 = vsel %vm1135_vm6, %v1125_v34, 0.0  ;;  %v1233_v16 = vmul.f32 %v1125_v34, %v1125_v34  ;;  %v726_v52 = vpop.f32.mrb[60].mxu1  ;;  %v1069_v25 = vadd.f32 %v1015_v10, %v719_v9  ;;  %v1694_v29 = vpop.f32.mrb[61].mxu0 }
 0x183   : > { %v1271_v57 = vadd.f32 %v1270_v15, %v1269_v50  ;;  %v1191_v22 = vadd.f32 %v1190_v13, %v1189_v5  ;;  %v727_v14 = vadd.f32 %v726_v52, %v2247_v11  ;;  %v1644_v33 = vpop.f32.mrb[61].mxu1  ;;  %v1018_v42 = vpop.f32.mrb[62].mxu0 }
 0x184   : > { %v1272_v24 = vsel %vm1135_vm6, %v1233_v16, 0.0  ;;  %v1101_v0 = vadd.f32 %v2280_v51, %v1069_v25  ;;  %v729_v49 = vpop.f32.mrb[62].mxu1  ;;  %v1070_v36 = vadd.f32 %v1018_v42, %v722_v26  ;;  %v1695_v55 = vpop.f32.mrb[63].mxu0 }
 0x185   : > { %v1273_v62 = vadd.f32 %v1272_v24, %v1271_v57  ;;  %v730_v18 = vadd.f32 %v729_v49, %v2251_v21  ;;  %v1645_v20 = vpop.f32.mrb[63].mxu1 }
 0x186   : > { %v1126_v32 = vmax.f32 %v1101_v0, 0.0  ;;  %v1102_v37 = vadd.f32 %v2280_v51, %v1070_v36 }
 0x188   : > { %1152 = vst.msk [vmem:[%s2286_s25 + $0x80] sm:$0xff] %vm1135_vm6, %v1126_v32  ;;  %v1192_v11 = vsel %vm1135_vm6, %v1126_v32, 0.0  ;;  %v1234_v35 = vmul.f32 %v1126_v32, %v1126_v32  ;;  %v1127_v43 = vmax.f32 %v1102_v37, 0.0 }
 0x189   : > { %v1193_v44 = vadd.f32 %v1192_v11, %v1191_v22  ;;  %v1023_v47 = vpop.f32.mrb[64].mxu0 }
 0x18a   : > { %v1274_v17 = vsel %vm1135_vm6, %v1234_v35, 0.0  ;;  %1153 = vst.msk [vmem:[%s2286_s25 + $0x88] sm:$0xff] %vm1135_vm6, %v1127_v43  ;;  %v1194_v63 = vsel %vm1135_vm6, %v1127_v43, 0.0  ;;  %v1235_v48 = vmul.f32 %v1127_v43, %v1127_v43  ;;  %v734_v21 = vpop.f32.mrb[64].mxu1  ;;  %v1071_v54 = vadd.f32 %v1023_v47, %v727_v14  ;;  %v1698_v59 = vpop.f32.mrb[65].mxu0 }
 0x18b   : > { %v1275_v60 = vadd.f32 %v1274_v17, %v1273_v62  ;;  %v1195_v41 = vadd.f32 %v1194_v63, %v1193_v44  ;;  %v735_v61 = vadd.f32 %v734_v21, %v2255_v38  ;;  %v1648_v30 = vpop.f32.mrb[65].mxu1  ;;  %v1026_v2 = vpop.f32.mrb[66].mxu0 }
 0x18c   : > { %v1276_v8 = vsel %vm1135_vm6, %v1235_v48, 0.0  ;;  %v1103_v3 = vadd.f32 %v2280_v51, %v1071_v54  ;;  %v737_v4 = vpop.f32.mrb[66].mxu1  ;;  %v1072_v9 = vadd.f32 %v1026_v2, %v730_v18  ;;  %v1699_v19 = vpop.f32.mrb[67].mxu0 }
 0x18d   : > { %v1277_v6 = vadd.f32 %v1276_v8, %v1275_v60  ;;  %v738_v23 = vadd.f32 %v737_v4, %v2259_v45  ;;  %v1649_v39 = vpop.f32.mrb[67].mxu1 }
 0x18e   : > { %v1128_v12 = vmax.f32 %v1103_v3, 0.0  ;;  %v1104_v40 = vadd.f32 %v2280_v51, %v1072_v9 }
 0x190   : > { %1154 = vst.msk [vmem:[%s2286_s25 + $0x90] sm:$0xff] %vm1135_vm6, %v1128_v12  ;;  %v1196_v38 = vsel %vm1135_vm6, %v1128_v12, 0.0  ;;  %v1236_v58 = vmul.f32 %v1128_v12, %v1128_v12  ;;  %v1129_v50 = vmax.f32 %v1104_v40, 0.0 }
 0x191   : > { %v1197_v26 = vadd.f32 %v1196_v38, %v1195_v41  ;;  %v1031_v28 = vpop.f32.mrb[68].mxu0 }
 0x192   : > { %v1278_v31 = vsel %vm1135_vm6, %v1236_v58, 0.0  ;;  %1155 = vst.msk [vmem:[%s2286_s25 + $0x98] sm:$0xff] %vm1135_vm6, %v1129_v50  ;;  %v1198_v1 = vsel %vm1135_vm6, %v1129_v50, 0.0  ;;  %v1237_v46 = vmul.f32 %v1129_v50, %v1129_v50  ;;  %v742_v45 = vpop.f32.mrb[68].mxu1  ;;  %v1073_v53 = vadd.f32 %v1031_v28, %v735_v61  ;;  %v1702_v34 = vpop.f32.mrb[69].mxu0 }
 0x193   : > { %v1279_v5 = vadd.f32 %v1278_v31, %v1277_v6  ;;  %v1199_v10 = vadd.f32 %v1198_v1, %v1197_v26  ;;  %v743_v15 = vadd.f32 %v742_v45, %v2263_v56  ;;  %v1652_v13 = vpop.f32.mrb[69].mxu1  ;;  %v1034_v16 = vpop.f32.mrb[70].mxu0 }
 0x194   : > { %v1280_v52 = vsel %vm1135_vm6, %v1237_v46, 0.0  ;;  %v1105_v25 = vadd.f32 %v2280_v51, %v1073_v53  ;;  %v745_v29 = vpop.f32.mrb[70].mxu1  ;;  %v1074_v57 = vadd.f32 %v1034_v16, %v738_v23  ;;  %v1703_v22 = vpop.f32.mrb[71].mxu0 }
 0x195   : > { %v1281_v14 = vadd.f32 %v1280_v52, %v1279_v5  ;;  %v746_v33 = vadd.f32 %v745_v29, %v2267_v27  ;;  %v1653_v42 = vpop.f32.mrb[71].mxu1 }
 0x196   : > { %v1130_v24 = vmax.f32 %v1105_v25, 0.0  ;;  %v1106_v0 = vadd.f32 %v2280_v51, %v1074_v57 }
 0x198   : > { %1156 = vst.msk [vmem:[%s2286_s25 + $0xa0] sm:$0xff] %vm1135_vm6, %v1130_v24  ;;  %v1200_v56 = vsel %vm1135_vm6, %v1130_v24, 0.0  ;;  %v1238_v49 = vmul.f32 %v1130_v24, %v1130_v24  ;;  %v1131_v36 = vmax.f32 %v1106_v0, 0.0 }
 0x199   : > { %v1201_v55 = vadd.f32 %v1200_v56, %v1199_v10  ;;  %v1039_v62 = vpop.f32.mrb[72].mxu0 }
 0x19a   : > { %v1282_v18 = vsel %vm1135_vm6, %v1238_v49, 0.0  ;;  %1157 = vst.msk [vmem:[%s2286_s25 + $0xa8] sm:$0xff] %vm1135_vm6, %v1131_v36  ;;  %v1202_v20 = vsel %vm1135_vm6, %v1131_v36, 0.0  ;;  %v1239_v32 = vmul.f32 %v1131_v36, %v1131_v36  ;;  %v750_v27 = vpop.f32.mrb[72].mxu1  ;;  %v1075_v37 = vadd.f32 %v1039_v62, %v743_v15  ;;  %v1706_v11 = vpop.f32.mrb[73].mxu0 }
 0x19b   : > { %v1283_v35 = vadd.f32 %v1282_v18, %v1281_v14  ;;  %v1203_v43 = vadd.f32 %v1202_v20, %v1201_v55  ;;  %v751_v44 = vadd.f32 %v750_v27, %v2271_v7  ;;  %v1042_v47 = vpop.f32.mrb[74].mxu0  ;;  %v1656_v17 = vpop.f32.mrb[73].mxu1 }
 0x19c   : > { %v1284_v63 = vsel %vm1135_vm6, %v1239_v32, 0.0  ;;  %v1107_v48 = vadd.f32 %v2280_v51, %v1075_v37  ;;  %v1076_v21 = vadd.f32 %v1042_v47, %v746_v33  ;;  %v1707_v54 = vpop.f32.mrb[75].mxu0  ;;  %v753_v59 = vpop.f32.mrb[74].mxu1 }
 0x19d   : > { %v1285_v60 = vadd.f32 %v1284_v63, %v1283_v35  ;;  %v1657_v41 = vpop.f32.mrb[75].mxu1 }
 0x19e   : > { %v1132_v61 = vmax.f32 %v1107_v48, 0.0  ;;  %v1108_v30 = vadd.f32 %v2280_v51, %v1076_v21 }
 0x1a0   : > { %1158 = vst.msk [vmem:[%s2286_s25 + $0xb0] sm:$0xff] %vm1135_vm6, %v1132_v61  ;;  %v1204_v2 = vsel %vm1135_vm6, %v1132_v61, 0.0  ;;  %v1240_v7 = vmul.f32 %v1132_v61, %v1132_v61  ;;  %v1133_v8 = vmax.f32 %v1108_v30, 0.0 }
 0x1a1   : > { %v1205_v3 = vadd.f32 %v1204_v2, %v1203_v43  ;;  %v1047_v4 = vpop.f32.mrb[76].mxu0 }
 0x1a2   : > { %v1286_v9 = vsel %vm1135_vm6, %v1240_v7, 0.0  ;;  %1159 = vst.msk [vmem:[%s2286_s25 + $0xb8] sm:$0xff] %vm1135_vm6, %v1133_v8  ;;  %v1206_v19 = vsel %vm1135_vm6, %v1133_v8, 0.0  ;;  %v1241_v6 = vmul.f32 %v1133_v8, %v1133_v8  ;;  %v1077_v23 = vadd.f32 %v1047_v4, %v751_v44  ;;  %v1710_v39 = vpop.f32.mrb[77].mxu0 }
 0x1a3   : > { %v1287_v12 = vadd.f32 %v1286_v9, %v1285_v60  ;;  %v1207_v40 = vadd.f32 %v1206_v19, %v1205_v3  ;;  %v1050_v38 = vpop.f32.mrb[78].mxu0 }
 0x1a4   : > { %v1288_v58 = vsel %vm1135_vm6, %v1241_v6, 0.0  ;;  %v1109_v50 = vadd.f32 %v2280_v51, %v1077_v23  ;;  %v1711_v26 = vpop.f32.mrb[79].mxu0 }
 0x1a5   : > { %v1289_v28 = vadd.f32 %v1288_v58, %v1287_v12 }
 0x1a6   : > { %v1134_v31 = vmax.f32 %v1109_v50, 0.0 }
 0x1a8   : > { %1160 = vst.msk [vmem:[%s2286_s25 + $0xc0] sm:$0xff] %vm1135_vm6, %v1134_v31  ;;  %v1208_v1 = vsel %vm1135_vm6, %v1134_v31, 0.0  ;;  %v1242_v46 = vmul.f32 %v1134_v31, %v1134_v31 }
 0x1a9   : > { %v1209_v45 = vadd.f32 %v1208_v1, %v1207_v40 }
 0x1aa   : > { %v1290_v53 = vsel %vm1135_vm6, %v1242_v46, 0.0 }
 0x1ab   : > { %v1210_v34 = vrot.slane %v1209_v45, 4  ;;  %v1291_v5 = vadd.f32 %v1290_v53, %v1289_v28 }
 0x1ad   : > { %v1211_v10 = vadd.f32 %v1210_v34, %v1209_v45  ;;  %v1292_v15 = vrot.slane %v1291_v5, 4 }
 0x1af   : > { %v1212_v13 = vrot.slane %v1211_v10, 2  ;;  %v1293_v16 = vadd.f32 %v1292_v15, %v1291_v5 }
 0x1b1   : > { %v1213_v51 = vadd.f32 %v1212_v13, %v1211_v10  ;;  %v1294_v52 = vrot.slane %v1293_v16, 2 }
 0x1b3   : > { %v1214_v25 = vrot.slane %v1213_v51, 1  ;;  %v1295_v29 = vadd.f32 %v1294_v52, %v1293_v16 }
 0x1b5   : > { %v1215_v57 = vadd.f32 %v1214_v25, %v1213_v51  ;;  %v1296_v22 = vrot.slane %v1295_v29, 1 }
 0x1b7   : > { %1217 = vst.msk [vmem:[%s251_s28] sm:$0x1] %vm1216_vm7, %v1215_v57  ;;  %v1297_v14 = vadd.f32 %v1296_v22, %v1295_v29 }
 0x1b9   : > { %1298 = vst.msk [vmem:[%s254_s6] sm:$0x1] %vm1216_vm7, %v1297_v14 }
 0x1ba PF: > { %s17_s18 = sadd.s32 1, %s1815_s18  }
 0x1bb   : > { %p14_p3 = scmp.ge.s32.totalorder %s17_s18, 4  }
 0x1bd   :  { %16 = sbr.rel (!%p14_p3) target bundleno = 1 (0x1), region = 93 }
 0x1c4   :  { %1344 = vsyncpa [#allocation3], 1 }
 0x1c5   :  { %1346 = vsyncpa [#allocation3 + $0x1], 1 }

// kernel: encoder_forward.10
= control target key start
LH: loop header
LB: loop body
LE: loop exit
PB: predicated region body
PF: predicated region fallthrough
CT: control target
= control target key end

     0   :  { %s2019_s18 = smov 0   ;;  %s2641_s0 = inlined_call_operand.vmem [shape: bf16[2,220,96], index: 0, kind: input, shape index: {}]   ;;  %s2642_s1 = inlined_call_operand.vmem [shape: bf16[3,96,32], index: 1, kind: input, shape index: {}]   ;;  %s2643_s2 = inlined_call_operand.vmem [shape: f32[1,32], index: 2, kind: input, shape index: {}]   ;;  %s2644_s3 = inlined_call_operand.vmem [shape: f32[2,200,32], index: 3, kind: output, shape index: {0}]   ;;  %s2645_s4 = inlined_call_operand.vmem [shape: f32[2,1,32], index: 4, kind: output, shape index: {1}]   ;;  %s2646_s5 = inlined_call_operand.vmem [shape: f32[2,1,32], index: 5, kind: output, shape index: {2}]  }
   0x1 LB: > { %s1519_s19 = sadd.s32 4294967295, %s1985_s18   ;;  %p1523_p0 = scmp.ge.s32.totalorder %s1985_s18, 1  ;;  %s1985_s18 = sphi %s2019_s18, %s16_s18  }
   0x2   : > { %p192_p1 = scmp.lt.s32.totalorder %s1985_s18, 3 }
   0x4   : > { %p193_p2 = pnand %p1523_p0, %p192_p1 }
   0x5   : > { %v1922_v0 = vld [vmem:[%s2642_s1 + $0x30] sm:$0xff] (!%p193_p2)   ;;  %v1987_v1 = vmov (!%p193_p2), 0.0   ;;  %v1923_v2 = vld [vmem:[%s2642_s1 + $0x38] sm:$0xff] (!%p193_p2)   ;;  %p226_p3 = scmp.lt.s32.totalorder (!%p193_p2), %s1519_s19, 1  ;;  %vm1988_vm0 = vmmov (!%p193_p2), 0   ;;  %v1924_v3 = vld [vmem:[%s2642_s1 + $0x40] sm:$0xff] (!%p193_p2)  }
   0x6   : > { %196 = sbr.rel (%p193_p2) target bundleno = 418 (0x1a2), region = 32  ;;  %1706 = vmatprep.subr.bf16.mxu0 (!%p193_p2), %v1987_v1  ;;  %1898 = vmatprep.subr.bf16.mxu1 (!%p193_p2), %v1987_v1  ;;  %v1925_v4 = vld [vmem:[%s2642_s1 + $0x48] sm:$0xff] (!%p193_p2)   ;;  %v1926_v17 = vld [vmem:[%s2642_s1 + $0x50] sm:$0xff] (!%p193_p2)   ;;  %v1927_v26 = vld [vmem:[%s2642_s1 + $0x58] sm:$0xff] (!%p193_p2)   ;;  %vm361_vm1 = vcmask (!%p193_p2), 1046528   ;;  %vm423_vm2 = vcmask (!%p193_p2), 785408  }
   0x7   : > { %1707 = vmatpush3.bf16.msra.mxu0 (!%p193_p2), %v1922_v0  ;;  %1904 = vmatpush3.bf16.msra.mxu1 (!%p193_p2), %v1922_v0  ;;  %v1932_v35 = vld [vmem:[%s2642_s1 + $0x60] sm:$0xff] (!%p193_p2)   ;;  %v1936_v41 = vld [vmem:[%s2642_s1 + $0x68] sm:$0xff] (!%p193_p2)   ;;  %v1940_v52 = vld [vmem:[%s2642_s1 + $0x70] sm:$0xff] (!%p193_p2)   ;;  %vm931_vm3 = vcmask (!%p193_p2), 1045504   ;;  %vm1250_vm4 = vcmask (!%p193_p2), 261120   ;;  %vm1331_vm5 = vcmask (!%p193_p2), 253952  }
   0x8   : > { %1708 = vmatprep.subr.bf16.mxu0 (!%p193_p2), %v1987_v1  ;;  %1899 = vmatprep.subr.bf16.mxu1 (!%p193_p2), %v1987_v1  ;;  %v1933_v36 = vld [vmem:[%s2642_s1] sm:$0xff] (!%p193_p2)   ;;  %v1937_v46 = vld [vmem:[%s2642_s1 + $0x8] sm:$0xff] (!%p193_p2)   ;;  %v1941_v53 = vld [vmem:[%s2642_s1 + $0x10] sm:$0xff] (!%p193_p2)  }
   0x9   : > { %1718 = vmatprep.mubr.msk.bf16.mxu0 (!%p193_p2), %vm1988_vm0, %v1987_v1  ;;  %1746 = vmatprep.mubr.msk.bf16.mxu1 (!%p193_p2), %vm1988_vm0, %v1987_v1  ;;  %v1944_v57 = vld [vmem:[%s2642_s1 + $0x78] sm:$0xff] (!%p193_p2)   ;;  %v1948_v62 = vld [vmem:[%s2642_s1 + $0x20] sm:$0xff] (!%p193_p2)  }
   0xa   : > { %v1945_v59 = vld [vmem:[%s2642_s1 + $0x18] sm:$0xff] (!%p193_p2)   ;;  %v1949_v63 = vld [vmem:[%s2642_s1 + $0x80] sm:$0xff] (!%p193_p2)  }
   0xb   : > { %1709 = vmatpush3.bf16.msra.mxu0 (!%p193_p2), %v1923_v2  ;;  %1905 = vmatpush3.bf16.msra.mxu1 (!%p193_p2), %v1923_v2 }
   0xc   : > { %1710 = vmatprep.subr.bf16.mxu0 (!%p193_p2), %v1987_v1  ;;  %1900 = vmatprep.subr.bf16.mxu1 (!%p193_p2), %v1987_v1 }
   0xd   : > { %s2648_s19 = smov (!%p226_p3, %s1519_s19), 1 }
   0xe   : > { %s1910_s26 = smul.u32 112, %s2648_s19  ;;  %s238_s22 = scalar_lea.vmem %s2645_s4, %s2648_s19 }
   0xf   : > { %1711 = vmatpush3.bf16.msra.mxu0 %v1924_v3  ;;  %1906 = vmatpush3.bf16.msra.mxu1 %v1924_v3  ;;  %s241_s25 = scalar_lea.vmem %s2646_s5, %s2648_s19 }
  0x10   : > { %s2052_s29 = scalar_lea.vmem %s2641_s0, %s1910_s26  ;;  %1712 = vmatprep.subr.bf16.mxu0 %v1987_v1  ;;  %1901 = vmatprep.subr.bf16.mxu1 %v1987_v1 }
  0x11   : > { %v2058_v5 = vld [vmem:[%s2052_s29 + $0xc] sm:$0xf]  ;;  %v2061_v6 = vld [vmem:[%s2052_s29 + $0x10] sm:$0xf]  ;;  %v2064_v7 = vld [vmem:[%s2052_s29 + $0x8] sm:$0xf] }
  0x12   : > { %v280_v8 = vld [vmem:[%s2052_s29 + $0x4] sm:$0xe]  ;;  %v2068_v9 = vld [vmem:[%s2052_s29 + $0x3c] sm:$0xf]  ;;  %v1539_v10 = vcombine.low %v2058_v5, %v2061_v6  ;;  %v2075_v11 = vld [vmem:[%s2052_s29 + $0x40] sm:$0xf] }
  0x13   : > { %v2078_v12 = vld [vmem:[%s2052_s29 + $0x44] sm:$0xf]  ;;  %v2081_v13 = vld [vmem:[%s2052_s29 + $0x48] sm:$0xf]  ;;  %v2084_v14 = vld [vmem:[%s2052_s29 + $0x4c] sm:$0xf]  ;;  %1713 = vmatpush3.bf16.msra.mxu0 %v1925_v4  ;;  %1907 = vmatpush3.bf16.msra.mxu1 %v1925_v4  ;;  %v1538_v18 = vcombine.low %v280_v8, %v2064_v7  ;;  %v1545_v19 = vcombine.low %v2068_v9, %v2075_v11 }
  0x14   : > { %v1578_v15 = vcombine.low %v2075_v11, %v2078_v12  ;;  %v1579_v16 = vcombine.low %v2081_v13, %v2084_v14  ;;  %v1546_v20 = vcombine.low %v2078_v12, %v2081_v13  ;;  %1714 = vmatprep.subr.bf16.mxu0 %v1987_v1  ;;  %1902 = vmatprep.subr.bf16.mxu1 %v1987_v1  ;;  %v363_v21 = vrot.slane %v1539_v10, 1  ;;  %v2101_v22 = vld [vmem:[%s2052_s29 + $0x14] sm:$0xf]  ;;  %v2104_v23 = vld [vmem:[%s2052_s29 + $0x18] sm:$0xf]  ;;  %v2215_v0 = vld [vmem:[%s2052_s29 + $0x48] sm:$0xff]  }
  0x15   : > { %v2107_v24 = vld [vmem:[%s2052_s29 + $0x50] sm:$0xf]  ;;  %v2110_v25 = vld [vmem:[%s2052_s29 + $0x54] sm:$0xf]  ;;  %v362_v27 = vrot.slane %v1538_v18, 1  ;;  %v2115_v28 = vrot.slane %v1545_v19, 1  ;;  %v1540_v31 = vcombine.low %v2101_v22, %v2104_v23 }
  0x16   : > { %v377_v29 = vrot.slane %v1546_v20, 1  ;;  %v1580_v30 = vcombine.low %v2107_v24, %v2110_v25  ;;  %v1547_v32 = vcombine.low %v2084_v14, %v2107_v24  ;;  %v2137_v39 = vld [vmem:[%s2052_s29 + $0x1c] sm:$0xf]  ;;  %v2140_v40 = vld [vmem:[%s2052_s29 + $0x20] sm:$0xf]  ;;  %v1972_v8 = vld [vmem:[%s2052_s29 + $0x50] sm:$0xff]  }
  0x17   : > { %1715 = vmatpush3.bf16.msra.mxu0 %v1926_v17  ;;  %1908 = vmatpush3.bf16.msra.mxu1 %v1926_v17  ;;  %v364_v33 = vsel %vm361_vm1, %v362_v27, %v363_v21  ;;  %v365_v37 = vrot.slane %v1540_v31, 1  ;;  %v2148_v42 = vld [vmem:[%s2052_s29 + $0x58] sm:$0xf]  ;;  %v2151_v43 = vld [vmem:[%s2052_s29 + $0x5c] sm:$0xf]  ;;  %v1541_v48 = vcombine.low %v2137_v39, %v2140_v40  ;;  %v947_v10 = vrot.slane %v2215_v0, 2 }
  0x18   : > { %1716 = vmatprep.subr.bf16.mxu0 %v1987_v1  ;;  %1903 = vmatprep.subr.bf16.mxu1 %v1987_v1  ;;  %v378_v34 = vsel %vm361_vm1, %v2115_v28, %v377_v29  ;;  %v379_v38 = vrot.slane %v1547_v32, 1  ;;  %v2154_v44 = vld [vmem:[%s2052_s29 + $0x38] sm:$0xf]  ;;  %v1581_v47 = vcombine.low %v2148_v42, %v2151_v43  ;;  %v1548_v51 = vcombine.low %v2110_v25, %v2148_v42  ;;  %v2184_v55 = vld [vmem:[%s2052_s29 + $0x24] sm:$0xf] }
  0x19   : > { %v1577_v45 = vcombine.low %v2154_v44, %v2068_v9  ;;  %v366_v49 = vsel %vm361_vm1, %v363_v21, %v365_v37  ;;  %v367_v54 = vrot.slane %v1541_v48, 1  ;;  %v2189_v56 = vld [vmem:[%s2052_s29 + $0x28] sm:$0xf]  ;;  %v2202_v60 = vld [vmem:[%s2052_s29 + $0x60] sm:$0xf]  ;;  %v1974_v17 = vld [vmem:[%s2052_s29 + $0x58] sm:$0xff]  }
  0x1a   : > { %v380_v50 = vsel %vm361_vm1, %v377_v29, %v379_v38  ;;  %v381_v58 = vrot.slane %v1548_v51, 1  ;;  %v1542_v61 = vcombine.low %v2184_v55, %v2189_v56  ;;  %v1549_v4 = vcombine.low %v2151_v43, %v2202_v60  ;;  %v1976_v19 = vld [vmem:[%s2052_s29 + $0x60] sm:$0xff]   ;;  %v2234_v27 = vld [vmem:[%s2052_s29 + $0x2c] sm:$0xf] }
  0x1b   : > { %1717 = vmatpush3.bf16.msra.mxu0 %v1927_v26  ;;  %1909 = vmatpush3.bf16.msra.mxu1 %v1927_v26  ;;  %v368_v2 = vsel %vm361_vm1, %v365_v37, %v367_v54  ;;  %v949_v18 = vrot.slane %v1972_v8, 2  ;;  %v951_v21 = vrot.slane %v1974_v17, 2  ;;  %v953_v31 = vrot.slane %v1976_v19, 2  ;;  %v2242_v32 = vld [vmem:[%s2052_s29 + $0x68] sm:$0x3f]  }
  0x1c   : > { %1834 = vmatprep.subr.bf16.mxu0 %v1987_v1  ;;  %1770 = vmatprep.subr.bf16.mxu1 %v1987_v1  ;;  %v382_v3 = vsel %vm361_vm1, %v379_v38, %v381_v58  ;;  %v369_v20 = vrot.slane %v1542_v61, 1  ;;  %v383_v26 = vrot.slane %v1549_v4, 1  ;;  %v955_v38 = vrot.slane %v2242_v32, 2 }
  0x1d   : > { %v2239_v29 = vsel %vm931_vm3, %v947_v10, %v949_v18  ;;  %v2259_v37 = vsel %vm931_vm3, %v951_v21, %v953_v31  ;;  %v1571_v17 = vcombine.low %v2064_v7, %v2058_v5  ;;  %v1960_v7 = vld [vmem:[%s2052_s29 + $0x20] sm:$0xff]   ;;  %v1582_v9 = vcombine.low %v2202_v60, %v2202_v60 }
  0x1e   : > { %1719 = vmatmul.mubr.msk.bf16.vlgmr.msra.gmra.mrb[0].mxu0 %vm423_vm2, %v364_v33  ;;  %1747 = vmatmul.mubr.msk.bf16.vlgmr.msra.gmra.mrb[0].mxu1 %vm423_vm2, %v378_v34  ;;  %v2245_v33 = vld [vmem:[%s2052_s29 + $0x30] sm:$0xf]  ;;  %v1951_v34 = vld [vmem:[%s2642_s1 + $0x28] sm:$0xff]  }
  0x1f   : > { %1835 = vmatpush3.bf16.msra.mxu0 %v1932_v35  ;;  %1722 = vmatprep.mubr.msk.bf16.mxu0 %vm1988_vm0, %v1987_v1  ;;  %v1953_v35 = vld [vmem:[%s2642_s1 + $0x88] sm:$0xff]   ;;  %v1543_v48 = vcombine.low %v2234_v27, %v2245_v33 }
  0x20   : > { %1750 = vmatprep.mubr.msk.bf16.mxu1 %vm1988_vm0, %v1987_v1  ;;  %1771 = vmatpush3.bf16.msra.mxu1 %v1933_v36  ;;  %v2254_v36 = vsel %vm931_vm3, %v949_v18, %v951_v21  ;;  %v1958_v18 = vld [vmem:[%s2052_s29 + $0x18] sm:$0xff]   ;;  %v937_v21 = vrot.slane %v1960_v7, 2 }
  0x21   : > { %1836 = vmatprep.subr.bf16.mxu0 %v1987_v1  ;;  %1772 = vmatprep.subr.bf16.mxu1 %v1987_v1  ;;  %v371_v51 = vrot.slane %v1543_v48, 1  ;;  %v935_v19 = vrot.slane %v1958_v18, 2 }
  0x23   : > { %1837 = vmatpush3.bf16.msra.mxu0 %v1936_v41  ;;  %v370_v41 = vsel %vm361_vm1, %v367_v54, %v369_v20  ;;  %v372_v54 = vsel %vm361_vm1, %v369_v20, %v371_v51  ;;  %v1572_v20 = vcombine.low %v2061_v6, %v2101_v22  ;;  %v938_v6 = vsel %vm931_vm3, %v935_v19, %v937_v21  ;;  %v1962_v22 = vld [vmem:[%s2052_s29 + $0x28] sm:$0xff]  }
  0x24   : > { %1773 = vmatpush3.bf16.msra.mxu1 %v1937_v46  ;;  %1838 = vmatprep.subr.bf16.mxu0 %v1987_v1  ;;  %v384_v46 = vsel %vm361_vm1, %v381_v58, %v383_v26 }
  0x25   : > { %1774 = vmatprep.subr.bf16.mxu1 %v1987_v1 }
  0x26   : > { %1723 = vmatmul.mubr.msk.bf16.gmra.mrb[4].mxu0 %vm423_vm2, %v366_v49  ;;  %1751 = vmatmul.mubr.msk.bf16.gmra.mrb[4].mxu1 %vm423_vm2, %v380_v50  ;;  %v1947_v49 = vld [vmem:[%s2052_s29 + $0x64] sm:$0x1f]   ;;  %v2270_v50 = vsel %vm931_vm3, %v953_v31, %v955_v38  ;;  %v939_v31 = vrot.slane %v1962_v22, 2 }
  0x27   : > { %1726 = vmatprep.mubr.msk.bf16.mxu0 %vm1988_vm0, %v1987_v1  ;;  %1754 = vmatprep.mubr.msk.bf16.mxu1 %vm1988_vm0, %v1987_v1 }
  0x28   : > { %1839 = vmatpush3.bf16.msra.mxu0 %v1940_v52  ;;  %1775 = vmatpush3.bf16.msra.mxu1 %v1941_v53  ;;  %v385_v52 = vrot.slane %v1947_v49, 1  ;;  %v2279_v53 = vld [vmem:[%s2052_s29 + $0x34] sm:$0xf] }
  0x29   : > { %1840 = vmatprep.subr.bf16.mxu0 %v1987_v1  ;;  %1776 = vmatprep.subr.bf16.mxu1 %v1987_v1  ;;  %v1544_v58 = vcombine.low %v2279_v53, %v2154_v44  ;;  %v1576_v48 = vcombine.low %v2245_v33, %v2279_v53 }
  0x2c   : > { %1841 = vmatpush3.bf16.msra.mxu0 %v1944_v57  ;;  %1777 = vmatpush3.bf16.msra.mxu1 %v1945_v59  ;;  %v386_v57 = vsel %vm361_vm1, %v383_v26, %v385_v52  ;;  %v373_v59 = vrot.slane %v1544_v58, 1  ;;  %v1573_v26 = vcombine.low %v2104_v23, %v2137_v39  ;;  %v940_v23 = vsel %vm931_vm3, %v937_v21, %v939_v31  ;;  %v1964_v39 = vld [vmem:[%s2052_s29 + $0x30] sm:$0xff]  }
  0x2d   : > { %1778 = vmatprep.subr.bf16.mxu1 %v1987_v1  ;;  %1842 = vmatprep.subr.bf16.mxu0 %v1987_v1 }
  0x2e   : > { %1727 = vmatmul.mubr.msk.bf16.gmra.mrb[8].mxu0 %vm423_vm2, %v368_v2  ;;  %1755 = vmatmul.mubr.msk.bf16.gmra.mrb[8].mxu1 %vm423_vm2, %v382_v3  ;;  %v374_v61 = vsel %vm361_vm1, %v371_v51, %v373_v59  ;;  %v1955_v2 = vld [vmem:[%s2052_s29 + $0x8] sm:$0xfc]   ;;  %v1956_v3 = vld [vmem:[%s2052_s29 + $0x10] sm:$0xff]  }
  0x2f   : > { %1730 = vmatprep.mubr.msk.bf16.mxu0 %vm1988_vm0, %v1987_v1  ;;  %1758 = vmatprep.mubr.msk.bf16.mxu1 %vm1988_vm0, %v1987_v1  ;;  %v932_v4 = vrot.slane %v1955_v2, 2  ;;  %v933_v8 = vrot.slane %v1956_v3, 2 }
  0x30   : > { %1779 = vmatpush3.bf16.msra.mxu1 %v1948_v62  ;;  %1843 = vmatpush3.bf16.msra.mxu0 %v1949_v63  ;;  %v1952_v62 = vld [vmem:[%s2052_s29] sm:$0xff]   ;;  %v376_v63 = vsel %vm361_vm1, %v373_v59, %v2115_v28 }
  0x31   : > { %1780 = vmatprep.subr.bf16.mxu1 %v1987_v1  ;;  %1844 = vmatprep.subr.bf16.mxu0 %v1987_v1  ;;  %v934_v28 = vsel %vm931_vm3, %v932_v4, %v933_v8  ;;  %v936_v5 = vsel %vm931_vm3, %v933_v8, %v935_v19 }
  0x34   : > { %1781 = vmatpush3.bf16.msra.mxu1 %v1951_v34  ;;  %1845 = vmatpush3.bf16.msra.mxu0 %v1953_v35  ;;  %v1574_v34 = vcombine.low %v2140_v40, %v2184_v55  ;;  %v941_v35 = vrot.slane %v1964_v39, 2  ;;  %v1966_v55 = vld [vmem:[%s2052_s29 + $0x38] sm:$0xff]  }
  0x36   : > { %1731 = vmatmul.mubr.msk.bf16.gmra.mrb[12].mxu0 %vm423_vm2, %v370_v41  ;;  %1759 = vmatmul.mubr.msk.bf16.gmra.mrb[12].mxu1 %vm423_vm2, %v384_v46  ;;  %v1575_v41 = vcombine.low %v2189_v56, %v2234_v27  ;;  %v942_v40 = vsel %vm931_vm3, %v939_v31, %v941_v35  ;;  %v943_v46 = vrot.slane %v1966_v55, 2  ;;  %v1968_v56 = vld [vmem:[%s2052_s29 + $0x40] sm:$0xff]   ;;  %s1911_s29 = smul.u32 200, %s2648_s19 }
  0x37   : > { %1734 = vmatprep.mubr.msk.bf16.mxu0 %vm1988_vm0, %v1987_v1  ;;  %1762 = vmatprep.mubr.msk.bf16.mxu1 %vm1988_vm0, %v1987_v1  ;;  %v945_v27 = vrot.slane %v1968_v56, 2 }
  0x38   : > { %v944_v49 = vsel %vm931_vm3, %v941_v35, %v943_v46  ;;  %s2483_s17 = scalar_lea.vmem %s2644_s3, %s1911_s29 }
  0x39   : > { %v946_v51 = vsel %vm931_vm3, %v943_v46, %v945_v27  ;;  %v948_v33 = vsel %vm931_vm3, %v945_v27, %v947_v10  ;;  %v2477_v27 = vld [vmem:[%s2643_s2] ss:$0 sm:$0xff] }
  0x3e   : > { %1735 = vmatmul.mubr.msk.bf16.gmra.mrb[16].mxu0 %vm423_vm2, %v372_v54  ;;  %1763 = vmatmul.mubr.msk.bf16.gmra.mrb[16].mxu1 %vm423_vm2, %v386_v57 }
  0x3f   : > { %1738 = vmatprep.mubr.msk.bf16.mxu0 %vm1988_vm0, %v1987_v1  ;;  %1766 = vmatprep.mubr.msk.bf16.mxu1 %vm1988_vm0, %v1987_v1 }
  0x46   : > { %1739 = vmatmul.mubr.msk.bf16.gmra.mrb[20].mxu0 %vm423_vm2, %v374_v61  ;;  %1767 = vmatmul.mubr.msk.bf16.gmra.mrb[20].mxu1 %vm423_vm2, %v385_v52 }
  0x47   : > { %1742 = vmatprep.mubr.msk.bf16.mxu0 %vm1988_vm0, %v1987_v1  ;;  %1782 = vmatprep.mubr.msk.bf16.mxu1 %vm1988_vm0, %v1987_v1 }
  0x4e   : > { %1743 = vmatmul.mubr.msk.bf16.gmra.mrb[24].mxu0 %vm423_vm2, %v376_v63  ;;  %1783 = vmatmul.mubr.msk.bf16.vlgmr.msra.gmra.mrb[24].mxu1 %vm423_vm2, %v1952_v62 }
  0x4f   : > { %1786 = vmatprep.mubr.msk.bf16.mxu1 %vm1988_vm0, %v1987_v1  ;;  %1846 = vmatprep.mubr.msk.bf16.mxu0 %vm1988_vm0, %v1987_v1 }
  0x56   : > { %1787 = vmatmul.mubr.msk.bf16.gmra.mrb[28].mxu1 %vm423_vm2, %v1571_v17  ;;  %1847 = vmatmul.mubr.msk.bf16.vlgmr.msra.gmra.mrb[28].mxu0 %vm423_vm2, %v934_v28 }
  0x57   : > { %1790 = vmatprep.mubr.msk.bf16.mxu1 %vm1988_vm0, %v1987_v1  ;;  %1850 = vmatprep.mubr.msk.bf16.mxu0 %vm1988_vm0, %v1987_v1 }
  0x5e   : > { %1791 = vmatmul.mubr.msk.bf16.gmra.mrb[32].mxu1 %vm423_vm2, %v1572_v20  ;;  %1851 = vmatmul.mubr.msk.bf16.gmra.mrb[32].mxu0 %vm423_vm2, %v936_v5 }
  0x5f   : > { %1794 = vmatprep.mubr.msk.bf16.mxu1 %vm1988_vm0, %v1987_v1  ;;  %1854 = vmatprep.mubr.msk.bf16.mxu0 %vm1988_vm0, %v1987_v1 }
  0x66   : > { %1795 = vmatmul.mubr.msk.bf16.gmra.mrb[36].mxu1 %vm423_vm2, %v1573_v26  ;;  %1855 = vmatmul.mubr.msk.bf16.gmra.mrb[36].mxu0 %vm423_vm2, %v938_v6 }
  0x67   : > { %1798 = vmatprep.mubr.msk.bf16.mxu1 %vm1988_vm0, %v1987_v1  ;;  %1858 = vmatprep.mubr.msk.bf16.mxu0 %vm1988_vm0, %v1987_v1 }
  0x6e   : > { %1799 = vmatmul.mubr.msk.bf16.gmra.mrb[40].mxu1 %vm423_vm2, %v1574_v34  ;;  %1859 = vmatmul.mubr.msk.bf16.gmra.mrb[40].mxu0 %vm423_vm2, %v940_v23 }
  0x6f   : > { %1802 = vmatprep.mubr.msk.bf16.mxu1 %vm1988_vm0, %v1987_v1  ;;  %1862 = vmatprep.mubr.msk.bf16.mxu0 %vm1988_vm0, %v1987_v1 }
  0x76   : > { %1803 = vmatmul.mubr.msk.bf16.gmra.mrb[44].mxu1 %vm423_vm2, %v1575_v41  ;;  %1863 = vmatmul.mubr.msk.bf16.gmra.mrb[44].mxu0 %vm423_vm2, %v942_v40 }
  0x77   : > { %1806 = vmatprep.mubr.msk.bf16.mxu1 %vm1988_vm0, %v1987_v1  ;;  %1866 = vmatprep.mubr.msk.bf16.mxu0 %vm1988_vm0, %v1987_v1 }
  0x7e   : > { %1807 = vmatmul.mubr.msk.bf16.gmra.mrb[48].mxu1 %vm423_vm2, %v1576_v48  ;;  %1867 = vmatmul.mubr.msk.bf16.gmra.mrb[48].mxu0 %vm423_vm2, %v944_v49 }
  0x7f   : > { %1810 = vmatprep.mubr.msk.bf16.mxu1 %vm1988_vm0, %v1987_v1  ;;  %1870 = vmatprep.mubr.msk.bf16.mxu0 %vm1988_vm0, %v1987_v1 }
  0x86   : > { %1811 = vmatmul.mubr.msk.bf16.gmra.mrb[52].mxu1 %vm423_vm2, %v1577_v45  ;;  %1871 = vmatmul.mubr.msk.bf16.gmra.mrb[52].mxu0 %vm423_vm2, %v946_v51 }
  0x87   : > { %1814 = vmatprep.mubr.msk.bf16.mxu1 %vm1988_vm0, %v1987_v1  ;;  %1874 = vmatprep.mubr.msk.bf16.mxu0 %vm1988_vm0, %v1987_v1 }
  0x8e   : > { %1815 = vmatmul.mubr.msk.bf16.gmra.mrb[56].mxu1 %vm423_vm2, %v1578_v15  ;;  %1875 = vmatmul.mubr.msk.bf16.gmra.mrb[56].mxu0 %vm423_vm2, %v948_v33 }
  0x8f   : > { %1818 = vmatprep.mubr.msk.bf16.mxu1 %vm1988_vm0, %v1987_v1  ;;  %1878 = vmatprep.mubr.msk.bf16.mxu0 %vm1988_vm0, %v1987_v1 }
  0x96   : > { %1819 = vmatmul.mubr.msk.bf16.gmra.mrb[60].mxu1 %vm423_vm2, %v1579_v16  ;;  %1879 = vmatmul.mubr.msk.bf16.gmra.mrb[60].mxu0 %vm423_vm2, %v2239_v29 }
  0x97   : > { %1822 = vmatprep.mubr.msk.bf16.mxu1 %vm1988_vm0, %v1987_v1  ;;  %1882 = vmatprep.mubr.msk.bf16.mxu0 %vm1988_vm0, %v1987_v1 }
  0x9e   : > { %1823 = vmatmul.mubr.msk.bf16.gmra.mrb[64].mxu1 %vm423_vm2, %v1580_v30  ;;  %1883 = vmatmul.mubr.msk.bf16.gmra.mrb[64].mxu0 %vm423_vm2, %v2254_v36 }
  0x9f   : > { %1826 = vmatprep.mubr.msk.bf16.mxu1 %vm1988_vm0, %v1987_v1  ;;  %1886 = vmatprep.mubr.msk.bf16.mxu0 %vm1988_vm0, %v1987_v1 }
  0xa6   : > { %1827 = vmatmul.mubr.msk.bf16.gmra.mrb[68].mxu1 %vm423_vm2, %v1581_v47  ;;  %1887 = vmatmul.mubr.msk.bf16.gmra.mrb[68].mxu0 %vm423_vm2, %v2259_v37 }
  0xa7   : > { %1830 = vmatprep.mubr.msk.bf16.mxu1 %vm1988_vm0, %v1987_v1  ;;  %1890 = vmatprep.mubr.msk.bf16.mxu0 %vm1988_vm0, %v1987_v1 }
  0xae   : > { %1831 = vmatmul.mubr.msk.bf16.gmra.mrb[72].mxu1 %vm423_vm2, %v1582_v9  ;;  %1891 = vmatmul.mubr.msk.bf16.gmra.mrb[72].mxu0 %vm423_vm2, %v2270_v50 }
  0xaf   : > { %1894 = vmatprep.mubr.msk.bf16.mxu0 %vm1988_vm0, %v1987_v1 }
  0xb6   : > { %1895 = vmatmul.mubr.msk.bf16.gmra.mrb[76].mxu0 %vm423_vm2, %v955_v38 }
  0xf1   : > { %v497_v11 = vpop.f32.mrb[0].mxu0  ;;  %v2431_v12 = vpop.f32.mrb[0].mxu1 }
  0xf2   : > { %v1720_v13 = vpop.f32.mrb[1].mxu0  ;;  %v1748_v14 = vpop.f32.mrb[1].mxu1 }
  0xf3   : > { %v500_v15 = vpop.f32.mrb[2].mxu0  ;;  %v2433_v16 = vpop.f32.mrb[2].mxu1 }
  0xf4   : > { %v1721_v24 = vpop.f32.mrb[3].mxu0  ;;  %v1749_v25 = vpop.f32.mrb[3].mxu1 }
  0xf9   : > { %v505_v30 = vpop.f32.mrb[4].mxu0  ;;  %v2435_v42 = vpop.f32.mrb[4].mxu1 }
  0xfa   : > { %v1724_v43 = vpop.f32.mrb[5].mxu0  ;;  %v1752_v44 = vpop.f32.mrb[5].mxu1 }
  0xfb   : > { %v508_v1 = vpop.f32.mrb[6].mxu0  ;;  %v2437_v45 = vpop.f32.mrb[6].mxu1 }
  0xfc   : > { %v1725_v47 = vpop.f32.mrb[7].mxu0  ;;  %v1753_v60 = vpop.f32.mrb[7].mxu1 }
 0x101   : > { %v2439_v0 = vpop.f32.mrb[8].mxu0  ;;  %v2441_v10 = vpop.f32.mrb[8].mxu1 }
 0x102   : > { %v1728_v29 = vpop.f32.mrb[9].mxu0  ;;  %v1756_v32 = vpop.f32.mrb[9].mxu1 }
 0x103   : > { %v2443_v36 = vpop.f32.mrb[10].mxu0  ;;  %v2445_v37 = vpop.f32.mrb[10].mxu1 }
 0x104   : > { %v1729_v38 = vpop.f32.mrb[11].mxu0  ;;  %v1757_v50 = vpop.f32.mrb[11].mxu1 }
 0x109   : > { %v2447_v52 = vpop.f32.mrb[12].mxu0  ;;  %v2449_v53 = vpop.f32.mrb[12].mxu1 }
 0x10a   : > { %v1732_v54 = vpop.f32.mrb[13].mxu0  ;;  %v1760_v57 = vpop.f32.mrb[13].mxu1 }
 0x10b   : > { %v2451_v58 = vpop.f32.mrb[14].mxu0  ;;  %v2453_v59 = vpop.f32.mrb[14].mxu1 }
 0x10c   : > { %v1733_v61 = vpop.f32.mrb[15].mxu0  ;;  %v1761_v62 = vpop.f32.mrb[15].mxu1 }
 0x111   : > { %v2455_v63 = vpop.f32.mrb[16].mxu0  ;;  %v2457_v2 = vpop.f32.mrb[16].mxu1 }
 0x112   : > { %v1736_v3 = vpop.f32.mrb[17].mxu0  ;;  %v1764_v4 = vpop.f32.mrb[17].mxu1 }
 0x113   : > { %v2459_v8 = vpop.f32.mrb[18].mxu0  ;;  %v2461_v17 = vpop.f32.mrb[18].mxu1 }
 0x114   : > { %v1737_v28 = vpop.f32.mrb[19].mxu0  ;;  %v1765_v18 = vpop.f32.mrb[19].mxu1 }
 0x119   : > { %v2463_v19 = vpop.f32.mrb[20].mxu0  ;;  %v2465_v20 = vpop.f32.mrb[20].mxu1 }
 0x11a   : > { %v1740_v5 = vpop.f32.mrb[21].mxu0  ;;  %v1768_v7 = vpop.f32.mrb[21].mxu1 }
 0x11b   : > { %v2467_v21 = vpop.f32.mrb[22].mxu0  ;;  %v596_v26 = vpop.f32.mrb[22].mxu1 }
 0x11c   : > { %v1741_v6 = vpop.f32.mrb[23].mxu0  ;;  %v1769_v22 = vpop.f32.mrb[23].mxu1 }
 0x121   : > { %v2469_v31 = vpop.f32.mrb[24].mxu0  ;;  %v725_v34 = vpop.f32.mrb[24].mxu1 }
 0x122   : > { %v726_v23 = vadd.f32 %v725_v34, %v497_v11  ;;  %v1744_v39 = vpop.f32.mrb[25].mxu0  ;;  %v1784_v35 = vpop.f32.mrb[25].mxu1 }
 0x123   : > { %v2471_v41 = vpop.f32.mrb[26].mxu0  ;;  %v728_v40 = vpop.f32.mrb[26].mxu1 }
 0x124   : > { %v729_v55 = vadd.f32 %v728_v40, %v500_v15  ;;  %v1745_v46 = vpop.f32.mrb[27].mxu0  ;;  %v1785_v48 = vpop.f32.mrb[27].mxu1 }
 0x129   : > { %v733_v49 = vpop.f32.mrb[28].mxu1  ;;  %v1066_v56 = vpop.f32.mrb[28].mxu0 }
 0x12a   : > { %v734_v51 = vadd.f32 %v733_v49, %v505_v30  ;;  %v1168_v33 = vadd.f32 %v1066_v56, %v726_v23  ;;  %v1788_v9 = vpop.f32.mrb[29].mxu1  ;;  %v1848_v11 = vpop.f32.mrb[29].mxu0 }
 0x12b   : > { %v736_v13 = vpop.f32.mrb[30].mxu1  ;;  %v1069_v14 = vpop.f32.mrb[30].mxu0 }
 0x12c   : > { %v1200_v24 = vadd.f32 %v2477_v27, %v1168_v33  ;;  %v737_v25 = vadd.f32 %v736_v13, %v508_v1  ;;  %v1169_v15 = vadd.f32 %v1069_v14, %v729_v55  ;;  %v1849_v43 = vpop.f32.mrb[31].mxu0  ;;  %v1789_v44 = vpop.f32.mrb[31].mxu1 }
 0x12e   : > { %v1225_v30 = vmax.f32 %v1200_v24, 0.0  ;;  %v1201_v47 = vadd.f32 %v2477_v27, %v1169_v15 }
 0x130   : > { %1251 = vst.msk [vmem:[%s2483_s17] sm:$0xff] %vm1250_vm4, %v1225_v30  ;;  %v1333_v60 = vmul.f32 %v1225_v30, %v1225_v30  ;;  %v1226_v29 = vmax.f32 %v1201_v47, 0.0  ;;  %v1276_v38 = vsel %vm1250_vm4, %v1225_v30, 0.0 }
 0x131   : > { %v741_v32 = vpop.f32.mrb[32].mxu1  ;;  %v1074_v1 = vpop.f32.mrb[32].mxu0 }
 0x132   : > { %1252 = vst.msk [vmem:[%s2483_s17 + $0x8] sm:$0xff] %vm1250_vm4, %v1226_v29  ;;  %v1277_v50 = vsel %vm1250_vm4, %v1226_v29, 0.0  ;;  %v1334_v54 = vmul.f32 %v1226_v29, %v1226_v29  ;;  %v742_v57 = vadd.f32 %v741_v32, %v2439_v0  ;;  %v1792_v61 = vpop.f32.mrb[33].mxu1  ;;  %v1852_v62 = vpop.f32.mrb[33].mxu0  ;;  %v1170_v4 = vadd.f32 %v1074_v1, %v734_v51 }
 0x133   : > { %v1278_v3 = vadd.f32 %v1277_v50, %v1276_v38  ;;  %v744_v28 = vpop.f32.mrb[34].mxu1  ;;  %v1077_v18 = vpop.f32.mrb[34].mxu0  ;;  %v1358_v5 = vsel %vm1250_vm4, %v1333_v60, 0.0 }
 0x134   : > { %v1359_v7 = vsel %vm1250_vm4, %v1334_v54, 0.0  ;;  %v745_v26 = vadd.f32 %v744_v28, %v2443_v36  ;;  %v1171_v6 = vadd.f32 %v1077_v18, %v737_v25  ;;  %v1853_v22 = vpop.f32.mrb[35].mxu0  ;;  %v1793_v34 = vpop.f32.mrb[35].mxu1  ;;  %v1202_v0 = vadd.f32 %v2477_v27, %v1170_v4 }
 0x135   : > { %v1360_v23 = vadd.f32 %v1359_v7, %v1358_v5 }
 0x136   : > { %v1203_v39 = vadd.f32 %v2477_v27, %v1171_v6  ;;  %v1227_v35 = vmax.f32 %v1202_v0, 0.0 }
 0x138   : > { %v1228_v40 = vmax.f32 %v1203_v39, 0.0  ;;  %1253 = vst.msk [vmem:[%s2483_s17 + $0x10] sm:$0xff] %vm1250_vm4, %v1227_v35  ;;  %v1279_v55 = vsel %vm1250_vm4, %v1227_v35, 0.0  ;;  %v1335_v46 = vmul.f32 %v1227_v35, %v1227_v35 }
 0x139   : > { %v749_v48 = vpop.f32.mrb[36].mxu1  ;;  %v1082_v49 = vpop.f32.mrb[36].mxu0  ;;  %v1280_v56 = vadd.f32 %v1279_v55, %v1278_v3 }
 0x13a   : > { %1254 = vst.msk [vmem:[%s2483_s17 + $0x18] sm:$0xff] %vm1250_vm4, %v1228_v40  ;;  %v1281_v36 = vsel %vm1250_vm4, %v1228_v40, 0.0  ;;  %v1336_v51 = vmul.f32 %v1228_v40, %v1228_v40  ;;  %v750_v33 = vadd.f32 %v749_v48, %v2447_v52  ;;  %v1796_v9 = vpop.f32.mrb[37].mxu1  ;;  %v1856_v11 = vpop.f32.mrb[37].mxu0  ;;  %v1361_v13 = vsel %vm1250_vm4, %v1335_v46, 0.0 }
 0x13b   : > { %v1172_v14 = vadd.f32 %v1082_v49, %v742_v57  ;;  %v752_v24 = vpop.f32.mrb[38].mxu1  ;;  %v1085_v25 = vpop.f32.mrb[38].mxu0  ;;  %v1362_v15 = vadd.f32 %v1361_v13, %v1360_v23  ;;  %v1282_v43 = vadd.f32 %v1281_v36, %v1280_v56 }
 0x13c   : > { %v1363_v44 = vsel %vm1250_vm4, %v1336_v51, 0.0  ;;  %v753_v30 = vadd.f32 %v752_v24, %v2451_v58  ;;  %v1857_v47 = vpop.f32.mrb[39].mxu0  ;;  %v1797_v60 = vpop.f32.mrb[39].mxu1  ;;  %v1173_v32 = vadd.f32 %v1085_v25, %v745_v26 }
 0x13d   : > { %v1204_v29 = vadd.f32 %v2477_v27, %v1172_v14  ;;  %v1364_v52 = vadd.f32 %v1363_v44, %v1362_v15 }
 0x13e   : > { %v1205_v38 = vadd.f32 %v2477_v27, %v1173_v32 }
 0x13f   : > { %v1229_v1 = vmax.f32 %v1204_v29, 0.0 }
 0x140   : > { %v1230_v57 = vmax.f32 %v1205_v38, 0.0 }
 0x141   : > { %1255 = vst.msk [vmem:[%s2483_s17 + $0x20] sm:$0xff] %vm1250_vm4, %v1229_v1  ;;  %v1283_v50 = vsel %vm1250_vm4, %v1229_v1, 0.0  ;;  %v1337_v54 = vmul.f32 %v1229_v1, %v1229_v1  ;;  %v757_v61 = vpop.f32.mrb[40].mxu1  ;;  %v1090_v62 = vpop.f32.mrb[40].mxu0 }
 0x142   : > { %v1284_v3 = vadd.f32 %v1283_v50, %v1282_v43  ;;  %v758_v58 = vadd.f32 %v757_v61, %v2455_v63  ;;  %v1174_v4 = vadd.f32 %v1090_v62, %v750_v33  ;;  %v1800_v28 = vpop.f32.mrb[41].mxu1  ;;  %v1860_v18 = vpop.f32.mrb[41].mxu0  ;;  %1256 = vst.msk [vmem:[%s2483_s17 + $0x28] sm:$0xff] %vm1250_vm4, %v1230_v57  ;;  %v1285_v7 = vsel %vm1250_vm4, %v1230_v57, 0.0 }
 0x143   : > { %v1365_v5 = vsel %vm1250_vm4, %v1337_v54, 0.0  ;;  %v1338_v26 = vmul.f32 %v1230_v57, %v1230_v57  ;;  %v760_v6 = vpop.f32.mrb[42].mxu1  ;;  %v1093_v22 = vpop.f32.mrb[42].mxu0 }
 0x144   : > { %v1366_v34 = vadd.f32 %v1365_v5, %v1364_v52  ;;  %v1286_v23 = vadd.f32 %v1285_v7, %v1284_v3  ;;  %v1206_v0 = vadd.f32 %v2477_v27, %v1174_v4  ;;  %v761_v39 = vadd.f32 %v760_v6, %v2459_v8  ;;  %v1861_v63 = vpop.f32.mrb[43].mxu0  ;;  %v1801_v35 = vpop.f32.mrb[43].mxu1 }
 0x145   : > { %v1367_v40 = vsel %vm1250_vm4, %v1338_v26, 0.0  ;;  %v1175_v55 = vadd.f32 %v1093_v22, %v753_v30 }
 0x146   : > { %v1368_v46 = vadd.f32 %v1367_v40, %v1366_v34  ;;  %v1231_v48 = vmax.f32 %v1206_v0, 0.0 }
 0x147   : > { %v1207_v49 = vadd.f32 %v2477_v27, %v1175_v55 }
 0x148   : > { %1257 = vst.msk [vmem:[%s2483_s17 + $0x30] sm:$0xff] %vm1250_vm4, %v1231_v48  ;;  %v1287_v56 = vsel %vm1250_vm4, %v1231_v48, 0.0  ;;  %v1339_v36 = vmul.f32 %v1231_v48, %v1231_v48 }
 0x149   : > { %v1288_v51 = vadd.f32 %v1287_v56, %v1286_v23  ;;  %v1232_v33 = vmax.f32 %v1207_v49, 0.0  ;;  %v765_v9 = vpop.f32.mrb[44].mxu1  ;;  %v1098_v11 = vpop.f32.mrb[44].mxu0 }
 0x14a   : > { %v1369_v8 = vsel %vm1250_vm4, %v1339_v36, 0.0  ;;  %v766_v13 = vadd.f32 %v765_v9, %v2463_v19  ;;  %v1176_v14 = vadd.f32 %v1098_v11, %v758_v58  ;;  %v1804_v24 = vpop.f32.mrb[45].mxu1  ;;  %v1864_v25 = vpop.f32.mrb[45].mxu0 }
 0x14b   : > { %v1370_v15 = vadd.f32 %v1369_v8, %v1368_v46  ;;  %1258 = vst.msk [vmem:[%s2483_s17 + $0x38] sm:$0xff] %vm1250_vm4, %v1232_v33  ;;  %v1289_v43 = vsel %vm1250_vm4, %v1232_v33, 0.0  ;;  %v1340_v44 = vmul.f32 %v1232_v33, %v1232_v33  ;;  %v768_v30 = vpop.f32.mrb[46].mxu1  ;;  %v1101_v47 = vpop.f32.mrb[46].mxu0 }
 0x14c   : > { %v1290_v60 = vadd.f32 %v1289_v43, %v1288_v51  ;;  %v1208_v29 = vadd.f32 %v2477_v27, %v1176_v14  ;;  %v769_v32 = vadd.f32 %v768_v30, %v2467_v21  ;;  %v1177_v52 = vadd.f32 %v1101_v47, %v761_v39  ;;  %v1865_v19 = vpop.f32.mrb[47].mxu0  ;;  %v1805_v1 = vpop.f32.mrb[47].mxu1 }
 0x14d   : > { %v1371_v38 = vsel %vm1250_vm4, %v1340_v44, 0.0 }
 0x14e   : > { %v1372_v50 = vadd.f32 %v1371_v38, %v1370_v15  ;;  %v1233_v54 = vmax.f32 %v1208_v29, 0.0  ;;  %v1209_v57 = vadd.f32 %v2477_v27, %v1177_v52 }
 0x150   : > { %1259 = vst.msk [vmem:[%s2483_s17 + $0x40] sm:$0xff] %vm1250_vm4, %v1233_v54  ;;  %v1291_v61 = vsel %vm1250_vm4, %v1233_v54, 0.0  ;;  %v1341_v62 = vmul.f32 %v1233_v54, %v1233_v54  ;;  %v1234_v3 = vmax.f32 %v1209_v57, 0.0 }
 0x151   : > { %v1292_v58 = vadd.f32 %v1291_v61, %v1290_v60  ;;  %v773_v4 = vpop.f32.mrb[48].mxu1  ;;  %v1106_v28 = vpop.f32.mrb[48].mxu0 }
 0x152   : > { %v1373_v21 = vsel %vm1250_vm4, %v1341_v62, 0.0  ;;  %1260 = vst.msk [vmem:[%s2483_s17 + $0x48] sm:$0xff] %vm1250_vm4, %v1234_v3  ;;  %v1293_v18 = vsel %vm1250_vm4, %v1234_v3, 0.0  ;;  %v1342_v5 = vmul.f32 %v1234_v3, %v1234_v3  ;;  %v774_v7 = vadd.f32 %v773_v4, %v2469_v31  ;;  %v1808_v26 = vpop.f32.mrb[49].mxu1  ;;  %v1868_v6 = vpop.f32.mrb[49].mxu0 }
 0x153   : > { %v1374_v22 = vadd.f32 %v1373_v21, %v1372_v50  ;;  %v1294_v34 = vadd.f32 %v1293_v18, %v1292_v58  ;;  %v1178_v23 = vadd.f32 %v1106_v28, %v766_v13  ;;  %v776_v0 = vpop.f32.mrb[50].mxu1  ;;  %v1109_v39 = vpop.f32.mrb[50].mxu0 }
 0x154   : > { %v1375_v63 = vsel %vm1250_vm4, %v1342_v5, 0.0  ;;  %v777_v35 = vadd.f32 %v776_v0, %v2471_v41  ;;  %v1179_v40 = vadd.f32 %v1109_v39, %v769_v32  ;;  %v1869_v55 = vpop.f32.mrb[51].mxu0  ;;  %v1809_v46 = vpop.f32.mrb[51].mxu1 }
 0x155   : > { %v1376_v48 = vadd.f32 %v1375_v63, %v1374_v22  ;;  %v1210_v49 = vadd.f32 %v2477_v27, %v1178_v23 }
 0x156   : > { %v1211_v31 = vadd.f32 %v2477_v27, %v1179_v40 }
 0x157   : > { %v1235_v56 = vmax.f32 %v1210_v49, 0.0 }
 0x158   : > { %v1236_v36 = vmax.f32 %v1211_v31, 0.0 }
 0x159   : > { %1261 = vst.msk [vmem:[%s2483_s17 + $0x50] sm:$0xff] %vm1250_vm4, %v1235_v56  ;;  %v1295_v51 = vsel %vm1250_vm4, %v1235_v56, 0.0  ;;  %v1343_v33 = vmul.f32 %v1235_v56, %v1235_v56  ;;  %v781_v9 = vpop.f32.mrb[52].mxu1  ;;  %v1114_v11 = vpop.f32.mrb[52].mxu0 }
 0x15a   : > { %v1296_v8 = vadd.f32 %v1295_v51, %v1294_v34  ;;  %1262 = vst.msk [vmem:[%s2483_s17 + $0x58] sm:$0xff] %vm1250_vm4, %v1236_v36  ;;  %v1297_v41 = vsel %vm1250_vm4, %v1236_v36, 0.0  ;;  %v1344_v13 = vmul.f32 %v1236_v36, %v1236_v36  ;;  %v782_v14 = vadd.f32 %v781_v9, %v2431_v12  ;;  %v1812_v24 = vpop.f32.mrb[53].mxu1  ;;  %v1872_v25 = vpop.f32.mrb[53].mxu0 }
 0x15b   : > { %v1377_v15 = vsel %vm1250_vm4, %v1343_v33, 0.0  ;;  %v1180_v43 = vadd.f32 %v1114_v11, %v774_v7  ;;  %v784_v44 = vpop.f32.mrb[54].mxu1  ;;  %v1117_v30 = vpop.f32.mrb[54].mxu0 }
 0x15c   : > { %v1378_v47 = vadd.f32 %v1377_v15, %v1376_v48  ;;  %v1298_v60 = vadd.f32 %v1297_v41, %v1296_v8  ;;  %v1379_v29 = vsel %vm1250_vm4, %v1344_v13, 0.0  ;;  %v785_v32 = vadd.f32 %v784_v44, %v2433_v16  ;;  %v1873_v52 = vpop.f32.mrb[55].mxu0  ;;  %v1813_v19 = vpop.f32.mrb[55].mxu1 }
 0x15d   : > { %v1212_v1 = vadd.f32 %v2477_v27, %v1180_v43  ;;  %v1181_v38 = vadd.f32 %v1117_v30, %v777_v35 }
 0x15e   : > { %v1380_v12 = vadd.f32 %v1379_v29, %v1378_v47 }
 0x15f   : > { %v1237_v50 = vmax.f32 %v1212_v1, 0.0  ;;  %v1213_v54 = vadd.f32 %v2477_v27, %v1181_v38 }
 0x161   : > { %1263 = vst.msk [vmem:[%s2483_s17 + $0x60] sm:$0xff] %vm1250_vm4, %v1237_v50  ;;  %v1299_v57 = vsel %vm1250_vm4, %v1237_v50, 0.0  ;;  %v1345_v61 = vmul.f32 %v1237_v50, %v1237_v50  ;;  %v1238_v62 = vmax.f32 %v1213_v54, 0.0  ;;  %v789_v3 = vpop.f32.mrb[56].mxu1  ;;  %v1122_v58 = vpop.f32.mrb[56].mxu0 }
 0x162   : > { %v1300_v4 = vadd.f32 %v1299_v57, %v1298_v60  ;;  %v790_v16 = vadd.f32 %v789_v3, %v2435_v42  ;;  %v1182_v28 = vadd.f32 %v1122_v58, %v782_v14  ;;  %v1816_v21 = vpop.f32.mrb[57].mxu1  ;;  %v1876_v18 = vpop.f32.mrb[57].mxu0 }
 0x163   : > { %v1381_v5 = vsel %vm1250_vm4, %v1345_v61, 0.0  ;;  %1264 = vst.msk [vmem:[%s2483_s17 + $0x68] sm:$0xff] %vm1250_vm4, %v1238_v62  ;;  %v1301_v7 = vsel %vm1250_vm4, %v1238_v62, 0.0  ;;  %v1346_v26 = vmul.f32 %v1238_v62, %v1238_v62  ;;  %v792_v6 = vpop.f32.mrb[58].mxu1  ;;  %v1125_v22 = vpop.f32.mrb[58].mxu0 }
 0x164   : > { %v1382_v34 = vadd.f32 %v1381_v5, %v1380_v12  ;;  %v1302_v23 = vadd.f32 %v1301_v7, %v1300_v4  ;;  %v1214_v0 = vadd.f32 %v2477_v27, %v1182_v28  ;;  %v793_v39 = vadd.f32 %v792_v6, %v2437_v45  ;;  %v1877_v42 = vpop.f32.mrb[59].mxu0  ;;  %v1817_v63 = vpop.f32.mrb[59].mxu1 }
 0x165   : > { %v1383_v35 = vsel %vm1250_vm4, %v1346_v26, 0.0  ;;  %v1183_v40 = vadd.f32 %v1125_v22, %v785_v32 }
 0x166   : > { %v1384_v55 = vadd.f32 %v1383_v35, %v1382_v34  ;;  %v1239_v46 = vmax.f32 %v1214_v0, 0.0 }
 0x167   : > { %v1215_v48 = vadd.f32 %v2477_v27, %v1183_v40 }
 0x168   : > { %1265 = vst.msk [vmem:[%s2483_s17 + $0x70] sm:$0xff] %vm1250_vm4, %v1239_v46  ;;  %v1303_v49 = vsel %vm1250_vm4, %v1239_v46, 0.0  ;;  %v1347_v31 = vmul.f32 %v1239_v46, %v1239_v46 }
 0x169   : > { %v1304_v56 = vadd.f32 %v1303_v49, %v1302_v23  ;;  %v1240_v36 = vmax.f32 %v1215_v48, 0.0  ;;  %v797_v51 = vpop.f32.mrb[60].mxu1  ;;  %v1130_v33 = vpop.f32.mrb[60].mxu0 }
 0x16a   : > { %v1385_v45 = vsel %vm1250_vm4, %v1347_v31, 0.0  ;;  %v798_v9 = vadd.f32 %v797_v51, %v2441_v10  ;;  %v1184_v11 = vadd.f32 %v1130_v33, %v790_v16  ;;  %v1820_v8 = vpop.f32.mrb[61].mxu1  ;;  %v1880_v41 = vpop.f32.mrb[61].mxu0 }
 0x16b   : > { %v1386_v13 = vadd.f32 %v1385_v45, %v1384_v55  ;;  %1266 = vst.msk [vmem:[%s2483_s17 + $0x78] sm:$0xff] %vm1250_vm4, %v1240_v36  ;;  %v1305_v14 = vsel %vm1250_vm4, %v1240_v36, 0.0  ;;  %v1348_v24 = vmul.f32 %v1240_v36, %v1240_v36  ;;  %v800_v25 = vpop.f32.mrb[62].mxu1  ;;  %v1133_v15 = vpop.f32.mrb[62].mxu0 }
 0x16c   : > { %v1306_v43 = vadd.f32 %v1305_v14, %v1304_v56  ;;  %v1216_v44 = vadd.f32 %v2477_v27, %v1184_v11  ;;  %v801_v30 = vadd.f32 %v800_v25, %v2445_v37  ;;  %v1185_v47 = vadd.f32 %v1133_v15, %v793_v39  ;;  %v1881_v10 = vpop.f32.mrb[63].mxu0  ;;  %v1821_v60 = vpop.f32.mrb[63].mxu1 }
 0x16d   : > { %v1387_v29 = vsel %vm1250_vm4, %v1348_v24, 0.0 }
 0x16e   : > { %v1388_v32 = vadd.f32 %v1387_v29, %v1386_v13  ;;  %v1241_v52 = vmax.f32 %v1216_v44, 0.0  ;;  %v1217_v19 = vadd.f32 %v2477_v27, %v1185_v47 }
 0x170   : > { %1267 = vst.msk [vmem:[%s2483_s17 + $0x80] sm:$0xff] %vm1250_vm4, %v1241_v52  ;;  %v1307_v1 = vsel %vm1250_vm4, %v1241_v52, 0.0  ;;  %v1349_v38 = vmul.f32 %v1241_v52, %v1241_v52  ;;  %v1242_v12 = vmax.f32 %v1217_v19, 0.0 }
 0x171   : > { %v1308_v50 = vadd.f32 %v1307_v1, %v1306_v43  ;;  %v805_v54 = vpop.f32.mrb[64].mxu1  ;;  %v1138_v57 = vpop.f32.mrb[64].mxu0 }
 0x172   : > { %v1389_v37 = vsel %vm1250_vm4, %v1349_v38, 0.0  ;;  %1268 = vst.msk [vmem:[%s2483_s17 + $0x88] sm:$0xff] %vm1250_vm4, %v1242_v12  ;;  %v1309_v61 = vsel %vm1250_vm4, %v1242_v12, 0.0  ;;  %v1350_v62 = vmul.f32 %v1242_v12, %v1242_v12  ;;  %v806_v3 = vadd.f32 %v805_v54, %v2449_v53  ;;  %v1824_v58 = vpop.f32.mrb[65].mxu1  ;;  %v1884_v4 = vpop.f32.mrb[65].mxu0 }
 0x173   : > { %v1390_v16 = vadd.f32 %v1389_v37, %v1388_v32  ;;  %v1310_v28 = vadd.f32 %v1309_v61, %v1308_v50  ;;  %v1186_v21 = vadd.f32 %v1138_v57, %v798_v9  ;;  %v808_v18 = vpop.f32.mrb[66].mxu1  ;;  %v1141_v5 = vpop.f32.mrb[66].mxu0 }
 0x174   : > { %v1391_v7 = vsel %vm1250_vm4, %v1350_v62, 0.0  ;;  %v809_v26 = vadd.f32 %v808_v18, %v2453_v59  ;;  %v1187_v6 = vadd.f32 %v1141_v5, %v801_v30  ;;  %v1885_v22 = vpop.f32.mrb[67].mxu0  ;;  %v1825_v34 = vpop.f32.mrb[67].mxu1 }
 0x175   : > { %v1392_v23 = vadd.f32 %v1391_v7, %v1390_v16  ;;  %v1218_v0 = vadd.f32 %v2477_v27, %v1186_v21 }
 0x176   : > { %v1219_v53 = vadd.f32 %v2477_v27, %v1187_v6 }
 0x177   : > { %v1243_v39 = vmax.f32 %v1218_v0, 0.0 }
 0x178   : > { %v1244_v42 = vmax.f32 %v1219_v53, 0.0 }
 0x179   : > { %1269 = vst.msk [vmem:[%s2483_s17 + $0x90] sm:$0xff] %vm1250_vm4, %v1243_v39  ;;  %v1311_v63 = vsel %vm1250_vm4, %v1243_v39, 0.0  ;;  %v1351_v35 = vmul.f32 %v1243_v39, %v1243_v39  ;;  %v813_v40 = vpop.f32.mrb[68].mxu1  ;;  %v1146_v55 = vpop.f32.mrb[68].mxu0 }
 0x17a   : > { %v1312_v46 = vadd.f32 %v1311_v63, %v1310_v28  ;;  %1270 = vst.msk [vmem:[%s2483_s17 + $0x98] sm:$0xff] %vm1250_vm4, %v1244_v42  ;;  %v1313_v59 = vsel %vm1250_vm4, %v1244_v42, 0.0  ;;  %v1352_v48 = vmul.f32 %v1244_v42, %v1244_v42  ;;  %v814_v49 = vadd.f32 %v813_v40, %v2457_v2  ;;  %v1828_v31 = vpop.f32.mrb[69].mxu1  ;;  %v1888_v56 = vpop.f32.mrb[69].mxu0 }
 0x17b   : > { %v1393_v36 = vsel %vm1250_vm4, %v1351_v35, 0.0  ;;  %v1188_v51 = vadd.f32 %v1146_v55, %v806_v3  ;;  %v816_v33 = vpop.f32.mrb[70].mxu1  ;;  %v1149_v45 = vpop.f32.mrb[70].mxu0 }
 0x17c   : > { %v1394_v9 = vadd.f32 %v1393_v36, %v1392_v23  ;;  %v1314_v11 = vadd.f32 %v1313_v59, %v1312_v46  ;;  %v1395_v8 = vsel %vm1250_vm4, %v1352_v48, 0.0  ;;  %v817_v41 = vadd.f32 %v816_v33, %v2461_v17  ;;  %v1889_v13 = vpop.f32.mrb[71].mxu0  ;;  %v1829_v14 = vpop.f32.mrb[71].mxu1 }
 0x17d   : > { %v1220_v24 = vadd.f32 %v2477_v27, %v1188_v51  ;;  %v1189_v25 = vadd.f32 %v1149_v45, %v809_v26 }
 0x17e   : > { %v1396_v2 = vadd.f32 %v1395_v8, %v1394_v9 }
 0x17f   : > { %v1245_v15 = vmax.f32 %v1220_v24, 0.0  ;;  %v1221_v43 = vadd.f32 %v2477_v27, %v1189_v25 }
 0x181   : > { %1271 = vst.msk [vmem:[%s2483_s17 + $0xa0] sm:$0xff] %vm1250_vm4, %v1245_v15  ;;  %v1315_v44 = vsel %vm1250_vm4, %v1245_v15, 0.0  ;;  %v1353_v30 = vmul.f32 %v1245_v15, %v1245_v15  ;;  %v1246_v47 = vmax.f32 %v1221_v43, 0.0  ;;  %v821_v10 = vpop.f32.mrb[72].mxu1  ;;  %v1154_v60 = vpop.f32.mrb[72].mxu0 }
 0x182   : > { %v1316_v29 = vadd.f32 %v1315_v44, %v1314_v11  ;;  %v822_v17 = vadd.f32 %v821_v10, %v2465_v20  ;;  %v1190_v32 = vadd.f32 %v1154_v60, %v814_v49  ;;  %v1892_v52 = vpop.f32.mrb[73].mxu0  ;;  %v1832_v19 = vpop.f32.mrb[73].mxu1 }
 0x183   : > { %v1397_v1 = vsel %vm1250_vm4, %v1353_v30, 0.0  ;;  %1272 = vst.msk [vmem:[%s2483_s17 + $0xa8] sm:$0xff] %vm1250_vm4, %v1246_v47  ;;  %v1317_v38 = vsel %vm1250_vm4, %v1246_v47, 0.0  ;;  %v1354_v12 = vmul.f32 %v1246_v47, %v1246_v47  ;;  %v1157_v50 = vpop.f32.mrb[74].mxu0  ;;  %v824_v54 = vpop.f32.mrb[74].mxu1 }
 0x184   : > { %v1398_v57 = vadd.f32 %v1397_v1, %v1396_v2  ;;  %v1318_v37 = vadd.f32 %v1317_v38, %v1316_v29  ;;  %v1222_v61 = vadd.f32 %v2477_v27, %v1190_v32  ;;  %v1191_v62 = vadd.f32 %v1157_v50, %v817_v41  ;;  %v1893_v20 = vpop.f32.mrb[75].mxu0  ;;  %v1833_v3 = vpop.f32.mrb[75].mxu1 }
 0x185   : > { %v1399_v58 = vsel %vm1250_vm4, %v1354_v12, 0.0 }
 0x186   : > { %v1400_v4 = vadd.f32 %v1399_v58, %v1398_v57  ;;  %v1247_v16 = vmax.f32 %v1222_v61, 0.0  ;;  %v1223_v28 = vadd.f32 %v2477_v27, %v1191_v62 }
 0x188   : > { %1273 = vst.msk [vmem:[%s2483_s17 + $0xb0] sm:$0xff] %vm1250_vm4, %v1247_v16  ;;  %v1319_v21 = vsel %vm1250_vm4, %v1247_v16, 0.0  ;;  %v1355_v18 = vmul.f32 %v1247_v16, %v1247_v16  ;;  %v1248_v5 = vmax.f32 %v1223_v28, 0.0 }
 0x189   : > { %v1320_v7 = vadd.f32 %v1319_v21, %v1318_v37  ;;  %v1162_v26 = vpop.f32.mrb[76].mxu0 }
 0x18a   : > { %v1401_v6 = vsel %vm1250_vm4, %v1355_v18, 0.0  ;;  %1274 = vst.msk [vmem:[%s2483_s17 + $0xb8] sm:$0xff] %vm1250_vm4, %v1248_v5  ;;  %v1321_v22 = vsel %vm1250_vm4, %v1248_v5, 0.0  ;;  %v1356_v34 = vmul.f32 %v1248_v5, %v1248_v5  ;;  %v1192_v23 = vadd.f32 %v1162_v26, %v822_v17  ;;  %v1896_v0 = vpop.f32.mrb[77].mxu0 }
 0x18b   : > { %v1402_v53 = vadd.f32 %v1401_v6, %v1400_v4  ;;  %v1322_v39 = vadd.f32 %v1321_v22, %v1320_v7  ;;  %v1165_v42 = vpop.f32.mrb[78].mxu0 }
 0x18c   : > { %v1403_v63 = vsel %vm1250_vm4, %v1356_v34, 0.0  ;;  %v1224_v35 = vadd.f32 %v2477_v27, %v1192_v23  ;;  %v1897_v40 = vpop.f32.mrb[79].mxu0 }
 0x18d   : > { %v1404_v55 = vadd.f32 %v1403_v63, %v1402_v53 }
 0x18e   : > { %v1249_v46 = vmax.f32 %v1224_v35, 0.0 }
 0x190   : > { %1275 = vst.msk [vmem:[%s2483_s17 + $0xc0] sm:$0xff] %vm1250_vm4, %v1249_v46  ;;  %v1323_v59 = vsel %vm1250_vm4, %v1249_v46, 0.0  ;;  %v1357_v48 = vmul.f32 %v1249_v46, %v1249_v46 }
 0x191   : > { %v1324_v49 = vadd.f32 %v1323_v59, %v1322_v39 }
 0x192   : > { %v1405_v31 = vsel %vm1250_vm4, %v1357_v48, 0.0 }
 0x193   : > { %v1325_v56 = vrot.slane %v1324_v49, 4  ;;  %v1406_v36 = vadd.f32 %v1405_v31, %v1404_v55 }
 0x195   : > { %v1326_v51 = vadd.f32 %v1325_v56, %v1324_v49  ;;  %v1407_v33 = vrot.slane %v1406_v36, 4 }
 0x197   : > { %v1327_v45 = vrot.slane %v1326_v51, 2  ;;  %v1408_v9 = vadd.f32 %v1407_v33, %v1406_v36 }
 0x199   : > { %v1328_v27 = vadd.f32 %v1327_v45, %v1326_v51  ;;  %v1409_v11 = vrot.slane %v1408_v9, 2 }
 0x19b   : > { %v1329_v8 = vrot.slane %v1328_v27, 1  ;;  %v1410_v41 = vadd.f32 %v1409_v11, %v1408_v9 }
 0x19d   : > { %v1330_v13 = vadd.f32 %v1329_v8, %v1328_v27  ;;  %v1411_v14 = vrot.slane %v1410_v41, 1 }
 0x19f   : > { %1332 = vst.msk [vmem:[%s238_s22] sm:$0x1] %vm1331_vm5, %v1330_v13  ;;  %v1412_v24 = vadd.f32 %v1411_v14, %v1410_v41 }
 0x1a1   : > { %1413 = vst.msk [vmem:[%s241_s25] sm:$0x1] %vm1331_vm5, %v1412_v24 }
 0x1a2 PF: > { %s16_s18 = sadd.s32 1, %s1985_s18  }
 0x1a3   : > { %p13_p4 = scmp.ge.s32.totalorder %s16_s18, 4  }
 0x1a5   :  { %15 = sbr.rel (!%p13_p4) target bundleno = 1 (0x1), region = 88 }

// kernel: encoder_forward.11
= control target key start
LH: loop header
LB: loop body
LE: loop exit
PB: predicated region body
PF: predicated region fallthrough
CT: control target
= control target key end

     0   :  { %s2019_s18 = smov 0   ;;  %s2641_s0 = inlined_call_operand.vmem [shape: bf16[2,220,96], index: 0, kind: input, shape index: {}]   ;;  %s2642_s1 = inlined_call_operand.vmem [shape: bf16[3,96,64], index: 1, kind: input, shape index: {}]   ;;  %s2643_s2 = inlined_call_operand.vmem [shape: f32[1,64], index: 2, kind: input, shape index: {}]   ;;  %s2644_s3 = inlined_call_operand.vmem [shape: f32[2,200,64], index: 3, kind: output, shape index: {0}]   ;;  %s2645_s4 = inlined_call_operand.vmem [shape: f32[2,1,64], index: 4, kind: output, shape index: {1}]   ;;  %s2646_s5 = inlined_call_operand.vmem [shape: f32[2,1,64], index: 5, kind: output, shape index: {2}]  }
   0x1 LB: > { %s1519_s19 = sadd.s32 4294967295, %s1985_s18   ;;  %p1523_p0 = scmp.ge.s32.totalorder %s1985_s18, 1  ;;  %s1985_s18 = sphi %s2019_s18, %s16_s18  }
   0x2   : > { %p192_p1 = scmp.lt.s32.totalorder %s1985_s18, 3 }
   0x4   : > { %p193_p2 = pnand %p1523_p0, %p192_p1 }
   0x5   : > { %v1922_v0 = vld [vmem:[%s2642_s1 + $0x30] sm:$0xff] (!%p193_p2)   ;;  %v1987_v1 = vmov (!%p193_p2), 0.0   ;;  %v1923_v2 = vld [vmem:[%s2642_s1 + $0x38] sm:$0xff] (!%p193_p2)   ;;  %p226_p3 = scmp.lt.s32.totalorder (!%p193_p2), %s1519_s19, 1  ;;  %vm1988_vm0 = vmmov (!%p193_p2), 0   ;;  %v1924_v3 = vld [vmem:[%s2642_s1 + $0x40] sm:$0xff] (!%p193_p2)  }
   0x6   : > { %196 = sbr.rel (%p193_p2) target bundleno = 418 (0x1a2), region = 32  ;;  %1706 = vmatprep.subr.bf16.mxu0 (!%p193_p2), %v1987_v1  ;;  %1898 = vmatprep.subr.bf16.mxu1 (!%p193_p2), %v1987_v1  ;;  %v1925_v4 = vld [vmem:[%s2642_s1 + $0x48] sm:$0xff] (!%p193_p2)   ;;  %v1926_v17 = vld [vmem:[%s2642_s1 + $0x50] sm:$0xff] (!%p193_p2)   ;;  %v1927_v26 = vld [vmem:[%s2642_s1 + $0x58] sm:$0xff] (!%p193_p2)   ;;  %vm361_vm1 = vcmask (!%p193_p2), 1046528   ;;  %vm423_vm2 = vcmask (!%p193_p2), 785408  }
   0x7   : > { %1707 = vmatpush3.bf16.msra.mxu0 (!%p193_p2), %v1922_v0  ;;  %1904 = vmatpush3.bf16.msra.mxu1 (!%p193_p2), %v1922_v0  ;;  %v1932_v35 = vld [vmem:[%s2642_s1 + $0x60] sm:$0xff] (!%p193_p2)   ;;  %v1936_v41 = vld [vmem:[%s2642_s1 + $0x68] sm:$0xff] (!%p193_p2)   ;;  %v1940_v52 = vld [vmem:[%s2642_s1 + $0x70] sm:$0xff] (!%p193_p2)   ;;  %vm931_vm3 = vcmask (!%p193_p2), 1045504   ;;  %vm1250_vm4 = vcmask (!%p193_p2), 523264   ;;  %vm1331_vm5 = vcmask (!%p193_p2), 516096  }
   0x8   : > { %1708 = vmatprep.subr.bf16.mxu0 (!%p193_p2), %v1987_v1  ;;  %1899 = vmatprep.subr.bf16.mxu1 (!%p193_p2), %v1987_v1  ;;  %v1933_v36 = vld [vmem:[%s2642_s1] sm:$0xff] (!%p193_p2)   ;;  %v1937_v46 = vld [vmem:[%s2642_s1 + $0x8] sm:$0xff] (!%p193_p2)   ;;  %v1941_v53 = vld [vmem:[%s2642_s1 + $0x10] sm:$0xff] (!%p193_p2)  }
   0x9   : > { %1718 = vmatprep.mubr.msk.bf16.mxu0 (!%p193_p2), %vm1988_vm0, %v1987_v1  ;;  %1746 = vmatprep.mubr.msk.bf16.mxu1 (!%p193_p2), %vm1988_vm0, %v1987_v1  ;;  %v1944_v57 = vld [vmem:[%s2642_s1 + $0x78] sm:$0xff] (!%p193_p2)   ;;  %v1948_v62 = vld [vmem:[%s2642_s1 + $0x20] sm:$0xff] (!%p193_p2)  }
   0xa   : > { %v1945_v59 = vld [vmem:[%s2642_s1 + $0x18] sm:$0xff] (!%p193_p2)   ;;  %v1949_v63 = vld [vmem:[%s2642_s1 + $0x80] sm:$0xff] (!%p193_p2)  }
   0xb   : > { %1709 = vmatpush3.bf16.msra.mxu0 (!%p193_p2), %v1923_v2  ;;  %1905 = vmatpush3.bf16.msra.mxu1 (!%p193_p2), %v1923_v2 }
   0xc   : > { %1710 = vmatprep.subr.bf16.mxu0 (!%p193_p2), %v1987_v1  ;;  %1900 = vmatprep.subr.bf16.mxu1 (!%p193_p2), %v1987_v1 }
   0xd   : > { %s2648_s19 = smov (!%p226_p3, %s1519_s19), 1 }
   0xe   : > { %s1910_s26 = smul.u32 112, %s2648_s19  ;;  %s238_s22 = scalar_lea.vmem %s2645_s4, %s2648_s19 }
   0xf   : > { %1711 = vmatpush3.bf16.msra.mxu0 %v1924_v3  ;;  %1906 = vmatpush3.bf16.msra.mxu1 %v1924_v3  ;;  %s241_s25 = scalar_lea.vmem %s2646_s5, %s2648_s19 }
  0x10   : > { %s2052_s29 = scalar_lea.vmem %s2641_s0, %s1910_s26  ;;  %1712 = vmatprep.subr.bf16.mxu0 %v1987_v1  ;;  %1901 = vmatprep.subr.bf16.mxu1 %v1987_v1 }
  0x11   : > { %v2058_v5 = vld [vmem:[%s2052_s29 + $0xc] sm:$0xf]  ;;  %v2061_v6 = vld [vmem:[%s2052_s29 + $0x10] sm:$0xf]  ;;  %v2064_v7 = vld [vmem:[%s2052_s29 + $0x8] sm:$0xf] }
  0x12   : > { %v280_v8 = vld [vmem:[%s2052_s29 + $0x4] sm:$0xe]  ;;  %v2068_v9 = vld [vmem:[%s2052_s29 + $0x3c] sm:$0xf]  ;;  %v1539_v10 = vcombine.low %v2058_v5, %v2061_v6  ;;  %v2075_v11 = vld [vmem:[%s2052_s29 + $0x40] sm:$0xf] }
  0x13   : > { %v2078_v12 = vld [vmem:[%s2052_s29 + $0x44] sm:$0xf]  ;;  %v2081_v13 = vld [vmem:[%s2052_s29 + $0x48] sm:$0xf]  ;;  %v2084_v14 = vld [vmem:[%s2052_s29 + $0x4c] sm:$0xf]  ;;  %1713 = vmatpush3.bf16.msra.mxu0 %v1925_v4  ;;  %1907 = vmatpush3.bf16.msra.mxu1 %v1925_v4  ;;  %v1538_v18 = vcombine.low %v280_v8, %v2064_v7  ;;  %v1545_v19 = vcombine.low %v2068_v9, %v2075_v11 }
  0x14   : > { %v1578_v15 = vcombine.low %v2075_v11, %v2078_v12  ;;  %v1579_v16 = vcombine.low %v2081_v13, %v2084_v14  ;;  %v1546_v20 = vcombine.low %v2078_v12, %v2081_v13  ;;  %1714 = vmatprep.subr.bf16.mxu0 %v1987_v1  ;;  %1902 = vmatprep.subr.bf16.mxu1 %v1987_v1  ;;  %v363_v21 = vrot.slane %v1539_v10, 1  ;;  %v2101_v22 = vld [vmem:[%s2052_s29 + $0x14] sm:$0xf]  ;;  %v2104_v23 = vld [vmem:[%s2052_s29 + $0x18] sm:$0xf]  ;;  %v2215_v0 = vld [vmem:[%s2052_s29 + $0x48] sm:$0xff]  }
  0x15   : > { %v2107_v24 = vld [vmem:[%s2052_s29 + $0x50] sm:$0xf]  ;;  %v2110_v25 = vld [vmem:[%s2052_s29 + $0x54] sm:$0xf]  ;;  %v362_v27 = vrot.slane %v1538_v18, 1  ;;  %v2115_v28 = vrot.slane %v1545_v19, 1  ;;  %v1540_v31 = vcombine.low %v2101_v22, %v2104_v23 }
  0x16   : > { %v377_v29 = vrot.slane %v1546_v20, 1  ;;  %v1580_v30 = vcombine.low %v2107_v24, %v2110_v25  ;;  %v1547_v32 = vcombine.low %v2084_v14, %v2107_v24  ;;  %v2137_v39 = vld [vmem:[%s2052_s29 + $0x1c] sm:$0xf]  ;;  %v2140_v40 = vld [vmem:[%s2052_s29 + $0x20] sm:$0xf]  ;;  %v1972_v8 = vld [vmem:[%s2052_s29 + $0x50] sm:$0xff]  }
  0x17   : > { %1715 = vmatpush3.bf16.msra.mxu0 %v1926_v17  ;;  %1908 = vmatpush3.bf16.msra.mxu1 %v1926_v17  ;;  %v364_v33 = vsel %vm361_vm1, %v362_v27, %v363_v21  ;;  %v365_v37 = vrot.slane %v1540_v31, 1  ;;  %v2148_v42 = vld [vmem:[%s2052_s29 + $0x58] sm:$0xf]  ;;  %v2151_v43 = vld [vmem:[%s2052_s29 + $0x5c] sm:$0xf]  ;;  %v1541_v48 = vcombine.low %v2137_v39, %v2140_v40  ;;  %v947_v10 = vrot.slane %v2215_v0, 2 }
  0x18   : > { %1716 = vmatprep.subr.bf16.mxu0 %v1987_v1  ;;  %1903 = vmatprep.subr.bf16.mxu1 %v1987_v1  ;;  %v378_v34 = vsel %vm361_vm1, %v2115_v28, %v377_v29  ;;  %v379_v38 = vrot.slane %v1547_v32, 1  ;;  %v2154_v44 = vld [vmem:[%s2052_s29 + $0x38] sm:$0xf]  ;;  %v1581_v47 = vcombine.low %v2148_v42, %v2151_v43  ;;  %v1548_v51 = vcombine.low %v2110_v25, %v2148_v42  ;;  %v2184_v55 = vld [vmem:[%s2052_s29 + $0x24] sm:$0xf] }
  0x19   : > { %v1577_v45 = vcombine.low %v2154_v44, %v2068_v9  ;;  %v366_v49 = vsel %vm361_vm1, %v363_v21, %v365_v37  ;;  %v367_v54 = vrot.slane %v1541_v48, 1  ;;  %v2189_v56 = vld [vmem:[%s2052_s29 + $0x28] sm:$0xf]  ;;  %v2202_v60 = vld [vmem:[%s2052_s29 + $0x60] sm:$0xf]  ;;  %v1974_v17 = vld [vmem:[%s2052_s29 + $0x58] sm:$0xff]  }
  0x1a   : > { %v380_v50 = vsel %vm361_vm1, %v377_v29, %v379_v38  ;;  %v381_v58 = vrot.slane %v1548_v51, 1  ;;  %v1542_v61 = vcombine.low %v2184_v55, %v2189_v56  ;;  %v1549_v4 = vcombine.low %v2151_v43, %v2202_v60  ;;  %v1976_v19 = vld [vmem:[%s2052_s29 + $0x60] sm:$0xff]   ;;  %v2234_v27 = vld [vmem:[%s2052_s29 + $0x2c] sm:$0xf] }
  0x1b   : > { %1717 = vmatpush3.bf16.msra.mxu0 %v1927_v26  ;;  %1909 = vmatpush3.bf16.msra.mxu1 %v1927_v26  ;;  %v368_v2 = vsel %vm361_vm1, %v365_v37, %v367_v54  ;;  %v949_v18 = vrot.slane %v1972_v8, 2  ;;  %v951_v21 = vrot.slane %v1974_v17, 2  ;;  %v953_v31 = vrot.slane %v1976_v19, 2  ;;  %v2242_v32 = vld [vmem:[%s2052_s29 + $0x68] sm:$0x3f]  }
  0x1c   : > { %1834 = vmatprep.subr.bf16.mxu0 %v1987_v1  ;;  %1770 = vmatprep.subr.bf16.mxu1 %v1987_v1  ;;  %v382_v3 = vsel %vm361_vm1, %v379_v38, %v381_v58  ;;  %v369_v20 = vrot.slane %v1542_v61, 1  ;;  %v383_v26 = vrot.slane %v1549_v4, 1  ;;  %v955_v38 = vrot.slane %v2242_v32, 2 }
  0x1d   : > { %v2239_v29 = vsel %vm931_vm3, %v947_v10, %v949_v18  ;;  %v2259_v37 = vsel %vm931_vm3, %v951_v21, %v953_v31  ;;  %v1571_v17 = vcombine.low %v2064_v7, %v2058_v5  ;;  %v1960_v7 = vld [vmem:[%s2052_s29 + $0x20] sm:$0xff]   ;;  %v1582_v9 = vcombine.low %v2202_v60, %v2202_v60 }
  0x1e   : > { %1719 = vmatmul.mubr.msk.bf16.vlgmr.msra.gmra.mrb[0].mxu0 %vm423_vm2, %v364_v33  ;;  %1747 = vmatmul.mubr.msk.bf16.vlgmr.msra.gmra.mrb[0].mxu1 %vm423_vm2, %v378_v34  ;;  %v2245_v33 = vld [vmem:[%s2052_s29 + $0x30] sm:$0xf]  ;;  %v1951_v34 = vld [vmem:[%s2642_s1 + $0x28] sm:$0xff]  }
  0x1f   : > { %1835 = vmatpush3.bf16.msra.mxu0 %v1932_v35  ;;  %1722 = vmatprep.mubr.msk.bf16.mxu0 %vm1988_vm0, %v1987_v1  ;;  %v1953_v35 = vld [vmem:[%s2642_s1 + $0x88] sm:$0xff]   ;;  %v1543_v48 = vcombine.low %v2234_v27, %v2245_v33 }
  0x20   : > { %1750 = vmatprep.mubr.msk.bf16.mxu1 %vm1988_vm0, %v1987_v1  ;;  %1771 = vmatpush3.bf16.msra.mxu1 %v1933_v36  ;;  %v2254_v36 = vsel %vm931_vm3, %v949_v18, %v951_v21  ;;  %v1958_v18 = vld [vmem:[%s2052_s29 + $0x18] sm:$0xff]   ;;  %v937_v21 = vrot.slane %v1960_v7, 2 }
  0x21   : > { %1836 = vmatprep.subr.bf16.mxu0 %v1987_v1  ;;  %1772 = vmatprep.subr.bf16.mxu1 %v1987_v1  ;;  %v371_v51 = vrot.slane %v1543_v48, 1  ;;  %v935_v19 = vrot.slane %v1958_v18, 2 }
  0x23   : > { %1837 = vmatpush3.bf16.msra.mxu0 %v1936_v41  ;;  %v370_v41 = vsel %vm361_vm1, %v367_v54, %v369_v20  ;;  %v372_v54 = vsel %vm361_vm1, %v369_v20, %v371_v51  ;;  %v1572_v20 = vcombine.low %v2061_v6, %v2101_v22  ;;  %v938_v6 = vsel %vm931_vm3, %v935_v19, %v937_v21  ;;  %v1962_v22 = vld [vmem:[%s2052_s29 + $0x28] sm:$0xff]  }
  0x24   : > { %1773 = vmatpush3.bf16.msra.mxu1 %v1937_v46  ;;  %1838 = vmatprep.subr.bf16.mxu0 %v1987_v1  ;;  %v384_v46 = vsel %vm361_vm1, %v381_v58, %v383_v26 }
  0x25   : > { %1774 = vmatprep.subr.bf16.mxu1 %v1987_v1 }
  0x26   : > { %1723 = vmatmul.mubr.msk.bf16.gmra.mrb[4].mxu0 %vm423_vm2, %v366_v49  ;;  %1751 = vmatmul.mubr.msk.bf16.gmra.mrb[4].mxu1 %vm423_vm2, %v380_v50  ;;  %v1947_v49 = vld [vmem:[%s2052_s29 + $0x64] sm:$0x1f]   ;;  %v2270_v50 = vsel %vm931_vm3, %v953_v31, %v955_v38  ;;  %v939_v31 = vrot.slane %v1962_v22, 2 }
  0x27   : > { %1726 = vmatprep.mubr.msk.bf16.mxu0 %vm1988_vm0, %v1987_v1  ;;  %1754 = vmatprep.mubr.msk.bf16.mxu1 %vm1988_vm0, %v1987_v1 }
  0x28   : > { %1839 = vmatpush3.bf16.msra.mxu0 %v1940_v52  ;;  %1775 = vmatpush3.bf16.msra.mxu1 %v1941_v53  ;;  %v385_v52 = vrot.slane %v1947_v49, 1  ;;  %v2279_v53 = vld [vmem:[%s2052_s29 + $0x34] sm:$0xf] }
  0x29   : > { %1840 = vmatprep.subr.bf16.mxu0 %v1987_v1  ;;  %1776 = vmatprep.subr.bf16.mxu1 %v1987_v1  ;;  %v1544_v58 = vcombine.low %v2279_v53, %v2154_v44  ;;  %v1576_v48 = vcombine.low %v2245_v33, %v2279_v53 }
  0x2c   : > { %1841 = vmatpush3.bf16.msra.mxu0 %v1944_v57  ;;  %1777 = vmatpush3.bf16.msra.mxu1 %v1945_v59  ;;  %v386_v57 = vsel %vm361_vm1, %v383_v26, %v385_v52  ;;  %v373_v59 = vrot.slane %v1544_v58, 1  ;;  %v1573_v26 = vcombine.low %v2104_v23, %v2137_v39  ;;  %v940_v23 = vsel %vm931_vm3, %v937_v21, %v939_v31  ;;  %v1964_v39 = vld [vmem:[%s2052_s29 + $0x30] sm:$0xff]  }
  0x2d   : > { %1778 = vmatprep.subr.bf16.mxu1 %v1987_v1  ;;  %1842 = vmatprep.subr.bf16.mxu0 %v1987_v1 }
  0x2e   : > { %1727 = vmatmul.mubr.msk.bf16.gmra.mrb[8].mxu0 %vm423_vm2, %v368_v2  ;;  %1755 = vmatmul.mubr.msk.bf16.gmra.mrb[8].mxu1 %vm423_vm2, %v382_v3  ;;  %v374_v61 = vsel %vm361_vm1, %v371_v51, %v373_v59  ;;  %v1955_v2 = vld [vmem:[%s2052_s29 + $0x8] sm:$0xfc]   ;;  %v1956_v3 = vld [vmem:[%s2052_s29 + $0x10] sm:$0xff]  }
  0x2f   : > { %1730 = vmatprep.mubr.msk.bf16.mxu0 %vm1988_vm0, %v1987_v1  ;;  %1758 = vmatprep.mubr.msk.bf16.mxu1 %vm1988_vm0, %v1987_v1  ;;  %v932_v4 = vrot.slane %v1955_v2, 2  ;;  %v933_v8 = vrot.slane %v1956_v3, 2 }
  0x30   : > { %1779 = vmatpush3.bf16.msra.mxu1 %v1948_v62  ;;  %1843 = vmatpush3.bf16.msra.mxu0 %v1949_v63  ;;  %v1952_v62 = vld [vmem:[%s2052_s29] sm:$0xff]   ;;  %v376_v63 = vsel %vm361_vm1, %v373_v59, %v2115_v28 }
  0x31   : > { %1780 = vmatprep.subr.bf16.mxu1 %v1987_v1  ;;  %1844 = vmatprep.subr.bf16.mxu0 %v1987_v1  ;;  %v934_v28 = vsel %vm931_vm3, %v932_v4, %v933_v8  ;;  %v936_v5 = vsel %vm931_vm3, %v933_v8, %v935_v19 }
  0x34   : > { %1781 = vmatpush3.bf16.msra.mxu1 %v1951_v34  ;;  %1845 = vmatpush3.bf16.msra.mxu0 %v1953_v35  ;;  %v1574_v34 = vcombine.low %v2140_v40, %v2184_v55  ;;  %v941_v35 = vrot.slane %v1964_v39, 2  ;;  %v1966_v55 = vld [vmem:[%s2052_s29 + $0x38] sm:$0xff]  }
  0x36   : > { %1731 = vmatmul.mubr.msk.bf16.gmra.mrb[12].mxu0 %vm423_vm2, %v370_v41  ;;  %1759 = vmatmul.mubr.msk.bf16.gmra.mrb[12].mxu1 %vm423_vm2, %v384_v46  ;;  %v1575_v41 = vcombine.low %v2189_v56, %v2234_v27  ;;  %v942_v40 = vsel %vm931_vm3, %v939_v31, %v941_v35  ;;  %v943_v46 = vrot.slane %v1966_v55, 2  ;;  %v1968_v56 = vld [vmem:[%s2052_s29 + $0x40] sm:$0xff]   ;;  %s1911_s29 = smul.u32 200, %s2648_s19 }
  0x37   : > { %1734 = vmatprep.mubr.msk.bf16.mxu0 %vm1988_vm0, %v1987_v1  ;;  %1762 = vmatprep.mubr.msk.bf16.mxu1 %vm1988_vm0, %v1987_v1  ;;  %v945_v27 = vrot.slane %v1968_v56, 2 }
  0x38   : > { %v944_v49 = vsel %vm931_vm3, %v941_v35, %v943_v46  ;;  %s2483_s17 = scalar_lea.vmem %s2644_s3, %s1911_s29 }
  0x39   : > { %v946_v51 = vsel %vm931_vm3, %v943_v46, %v945_v27  ;;  %v948_v33 = vsel %vm931_vm3, %v945_v27, %v947_v10  ;;  %v2477_v27 = vld [vmem:[%s2643_s2] ss:$0 sm:$0xff] }
  0x3e   : > { %1735 = vmatmul.mubr.msk.bf16.gmra.mrb[16].mxu0 %vm423_vm2, %v372_v54  ;;  %1763 = vmatmul.mubr.msk.bf16.gmra.mrb[16].mxu1 %vm423_vm2, %v386_v57 }
  0x3f   : > { %1738 = vmatprep.mubr.msk.bf16.mxu0 %vm1988_vm0, %v1987_v1  ;;  %1766 = vmatprep.mubr.msk.bf16.mxu1 %vm1988_vm0, %v1987_v1 }
  0x46   : > { %1739 = vmatmul.mubr.msk.bf16.gmra.mrb[20].mxu0 %vm423_vm2, %v374_v61  ;;  %1767 = vmatmul.mubr.msk.bf16.gmra.mrb[20].mxu1 %vm423_vm2, %v385_v52 }
  0x47   : > { %1742 = vmatprep.mubr.msk.bf16.mxu0 %vm1988_vm0, %v1987_v1  ;;  %1782 = vmatprep.mubr.msk.bf16.mxu1 %vm1988_vm0, %v1987_v1 }
  0x4e   : > { %1743 = vmatmul.mubr.msk.bf16.gmra.mrb[24].mxu0 %vm423_vm2, %v376_v63  ;;  %1783 = vmatmul.mubr.msk.bf16.vlgmr.msra.gmra.mrb[24].mxu1 %vm423_vm2, %v1952_v62 }
  0x4f   : > { %1786 = vmatprep.mubr.msk.bf16.mxu1 %vm1988_vm0, %v1987_v1  ;;  %1846 = vmatprep.mubr.msk.bf16.mxu0 %vm1988_vm0, %v1987_v1 }
  0x56   : > { %1787 = vmatmul.mubr.msk.bf16.gmra.mrb[28].mxu1 %vm423_vm2, %v1571_v17  ;;  %1847 = vmatmul.mubr.msk.bf16.vlgmr.msra.gmra.mrb[28].mxu0 %vm423_vm2, %v934_v28 }
  0x57   : > { %1790 = vmatprep.mubr.msk.bf16.mxu1 %vm1988_vm0, %v1987_v1  ;;  %1850 = vmatprep.mubr.msk.bf16.mxu0 %vm1988_vm0, %v1987_v1 }
  0x5e   : > { %1791 = vmatmul.mubr.msk.bf16.gmra.mrb[32].mxu1 %vm423_vm2, %v1572_v20  ;;  %1851 = vmatmul.mubr.msk.bf16.gmra.mrb[32].mxu0 %vm423_vm2, %v936_v5 }
  0x5f   : > { %1794 = vmatprep.mubr.msk.bf16.mxu1 %vm1988_vm0, %v1987_v1  ;;  %1854 = vmatprep.mubr.msk.bf16.mxu0 %vm1988_vm0, %v1987_v1 }
  0x66   : > { %1795 = vmatmul.mubr.msk.bf16.gmra.mrb[36].mxu1 %vm423_vm2, %v1573_v26  ;;  %1855 = vmatmul.mubr.msk.bf16.gmra.mrb[36].mxu0 %vm423_vm2, %v938_v6 }
  0x67   : > { %1798 = vmatprep.mubr.msk.bf16.mxu1 %vm1988_vm0, %v1987_v1  ;;  %1858 = vmatprep.mubr.msk.bf16.mxu0 %vm1988_vm0, %v1987_v1 }
  0x6e   : > { %1799 = vmatmul.mubr.msk.bf16.gmra.mrb[40].mxu1 %vm423_vm2, %v1574_v34  ;;  %1859 = vmatmul.mubr.msk.bf16.gmra.mrb[40].mxu0 %vm423_vm2, %v940_v23 }
  0x6f   : > { %1802 = vmatprep.mubr.msk.bf16.mxu1 %vm1988_vm0, %v1987_v1  ;;  %1862 = vmatprep.mubr.msk.bf16.mxu0 %vm1988_vm0, %v1987_v1 }
  0x76   : > { %1803 = vmatmul.mubr.msk.bf16.gmra.mrb[44].mxu1 %vm423_vm2, %v1575_v41  ;;  %1863 = vmatmul.mubr.msk.bf16.gmra.mrb[44].mxu0 %vm423_vm2, %v942_v40 }
  0x77   : > { %1806 = vmatprep.mubr.msk.bf16.mxu1 %vm1988_vm0, %v1987_v1  ;;  %1866 = vmatprep.mubr.msk.bf16.mxu0 %vm1988_vm0, %v1987_v1 }
  0x7e   : > { %1807 = vmatmul.mubr.msk.bf16.gmra.mrb[48].mxu1 %vm423_vm2, %v1576_v48  ;;  %1867 = vmatmul.mubr.msk.bf16.gmra.mrb[48].mxu0 %vm423_vm2, %v944_v49 }
  0x7f   : > { %1810 = vmatprep.mubr.msk.bf16.mxu1 %vm1988_vm0, %v1987_v1  ;;  %1870 = vmatprep.mubr.msk.bf16.mxu0 %vm1988_vm0, %v1987_v1 }
  0x86   : > { %1811 = vmatmul.mubr.msk.bf16.gmra.mrb[52].mxu1 %vm423_vm2, %v1577_v45  ;;  %1871 = vmatmul.mubr.msk.bf16.gmra.mrb[52].mxu0 %vm423_vm2, %v946_v51 }
  0x87   : > { %1814 = vmatprep.mubr.msk.bf16.mxu1 %vm1988_vm0, %v1987_v1  ;;  %1874 = vmatprep.mubr.msk.bf16.mxu0 %vm1988_vm0, %v1987_v1 }
  0x8e   : > { %1815 = vmatmul.mubr.msk.bf16.gmra.mrb[56].mxu1 %vm423_vm2, %v1578_v15  ;;  %1875 = vmatmul.mubr.msk.bf16.gmra.mrb[56].mxu0 %vm423_vm2, %v948_v33 }
  0x8f   : > { %1818 = vmatprep.mubr.msk.bf16.mxu1 %vm1988_vm0, %v1987_v1  ;;  %1878 = vmatprep.mubr.msk.bf16.mxu0 %vm1988_vm0, %v1987_v1 }
  0x96   : > { %1819 = vmatmul.mubr.msk.bf16.gmra.mrb[60].mxu1 %vm423_vm2, %v1579_v16  ;;  %1879 = vmatmul.mubr.msk.bf16.gmra.mrb[60].mxu0 %vm423_vm2, %v2239_v29 }
  0x97   : > { %1822 = vmatprep.mubr.msk.bf16.mxu1 %vm1988_vm0, %v1987_v1  ;;  %1882 = vmatprep.mubr.msk.bf16.mxu0 %vm1988_vm0, %v1987_v1 }
  0x9e   : > { %1823 = vmatmul.mubr.msk.bf16.gmra.mrb[64].mxu1 %vm423_vm2, %v1580_v30  ;;  %1883 = vmatmul.mubr.msk.bf16.gmra.mrb[64].mxu0 %vm423_vm2, %v2254_v36 }
  0x9f   : > { %1826 = vmatprep.mubr.msk.bf16.mxu1 %vm1988_vm0, %v1987_v1  ;;  %1886 = vmatprep.mubr.msk.bf16.mxu0 %vm1988_vm0, %v1987_v1 }
  0xa6   : > { %1827 = vmatmul.mubr.msk.bf16.gmra.mrb[68].mxu1 %vm423_vm2, %v1581_v47  ;;  %1887 = vmatmul.mubr.msk.bf16.gmra.mrb[68].mxu0 %vm423_vm2, %v2259_v37 }
  0xa7   : > { %1830 = vmatprep.mubr.msk.bf16.mxu1 %vm1988_vm0, %v1987_v1  ;;  %1890 = vmatprep.mubr.msk.bf16.mxu0 %vm1988_vm0, %v1987_v1 }
  0xae   : > { %1831 = vmatmul.mubr.msk.bf16.gmra.mrb[72].mxu1 %vm423_vm2, %v1582_v9  ;;  %1891 = vmatmul.mubr.msk.bf16.gmra.mrb[72].mxu0 %vm423_vm2, %v2270_v50 }
  0xaf   : > { %1894 = vmatprep.mubr.msk.bf16.mxu0 %vm1988_vm0, %v1987_v1 }
  0xb6   : > { %1895 = vmatmul.mubr.msk.bf16.gmra.mrb[76].mxu0 %vm423_vm2, %v955_v38 }
  0xf1   : > { %v497_v11 = vpop.f32.mrb[0].mxu0  ;;  %v2431_v12 = vpop.f32.mrb[0].mxu1 }
  0xf2   : > { %v1720_v13 = vpop.f32.mrb[1].mxu0  ;;  %v1748_v14 = vpop.f32.mrb[1].mxu1 }
  0xf3   : > { %v500_v15 = vpop.f32.mrb[2].mxu0  ;;  %v2433_v16 = vpop.f32.mrb[2].mxu1 }
  0xf4   : > { %v1721_v24 = vpop.f32.mrb[3].mxu0  ;;  %v1749_v25 = vpop.f32.mrb[3].mxu1 }
  0xf9   : > { %v505_v30 = vpop.f32.mrb[4].mxu0  ;;  %v2435_v42 = vpop.f32.mrb[4].mxu1 }
  0xfa   : > { %v1724_v43 = vpop.f32.mrb[5].mxu0  ;;  %v1752_v44 = vpop.f32.mrb[5].mxu1 }
  0xfb   : > { %v508_v1 = vpop.f32.mrb[6].mxu0  ;;  %v2437_v45 = vpop.f32.mrb[6].mxu1 }
  0xfc   : > { %v1725_v47 = vpop.f32.mrb[7].mxu0  ;;  %v1753_v60 = vpop.f32.mrb[7].mxu1 }
 0x101   : > { %v2439_v0 = vpop.f32.mrb[8].mxu0  ;;  %v2441_v10 = vpop.f32.mrb[8].mxu1 }
 0x102   : > { %v1728_v29 = vpop.f32.mrb[9].mxu0  ;;  %v1756_v32 = vpop.f32.mrb[9].mxu1 }
 0x103   : > { %v2443_v36 = vpop.f32.mrb[10].mxu0  ;;  %v2445_v37 = vpop.f32.mrb[10].mxu1 }
 0x104   : > { %v1729_v38 = vpop.f32.mrb[11].mxu0  ;;  %v1757_v50 = vpop.f32.mrb[11].mxu1 }
 0x109   : > { %v2447_v52 = vpop.f32.mrb[12].mxu0  ;;  %v2449_v53 = vpop.f32.mrb[12].mxu1 }
 0x10a   : > { %v1732_v54 = vpop.f32.mrb[13].mxu0  ;;  %v1760_v57 = vpop.f32.mrb[13].mxu1 }
 0x10b   : > { %v2451_v58 = vpop.f32.mrb[14].mxu0  ;;  %v2453_v59 = vpop.f32.mrb[14].mxu1 }
 0x10c   : > { %v1733_v61 = vpop.f32.mrb[15].mxu0  ;;  %v1761_v62 = vpop.f32.mrb[15].mxu1 }
 0x111   : > { %v2455_v63 = vpop.f32.mrb[16].mxu0  ;;  %v2457_v2 = vpop.f32.mrb[16].mxu1 }
 0x112   : > { %v1736_v3 = vpop.f32.mrb[17].mxu0  ;;  %v1764_v4 = vpop.f32.mrb[17].mxu1 }
 0x113   : > { %v2459_v8 = vpop.f32.mrb[18].mxu0  ;;  %v2461_v17 = vpop.f32.mrb[18].mxu1 }
 0x114   : > { %v1737_v28 = vpop.f32.mrb[19].mxu0  ;;  %v1765_v18 = vpop.f32.mrb[19].mxu1 }
 0x119   : > { %v2463_v19 = vpop.f32.mrb[20].mxu0  ;;  %v2465_v20 = vpop.f32.mrb[20].mxu1 }
 0x11a   : > { %v1740_v5 = vpop.f32.mrb[21].mxu0  ;;  %v1768_v7 = vpop.f32.mrb[21].mxu1 }
 0x11b   : > { %v2467_v21 = vpop.f32.mrb[22].mxu0  ;;  %v596_v26 = vpop.f32.mrb[22].mxu1 }
 0x11c   : > { %v1741_v6 = vpop.f32.mrb[23].mxu0  ;;  %v1769_v22 = vpop.f32.mrb[23].mxu1 }
 0x121   : > { %v2469_v31 = vpop.f32.mrb[24].mxu0  ;;  %v725_v34 = vpop.f32.mrb[24].mxu1 }
 0x122   : > { %v726_v23 = vadd.f32 %v725_v34, %v497_v11  ;;  %v1744_v39 = vpop.f32.mrb[25].mxu0  ;;  %v1784_v35 = vpop.f32.mrb[25].mxu1 }
 0x123   : > { %v2471_v41 = vpop.f32.mrb[26].mxu0  ;;  %v728_v40 = vpop.f32.mrb[26].mxu1 }
 0x124   : > { %v729_v55 = vadd.f32 %v728_v40, %v500_v15  ;;  %v1745_v46 = vpop.f32.mrb[27].mxu0  ;;  %v1785_v48 = vpop.f32.mrb[27].mxu1 }
 0x129   : > { %v733_v49 = vpop.f32.mrb[28].mxu1  ;;  %v1066_v56 = vpop.f32.mrb[28].mxu0 }
 0x12a   : > { %v734_v51 = vadd.f32 %v733_v49, %v505_v30  ;;  %v1168_v33 = vadd.f32 %v1066_v56, %v726_v23  ;;  %v1788_v9 = vpop.f32.mrb[29].mxu1  ;;  %v1848_v11 = vpop.f32.mrb[29].mxu0 }
 0x12b   : > { %v736_v13 = vpop.f32.mrb[30].mxu1  ;;  %v1069_v14 = vpop.f32.mrb[30].mxu0 }
 0x12c   : > { %v1200_v24 = vadd.f32 %v2477_v27, %v1168_v33  ;;  %v737_v25 = vadd.f32 %v736_v13, %v508_v1  ;;  %v1169_v15 = vadd.f32 %v1069_v14, %v729_v55  ;;  %v1849_v43 = vpop.f32.mrb[31].mxu0  ;;  %v1789_v44 = vpop.f32.mrb[31].mxu1 }
 0x12e   : > { %v1225_v30 = vmax.f32 %v1200_v24, 0.0  ;;  %v1201_v47 = vadd.f32 %v2477_v27, %v1169_v15 }
 0x130   : > { %1251 = vst.msk [vmem:[%s2483_s17] sm:$0xff] %vm1250_vm4, %v1225_v30  ;;  %v1333_v60 = vmul.f32 %v1225_v30, %v1225_v30  ;;  %v1226_v29 = vmax.f32 %v1201_v47, 0.0  ;;  %v1276_v38 = vsel %vm1250_vm4, %v1225_v30, 0.0 }
 0x131   : > { %v741_v32 = vpop.f32.mrb[32].mxu1  ;;  %v1074_v1 = vpop.f32.mrb[32].mxu0 }
 0x132   : > { %1252 = vst.msk [vmem:[%s2483_s17 + $0x8] sm:$0xff] %vm1250_vm4, %v1226_v29  ;;  %v1277_v50 = vsel %vm1250_vm4, %v1226_v29, 0.0  ;;  %v1334_v54 = vmul.f32 %v1226_v29, %v1226_v29  ;;  %v742_v57 = vadd.f32 %v741_v32, %v2439_v0  ;;  %v1792_v61 = vpop.f32.mrb[33].mxu1  ;;  %v1852_v62 = vpop.f32.mrb[33].mxu0  ;;  %v1170_v4 = vadd.f32 %v1074_v1, %v734_v51 }
 0x133   : > { %v1278_v3 = vadd.f32 %v1277_v50, %v1276_v38  ;;  %v744_v28 = vpop.f32.mrb[34].mxu1  ;;  %v1077_v18 = vpop.f32.mrb[34].mxu0  ;;  %v1358_v5 = vsel %vm1250_vm4, %v1333_v60, 0.0 }
 0x134   : > { %v1359_v7 = vsel %vm1250_vm4, %v1334_v54, 0.0  ;;  %v745_v26 = vadd.f32 %v744_v28, %v2443_v36  ;;  %v1171_v6 = vadd.f32 %v1077_v18, %v737_v25  ;;  %v1853_v22 = vpop.f32.mrb[35].mxu0  ;;  %v1793_v34 = vpop.f32.mrb[35].mxu1  ;;  %v1202_v0 = vadd.f32 %v2477_v27, %v1170_v4 }
 0x135   : > { %v1360_v23 = vadd.f32 %v1359_v7, %v1358_v5 }
 0x136   : > { %v1203_v39 = vadd.f32 %v2477_v27, %v1171_v6  ;;  %v1227_v35 = vmax.f32 %v1202_v0, 0.0 }
 0x138   : > { %v1228_v40 = vmax.f32 %v1203_v39, 0.0  ;;  %1253 = vst.msk [vmem:[%s2483_s17 + $0x10] sm:$0xff] %vm1250_vm4, %v1227_v35  ;;  %v1279_v55 = vsel %vm1250_vm4, %v1227_v35, 0.0  ;;  %v1335_v46 = vmul.f32 %v1227_v35, %v1227_v35 }
 0x139   : > { %v749_v48 = vpop.f32.mrb[36].mxu1  ;;  %v1082_v49 = vpop.f32.mrb[36].mxu0  ;;  %v1280_v56 = vadd.f32 %v1279_v55, %v1278_v3 }
 0x13a   : > { %1254 = vst.msk [vmem:[%s2483_s17 + $0x18] sm:$0xff] %vm1250_vm4, %v1228_v40  ;;  %v1281_v36 = vsel %vm1250_vm4, %v1228_v40, 0.0  ;;  %v1336_v51 = vmul.f32 %v1228_v40, %v1228_v40  ;;  %v750_v33 = vadd.f32 %v749_v48, %v2447_v52  ;;  %v1796_v9 = vpop.f32.mrb[37].mxu1  ;;  %v1856_v11 = vpop.f32.mrb[37].mxu0  ;;  %v1361_v13 = vsel %vm1250_vm4, %v1335_v46, 0.0 }
 0x13b   : > { %v1172_v14 = vadd.f32 %v1082_v49, %v742_v57  ;;  %v752_v24 = vpop.f32.mrb[38].mxu1  ;;  %v1085_v25 = vpop.f32.mrb[38].mxu0  ;;  %v1362_v15 = vadd.f32 %v1361_v13, %v1360_v23  ;;  %v1282_v43 = vadd.f32 %v1281_v36, %v1280_v56 }
 0x13c   : > { %v1363_v44 = vsel %vm1250_vm4, %v1336_v51, 0.0  ;;  %v753_v30 = vadd.f32 %v752_v24, %v2451_v58  ;;  %v1857_v47 = vpop.f32.mrb[39].mxu0  ;;  %v1797_v60 = vpop.f32.mrb[39].mxu1  ;;  %v1173_v32 = vadd.f32 %v1085_v25, %v745_v26 }
 0x13d   : > { %v1204_v29 = vadd.f32 %v2477_v27, %v1172_v14  ;;  %v1364_v52 = vadd.f32 %v1363_v44, %v1362_v15 }
 0x13e   : > { %v1205_v38 = vadd.f32 %v2477_v27, %v1173_v32 }
 0x13f   : > { %v1229_v1 = vmax.f32 %v1204_v29, 0.0 }
 0x140   : > { %v1230_v57 = vmax.f32 %v1205_v38, 0.0 }
 0x141   : > { %1255 = vst.msk [vmem:[%s2483_s17 + $0x20] sm:$0xff] %vm1250_vm4, %v1229_v1  ;;  %v1283_v50 = vsel %vm1250_vm4, %v1229_v1, 0.0  ;;  %v1337_v54 = vmul.f32 %v1229_v1, %v1229_v1  ;;  %v757_v61 = vpop.f32.mrb[40].mxu1  ;;  %v1090_v62 = vpop.f32.mrb[40].mxu0 }
 0x142   : > { %v1284_v3 = vadd.f32 %v1283_v50, %v1282_v43  ;;  %v758_v58 = vadd.f32 %v757_v61, %v2455_v63  ;;  %v1174_v4 = vadd.f32 %v1090_v62, %v750_v33  ;;  %v1800_v28 = vpop.f32.mrb[41].mxu1  ;;  %v1860_v18 = vpop.f32.mrb[41].mxu0  ;;  %1256 = vst.msk [vmem:[%s2483_s17 + $0x28] sm:$0xff] %vm1250_vm4, %v1230_v57  ;;  %v1285_v7 = vsel %vm1250_vm4, %v1230_v57, 0.0 }
 0x143   : > { %v1365_v5 = vsel %vm1250_vm4, %v1337_v54, 0.0  ;;  %v1338_v26 = vmul.f32 %v1230_v57, %v1230_v57  ;;  %v760_v6 = vpop.f32.mrb[42].mxu1  ;;  %v1093_v22 = vpop.f32.mrb[42].mxu0 }
 0x144   : > { %v1366_v34 = vadd.f32 %v1365_v5, %v1364_v52  ;;  %v1286_v23 = vadd.f32 %v1285_v7, %v1284_v3  ;;  %v1206_v0 = vadd.f32 %v2477_v27, %v1174_v4  ;;  %v761_v39 = vadd.f32 %v760_v6, %v2459_v8  ;;  %v1861_v63 = vpop.f32.mrb[43].mxu0  ;;  %v1801_v35 = vpop.f32.mrb[43].mxu1 }
 0x145   : > { %v1367_v40 = vsel %vm1250_vm4, %v1338_v26, 0.0  ;;  %v1175_v55 = vadd.f32 %v1093_v22, %v753_v30 }
 0x146   : > { %v1368_v46 = vadd.f32 %v1367_v40, %v1366_v34  ;;  %v1231_v48 = vmax.f32 %v1206_v0, 0.0 }
 0x147   : > { %v1207_v49 = vadd.f32 %v2477_v27, %v1175_v55 }
 0x148   : > { %1257 = vst.msk [vmem:[%s2483_s17 + $0x30] sm:$0xff] %vm1250_vm4, %v1231_v48  ;;  %v1287_v56 = vsel %vm1250_vm4, %v1231_v48, 0.0  ;;  %v1339_v36 = vmul.f32 %v1231_v48, %v1231_v48 }
 0x149   : > { %v1288_v51 = vadd.f32 %v1287_v56, %v1286_v23  ;;  %v1232_v33 = vmax.f32 %v1207_v49, 0.0  ;;  %v765_v9 = vpop.f32.mrb[44].mxu1  ;;  %v1098_v11 = vpop.f32.mrb[44].mxu0 }
 0x14a   : > { %v1369_v8 = vsel %vm1250_vm4, %v1339_v36, 0.0  ;;  %v766_v13 = vadd.f32 %v765_v9, %v2463_v19  ;;  %v1176_v14 = vadd.f32 %v1098_v11, %v758_v58  ;;  %v1804_v24 = vpop.f32.mrb[45].mxu1  ;;  %v1864_v25 = vpop.f32.mrb[45].mxu0 }
 0x14b   : > { %v1370_v15 = vadd.f32 %v1369_v8, %v1368_v46  ;;  %1258 = vst.msk [vmem:[%s2483_s17 + $0x38] sm:$0xff] %vm1250_vm4, %v1232_v33  ;;  %v1289_v43 = vsel %vm1250_vm4, %v1232_v33, 0.0  ;;  %v1340_v44 = vmul.f32 %v1232_v33, %v1232_v33  ;;  %v768_v30 = vpop.f32.mrb[46].mxu1  ;;  %v1101_v47 = vpop.f32.mrb[46].mxu0 }
 0x14c   : > { %v1290_v60 = vadd.f32 %v1289_v43, %v1288_v51  ;;  %v1208_v29 = vadd.f32 %v2477_v27, %v1176_v14  ;;  %v769_v32 = vadd.f32 %v768_v30, %v2467_v21  ;;  %v1177_v52 = vadd.f32 %v1101_v47, %v761_v39  ;;  %v1865_v19 = vpop.f32.mrb[47].mxu0  ;;  %v1805_v1 = vpop.f32.mrb[47].mxu1 }
 0x14d   : > { %v1371_v38 = vsel %vm1250_vm4, %v1340_v44, 0.0 }
 0x14e   : > { %v1372_v50 = vadd.f32 %v1371_v38, %v1370_v15  ;;  %v1233_v54 = vmax.f32 %v1208_v29, 0.0  ;;  %v1209_v57 = vadd.f32 %v2477_v27, %v1177_v52 }
 0x150   : > { %1259 = vst.msk [vmem:[%s2483_s17 + $0x40] sm:$0xff] %vm1250_vm4, %v1233_v54  ;;  %v1291_v61 = vsel %vm1250_vm4, %v1233_v54, 0.0  ;;  %v1341_v62 = vmul.f32 %v1233_v54, %v1233_v54  ;;  %v1234_v3 = vmax.f32 %v1209_v57, 0.0 }
 0x151   : > { %v1292_v58 = vadd.f32 %v1291_v61, %v1290_v60  ;;  %v773_v4 = vpop.f32.mrb[48].mxu1  ;;  %v1106_v28 = vpop.f32.mrb[48].mxu0 }
 0x152   : > { %v1373_v21 = vsel %vm1250_vm4, %v1341_v62, 0.0  ;;  %1260 = vst.msk [vmem:[%s2483_s17 + $0x48] sm:$0xff] %vm1250_vm4, %v1234_v3  ;;  %v1293_v18 = vsel %vm1250_vm4, %v1234_v3, 0.0  ;;  %v1342_v5 = vmul.f32 %v1234_v3, %v1234_v3  ;;  %v774_v7 = vadd.f32 %v773_v4, %v2469_v31  ;;  %v1808_v26 = vpop.f32.mrb[49].mxu1  ;;  %v1868_v6 = vpop.f32.mrb[49].mxu0 }
 0x153   : > { %v1374_v22 = vadd.f32 %v1373_v21, %v1372_v50  ;;  %v1294_v34 = vadd.f32 %v1293_v18, %v1292_v58  ;;  %v1178_v23 = vadd.f32 %v1106_v28, %v766_v13  ;;  %v776_v0 = vpop.f32.mrb[50].mxu1  ;;  %v1109_v39 = vpop.f32.mrb[50].mxu0 }
 0x154   : > { %v1375_v63 = vsel %vm1250_vm4, %v1342_v5, 0.0  ;;  %v777_v35 = vadd.f32 %v776_v0, %v2471_v41  ;;  %v1179_v40 = vadd.f32 %v1109_v39, %v769_v32  ;;  %v1869_v55 = vpop.f32.mrb[51].mxu0  ;;  %v1809_v46 = vpop.f32.mrb[51].mxu1 }
 0x155   : > { %v1376_v48 = vadd.f32 %v1375_v63, %v1374_v22  ;;  %v1210_v49 = vadd.f32 %v2477_v27, %v1178_v23 }
 0x156   : > { %v1211_v31 = vadd.f32 %v2477_v27, %v1179_v40 }
 0x157   : > { %v1235_v56 = vmax.f32 %v1210_v49, 0.0 }
 0x158   : > { %v1236_v36 = vmax.f32 %v1211_v31, 0.0 }
 0x159   : > { %1261 = vst.msk [vmem:[%s2483_s17 + $0x50] sm:$0xff] %vm1250_vm4, %v1235_v56  ;;  %v1295_v51 = vsel %vm1250_vm4, %v1235_v56, 0.0  ;;  %v1343_v33 = vmul.f32 %v1235_v56, %v1235_v56  ;;  %v781_v9 = vpop.f32.mrb[52].mxu1  ;;  %v1114_v11 = vpop.f32.mrb[52].mxu0 }
 0x15a   : > { %v1296_v8 = vadd.f32 %v1295_v51, %v1294_v34  ;;  %1262 = vst.msk [vmem:[%s2483_s17 + $0x58] sm:$0xff] %vm1250_vm4, %v1236_v36  ;;  %v1297_v41 = vsel %vm1250_vm4, %v1236_v36, 0.0  ;;  %v1344_v13 = vmul.f32 %v1236_v36, %v1236_v36  ;;  %v782_v14 = vadd.f32 %v781_v9, %v2431_v12  ;;  %v1812_v24 = vpop.f32.mrb[53].mxu1  ;;  %v1872_v25 = vpop.f32.mrb[53].mxu0 }
 0x15b   : > { %v1377_v15 = vsel %vm1250_vm4, %v1343_v33, 0.0  ;;  %v1180_v43 = vadd.f32 %v1114_v11, %v774_v7  ;;  %v784_v44 = vpop.f32.mrb[54].mxu1  ;;  %v1117_v30 = vpop.f32.mrb[54].mxu0 }
 0x15c   : > { %v1378_v47 = vadd.f32 %v1377_v15, %v1376_v48  ;;  %v1298_v60 = vadd.f32 %v1297_v41, %v1296_v8  ;;  %v1379_v29 = vsel %vm1250_vm4, %v1344_v13, 0.0  ;;  %v785_v32 = vadd.f32 %v784_v44, %v2433_v16  ;;  %v1873_v52 = vpop.f32.mrb[55].mxu0  ;;  %v1813_v19 = vpop.f32.mrb[55].mxu1 }
 0x15d   : > { %v1212_v1 = vadd.f32 %v2477_v27, %v1180_v43  ;;  %v1181_v38 = vadd.f32 %v1117_v30, %v777_v35 }
 0x15e   : > { %v1380_v12 = vadd.f32 %v1379_v29, %v1378_v47 }
 0x15f   : > { %v1237_v50 = vmax.f32 %v1212_v1, 0.0  ;;  %v1213_v54 = vadd.f32 %v2477_v27, %v1181_v38 }
 0x161   : > { %1263 = vst.msk [vmem:[%s2483_s17 + $0x60] sm:$0xff] %vm1250_vm4, %v1237_v50  ;;  %v1299_v57 = vsel %vm1250_vm4, %v1237_v50, 0.0  ;;  %v1345_v61 = vmul.f32 %v1237_v50, %v1237_v50  ;;  %v1238_v62 = vmax.f32 %v1213_v54, 0.0  ;;  %v789_v3 = vpop.f32.mrb[56].mxu1  ;;  %v1122_v58 = vpop.f32.mrb[56].mxu0 }
 0x162   : > { %v1300_v4 = vadd.f32 %v1299_v57, %v1298_v60  ;;  %v790_v16 = vadd.f32 %v789_v3, %v2435_v42  ;;  %v1182_v28 = vadd.f32 %v1122_v58, %v782_v14  ;;  %v1816_v21 = vpop.f32.mrb[57].mxu1  ;;  %v1876_v18 = vpop.f32.mrb[57].mxu0 }
 0x163   : > { %v1381_v5 = vsel %vm1250_vm4, %v1345_v61, 0.0  ;;  %1264 = vst.msk [vmem:[%s2483_s17 + $0x68] sm:$0xff] %vm1250_vm4, %v1238_v62  ;;  %v1301_v7 = vsel %vm1250_vm4, %v1238_v62, 0.0  ;;  %v1346_v26 = vmul.f32 %v1238_v62, %v1238_v62  ;;  %v792_v6 = vpop.f32.mrb[58].mxu1  ;;  %v1125_v22 = vpop.f32.mrb[58].mxu0 }
 0x164   : > { %v1382_v34 = vadd.f32 %v1381_v5, %v1380_v12  ;;  %v1302_v23 = vadd.f32 %v1301_v7, %v1300_v4  ;;  %v1214_v0 = vadd.f32 %v2477_v27, %v1182_v28  ;;  %v793_v39 = vadd.f32 %v792_v6, %v2437_v45  ;;  %v1877_v42 = vpop.f32.mrb[59].mxu0  ;;  %v1817_v63 = vpop.f32.mrb[59].mxu1 }
 0x165   : > { %v1383_v35 = vsel %vm1250_vm4, %v1346_v26, 0.0  ;;  %v1183_v40 = vadd.f32 %v1125_v22, %v785_v32 }
 0x166   : > { %v1384_v55 = vadd.f32 %v1383_v35, %v1382_v34  ;;  %v1239_v46 = vmax.f32 %v1214_v0, 0.0 }
 0x167   : > { %v1215_v48 = vadd.f32 %v2477_v27, %v1183_v40 }
 0x168   : > { %1265 = vst.msk [vmem:[%s2483_s17 + $0x70] sm:$0xff] %vm1250_vm4, %v1239_v46  ;;  %v1303_v49 = vsel %vm1250_vm4, %v1239_v46, 0.0  ;;  %v1347_v31 = vmul.f32 %v1239_v46, %v1239_v46 }
 0x169   : > { %v1304_v56 = vadd.f32 %v1303_v49, %v1302_v23  ;;  %v1240_v36 = vmax.f32 %v1215_v48, 0.0  ;;  %v797_v51 = vpop.f32.mrb[60].mxu1  ;;  %v1130_v33 = vpop.f32.mrb[60].mxu0 }
 0x16a   : > { %v1385_v45 = vsel %vm1250_vm4, %v1347_v31, 0.0  ;;  %v798_v9 = vadd.f32 %v797_v51, %v2441_v10  ;;  %v1184_v11 = vadd.f32 %v1130_v33, %v790_v16  ;;  %v1820_v8 = vpop.f32.mrb[61].mxu1  ;;  %v1880_v41 = vpop.f32.mrb[61].mxu0 }
 0x16b   : > { %v1386_v13 = vadd.f32 %v1385_v45, %v1384_v55  ;;  %1266 = vst.msk [vmem:[%s2483_s17 + $0x78] sm:$0xff] %vm1250_vm4, %v1240_v36  ;;  %v1305_v14 = vsel %vm1250_vm4, %v1240_v36, 0.0  ;;  %v1348_v24 = vmul.f32 %v1240_v36, %v1240_v36  ;;  %v800_v25 = vpop.f32.mrb[62].mxu1  ;;  %v1133_v15 = vpop.f32.mrb[62].mxu0 }
 0x16c   : > { %v1306_v43 = vadd.f32 %v1305_v14, %v1304_v56  ;;  %v1216_v44 = vadd.f32 %v2477_v27, %v1184_v11  ;;  %v801_v30 = vadd.f32 %v800_v25, %v2445_v37  ;;  %v1185_v47 = vadd.f32 %v1133_v15, %v793_v39  ;;  %v1881_v10 = vpop.f32.mrb[63].mxu0  ;;  %v1821_v60 = vpop.f32.mrb[63].mxu1 }
 0x16d   : > { %v1387_v29 = vsel %vm1250_vm4, %v1348_v24, 0.0 }
 0x16e   : > { %v1388_v32 = vadd.f32 %v1387_v29, %v1386_v13  ;;  %v1241_v52 = vmax.f32 %v1216_v44, 0.0  ;;  %v1217_v19 = vadd.f32 %v2477_v27, %v1185_v47 }
 0x170   : > { %1267 = vst.msk [vmem:[%s2483_s17 + $0x80] sm:$0xff] %vm1250_vm4, %v1241_v52  ;;  %v1307_v1 = vsel %vm1250_vm4, %v1241_v52, 0.0  ;;  %v1349_v38 = vmul.f32 %v1241_v52, %v1241_v52  ;;  %v1242_v12 = vmax.f32 %v1217_v19, 0.0 }
 0x171   : > { %v1308_v50 = vadd.f32 %v1307_v1, %v1306_v43  ;;  %v805_v54 = vpop.f32.mrb[64].mxu1  ;;  %v1138_v57 = vpop.f32.mrb[64].mxu0 }
 0x172   : > { %v1389_v37 = vsel %vm1250_vm4, %v1349_v38, 0.0  ;;  %1268 = vst.msk [vmem:[%s2483_s17 + $0x88] sm:$0xff] %vm1250_vm4, %v1242_v12  ;;  %v1309_v61 = vsel %vm1250_vm4, %v1242_v12, 0.0  ;;  %v1350_v62 = vmul.f32 %v1242_v12, %v1242_v12  ;;  %v806_v3 = vadd.f32 %v805_v54, %v2449_v53  ;;  %v1824_v58 = vpop.f32.mrb[65].mxu1  ;;  %v1884_v4 = vpop.f32.mrb[65].mxu0 }
 0x173   : > { %v1390_v16 = vadd.f32 %v1389_v37, %v1388_v32  ;;  %v1310_v28 = vadd.f32 %v1309_v61, %v1308_v50  ;;  %v1186_v21 = vadd.f32 %v1138_v57, %v798_v9  ;;  %v808_v18 = vpop.f32.mrb[66].mxu1  ;;  %v1141_v5 = vpop.f32.mrb[66].mxu0 }
 0x174   : > { %v1391_v7 = vsel %vm1250_vm4, %v1350_v62, 0.0  ;;  %v809_v26 = vadd.f32 %v808_v18, %v2453_v59  ;;  %v1187_v6 = vadd.f32 %v1141_v5, %v801_v30  ;;  %v1885_v22 = vpop.f32.mrb[67].mxu0  ;;  %v1825_v34 = vpop.f32.mrb[67].mxu1 }
 0x175   : > { %v1392_v23 = vadd.f32 %v1391_v7, %v1390_v16  ;;  %v1218_v0 = vadd.f32 %v2477_v27, %v1186_v21 }
 0x176   : > { %v1219_v53 = vadd.f32 %v2477_v27, %v1187_v6 }
 0x177   : > { %v1243_v39 = vmax.f32 %v1218_v0, 0.0 }
 0x178   : > { %v1244_v42 = vmax.f32 %v1219_v53, 0.0 }
 0x179   : > { %1269 = vst.msk [vmem:[%s2483_s17 + $0x90] sm:$0xff] %vm1250_vm4, %v1243_v39  ;;  %v1311_v63 = vsel %vm1250_vm4, %v1243_v39, 0.0  ;;  %v1351_v35 = vmul.f32 %v1243_v39, %v1243_v39  ;;  %v813_v40 = vpop.f32.mrb[68].mxu1  ;;  %v1146_v55 = vpop.f32.mrb[68].mxu0 }
 0x17a   : > { %v1312_v46 = vadd.f32 %v1311_v63, %v1310_v28  ;;  %1270 = vst.msk [vmem:[%s2483_s17 + $0x98] sm:$0xff] %vm1250_vm4, %v1244_v42  ;;  %v1313_v59 = vsel %vm1250_vm4, %v1244_v42, 0.0  ;;  %v1352_v48 = vmul.f32 %v1244_v42, %v1244_v42  ;;  %v814_v49 = vadd.f32 %v813_v40, %v2457_v2  ;;  %v1828_v31 = vpop.f32.mrb[69].mxu1  ;;  %v1888_v56 = vpop.f32.mrb[69].mxu0 }
 0x17b   : > { %v1393_v36 = vsel %vm1250_vm4, %v1351_v35, 0.0  ;;  %v1188_v51 = vadd.f32 %v1146_v55, %v806_v3  ;;  %v816_v33 = vpop.f32.mrb[70].mxu1  ;;  %v1149_v45 = vpop.f32.mrb[70].mxu0 }
 0x17c   : > { %v1394_v9 = vadd.f32 %v1393_v36, %v1392_v23  ;;  %v1314_v11 = vadd.f32 %v1313_v59, %v1312_v46  ;;  %v1395_v8 = vsel %vm1250_vm4, %v1352_v48, 0.0  ;;  %v817_v41 = vadd.f32 %v816_v33, %v2461_v17  ;;  %v1889_v13 = vpop.f32.mrb[71].mxu0  ;;  %v1829_v14 = vpop.f32.mrb[71].mxu1 }
 0x17d   : > { %v1220_v24 = vadd.f32 %v2477_v27, %v1188_v51  ;;  %v1189_v25 = vadd.f32 %v1149_v45, %v809_v26 }
 0x17e   : > { %v1396_v2 = vadd.f32 %v1395_v8, %v1394_v9 }
 0x17f   : > { %v1245_v15 = vmax.f32 %v1220_v24, 0.0  ;;  %v1221_v43 = vadd.f32 %v2477_v27, %v1189_v25 }
 0x181   : > { %1271 = vst.msk [vmem:[%s2483_s17 + $0xa0] sm:$0xff] %vm1250_vm4, %v1245_v15  ;;  %v1315_v44 = vsel %vm1250_vm4, %v1245_v15, 0.0  ;;  %v1353_v30 = vmul.f32 %v1245_v15, %v1245_v15  ;;  %v1246_v47 = vmax.f32 %v1221_v43, 0.0  ;;  %v821_v10 = vpop.f32.mrb[72].mxu1  ;;  %v1154_v60 = vpop.f32.mrb[72].mxu0 }
 0x182   : > { %v1316_v29 = vadd.f32 %v1315_v44, %v1314_v11  ;;  %v822_v17 = vadd.f32 %v821_v10, %v2465_v20  ;;  %v1190_v32 = vadd.f32 %v1154_v60, %v814_v49  ;;  %v1892_v52 = vpop.f32.mrb[73].mxu0  ;;  %v1832_v19 = vpop.f32.mrb[73].mxu1 }
 0x183   : > { %v1397_v1 = vsel %vm1250_vm4, %v1353_v30, 0.0  ;;  %1272 = vst.msk [vmem:[%s2483_s17 + $0xa8] sm:$0xff] %vm1250_vm4, %v1246_v47  ;;  %v1317_v38 = vsel %vm1250_vm4, %v1246_v47, 0.0  ;;  %v1354_v12 = vmul.f32 %v1246_v47, %v1246_v47  ;;  %v1157_v50 = vpop.f32.mrb[74].mxu0  ;;  %v824_v54 = vpop.f32.mrb[74].mxu1 }
 0x184   : > { %v1398_v57 = vadd.f32 %v1397_v1, %v1396_v2  ;;  %v1318_v37 = vadd.f32 %v1317_v38, %v1316_v29  ;;  %v1222_v61 = vadd.f32 %v2477_v27, %v1190_v32  ;;  %v1191_v62 = vadd.f32 %v1157_v50, %v817_v41  ;;  %v1893_v20 = vpop.f32.mrb[75].mxu0  ;;  %v1833_v3 = vpop.f32.mrb[75].mxu1 }
 0x185   : > { %v1399_v58 = vsel %vm1250_vm4, %v1354_v12, 0.0 }
 0x186   : > { %v1400_v4 = vadd.f32 %v1399_v58, %v1398_v57  ;;  %v1247_v16 = vmax.f32 %v1222_v61, 0.0  ;;  %v1223_v28 = vadd.f32 %v2477_v27, %v1191_v62 }
 0x188   : > { %1273 = vst.msk [vmem:[%s2483_s17 + $0xb0] sm:$0xff] %vm1250_vm4, %v1247_v16  ;;  %v1319_v21 = vsel %vm1250_vm4, %v1247_v16, 0.0  ;;  %v1355_v18 = vmul.f32 %v1247_v16, %v1247_v16  ;;  %v1248_v5 = vmax.f32 %v1223_v28, 0.0 }
 0x189   : > { %v1320_v7 = vadd.f32 %v1319_v21, %v1318_v37  ;;  %v1162_v26 = vpop.f32.mrb[76].mxu0 }
 0x18a   : > { %v1401_v6 = vsel %vm1250_vm4, %v1355_v18, 0.0  ;;  %1274 = vst.msk [vmem:[%s2483_s17 + $0xb8] sm:$0xff] %vm1250_vm4, %v1248_v5  ;;  %v1321_v22 = vsel %vm1250_vm4, %v1248_v5, 0.0  ;;  %v1356_v34 = vmul.f32 %v1248_v5, %v1248_v5  ;;  %v1192_v23 = vadd.f32 %v1162_v26, %v822_v17  ;;  %v1896_v0 = vpop.f32.mrb[77].mxu0 }
 0x18b   : > { %v1402_v53 = vadd.f32 %v1401_v6, %v1400_v4  ;;  %v1322_v39 = vadd.f32 %v1321_v22, %v1320_v7  ;;  %v1165_v42 = vpop.f32.mrb[78].mxu0 }
 0x18c   : > { %v1403_v63 = vsel %vm1250_vm4, %v1356_v34, 0.0  ;;  %v1224_v35 = vadd.f32 %v2477_v27, %v1192_v23  ;;  %v1897_v40 = vpop.f32.mrb[79].mxu0 }
 0x18d   : > { %v1404_v55 = vadd.f32 %v1403_v63, %v1402_v53 }
 0x18e   : > { %v1249_v46 = vmax.f32 %v1224_v35, 0.0 }
 0x190   : > { %1275 = vst.msk [vmem:[%s2483_s17 + $0xc0] sm:$0xff] %vm1250_vm4, %v1249_v46  ;;  %v1323_v59 = vsel %vm1250_vm4, %v1249_v46, 0.0  ;;  %v1357_v48 = vmul.f32 %v1249_v46, %v1249_v46 }
 0x191   : > { %v1324_v49 = vadd.f32 %v1323_v59, %v1322_v39 }
 0x192   : > { %v1405_v31 = vsel %vm1250_vm4, %v1357_v48, 0.0 }
 0x193   : > { %v1325_v56 = vrot.slane %v1324_v49, 4  ;;  %v1406_v36 = vadd.f32 %v1405_v31, %v1404_v55 }
 0x195   : > { %v1326_v51 = vadd.f32 %v1325_v56, %v1324_v49  ;;  %v1407_v33 = vrot.slane %v1406_v36, 4 }
 0x197   : > { %v1327_v45 = vrot.slane %v1326_v51, 2  ;;  %v1408_v9 = vadd.f32 %v1407_v33, %v1406_v36 }
 0x199   : > { %v1328_v27 = vadd.f32 %v1327_v45, %v1326_v51  ;;  %v1409_v11 = vrot.slane %v1408_v9, 2 }
 0x19b   : > { %v1329_v8 = vrot.slane %v1328_v27, 1  ;;  %v1410_v41 = vadd.f32 %v1409_v11, %v1408_v9 }
 0x19d   : > { %v1330_v13 = vadd.f32 %v1329_v8, %v1328_v27  ;;  %v1411_v14 = vrot.slane %v1410_v41, 1 }
 0x19f   : > { %1332 = vst.msk [vmem:[%s238_s22] sm:$0x1] %vm1331_vm5, %v1330_v13  ;;  %v1412_v24 = vadd.f32 %v1411_v14, %v1410_v41 }
 0x1a1   : > { %1413 = vst.msk [vmem:[%s241_s25] sm:$0x1] %vm1331_vm5, %v1412_v24 }
 0x1a2 PF: > { %s16_s18 = sadd.s32 1, %s1985_s18  }
 0x1a3   : > { %p13_p4 = scmp.ge.s32.totalorder %s16_s18, 4  }
 0x1a5   :  { %15 = sbr.rel (!%p13_p4) target bundleno = 1 (0x1), region = 88 }

// kernel: encoder_forward.13
= control target key start
LH: loop header
LB: loop body
LE: loop exit
PB: predicated region body
PF: predicated region fallthrough
CT: control target
= control target key end

     0   :  { %s498_s12 = smov 0   ;;  %s500_s13 = smov 0   ;;  %s576_s0 = inlined_call_operand.vmem [shape: f32[2,20,10,64], index: 0, kind: input, shape index: {}]   ;;  %s577_s1 = inlined_call_operand.vmem [shape: f32[1,1,64], index: 1, kind: input, shape index: {}]   ;;  %s578_s2 = inlined_call_operand.vmem [shape: f32[1,1,64], index: 2, kind: input, shape index: {}]   ;;  %s579_s3 = inlined_call_operand.vmem [shape: f32[2,4,2,64], index: 3, kind: output, shape index: {}]  }
   0x1   :  { %s502_s14 = smov 0   ;;  %s504_s15 = smov 0  }
   0x2   :  { %s506_s16 = smov 0  }
   0x3 LB: > { %s22_s17 = sadd.s32 1, %s468_s14  ;;  %s25_s18 = sadd.s32 1, %s472_s15  ;;  %s476_s16 = sphi %s506_s16, %s13_s16   ;;  %s472_s15 = sphi %s504_s15, %s583_s15   ;;  %s468_s14 = sphi %s502_s14, %s582_s14   ;;  %s464_s13 = sphi %s500_s13, %s581_s13   ;;  %s460_s12 = sphi %s498_s12, %s580_s12  }
   0x4   : > { %p23_p0 = scmp.ge.s32.totalorder %s22_s17, 4  ;;  %p388_p1 = scmp.ge.s32.totalorder %s476_s16, 1 }
   0x5   : > { %p159_p2 = scmp.lt.s32.totalorder %s476_s16, 9 }
   0x6   : > { %s585_s17 = smov (%p23_p0, %s22_s17), 0  ;;  %s587_s18 = smov (!%p23_p0, %s25_s18), %s472_s15 }
   0x7   : > { %p160_p3 = pnand %p388_p1, %p159_p2  ;;  %p27_p4 = scmp.ge.s32.totalorder %s587_s18, 2 }
   0x8   : > { %s191_s19 = smul.u32 (!%p160_p3), 5, %s460_s12  ;;  %p192_p5 = scmp.lt.s32.totalorder (!%p160_p3), %s464_s13, 1  ;;  %v393_v0 = vld [vmem:[%s577_s1] ss:$0 sm:$0xff] (!%p160_p3)  ;;  %vm254_vm0 = vcmask (!%p160_p3), 523264   ;;  %vm264_vm1 = vcmask (!%p160_p3), 517120  }
   0x9   : > { %s589_s18 = smov (%p27_p4, %s587_s18), 0  ;;  %163 = sbr.rel (%p160_p3) target bundleno = 54 (0x36), region = 32 }
   0xa   : > { %p194_p6 = scmp.lt.s32.totalorder (!%p160_p3), %s191_s19, 19  ;;  %v394_v1 = vld [vmem:[%s578_s2] ss:$0 sm:$0xff] (!%p160_p3)  ;;  %vm274_vm2 = vcmask (!%p160_p3), 520192   ;;  %vm282_vm3 = vcmask (!%p160_p3), 523269   ;;  %p204_p7 = scmp.lt.s32.totalorder (!%p160_p3), %s460_s12, 3 }
   0xb   : > { %vm292_vm4 = vcmask (!%p160_p3), 1040384  }
  0x10   : > { %s591_s13 = smov (!%p192_p5, %s464_s13), 1  ;;  %s593_s19 = smov (!%p194_p6, %s191_s19), 19 }
  0x11   : > { %s397_s20 = smul.u32 40, %s591_s13  ;;  %s389_s21 = sshll.u32 %s593_s19, 1 }
  0x12   : > { %s595_s12 = smov (!%p204_p7, %s460_s12), 3  ;;  %s391_s4 = sshll.u32 %s591_s13, 2 }
  0x13   : > { %s198_s22 = sadd.s32 %s397_s20, %s389_s21  ;;  %s207_s5 = sadd.s32 %s391_s4, %s595_s12 }
  0x14   : > { %s390_s23 = sshll.u32 %s198_s22, 3  ;;  %s392_s6 = sshll.u32 %s207_s5, 1 }
  0x15   : > { %s200_s28 = scalar_lea.vmem %s576_s0, %s390_s23  ;;  %s209_s9 = scalar_lea.vmem %s579_s3, %s392_s6 }
  0x16   : > { %v210_v2 = vld [vmem:[%s200_s28] sm:$0xff]  ;;  %v211_v3 = vld [vmem:[%s200_s28 + $0x8] sm:$0x3]  ;;  %v212_v4 = vld [vmem:[%s200_s28 + $0x10] sm:$0xff] }
  0x17   : > { %v213_v5 = vld [vmem:[%s200_s28 + $0x18] sm:$0x3]  ;;  %v214_v6 = vld [vmem:[%s200_s28 + $0x20] sm:$0xff]  ;;  %v215_v7 = vld [vmem:[%s200_s28 + $0x28] sm:$0x3]  ;;  %v227_v8 = vmul.f32 %v393_v0, %v210_v2  ;;  %v228_v9 = vmul.f32 %v393_v0, %v211_v3  ;;  %v229_v10 = vmul.f32 %v393_v0, %v212_v4 }
  0x18   : > { %v216_v11 = vld [vmem:[%s200_s28 + $0x30] sm:$0xff]  ;;  %v217_v12 = vld [vmem:[%s200_s28 + $0x38] sm:$0x3]  ;;  %v218_v13 = vld [vmem:[%s200_s28 + $0x40] sm:$0xff]  ;;  %v230_v14 = vmul.f32 %v393_v0, %v213_v5  ;;  %v231_v15 = vmul.f32 %v393_v0, %v214_v6  ;;  %v232_v16 = vmul.f32 %v393_v0, %v215_v7 }
  0x19   : > { %v219_v17 = vld [vmem:[%s200_s28 + $0x48] sm:$0x3]  ;;  %v233_v18 = vmul.f32 %v393_v0, %v216_v11  ;;  %v234_v19 = vmul.f32 %v393_v0, %v217_v12  ;;  %v235_v20 = vmul.f32 %v393_v0, %v218_v13  ;;  %v244_v21 = vadd.f32 %v394_v1, %v227_v8 }
  0x1a   : > { %v236_v22 = vmul.f32 %v393_v0, %v219_v17  ;;  %v245_v23 = vadd.f32 %v394_v1, %v228_v9  ;;  %v246_v24 = vadd.f32 %v394_v1, %v229_v10  ;;  %v247_v25 = vadd.f32 %v394_v1, %v230_v14 }
  0x1b   : > { %v248_v26 = vadd.f32 %v394_v1, %v231_v15  ;;  %v249_v27 = vadd.f32 %v394_v1, %v232_v16  ;;  %v250_v28 = vadd.f32 %v394_v1, %v233_v18  ;;  %v251_v29 = vadd.f32 %v394_v1, %v234_v19 }
  0x1c   : > { %v252_v30 = vadd.f32 %v394_v1, %v235_v20  ;;  %v253_v31 = vadd.f32 %v394_v1, %v236_v22  ;;  %v255_v32 = vsel %vm254_vm0, %v244_v21, -inf  ;;  %v256_v33 = vsel %vm254_vm0, %v246_v24, -inf }
  0x1d   : > { %v257_v34 = vsel %vm254_vm0, %v248_v26, -inf  ;;  %v259_v35 = vsel %vm254_vm0, %v250_v28, -inf  ;;  %v265_v36 = vsel %vm264_vm1, %v245_v23, -inf  ;;  %v266_v37 = vsel %vm264_vm1, %v247_v25, -inf }
  0x1e   : > { %v258_v38 = vmax.f32 %v255_v32, %v257_v34  ;;  %v260_v39 = vmax.f32 %v256_v33, %v259_v35  ;;  %v261_v40 = vsel %vm254_vm0, %v252_v30, -inf  ;;  %v267_v41 = vsel %vm264_vm1, %v249_v27, -inf }
  0x1f   : > { %v268_v42 = vmax.f32 %v265_v36, %v267_v41  ;;  %v269_v43 = vsel %vm264_vm1, %v251_v29, -inf  ;;  %v271_v44 = vsel %vm264_vm1, %v253_v31, -inf }
  0x20   : > { %v262_v45 = vmax.f32 %v258_v38, %v261_v40  ;;  %v270_v46 = vmax.f32 %v266_v37, %v269_v43 }
  0x21   : > { %v272_v47 = vmax.f32 %v268_v42, %v271_v44 }
  0x22   : > { %v263_v48 = vmax.f32 %v262_v45, %v260_v39 }
  0x23   : > { %v273_v49 = vmax.f32 %v272_v47, %v270_v46 }
  0x24   : > { %v275_v50 = vsel %vm274_vm2, %v263_v48, -inf  ;;  %v283_v51 = vsel %vm282_vm3, %v263_v48, -inf }
  0x25   : > { %v276_v52 = vrot.slane %v275_v50, 4  ;;  %v284_v53 = vsel %vm264_vm1, %v273_v49, -inf }
  0x26   : > { %v285_v54 = vmax.f32 %v283_v51, %v284_v53 }
  0x27   : > { %v277_v55 = vmax.f32 %v275_v50, %v276_v52 }
  0x28   : > { %v286_v56 = vrot.slane %v285_v54, 4 }
  0x29   : > { %v278_v57 = vrot.slane %v277_v55, 2 }
  0x2a   : > { %v287_v58 = vmax.f32 %v285_v54, %v286_v56 }
  0x2b   : > { %v279_v59 = vmax.f32 %v277_v55, %v278_v57 }
  0x2c   : > { %v288_v60 = vrot.slane %v287_v58, 2 }
  0x2d   : > { %v280_v61 = vrot.slane %v279_v59, 1 }
  0x2e   : > { %v289_v62 = vmax.f32 %v287_v58, %v288_v60 }
  0x2f   : > { %v281_v63 = vmax.f32 %v279_v59, %v280_v61 }
  0x30   : > { %v290_v0 = vrot.slane %v289_v62, 1 }
  0x32   : > { %v291_v1 = vmax.f32 %v289_v62, %v290_v0 }
  0x34   : > { %v293_v2 = vsel %vm292_vm4, %v281_v63, %v291_v1 }
  0x35   : > { %294 = vst.msk [vmem:[%s209_s9] sm:$0x3] %vm264_vm1, %v293_v2 }
  0x36 PF: > { %s13_s16 = sadd.s32 1, %s476_s16   ;;  %s580_s12 = smov %s468_s14 }
  0x37   : > { %p10_p8 = scmp.ge.s32.totalorder %s13_s16, 10   ;;  %s581_s13 = smov %s472_s15 }
  0x38   : > { %s582_s14 = smov %s585_s17  ;;  %s583_s15 = smov %s589_s18 }
  0x39   :  { %12 = sbr.rel (!%p10_p8) target bundleno = 3 (0x3), region = 62 }

// kernel: encoder_forward.12
= control target key start
LH: loop header
LB: loop body
LE: loop exit
PB: predicated region body
PF: predicated region fallthrough
CT: control target
= control target key end

     0   :  { %s2225_s18 = smov 0   ;;  %s3082_s0 = inlined_call_operand.vmem [shape: bf16[2,220,192], index: 0, kind: input, shape index: {}]   ;;  %s3083_s1 = inlined_call_operand.vmem [shape: bf16[3,192,64], index: 1, kind: input, shape index: {}]   ;;  %s3084_s2 = inlined_call_operand.vmem [shape: f32[1,64], index: 2, kind: input, shape index: {}]   ;;  %s3085_s3 = inlined_call_operand.vmem [shape: f32[2,200,64], index: 3, kind: output, shape index: {0}]   ;;  %s3086_s4 = inlined_call_operand.vmem [shape: f32[2,1,64], index: 4, kind: output, shape index: {1}]   ;;  %s3087_s5 = inlined_call_operand.vmem [shape: f32[2,1,64], index: 5, kind: output, shape index: {2}]  }
   0x1 LB: > { %s1844_s19 = sadd.s32 4294967295, %s2192_s18   ;;  %p1848_p0 = scmp.ge.s32.totalorder %s2192_s18, 1  ;;  %s2192_s18 = sphi %s2225_s18, %s16_s18  }
   0x2   : > { %p192_p1 = scmp.lt.s32.totalorder %s2192_s18, 3 }
   0x4   : > { %p193_p2 = pnand %p1848_p0, %p192_p1 }
   0x6   : > { %196 = sbr.rel (%p193_p2) target bundleno = 452 (0x1c4), region = 32 }
   0xd   : > { %v2090_v0 = vld [vmem:[%s3083_s1 + $0x60] sm:$0xff]   ;;  %v3091_v1 = vmov 0   ;;  %p226_p3 = scmp.lt.s32.totalorder %s1844_s19, 1  ;;  %v2091_v2 = vld [vmem:[%s3083_s1 + $0x68] sm:$0xff]   ;;  %v2092_v3 = vld [vmem:[%s3083_s1 + $0x70] sm:$0xff]   ;;  %vm424_vm0 = vcmask 1046528  }
   0xe   : > { %2055 = vmatprep.subr.bf16.mxu1 %v3091_v1  ;;  %600 = vmatprep.subr.bf16.mxu0 %v3091_v1  ;;  %v2093_v4 = vld [vmem:[%s3083_s1 + $0x78] sm:$0xff]   ;;  %v2094_v12 = vld [vmem:[%s3083_s1 + $0x80] sm:$0xff]   ;;  %vm560_vm1 = vcmask 523264   ;;  %v2095_v24 = vld [vmem:[%s3083_s1 + $0x88] sm:$0xff]   ;;  %vm1183_vm2 = vcmask 1045504   ;;  %vm1656_vm3 = vcmask 516096  }
   0xf   : > { %2067 = vmatpush1.bf16.msra.mxu1 %v2090_v0  ;;  %601 = vmatpush1.bf16.msra.mxu0 %v2090_v0  ;;  %s3113_s19 = smov (!%p226_p3, %s1844_s19), 1  ;;  %v2096_v32 = vld [vmem:[%s3083_s1 + $0x90] sm:$0xff]   ;;  %v2097_v33 = vld [vmem:[%s3083_s1 + $0x98] sm:$0xff]   ;;  %v2098_v42 = vld [vmem:[%s3083_s1 + $0xa0] sm:$0xff]  }
  0x10   : > { %2056 = vmatprep.subr.bf16.mxu1 %v3091_v1  ;;  %602 = vmatprep.subr.bf16.mxu0 %v3091_v1  ;;  %s2079_s24 = smul.u32 224, %s3113_s19  ;;  %v2099_v45 = vld [vmem:[%s3083_s1 + $0xa8] sm:$0xff]   ;;  %v2100_v61 = vld [vmem:[%s3083_s1 + $0xb0] sm:$0xff]   ;;  %s238_s12 = scalar_lea.vmem %s3086_s4, %s3113_s19 }
  0x11   : > { %s241_s15 = scalar_lea.vmem %s3087_s5, %s3113_s19 }
  0x12   : > { %s2254_s29 = scalar_lea.vmem %s3082_s0, %s2079_s24 }
  0x13   : > { %2068 = vmatpush1.bf16.msra.mxu1 %v2091_v2  ;;  %603 = vmatpush1.bf16.msra.mxu0 %v2091_v2  ;;  %v2262_v5 = vld [vmem:[%s2254_s29 + $0x68] sm:$0xff]  ;;  %v2265_v6 = vld [vmem:[%s2254_s29 + $0x70] sm:$0xff]  ;;  %v2268_v7 = vld [vmem:[%s2254_s29 + $0x78] sm:$0xff] }
  0x14   : > { %2057 = vmatprep.subr.bf16.mxu1 %v3091_v1  ;;  %604 = vmatprep.subr.bf16.mxu0 %v3091_v1  ;;  %v2271_v8 = vld [vmem:[%s2254_s29 + $0x80] sm:$0xff]  ;;  %v1888_v9 = vcombine.high %v2262_v5, %v2265_v6  ;;  %v2277_v10 = vcombine.high %v2265_v6, %v2268_v7  ;;  %v2281_v11 = vcombine.low %v2265_v6, %v2268_v7  ;;  %v2293_v15 = vld [vmem:[%s2254_s29 + $0x10] sm:$0xff]  ;;  %v2296_v16 = vld [vmem:[%s2254_s29 + $0x18] sm:$0xff] }
  0x15   : > { %v1890_v13 = vcombine.high %v2268_v7, %v2271_v8  ;;  %v2301_v18 = vld [vmem:[%s2254_s29 + $0x20] sm:$0xff]  ;;  %v2304_v19 = vld [vmem:[%s2254_s29 + $0x8] sm:$0xee]  ;;  %v2354_v38 = vld [vmem:[%s2254_s29 + $0x90] sm:$0xff]  ;;  %v1887_v47 = vcombine.low %v2262_v5, %v2265_v6  ;;  %v1889_v48 = vcombine.low %v2268_v7, %v2271_v8 }
  0x16   : > { %v2290_v14 = vrot.slane %v1888_v9, 1  ;;  %v1876_v22 = vcombine.high %v2304_v19, %v2293_v15  ;;  %v1878_v23 = vcombine.high %v2296_v16, %v2301_v18  ;;  %v2325_v28 = vld [vmem:[%s2254_s29 + $0x88] sm:$0xff]  ;;  %v1208_v35 = vrot.slane %v2277_v10, 2  ;;  %v2357_v39 = vld [vmem:[%s2254_s29 + $0x98] sm:$0xff]  ;;  %v2388_v46 = vld [vmem:[%s2254_s29 + $0xa0] sm:$0xff] }
  0x17   : > { %2069 = vmatpush1.bf16.msra.mxu1 %v2092_v3  ;;  %605 = vmatpush1.bf16.msra.mxu0 %v2092_v3  ;;  %v2298_v17 = vrot.slane %v1890_v13, 1  ;;  %v2330_v29 = vcombine.high %v2271_v8, %v2325_v28  ;;  %v2334_v30 = vcombine.low %v2271_v8, %v2325_v28  ;;  %v1206_v36 = vrot.slane %v2281_v11, 2  ;;  %v2395_v49 = vld [vmem:[%s2254_s29 + $0xa8] sm:$0xff]  ;;  %v2406_v54 = vld [vmem:[%s2254_s29 + $0x30] sm:$0xff]  ;;  %v2415_v57 = vld [vmem:[%s2254_s29 + $0x58] sm:$0xff] }
  0x18   : > { %2058 = vmatprep.subr.bf16.mxu1 %v3091_v1  ;;  %606 = vmatprep.subr.bf16.mxu0 %v3091_v1  ;;  %v428_v26 = vrot.slane %v1876_v22, 1  ;;  %v2322_v27 = vrot.slane %v1878_v23, 1  ;;  %v2376_v43 = vcombine.high %v2354_v38, %v2357_v39  ;;  %v2382_v44 = vcombine.low %v2354_v38, %v2357_v39  ;;  %v248_v53 = vld [vmem:[%s2254_s29 + $0x28] sm:$0xff]  ;;  %v2418_v58 = vld [vmem:[%s2254_s29 + $0x60] sm:$0xff]  ;;  %v2101_v7 = vld [vmem:[%s3083_s1 + $0xb8] sm:$0xff]  }
  0x19   : > { %v454_v25 = vsel %vm424_vm0, %v2290_v14, %v2298_v17  ;;  %v1212_v34 = vrot.slane %v2330_v29, 2  ;;  %v1210_v37 = vrot.slane %v2334_v30, 2  ;;  %v1875_v51 = vcombine.low %v2304_v19, %v2293_v15  ;;  %v2451_v9 = vld [vmem:[%s2254_s29 + $0xb0] sm:$0xff]  ;;  %v2456_v13 = vld [vmem:[%s2254_s29 + $0xb8] sm:$0xff] }
  0x1a   : > { %1919 = vmatprep.mubr.msk.bf16.mxu1 %vm560_vm1, %v454_v25  ;;  %v430_v31 = vsel %vm424_vm0, %v428_v26, %v2322_v27  ;;  %v1216_v50 = vrot.slane %v2376_v43, 2  ;;  %v1877_v52 = vcombine.low %v2296_v16, %v2301_v18  ;;  %v2410_v55 = vcombine.high %v2388_v46, %v2395_v49 }
  0x1b   : > { %2070 = vmatpush1.bf16.msra.mxu1 %v2093_v4  ;;  %607 = vmatpush1.bf16.msra.mxu0 %v2093_v4  ;;  %v2362_v40 = vsel %vm1183_vm2, %v1208_v35, %v1212_v34  ;;  %v2369_v41 = vsel %vm1183_vm2, %v1206_v36, %v1210_v37  ;;  %v1892_v56 = vcombine.high %v2325_v28, %v2354_v38  ;;  %v2434_v63 = vrot.slane %v1887_v47, 1  ;;  %v2114_v47 = vld [vmem:[%s3083_s1 + $0xc0] sm:$0xff]  }
  0x1c   : > { %2059 = vmatprep.subr.bf16.mxu1 %v3091_v1  ;;  %608 = vmatprep.subr.bf16.mxu0 %v3091_v1  ;;  %v2423_v59 = vsel %vm1183_vm2, %v1212_v34, %v1216_v50  ;;  %v2427_v60 = vcombine.low %v2388_v46, %v2395_v49  ;;  %v1886_v62 = vcombine.high %v2415_v57, %v2418_v58  ;;  %v2436_v0 = vrot.slane %v1889_v48, 1 }
  0x1d   : > { %1913 = vmatprep.mubr.msk.bf16.mxu0 %vm560_vm1, %v430_v31  ;;  %v425_v2 = vrot.slane %v1875_v51, 1  ;;  %v2440_v3 = vrot.slane %v1877_v52, 1  ;;  %v1880_v4 = vcombine.high %v248_v53, %v2406_v54  ;;  %v2448_v8 = vrot.slane %v1892_v56, 1 }
  0x1e   : > { %3095 = vst [vmem:[#allocation2_spill] sm:$0xff] %v2427_v60  ;;  %v2443_v6 = vrot.slane %v1886_v62, 1  ;;  %v2464_v22 = vcombine.low %v2301_v18, %v248_v53  ;;  %v2468_v23 = vcombine.high %v2418_v58, %v2262_v5  ;;  %v2472_v25 = vcombine.high %v2301_v18, %v248_v53 }
  0x1f   : > { %2071 = vmatpush1.bf16.msra.mxu1 %v2094_v12  ;;  %609 = vmatpush1.bf16.msra.mxu0 %v2094_v12  ;;  %v1891_v12 = vcombine.low %v2325_v28, %v2354_v38  ;;  %v2476_v26 = vcombine.low %v2418_v58, %v2262_v5  ;;  %v2484_v28 = vcombine.high %v2451_v9, %v2456_v13  ;;  %v2106_v5 = vld [vmem:[%s3083_s1] sm:$0xff]   ;;  %v1218_v21 = vrot.slane %v2427_v60, 2 }
  0x20   : > { %2060 = vmatprep.subr.bf16.mxu1 %v3091_v1  ;;  %610 = vmatprep.subr.bf16.mxu0 %v3091_v1  ;;  %v2461_v19 = vsel %vm424_vm0, %v2443_v6, %v2290_v14  ;;  %v2480_v14 = vrot.slane %v1880_v4, 1  ;;  %v2488_v31 = vcombine.low %v2451_v9, %v2456_v13  ;;  %v452_v18 = vsel %vm424_vm0, %v2434_v63, %v2436_v0 }
  0x21   : > { %3096 = vst [vmem:[#allocation3_spill] sm:$0xff] %v2484_v28  ;;  %v427_v34 = vsel %vm424_vm0, %v425_v2, %v2440_v3  ;;  %v2504_v38 = vrot.slane %v1891_v12, 1  ;;  %v3089_v52 = vrot.slane %v2476_v26, 2  ;;  %v1894_v56 = vcombine.high %v2357_v39, %v2388_v46 }
  0x22   : > { %3097 = vst [vmem:[#allocation4_spill] sm:$0xff] %v2488_v31  ;;  %v1214_v2 = vrot.slane %v2382_v44, 2  ;;  %v1224_v20 = vrot.slane %v2484_v28, 2 }
  0x23   : > { %2072 = vmatpush1.bf16.msra.mxu1 %v2095_v24  ;;  %611 = vmatpush1.bf16.msra.mxu0 %v2095_v24  ;;  %v1879_v24 = vcombine.low %v248_v53, %v2406_v54  ;;  %v434_v53 = vsel %vm424_vm0, %v2322_v27, %v2480_v14  ;;  %v2543_v12 = vsel %vm1183_vm2, %v3089_v52, %v1206_v36  ;;  %v2107_v36 = vld [vmem:[%s3083_s1 + $0x8] sm:$0xff]   ;;  %v1222_v52 = vrot.slane %v2488_v31, 2 }
  0x24   : > { %2061 = vmatprep.subr.bf16.mxu1 %v3091_v1  ;;  %612 = vmatprep.subr.bf16.mxu0 %v3091_v1  ;;  %v461_v51 = vrot.slane %v1894_v56, 1  ;;  %v1893_v31 = vcombine.low %v2357_v39, %v2388_v46  ;;  %v2612_v46 = vld [vmem:[%s2254_s29 + $0x48] sm:$0xff] }
  0x25   : > { %v2513_v48 = vrot.slane %v1879_v24, 1  ;;  %v2549_v24 = vld [vmem:[%s2254_s29 + $0xc8] sm:$0xff] }
  0x27   : > { %2073 = vmatpush1.bf16.msra.mxu1 %v2096_v32  ;;  %613 = vmatpush1.bf16.msra.mxu0 %v2096_v32  ;;  %v2497_v32 = vld [vmem:[%s2254_s29 + $0x38] sm:$0xff] }
  0x28   : > { %2062 = vmatprep.subr.bf16.mxu1 %v3091_v1  ;;  %614 = vmatprep.subr.bf16.mxu0 %v3091_v1 }
  0x2b   : > { %2074 = vmatpush1.bf16.msra.mxu1 %v2097_v33  ;;  %615 = vmatpush1.bf16.msra.mxu0 %v2097_v33  ;;  %v458_v33 = vsel %vm424_vm0, %v2298_v17, %v2448_v8 }
  0x2c   : > { %2063 = vmatprep.subr.bf16.mxu1 %v3091_v1  ;;  %616 = vmatprep.subr.bf16.mxu0 %v3091_v1 }
  0x2f   : > { %2075 = vmatpush1.bf16.msra.mxu1 %v2098_v42  ;;  %617 = vmatpush1.bf16.msra.mxu0 %v2098_v42  ;;  %v2507_v42 = vld [vmem:[%s2254_s29 + $0x40] sm:$0xff] }
  0x30   : > { %2064 = vmatprep.subr.bf16.mxu1 %v3091_v1  ;;  %618 = vmatprep.subr.bf16.mxu0 %v3091_v1  ;;  %v1882_v4 = vcombine.high %v2497_v32, %v2507_v42  ;;  %v1881_v39 = vcombine.low %v2497_v32, %v2507_v42 }
  0x32   : > { %v435_v60 = vrot.slane %v1881_v39, 1 }
  0x33   : > { %2076 = vmatpush1.bf16.msra.mxu1 %v2099_v45  ;;  %619 = vmatpush1.bf16.msra.mxu0 %v2099_v45  ;;  %v3088_v45 = vrot.slane %v2468_v23, 2 }
  0x34   : > { %2065 = vmatprep.subr.bf16.mxu1 %v3091_v1  ;;  %620 = vmatprep.subr.bf16.mxu0 %v3091_v1 }
  0x35   : > { %v2531_v62 = vsel %vm1183_vm2, %v3088_v45, %v1208_v35  ;;  %v2546_v35 = vld [vmem:[%s2254_s29 + $0xc0] sm:$0xff]  ;;  %v2554_v45 = vsel %vm1183_vm2, %v1210_v37, %v1214_v2 }
  0x36   : > { %v2024_v37 = vcombine.high %v2546_v35, %v2549_v24 }
  0x37   : > { %2077 = vmatpush1.bf16.msra.mxu1 %v2100_v61  ;;  %621 = vmatpush1.bf16.msra.mxu0 %v2100_v61  ;;  %v1028_v61 = vld [vmem:[%s2254_s29 + $0x10] sm:$0xcc] }
  0x38   : > { %2066 = vmatprep.subr.bf16.mxu1 %v3091_v1  ;;  %622 = vmatprep.subr.bf16.mxu0 %v3091_v1  ;;  %v2002_v27 = vcombine.high %v1028_v61, %v2296_v16 }
  0x3b   : > { %2078 = vmatpush1.bf16.msra.mxu1 %v2101_v7  ;;  %623 = vmatpush1.bf16.msra.mxu0 %v2101_v7  ;;  %v2001_v7 = vcombine.low %v1028_v61, %v2296_v16  ;;  %v1220_v61 = vrot.slane %v2410_v55, 2 }
  0x3c   : > { %892 = vmatprep.subr.bf16.mxu1 %v3091_v1  ;;  %1358 = vmatprep.subr.bf16.mxu0 %v3091_v1 }
  0x3d   : > { %v2573_v17 = vsel %vm1183_vm2, %v1216_v50, %v1220_v61  ;;  %v3099_v50 = vrot.slane %v2464_v22, 2 }
  0x3e   : > { %681 = vmatmul.mubr.bf16.vlgmr.msra.gmra.mrb[0].mxu1 %v452_v18  ;;  %633 = vmatmul.mubr.bf16.vlgmr.msra.gmra.mrb[0].mxu0 %v427_v34  ;;  %v1187_v18 = vrot.slane %v2002_v27, 2  ;;  %v1184_v34 = vrot.slane %v2001_v7, 2  ;;  %v2579_v7 = vsel %vm1183_vm2, %v1220_v61, %v1224_v20  ;;  %v1228_v61 = vrot.slane %v2024_v37, 2 }
  0x3f   : > { %893 = vmatpush1.bf16.msra.mxu1 %v2106_v5  ;;  %1920 = vmatprep.mubr.msk.bf16.mxu1 %vm560_vm1, %v458_v33  ;;  %v2116_v5 = vld [vmem:[%s3083_s1 + $0xc8] sm:$0xff]   ;;  %v2576_v33 = vsel %vm1183_vm2, %v1214_v2, %v1218_v21  ;;  %v2594_v2 = vsel %vm1183_vm2, %v1218_v21, %v1222_v52  ;;  %v432_v21 = vsel %vm424_vm0, %v2440_v3, %v2513_v48  ;;  %v3100_v37 = vmov 0   ;;  %v2122_v3 = vld [vmem:[%s3083_s1 + $0xd0] sm:$0xff]  }
  0x40   : > { %894 = vmatprep.subr.bf16.mxu1 %v3091_v1  ;;  %1359 = vmatpush1.bf16.msra.mxu0 %v2114_v47  ;;  %v3098_v47 = vrot.slane %v2472_v25, 2  ;;  %v2591_v27 = vsel %vm1183_vm2, %v1184_v34, %v3099_v50  ;;  %v2115_v34 = vld [vmem:[%s3083_s1 + $0x10] sm:$0xff]  }
  0x41   : > { %1360 = vmatprep.subr.bf16.mxu0 %v3091_v1  ;;  %1914 = vmatprep.mubr.msk.bf16.mxu0 %vm560_vm1, %v434_v53  ;;  %v437_v1 = vrot.slane %v1882_v4, 1  ;;  %v2023_v53 = vcombine.low %v2546_v35, %v2549_v24  ;;  %v2615_v4 = vld [vmem:[%s2254_s29 + $0x50] sm:$0xff] }
  0x42   : > { %v2586_v56 = vsel %vm1183_vm2, %v1187_v18, %v3098_v47  ;;  %v456_v18 = vsel %vm424_vm0, %v2436_v0, %v2504_v38  ;;  %v462_v0 = vsel %vm424_vm0, %v2448_v8, %v461_v51  ;;  %v1896_v47 = vcombine.high %v2395_v49, %v2451_v9 }
  0x43   : > { %895 = vmatpush1.bf16.msra.mxu1 %v2107_v36  ;;  %v2618_v36 = vsel %vm1183_vm2, %v1224_v20, %v1228_v61  ;;  %v1226_v50 = vrot.slane %v2023_v53, 2  ;;  %v459_v20 = vrot.slane %v1893_v31, 1  ;;  %v1884_v8 = vcombine.high %v2612_v46, %v2615_v4  ;;  %v2119_v53 = vld [vmem:[%s3083_s1 + $0x18] sm:$0xff]  }
  0x44   : > { %896 = vmatprep.subr.bf16.mxu1 %v3100_v37  ;;  %1361 = vmatpush1.bf16.msra.mxu0 %v2116_v5  ;;  %v438_v5 = vsel %vm424_vm0, %v2480_v14, %v437_v1  ;;  %v2124_v14 = vld [vmem:[%s3083_s1 + $0xd8] sm:$0xff]   ;;  %v465_v31 = vrot.slane %v1896_v47, 1  ;;  %v436_v47 = vsel %vm424_vm0, %v2513_v48, %v435_v60  ;;  %v2130_v48 = vld [vmem:[%s3083_s1 + $0xe0] sm:$0xff]  }
  0x45   : > { %1362 = vmatprep.subr.bf16.mxu0 %v3100_v37  ;;  %v2634_v28 = vsel %vm1183_vm2, %v1222_v52, %v1226_v50  ;;  %v2648_v52 = vld [vmem:[%s2254_s29 + $0xd0] ss:$8 sps:$4 sm:$0x3f]   ;;  %v441_v39 = vrot.slane %v1884_v8, 1 }
  0x46   : > { %689 = vmatmul.mubr.bf16.gmra.mrb[4].mxu1 %v456_v18  ;;  %641 = vmatmul.mubr.bf16.gmra.mrb[4].mxu0 %v432_v21  ;;  %3101 = vst [vmem:[#allocation5_spill] sm:$0xff] %v2634_v28  ;;  %v2641_v18 = vld [vmem:[%s2254_s29 + $0xd4] ss:$8 sps:$4 sm:$0x3f]   ;;  %v460_v21 = vsel %vm424_vm0, %v2504_v38, %v459_v20  ;;  %v1895_v28 = vcombine.low %v2395_v49, %v2451_v9 }
  0x47   : > { %897 = vmatpush1.bf16.msra.mxu1 %v2115_v34  ;;  %1921 = vmatprep.mubr.msk.bf16.mxu1 %vm560_vm1, %v462_v0  ;;  %v1232_v34 = vrot.slane %v2641_v18, 2  ;;  %v1230_v0 = vrot.slane %v2648_v52, 2  ;;  %v466_v8 = vsel %vm424_vm0, %v461_v51, %v465_v31  ;;  %v1898_v49 = vcombine.high %v2456_v13, %v2546_v35 }
  0x48   : > { %898 = vmatprep.subr.bf16.mxu1 %v3100_v37  ;;  %1363 = vmatpush1.bf16.msra.mxu0 %v2122_v3  ;;  %v2123_v3 = vld [vmem:[%s3083_s1 + $0x20] sm:$0xff]   ;;  %v463_v51 = vrot.slane %v1895_v28, 1 }
  0x49   : > { %1364 = vmatprep.subr.bf16.mxu0 %v3100_v37  ;;  %1915 = vmatprep.mubr.msk.bf16.mxu0 %vm560_vm1, %v438_v5  ;;  %v1883_v5 = vcombine.low %v2612_v46, %v2615_v4  ;;  %v2668_v38 = vsel %vm1183_vm2, %v1228_v61, %v1232_v34  ;;  %v2680_v9 = vsel %vm1183_vm2, %v1226_v50, %v1230_v0  ;;  %v2132_v50 = vld [vmem:[%s3083_s1 + $0xe8] sm:$0xff]  }
  0x4a   : > { %v442_v61 = vsel %vm424_vm0, %v437_v1, %v441_v39  ;;  %v294_v1 = vld [vmem:[%s2254_s29 + $0xd0] sm:$0x11]  ;;  %v464_v28 = vsel %vm424_vm0, %v459_v20, %v463_v51 }
  0x4b   : > { %899 = vmatpush1.bf16.msra.mxu1 %v2119_v53  ;;  %v2129_v53 = vld [vmem:[%s3083_s1 + $0x28] sm:$0xff]   ;;  %v2137_v20 = vld [vmem:[%s3083_s1 + $0xf0] sm:$0xff]  }
  0x4c   : > { %900 = vmatprep.subr.bf16.mxu1 %v3100_v37  ;;  %1365 = vmatpush1.bf16.msra.mxu0 %v2124_v14  ;;  %v439_v14 = vrot.slane %v1883_v5, 1  ;;  %v1897_v5 = vcombine.low %v2456_v13, %v2546_v35  ;;  %v2138_v13 = vld [vmem:[%s3083_s1 + $0x38] sm:$0xff]  }
  0x4d   : > { %1366 = vmatprep.subr.bf16.mxu0 %v3100_v37 }
  0x4e   : > { %697 = vmatmul.mubr.bf16.gmra.mrb[8].mxu1 %v460_v21  ;;  %649 = vmatmul.mubr.bf16.gmra.mrb[8].mxu0 %v436_v47  ;;  %v469_v21 = vrot.slane %v1898_v49, 1  ;;  %v440_v47 = vsel %vm424_vm0, %v435_v60, %v439_v14  ;;  %v1900_v49 = vcombine.high %v2549_v24, %v294_v1  ;;  %v446_v60 = vsel %vm424_vm0, %v441_v39, %v2443_v6  ;;  %v2142_v39 = vld [vmem:[%s3083_s1 + $0x40] sm:$0xff]  }
  0x4f   : > { %901 = vmatpush1.bf16.msra.mxu1 %v2123_v3  ;;  %1922 = vmatprep.mubr.msk.bf16.mxu1 %vm560_vm1, %v466_v8  ;;  %v2131_v3 = vld [vmem:[%s3083_s1 + $0x30] sm:$0xff]   ;;  %v1885_v8 = vcombine.low %v2415_v57, %v2418_v58  ;;  %v467_v58 = vrot.slane %v1897_v5, 1 }
  0x50   : > { %902 = vmatprep.subr.bf16.mxu1 %v3100_v37  ;;  %1367 = vmatpush1.bf16.msra.mxu0 %v2130_v48  ;;  %v470_v48 = vsel %vm424_vm0, %v465_v31, %v469_v21  ;;  %v2148_v5 = vld [vmem:[%s3083_s1 + $0x50] sm:$0xff]  }
  0x51   : > { %1368 = vmatprep.subr.bf16.mxu0 %v3100_v37  ;;  %1916 = vmatprep.mubr.msk.bf16.mxu0 %vm560_vm1, %v442_v61  ;;  %v443_v31 = vrot.slane %v1885_v8, 1  ;;  %v2139_v61 = vld [vmem:[%s3083_s1 + $0xf8] sm:$0xff]   ;;  %v468_v6 = vsel %vm424_vm0, %v463_v51, %v467_v58  ;;  %v2149_v8 = vld [vmem:[%s3083_s1 + $0x110] sm:$0xff]  }
  0x53   : > { %903 = vmatpush1.bf16.msra.mxu1 %v2129_v53  ;;  %v473_v53 = vrot.slane %v1900_v49, 1  ;;  %v2154_v49 = vld [vmem:[%s2254_s29 + $0x4] ss:$8 sps:$4 sm:$0xff]  }
  0x54   : > { %904 = vmatprep.subr.bf16.mxu1 %v3100_v37  ;;  %1369 = vmatpush1.bf16.msra.mxu0 %v2132_v50  ;;  %v444_v50 = vsel %vm424_vm0, %v439_v14, %v443_v31  ;;  %v2147_v14 = vld [vmem:[%s3083_s1 + $0x108] sm:$0xff]  }
  0x55   : > { %1370 = vmatprep.subr.bf16.mxu0 %v3100_v37 }
  0x56   : > { %705 = vmatmul.mubr.bf16.gmra.mrb[12].mxu1 %v464_v28  ;;  %657 = vmatmul.mubr.bf16.gmra.mrb[12].mxu0 %v440_v47  ;;  %v1899_v28 = vcombine.low %v2549_v24, %v294_v1  ;;  %v2145_v47 = vld [vmem:[%s3083_s1 + $0x100] sm:$0xff]   ;;  %v2146_v24 = vld [vmem:[%s3083_s1 + $0x48] sm:$0xff]   ;;  %v448_v1 = vsel %vm424_vm0, %v443_v31, %v2434_v63  ;;  %v2150_v63 = vld [vmem:[%s3083_s1 + $0x58] sm:$0xff]   ;;  %v2008_v31 = vcombine.high %v2507_v42, %v2612_v46 }
  0x57   : > { %905 = vmatpush1.bf16.msra.mxu1 %v2131_v3  ;;  %1923 = vmatprep.mubr.msk.bf16.mxu1 %vm560_vm1, %v470_v48  ;;  %v474_v3 = vsel %vm424_vm0, %v469_v21, %v473_v53  ;;  %v2151_v48 = vld [vmem:[%s3083_s1 + $0x118] sm:$0xff]  }
  0x58   : > { %906 = vmatprep.subr.bf16.mxu1 %v3100_v37  ;;  %1371 = vmatpush1.bf16.msra.mxu0 %v2137_v20  ;;  %v471_v51 = vrot.slane %v1899_v28, 1 }
  0x59   : > { %1372 = vmatprep.subr.bf16.mxu0 %v3100_v37  ;;  %1917 = vmatprep.mubr.msk.bf16.mxu0 %vm560_vm1, %v446_v60  ;;  %v2005_v60 = vcombine.low %v2406_v54, %v2497_v32 }
  0x5a   : > { %v472_v21 = vsel %vm424_vm0, %v467_v58, %v471_v51  ;;  %v3102_v58 = vrot.slane %v2472_v25, 2 }
  0x5b   : > { %907 = vmatpush1.bf16.msra.mxu1 %v2138_v13 }
  0x5c   : > { %1373 = vmatpush1.bf16.msra.mxu0 %v2139_v61  ;;  %908 = vmatprep.subr.bf16.mxu1 %v3100_v37  ;;  %v2152_v61 = vld [vmem:[%s2254_s29] ss:$8 sps:$4 sm:$0xff]   ;;  %s2080_s29 = smul.u32 200, %s3113_s19 }
  0x5d   : > { %1374 = vmatprep.subr.bf16.mxu0 %v3100_v37 }
  0x5e   : > { %713 = vmatmul.mubr.bf16.gmra.mrb[16].mxu1 %v468_v6  ;;  %665 = vmatmul.mubr.bf16.gmra.mrb[16].mxu0 %v444_v50  ;;  %s2922_s9 = scalar_lea.vmem %s3085_s3, %s2080_s29 }
  0x5f   : > { %1924 = vmatprep.mubr.msk.bf16.mxu1 %vm560_vm1, %v474_v3  ;;  %909 = vmatpush1.bf16.msra.mxu1 %v2142_v39  ;;  %v2010_v39 = vcombine.high %v2615_v4, %v2415_v57 }
  0x60   : > { %1375 = vmatpush1.bf16.msra.mxu0 %v2145_v47  ;;  %910 = vmatprep.subr.bf16.mxu1 %v3100_v37  ;;  %v3105_v47 = vcombine.low %v2293_v15, %v2296_v16 }
  0x61   : > { %1376 = vmatprep.subr.bf16.mxu0 %v3100_v37  ;;  %1918 = vmatprep.mubr.msk.bf16.mxu0 %vm560_vm1, %v2461_v19  ;;  %v2006_v19 = vcombine.high %v2406_v54, %v2497_v32  ;;  %v2007_v32 = vcombine.low %v2507_v42, %v2612_v46  ;;  %v1200_v28 = vrot.slane %v2010_v39, 2  ;;  %v2009_v42 = vcombine.low %v2615_v4, %v2415_v57 }
  0x63   : > { %911 = vmatpush1.bf16.msra.mxu1 %v2146_v24  ;;  %v1192_v20 = vrot.slane %v2006_v19, 2  ;;  %v1194_v50 = vrot.slane %v2007_v32, 2 }
  0x64   : > { %1377 = vmatpush1.bf16.msra.mxu0 %v2147_v14  ;;  %912 = vmatprep.subr.bf16.mxu1 %v3100_v37  ;;  %v3106_v14 = vrot.slane %v2468_v23, 2 }
  0x65   : > { %1378 = vmatprep.subr.bf16.mxu0 %v3100_v37  ;;  %v1193_v13 = vsel %vm1183_vm2, %v3102_v58, %v1192_v20 }
  0x66   : > { %721 = vmatmul.mubr.bf16.gmra.mrb[20].mxu1 %v472_v21  ;;  %673 = vmatmul.mubr.bf16.gmra.mrb[20].mxu0 %v448_v1  ;;  %v1205_v21 = vsel %vm1183_vm2, %v1200_v28, %v3106_v14 }
  0x67   : > { %1925 = vmatprep.mubr.msk.bf16.mxu1 %vm560_vm1, %v473_v53  ;;  %913 = vmatpush1.bf16.msra.mxu1 %v2148_v5  ;;  %v3103_v53 = vrot.slane %v2464_v22, 2 }
  0x68   : > { %1379 = vmatpush1.bf16.msra.mxu0 %v2149_v8  ;;  %914 = vmatprep.subr.bf16.mxu1 %v3100_v37 }
  0x69   : > { %1380 = vmatprep.subr.bf16.mxu0 %v3100_v37  ;;  %2039 = vmatprep.mubr.msk.bf16.mxu0 %vm560_vm1, %v2586_v56  ;;  %v1190_v56 = vrot.slane %v2005_v60, 2  ;;  %v1196_v37 = vrot.slane %v2008_v31, 2 }
  0x6b   : > { %915 = vmatpush1.bf16.msra.mxu1 %v2150_v63  ;;  %v1191_v54 = vsel %vm1183_vm2, %v3103_v53, %v1190_v56  ;;  %v1197_v6 = vsel %vm1183_vm2, %v1192_v20, %v1196_v37  ;;  %v1195_v3 = vsel %vm1183_vm2, %v1190_v56, %v1194_v50  ;;  %v1201_v46 = vsel %vm1183_vm2, %v1196_v37, %v1200_v28 }
  0x6c   : > { %1381 = vmatpush1.bf16.msra.mxu0 %v2151_v48 }
  0x6e   : > { %729 = vmatmul.mubr.bf16.gmra.mrb[24].mxu1 %v471_v51  ;;  %v1198_v51 = vrot.slane %v2009_v42, 2 }
  0x6f   : > { %1964 = vmatprep.mubr.msk.bf16.mxu1 %vm560_vm1, %v2154_v49  ;;  %1391 = vmatmul.mubr.bf16.vlgmr.msra.gmra.mrb[24].mxu0 %v2591_v27  ;;  %v3104_v27 = vcombine.high %v2293_v15, %v2296_v16  ;;  %v3107_v15 = vrot.slane %v2476_v26, 2 }
  0x70   : > { %2040 = vmatprep.mubr.msk.bf16.mxu0 %vm560_vm1, %v1193_v13  ;;  %v1199_v24 = vsel %vm1183_vm2, %v1194_v50, %v1198_v51 }
  0x71   : > { %v1203_v16 = vsel %vm1183_vm2, %v1198_v51, %v3107_v15 }
  0x76   : > { %925 = vmatmul.mubr.bf16.vlgmr.msra.gmra.mrb[28].mxu1 %v2152_v61 }
  0x77   : > { %1965 = vmatprep.mubr.msk.bf16.mxu1 %vm560_vm1, %v3104_v27  ;;  %1399 = vmatmul.mubr.bf16.gmra.mrb[28].mxu0 %v1191_v54 }
  0x78   : > { %2041 = vmatprep.mubr.msk.bf16.mxu0 %vm560_vm1, %v1197_v6 }
  0x7e   : > { %933 = vmatmul.mubr.bf16.gmra.mrb[32].mxu1 %v3105_v47 }
  0x7f   : > { %1966 = vmatprep.mubr.msk.bf16.mxu1 %vm560_vm1, %v2472_v25  ;;  %1407 = vmatmul.mubr.bf16.gmra.mrb[32].mxu0 %v1195_v3 }
  0x80   : > { %2042 = vmatprep.mubr.msk.bf16.mxu0 %vm560_vm1, %v1201_v46 }
  0x86   : > { %941 = vmatmul.mubr.bf16.gmra.mrb[36].mxu1 %v2464_v22 }
  0x87   : > { %1967 = vmatprep.mubr.msk.bf16.mxu1 %vm560_vm1, %v2006_v19  ;;  %1415 = vmatmul.mubr.bf16.gmra.mrb[36].mxu0 %v1199_v24 }
  0x88   : > { %2043 = vmatprep.mubr.msk.bf16.mxu0 %vm560_vm1, %v1205_v21 }
  0x8e   : > { %949 = vmatmul.mubr.bf16.gmra.mrb[40].mxu1 %v2005_v60 }
  0x8f   : > { %1968 = vmatprep.mubr.msk.bf16.mxu1 %vm560_vm1, %v2008_v31  ;;  %1423 = vmatmul.mubr.bf16.gmra.mrb[40].mxu0 %v1203_v16 }
  0x90   : > { %2044 = vmatprep.mubr.msk.bf16.mxu0 %vm560_vm1, %v2531_v62 }
  0x96   : > { %957 = vmatmul.mubr.bf16.gmra.mrb[44].mxu1 %v2007_v32 }
  0x97   : > { %1969 = vmatprep.mubr.msk.bf16.mxu1 %vm560_vm1, %v2010_v39  ;;  %1431 = vmatmul.mubr.bf16.gmra.mrb[44].mxu0 %v2543_v12 }
  0x98   : > { %2045 = vmatprep.mubr.msk.bf16.mxu0 %vm560_vm1, %v2362_v40  ;;  %v3111_v40 = vld [vmem:[#allocation4_spill] sm:$0xff] }
  0x9e   : > { %965 = vmatmul.mubr.bf16.gmra.mrb[48].mxu1 %v2009_v42 }
  0x9f   : > { %1970 = vmatprep.mubr.msk.bf16.mxu1 %vm560_vm1, %v2468_v23  ;;  %1439 = vmatmul.mubr.bf16.gmra.mrb[48].mxu0 %v2369_v41  ;;  %v1950_v41 = vcombine.low %v2546_v35, %v2546_v35 }
  0xa0   : > { %2046 = vmatprep.mubr.msk.bf16.mxu0 %vm560_vm1, %v2423_v59 }
  0xa6   : > { %973 = vmatmul.mubr.bf16.gmra.mrb[52].mxu1 %v2476_v26 }
  0xa7   : > { %1971 = vmatprep.mubr.msk.bf16.mxu1 %vm560_vm1, %v2277_v10  ;;  %1447 = vmatmul.mubr.bf16.gmra.mrb[52].mxu0 %v2554_v45  ;;  %v3108_v10 = vld [vmem:[#allocation5_spill] sm:$0xff] }
  0xa8   : > { %2047 = vmatprep.mubr.msk.bf16.mxu0 %vm560_vm1, %v2573_v17 }
  0xae   : > { %981 = vmatmul.mubr.bf16.gmra.mrb[56].mxu1 %v2281_v11  ;;  %v3109_v11 = vld [vmem:[#allocation2_spill] sm:$0xff] }
  0xaf   : > { %1972 = vmatprep.mubr.msk.bf16.mxu1 %vm560_vm1, %v2330_v29  ;;  %1455 = vmatmul.mubr.bf16.gmra.mrb[56].mxu0 %v2576_v33  ;;  %v3110_v29 = vld [vmem:[#allocation3_spill] sm:$0xff] }
  0xb0   : > { %2048 = vmatprep.mubr.msk.bf16.mxu0 %vm560_vm1, %v2579_v7 }
  0xb6   : > { %989 = vmatmul.mubr.bf16.gmra.mrb[60].mxu1 %v2334_v30  ;;  %v1951_v30 = vcombine.high %v2546_v35, %v2546_v35 }
  0xb7   : > { %1973 = vmatprep.mubr.msk.bf16.mxu1 %vm560_vm1, %v2376_v43  ;;  %1463 = vmatmul.mubr.bf16.gmra.mrb[60].mxu0 %v2594_v2 }
  0xb8   : > { %2049 = vmatprep.mubr.msk.bf16.mxu0 %vm560_vm1, %v2618_v36 }
  0xbe   : > { %997 = vmatmul.mubr.bf16.gmra.mrb[64].mxu1 %v2382_v44 }
  0xbf   : > { %1974 = vmatprep.mubr.msk.bf16.mxu1 %vm560_vm1, %v2410_v55  ;;  %1471 = vmatmul.mubr.bf16.gmra.mrb[64].mxu0 %v3108_v10 }
  0xc0   : > { %2050 = vmatprep.mubr.msk.bf16.mxu0 %vm560_vm1, %v2668_v38 }
  0xc6   : > { %1005 = vmatmul.mubr.bf16.gmra.mrb[68].mxu1 %v3109_v11 }
  0xc7   : > { %1975 = vmatprep.mubr.msk.bf16.mxu1 %vm560_vm1, %v3110_v29  ;;  %1479 = vmatmul.mubr.bf16.gmra.mrb[68].mxu0 %v2680_v9  ;;  %v2916_v29 = vld [vmem:[%s3084_s2] ss:$0 sm:$0xff] }
  0xc8   : > { %2051 = vmatprep.mubr.msk.bf16.mxu0 %vm560_vm1, %v1232_v34 }
  0xce   : > { %1013 = vmatmul.mubr.bf16.gmra.mrb[72].mxu1 %v3111_v40 }
  0xcf   : > { %1976 = vmatprep.mubr.msk.bf16.mxu1 %vm560_vm1, %v1951_v30  ;;  %1487 = vmatmul.mubr.bf16.gmra.mrb[72].mxu0 %v1230_v0 }
  0xd6   : > { %1021 = vmatmul.mubr.bf16.gmra.mrb[76].mxu1 %v1950_v41 }
 0x111   : > { %v2866_v43 = vpop.f32.mrb[0].mxu1  ;;  %v634_v44 = vpop.f32.mrb[0].mxu0 }
 0x112   : > { %v684_v55 = vpop.f32.mrb[1].mxu1  ;;  %v636_v57 = vpop.f32.mrb[1].mxu0 }
 0x113   : > { %v2868_v59 = vpop.f32.mrb[2].mxu1  ;;  %v637_v22 = vpop.f32.mrb[2].mxu0 }
 0x114   : > { %v687_v23 = vpop.f32.mrb[3].mxu1  ;;  %v639_v25 = vpop.f32.mrb[3].mxu0 }
 0x119   : > { %v2870_v26 = vpop.f32.mrb[4].mxu1  ;;  %v2872_v45 = vpop.f32.mrb[4].mxu0 }
 0x11a   : > { %v692_v17 = vpop.f32.mrb[5].mxu1  ;;  %v644_v62 = vpop.f32.mrb[5].mxu0 }
 0x11b   : > { %v2874_v12 = vpop.f32.mrb[6].mxu1  ;;  %v2876_v35 = vpop.f32.mrb[6].mxu0 }
 0x11c   : > { %v695_v33 = vpop.f32.mrb[7].mxu1  ;;  %v647_v7 = vpop.f32.mrb[7].mxu0 }
 0x121   : > { %v2878_v2 = vpop.f32.mrb[8].mxu1  ;;  %v2880_v4 = vpop.f32.mrb[8].mxu0 }
 0x122   : > { %v700_v36 = vpop.f32.mrb[9].mxu1  ;;  %v652_v18 = vpop.f32.mrb[9].mxu0 }
 0x123   : > { %v2882_v52 = vpop.f32.mrb[10].mxu1  ;;  %v2884_v34 = vpop.f32.mrb[10].mxu0 }
 0x124   : > { %v703_v0 = vpop.f32.mrb[11].mxu1  ;;  %v655_v38 = vpop.f32.mrb[11].mxu0 }
 0x129   : > { %v2886_v9 = vpop.f32.mrb[12].mxu1  ;;  %v2888_v1 = vpop.f32.mrb[12].mxu0 }
 0x12a   : > { %v708_v5 = vpop.f32.mrb[13].mxu1  ;;  %v660_v8 = vpop.f32.mrb[13].mxu0 }
 0x12b   : > { %v2890_v19 = vpop.f32.mrb[14].mxu1  ;;  %v2892_v63 = vpop.f32.mrb[14].mxu0 }
 0x12c   : > { %v711_v48 = vpop.f32.mrb[15].mxu1  ;;  %v663_v20 = vpop.f32.mrb[15].mxu0 }
 0x131   : > { %v2894_v49 = vpop.f32.mrb[16].mxu1  ;;  %v2896_v60 = vpop.f32.mrb[16].mxu0 }
 0x132   : > { %v716_v58 = vpop.f32.mrb[17].mxu1  ;;  %v668_v13 = vpop.f32.mrb[17].mxu0 }
 0x133   : > { %v2898_v31 = vpop.f32.mrb[18].mxu1  ;;  %v2900_v56 = vpop.f32.mrb[18].mxu0 }
 0x134   : > { %v719_v37 = vpop.f32.mrb[19].mxu1  ;;  %v671_v61 = vpop.f32.mrb[19].mxu0 }
 0x139   : > { %v2902_v53 = vpop.f32.mrb[20].mxu1  ;;  %v2904_v54 = vpop.f32.mrb[20].mxu0 }
 0x13a   : > { %v724_v32 = vpop.f32.mrb[21].mxu1  ;;  %v676_v6 = vpop.f32.mrb[21].mxu0 }
 0x13b   : > { %v2906_v39 = vpop.f32.mrb[22].mxu1  ;;  %v2908_v27 = vpop.f32.mrb[22].mxu0 }
 0x13c   : > { %v727_v50 = vpop.f32.mrb[23].mxu1  ;;  %v679_v28 = vpop.f32.mrb[23].mxu0 }
 0x141   : > { %v2910_v3 = vpop.f32.mrb[24].mxu1 }
 0x142   : > { %v732_v42 = vpop.f32.mrb[25].mxu1  ;;  %v1392_v46 = vpop.f32.mrb[24].mxu0 }
 0x143   : > { %v733_v47 = vpop.f32.mrb[26].mxu1  ;;  %v1394_v51 = vpop.f32.mrb[25].mxu0 }
 0x144   : > { %v734_v24 = vpop.f32.mrb[27].mxu1  ;;  %v1395_v14 = vpop.f32.mrb[26].mxu0 }
 0x145   : > { %v1397_v21 = vpop.f32.mrb[27].mxu0 }
 0x149   : > { %v926_v15 = vpop.f32.mrb[28].mxu1 }
 0x14a   : > { %v927_v16 = vadd.f32 %v926_v15, %v634_v44  ;;  %v928_v10 = vpop.f32.mrb[29].mxu1  ;;  %v1400_v11 = vpop.f32.mrb[28].mxu0 }
 0x14b   : > { %v929_v30 = vpop.f32.mrb[30].mxu1  ;;  %v1402_v40 = vpop.f32.mrb[29].mxu0 }
 0x14c   : > { %v1494_v41 = vadd.f32 %v1392_v46, %v927_v16  ;;  %v930_v55 = vadd.f32 %v929_v30, %v637_v22  ;;  %v931_v57 = vpop.f32.mrb[31].mxu1  ;;  %v1403_v23 = vpop.f32.mrb[30].mxu0 }
 0x14d   : > { %v1405_v25 = vpop.f32.mrb[31].mxu0 }
 0x14e   : > { %v1526_v17 = vadd.f32 %v2916_v29, %v1494_v41  ;;  %v1495_v62 = vadd.f32 %v1395_v14, %v930_v55 }
 0x150   : > { %v1551_v44 = vmax.f32 %v1526_v17, 0.0  ;;  %v1527_v33 = vadd.f32 %v2916_v29, %v1495_v62 }
 0x151   : > { %v934_v7 = vpop.f32.mrb[32].mxu1 }
 0x152   : > { %1576 = vst.msk [vmem:[%s2922_s9] sm:$0xff] %vm560_vm1, %v1551_v44  ;;  %v1658_v22 = vmul.f32 %v1551_v44, %v1551_v44  ;;  %v1552_v36 = vmax.f32 %v1527_v33, 0.0  ;;  %v935_v18 = vadd.f32 %v934_v7, %v2872_v45  ;;  %v936_v0 = vpop.f32.mrb[33].mxu1  ;;  %v1408_v38 = vpop.f32.mrb[32].mxu0  ;;  %v1601_v48 = vsel %vm560_vm1, %v1551_v44, 0.0 }
 0x153   : > { %v937_v5 = vpop.f32.mrb[34].mxu1  ;;  %v1410_v8 = vpop.f32.mrb[33].mxu0 }
 0x154   : > { %1577 = vst.msk [vmem:[%s2922_s9 + $0x8] sm:$0xff] %vm560_vm1, %v1552_v36  ;;  %v1602_v20 = vsel %vm560_vm1, %v1552_v36, 0.0  ;;  %v1659_v58 = vmul.f32 %v1552_v36, %v1552_v36  ;;  %v1496_v13 = vadd.f32 %v1400_v11, %v935_v18  ;;  %v939_v37 = vpop.f32.mrb[35].mxu1  ;;  %v1411_v61 = vpop.f32.mrb[34].mxu0  ;;  %v938_v6 = vadd.f32 %v937_v5, %v2876_v35 }
 0x155   : > { %v1603_v32 = vadd.f32 %v1602_v20, %v1601_v48  ;;  %v1413_v50 = vpop.f32.mrb[35].mxu0  ;;  %v1683_v45 = vsel %vm560_vm1, %v1658_v22, 0.0 }
 0x156   : > { %v1684_v28 = vsel %vm560_vm1, %v1659_v58, 0.0  ;;  %v1528_v42 = vadd.f32 %v2916_v29, %v1496_v13  ;;  %v1497_v47 = vadd.f32 %v1403_v23, %v938_v6 }
 0x157   : > { %v1685_v46 = vadd.f32 %v1684_v28, %v1683_v45 }
 0x158   : > { %v1553_v51 = vmax.f32 %v1528_v42, 0.0  ;;  %v1529_v24 = vadd.f32 %v2916_v29, %v1497_v47 }
 0x159   : > { %v942_v14 = vpop.f32.mrb[36].mxu1 }
 0x15a   : > { %1578 = vst.msk [vmem:[%s2922_s9 + $0x10] sm:$0xff] %vm560_vm1, %v1553_v51  ;;  %v1604_v21 = vsel %vm560_vm1, %v1553_v51, 0.0  ;;  %v1660_v15 = vmul.f32 %v1553_v51, %v1553_v51  ;;  %v943_v35 = vadd.f32 %v942_v14, %v2880_v4  ;;  %v944_v16 = vpop.f32.mrb[37].mxu1  ;;  %v1416_v10 = vpop.f32.mrb[36].mxu0  ;;  %v1554_v30 = vmax.f32 %v1529_v24, 0.0 }
 0x15b   : > { %v1605_v11 = vadd.f32 %v1604_v21, %v1603_v32  ;;  %v945_v40 = vpop.f32.mrb[38].mxu1  ;;  %v1418_v41 = vpop.f32.mrb[37].mxu0 }
 0x15c   : > { %v1686_v55 = vsel %vm560_vm1, %v1660_v15, 0.0  ;;  %v1498_v57 = vadd.f32 %v1408_v38, %v943_v35  ;;  %v946_v23 = vadd.f32 %v945_v40, %v2884_v34  ;;  %v947_v25 = vpop.f32.mrb[39].mxu1  ;;  %v1419_v17 = vpop.f32.mrb[38].mxu0  ;;  %1579 = vst.msk [vmem:[%s2922_s9 + $0x18] sm:$0xff] %vm560_vm1, %v1554_v30  ;;  %v1606_v44 = vsel %vm560_vm1, %v1554_v30, 0.0 }
 0x15d   : > { %v1687_v62 = vadd.f32 %v1686_v55, %v1685_v46  ;;  %v1661_v4 = vmul.f32 %v1554_v30, %v1554_v30  ;;  %v1421_v33 = vpop.f32.mrb[39].mxu0  ;;  %v1607_v7 = vadd.f32 %v1606_v44, %v1605_v11 }
 0x15e   : > { %v1530_v22 = vadd.f32 %v2916_v29, %v1498_v57  ;;  %v1499_v36 = vadd.f32 %v1411_v61, %v946_v23 }
 0x15f   : > { %v1688_v18 = vsel %vm560_vm1, %v1661_v4, 0.0 }
 0x160   : > { %v1689_v0 = vadd.f32 %v1688_v18, %v1687_v62  ;;  %v1555_v38 = vmax.f32 %v1530_v22, 0.0  ;;  %v1531_v34 = vadd.f32 %v2916_v29, %v1499_v36 }
 0x161   : > { %v950_v5 = vpop.f32.mrb[40].mxu1 }
 0x162   : > { %1580 = vst.msk [vmem:[%s2922_s9 + $0x20] sm:$0xff] %vm560_vm1, %v1555_v38  ;;  %v1608_v8 = vsel %vm560_vm1, %v1555_v38, 0.0  ;;  %v1662_v48 = vmul.f32 %v1555_v38, %v1555_v38  ;;  %v1556_v20 = vmax.f32 %v1531_v34, 0.0  ;;  %v951_v58 = vadd.f32 %v950_v5, %v2888_v1  ;;  %v952_v13 = vpop.f32.mrb[41].mxu1  ;;  %v1424_v37 = vpop.f32.mrb[40].mxu0 }
 0x163   : > { %v1609_v32 = vadd.f32 %v1608_v8, %v1607_v7  ;;  %v953_v61 = vpop.f32.mrb[42].mxu1  ;;  %v1426_v6 = vpop.f32.mrb[41].mxu0 }
 0x164   : > { %v1690_v50 = vsel %vm560_vm1, %v1662_v48, 0.0  ;;  %1581 = vst.msk [vmem:[%s2922_s9 + $0x28] sm:$0xff] %vm560_vm1, %v1556_v20  ;;  %v1610_v45 = vsel %vm560_vm1, %v1556_v20, 0.0  ;;  %v1663_v28 = vmul.f32 %v1556_v20, %v1556_v20  ;;  %v1500_v42 = vadd.f32 %v1416_v10, %v951_v58  ;;  %v955_v46 = vpop.f32.mrb[43].mxu1  ;;  %v1427_v47 = vpop.f32.mrb[42].mxu0 }
 0x165   : > { %v1691_v51 = vadd.f32 %v1690_v50, %v1689_v0  ;;  %v1611_v24 = vadd.f32 %v1610_v45, %v1609_v32  ;;  %v954_v1 = vadd.f32 %v953_v61, %v2892_v63  ;;  %v1429_v14 = vpop.f32.mrb[43].mxu0 }
 0x166   : > { %v1692_v21 = vsel %vm560_vm1, %v1663_v28, 0.0  ;;  %v1532_v15 = vadd.f32 %v2916_v29, %v1500_v42 }
 0x167   : > { %v1693_v35 = vadd.f32 %v1692_v21, %v1691_v51  ;;  %v1501_v16 = vadd.f32 %v1419_v17, %v954_v1 }
 0x168   : > { %v1557_v11 = vmax.f32 %v1532_v15, 0.0 }
 0x169   : > { %v1533_v30 = vadd.f32 %v2916_v29, %v1501_v16  ;;  %v958_v40 = vpop.f32.mrb[44].mxu1 }
 0x16a   : > { %1582 = vst.msk [vmem:[%s2922_s9 + $0x30] sm:$0xff] %vm560_vm1, %v1557_v11  ;;  %v1612_v10 = vsel %vm560_vm1, %v1557_v11, 0.0  ;;  %v1664_v41 = vmul.f32 %v1557_v11, %v1557_v11  ;;  %v959_v55 = vadd.f32 %v958_v40, %v2896_v60  ;;  %v960_v63 = vpop.f32.mrb[45].mxu1  ;;  %v1432_v57 = vpop.f32.mrb[44].mxu0 }
 0x16b   : > { %v1613_v23 = vadd.f32 %v1612_v10, %v1611_v24  ;;  %v1558_v25 = vmax.f32 %v1533_v30, 0.0  ;;  %v961_v62 = vpop.f32.mrb[46].mxu1  ;;  %v1434_v44 = vpop.f32.mrb[45].mxu0 }
 0x16c   : > { %v1694_v17 = vsel %vm560_vm1, %v1664_v41, 0.0  ;;  %v1502_v4 = vadd.f32 %v1424_v37, %v959_v55  ;;  %v962_v33 = vadd.f32 %v961_v62, %v2900_v56  ;;  %v963_v7 = vpop.f32.mrb[47].mxu1  ;;  %v1435_v22 = vpop.f32.mrb[46].mxu0 }
 0x16d   : > { %v1695_v36 = vadd.f32 %v1694_v17, %v1693_v35  ;;  %1583 = vst.msk [vmem:[%s2922_s9 + $0x38] sm:$0xff] %vm560_vm1, %v1558_v25  ;;  %v1614_v18 = vsel %vm560_vm1, %v1558_v25, 0.0  ;;  %v1665_v60 = vmul.f32 %v1558_v25, %v1558_v25  ;;  %v1437_v0 = vpop.f32.mrb[47].mxu0 }
 0x16e   : > { %v1615_v38 = vadd.f32 %v1614_v18, %v1613_v23  ;;  %v1534_v34 = vadd.f32 %v2916_v29, %v1502_v4  ;;  %v1503_v5 = vadd.f32 %v1427_v47, %v962_v33 }
 0x16f   : > { %v1696_v8 = vsel %vm560_vm1, %v1665_v60, 0.0 }
 0x170   : > { %v1697_v48 = vadd.f32 %v1696_v8, %v1695_v36  ;;  %v1559_v20 = vmax.f32 %v1534_v34, 0.0  ;;  %v1535_v56 = vadd.f32 %v2916_v29, %v1503_v5 }
 0x171   : > { %v966_v58 = vpop.f32.mrb[48].mxu1 }
 0x172   : > { %1584 = vst.msk [vmem:[%s2922_s9 + $0x40] sm:$0xff] %vm560_vm1, %v1559_v20  ;;  %v1616_v13 = vsel %vm560_vm1, %v1559_v20, 0.0  ;;  %v1666_v37 = vmul.f32 %v1559_v20, %v1559_v20  ;;  %v1560_v32 = vmax.f32 %v1535_v56, 0.0  ;;  %v967_v61 = vadd.f32 %v966_v58, %v2904_v54  ;;  %v968_v6 = vpop.f32.mrb[49].mxu1  ;;  %v1440_v50 = vpop.f32.mrb[48].mxu0 }
 0x173   : > { %v1617_v45 = vadd.f32 %v1616_v13, %v1615_v38  ;;  %v969_v28 = vpop.f32.mrb[50].mxu1  ;;  %v1442_v42 = vpop.f32.mrb[49].mxu0 }
 0x174   : > { %v1698_v46 = vsel %vm560_vm1, %v1666_v37, 0.0  ;;  %1585 = vst.msk [vmem:[%s2922_s9 + $0x48] sm:$0xff] %vm560_vm1, %v1560_v32  ;;  %v1618_v47 = vsel %vm560_vm1, %v1560_v32, 0.0  ;;  %v1667_v51 = vmul.f32 %v1560_v32, %v1560_v32  ;;  %v1504_v24 = vadd.f32 %v1432_v57, %v967_v61  ;;  %v971_v1 = vpop.f32.mrb[51].mxu1  ;;  %v1443_v14 = vpop.f32.mrb[50].mxu0 }
 0x175   : > { %v1699_v21 = vadd.f32 %v1698_v46, %v1697_v48  ;;  %v1619_v15 = vadd.f32 %v1618_v47, %v1617_v45  ;;  %v970_v54 = vadd.f32 %v969_v28, %v2908_v27  ;;  %v1445_v35 = vpop.f32.mrb[51].mxu0 }
 0x176   : > { %v1700_v16 = vsel %vm560_vm1, %v1667_v51, 0.0  ;;  %v1536_v11 = vadd.f32 %v2916_v29, %v1504_v24 }
 0x177   : > { %v1701_v30 = vadd.f32 %v1700_v16, %v1699_v21  ;;  %v1505_v40 = vadd.f32 %v1435_v22, %v970_v54 }
 0x178   : > { %v1561_v10 = vmax.f32 %v1536_v11, 0.0 }
 0x179   : > { %v1537_v41 = vadd.f32 %v2916_v29, %v1505_v40  ;;  %v974_v55 = vpop.f32.mrb[52].mxu1 }
 0x17a   : > { %1586 = vst.msk [vmem:[%s2922_s9 + $0x50] sm:$0xff] %vm560_vm1, %v1561_v10  ;;  %v1620_v63 = vsel %vm560_vm1, %v1561_v10, 0.0  ;;  %v1668_v57 = vmul.f32 %v1561_v10, %v1561_v10  ;;  %v975_v23 = vadd.f32 %v974_v55, %v2866_v43  ;;  %v976_v27 = vpop.f32.mrb[53].mxu1  ;;  %v1448_v25 = vpop.f32.mrb[52].mxu0 }
 0x17b   : > { %v1621_v62 = vadd.f32 %v1620_v63, %v1619_v15  ;;  %v1562_v44 = vmax.f32 %v1537_v41, 0.0  ;;  %v977_v17 = vpop.f32.mrb[54].mxu1  ;;  %v1450_v4 = vpop.f32.mrb[53].mxu0 }
 0x17c   : > { %v1702_v33 = vsel %vm560_vm1, %v1668_v57, 0.0  ;;  %v1506_v7 = vadd.f32 %v1440_v50, %v975_v23  ;;  %v978_v22 = vadd.f32 %v977_v17, %v2868_v59  ;;  %v979_v36 = vpop.f32.mrb[55].mxu1  ;;  %v1451_v18 = vpop.f32.mrb[54].mxu0 }
 0x17d   : > { %v1703_v60 = vadd.f32 %v1702_v33, %v1701_v30  ;;  %1587 = vst.msk [vmem:[%s2922_s9 + $0x58] sm:$0xff] %vm560_vm1, %v1562_v44  ;;  %v1622_v0 = vsel %vm560_vm1, %v1562_v44, 0.0  ;;  %v1669_v43 = vmul.f32 %v1562_v44, %v1562_v44  ;;  %v1453_v38 = vpop.f32.mrb[55].mxu0 }
 0x17e   : > { %v1623_v34 = vadd.f32 %v1622_v0, %v1621_v62  ;;  %v1538_v5 = vadd.f32 %v2916_v29, %v1506_v7  ;;  %v1507_v8 = vadd.f32 %v1443_v14, %v978_v22 }
 0x17f   : > { %v1704_v48 = vsel %vm560_vm1, %v1669_v43, 0.0 }
 0x180   : > { %v1705_v20 = vadd.f32 %v1704_v48, %v1703_v60  ;;  %v1563_v56 = vmax.f32 %v1538_v5, 0.0  ;;  %v1539_v59 = vadd.f32 %v2916_v29, %v1507_v8 }
 0x181   : > { %v982_v58 = vpop.f32.mrb[56].mxu1 }
 0x182   : > { %1588 = vst.msk [vmem:[%s2922_s9 + $0x60] sm:$0xff] %vm560_vm1, %v1563_v56  ;;  %v1624_v13 = vsel %vm560_vm1, %v1563_v56, 0.0  ;;  %v1670_v37 = vmul.f32 %v1563_v56, %v1563_v56  ;;  %v1564_v32 = vmax.f32 %v1539_v59, 0.0  ;;  %v983_v61 = vadd.f32 %v982_v58, %v2870_v26  ;;  %v984_v6 = vpop.f32.mrb[57].mxu1  ;;  %v1456_v50 = vpop.f32.mrb[56].mxu0 }
 0x183   : > { %v1625_v45 = vadd.f32 %v1624_v13, %v1623_v34  ;;  %v985_v28 = vpop.f32.mrb[58].mxu1  ;;  %v1458_v42 = vpop.f32.mrb[57].mxu0 }
 0x184   : > { %v1706_v46 = vsel %vm560_vm1, %v1670_v37, 0.0  ;;  %1589 = vst.msk [vmem:[%s2922_s9 + $0x68] sm:$0xff] %vm560_vm1, %v1564_v32  ;;  %v1626_v47 = vsel %vm560_vm1, %v1564_v32, 0.0  ;;  %v1671_v51 = vmul.f32 %v1564_v32, %v1564_v32  ;;  %v1508_v24 = vadd.f32 %v1448_v25, %v983_v61  ;;  %v987_v1 = vpop.f32.mrb[59].mxu1  ;;  %v1459_v14 = vpop.f32.mrb[58].mxu0 }
 0x185   : > { %v1707_v21 = vadd.f32 %v1706_v46, %v1705_v20  ;;  %v1627_v15 = vadd.f32 %v1626_v47, %v1625_v45  ;;  %v986_v26 = vadd.f32 %v985_v28, %v2874_v12  ;;  %v1461_v54 = vpop.f32.mrb[59].mxu0 }
 0x186   : > { %v1708_v35 = vsel %vm560_vm1, %v1671_v51, 0.0  ;;  %v1540_v16 = vadd.f32 %v2916_v29, %v1508_v24 }
 0x187   : > { %v1709_v11 = vadd.f32 %v1708_v35, %v1707_v21  ;;  %v1509_v30 = vadd.f32 %v1451_v18, %v986_v26 }
 0x188   : > { %v1565_v40 = vmax.f32 %v1540_v16, 0.0 }
 0x189   : > { %v1541_v10 = vadd.f32 %v2916_v29, %v1509_v30  ;;  %v990_v41 = vpop.f32.mrb[60].mxu1 }
 0x18a   : > { %1590 = vst.msk [vmem:[%s2922_s9 + $0x70] sm:$0xff] %vm560_vm1, %v1565_v40  ;;  %v1628_v55 = vsel %vm560_vm1, %v1565_v40, 0.0  ;;  %v1672_v63 = vmul.f32 %v1565_v40, %v1565_v40  ;;  %v991_v57 = vadd.f32 %v990_v41, %v2878_v2  ;;  %v992_v12 = vpop.f32.mrb[61].mxu1  ;;  %v1464_v23 = vpop.f32.mrb[60].mxu0 }
 0x18b   : > { %v1629_v27 = vadd.f32 %v1628_v55, %v1627_v15  ;;  %v1566_v25 = vmax.f32 %v1541_v10, 0.0  ;;  %v993_v62 = vpop.f32.mrb[62].mxu1  ;;  %v1466_v44 = vpop.f32.mrb[61].mxu0 }
 0x18c   : > { %v1710_v17 = vsel %vm560_vm1, %v1672_v63, 0.0  ;;  %v1510_v4 = vadd.f32 %v1456_v50, %v991_v57  ;;  %v994_v33 = vadd.f32 %v993_v62, %v2882_v52  ;;  %v995_v7 = vpop.f32.mrb[63].mxu1  ;;  %v1467_v22 = vpop.f32.mrb[62].mxu0 }
 0x18d   : > { %v1711_v36 = vadd.f32 %v1710_v17, %v1709_v11  ;;  %1591 = vst.msk [vmem:[%s2922_s9 + $0x78] sm:$0xff] %vm560_vm1, %v1566_v25  ;;  %v1630_v18 = vsel %vm560_vm1, %v1566_v25, 0.0  ;;  %v1673_v2 = vmul.f32 %v1566_v25, %v1566_v25  ;;  %v1469_v60 = vpop.f32.mrb[63].mxu0 }
 0x18e   : > { %v1631_v0 = vadd.f32 %v1630_v18, %v1629_v27  ;;  %v1542_v43 = vadd.f32 %v2916_v29, %v1510_v4  ;;  %v1511_v38 = vadd.f32 %v1459_v14, %v994_v33 }
 0x18f   : > { %v1712_v34 = vsel %vm560_vm1, %v1673_v2, 0.0 }
 0x190   : > { %v1713_v5 = vadd.f32 %v1712_v34, %v1711_v36  ;;  %v1567_v8 = vmax.f32 %v1542_v43, 0.0  ;;  %v1543_v52 = vadd.f32 %v2916_v29, %v1511_v38 }
 0x191   : > { %v998_v48 = vpop.f32.mrb[64].mxu1 }
 0x192   : > { %1592 = vst.msk [vmem:[%s2922_s9 + $0x80] sm:$0xff] %vm560_vm1, %v1567_v8  ;;  %v1632_v20 = vsel %vm560_vm1, %v1567_v8, 0.0  ;;  %v1674_v56 = vmul.f32 %v1567_v8, %v1567_v8  ;;  %v1568_v59 = vmax.f32 %v1543_v52, 0.0  ;;  %v999_v58 = vadd.f32 %v998_v48, %v2886_v9  ;;  %v1000_v13 = vpop.f32.mrb[65].mxu1  ;;  %v1472_v37 = vpop.f32.mrb[64].mxu0 }
 0x193   : > { %v1633_v32 = vadd.f32 %v1632_v20, %v1631_v0  ;;  %v1001_v61 = vpop.f32.mrb[66].mxu1  ;;  %v1474_v6 = vpop.f32.mrb[65].mxu0 }
 0x194   : > { %v1714_v50 = vsel %vm560_vm1, %v1674_v56, 0.0  ;;  %1593 = vst.msk [vmem:[%s2922_s9 + $0x88] sm:$0xff] %vm560_vm1, %v1568_v59  ;;  %v1634_v45 = vsel %vm560_vm1, %v1568_v59, 0.0  ;;  %v1675_v28 = vmul.f32 %v1568_v59, %v1568_v59  ;;  %v1512_v42 = vadd.f32 %v1464_v23, %v999_v58  ;;  %v1003_v46 = vpop.f32.mrb[67].mxu1  ;;  %v1475_v47 = vpop.f32.mrb[66].mxu0 }
 0x195   : > { %v1715_v51 = vadd.f32 %v1714_v50, %v1713_v5  ;;  %v1635_v24 = vadd.f32 %v1634_v45, %v1633_v32  ;;  %v1002_v9 = vadd.f32 %v1001_v61, %v2890_v19  ;;  %v1477_v1 = vpop.f32.mrb[67].mxu0 }
 0x196   : > { %v1716_v14 = vsel %vm560_vm1, %v1675_v28, 0.0  ;;  %v1544_v21 = vadd.f32 %v2916_v29, %v1512_v42 }
 0x197   : > { %v1717_v15 = vadd.f32 %v1716_v14, %v1715_v51  ;;  %v1513_v26 = vadd.f32 %v1467_v22, %v1002_v9 }
 0x198   : > { %v1569_v54 = vmax.f32 %v1544_v21, 0.0 }
 0x199   : > { %v1545_v35 = vadd.f32 %v2916_v29, %v1513_v26  ;;  %v1006_v16 = vpop.f32.mrb[68].mxu1 }
 0x19a   : > { %1594 = vst.msk [vmem:[%s2922_s9 + $0x90] sm:$0xff] %vm560_vm1, %v1569_v54  ;;  %v1636_v11 = vsel %vm560_vm1, %v1569_v54, 0.0  ;;  %v1676_v30 = vmul.f32 %v1569_v54, %v1569_v54  ;;  %v1007_v40 = vadd.f32 %v1006_v16, %v2894_v49  ;;  %v1008_v19 = vpop.f32.mrb[69].mxu1  ;;  %v1480_v10 = vpop.f32.mrb[68].mxu0 }
 0x19b   : > { %v1637_v41 = vadd.f32 %v1636_v11, %v1635_v24  ;;  %v1570_v55 = vmax.f32 %v1545_v35, 0.0  ;;  %v1009_v63 = vpop.f32.mrb[70].mxu1  ;;  %v1482_v57 = vpop.f32.mrb[69].mxu0 }
 0x19c   : > { %v1718_v12 = vsel %vm560_vm1, %v1676_v30, 0.0  ;;  %v1514_v23 = vadd.f32 %v1472_v37, %v1007_v40  ;;  %v1010_v27 = vadd.f32 %v1009_v63, %v2898_v31  ;;  %v1011_v25 = vpop.f32.mrb[71].mxu1  ;;  %v1483_v62 = vpop.f32.mrb[70].mxu0 }
 0x19d   : > { %v1719_v44 = vadd.f32 %v1718_v12, %v1717_v15  ;;  %1595 = vst.msk [vmem:[%s2922_s9 + $0x98] sm:$0xff] %vm560_vm1, %v1570_v55  ;;  %v1638_v17 = vsel %vm560_vm1, %v1570_v55, 0.0  ;;  %v1677_v49 = vmul.f32 %v1570_v55, %v1570_v55  ;;  %v1485_v4 = vpop.f32.mrb[71].mxu0 }
 0x19e   : > { %v1639_v33 = vadd.f32 %v1638_v17, %v1637_v41  ;;  %v1546_v7 = vadd.f32 %v2916_v29, %v1514_v23  ;;  %v1515_v22 = vadd.f32 %v1475_v47, %v1010_v27 }
 0x19f   : > { %v1720_v36 = vsel %vm560_vm1, %v1677_v49, 0.0 }
 0x1a0   : > { %v1721_v18 = vadd.f32 %v1720_v36, %v1719_v44  ;;  %v1571_v2 = vmax.f32 %v1546_v7, 0.0  ;;  %v1547_v31 = vadd.f32 %v2916_v29, %v1515_v22 }
 0x1a1   : > { %v1014_v60 = vpop.f32.mrb[72].mxu1 }
 0x1a2   : > { %1596 = vst.msk [vmem:[%s2922_s9 + $0xa0] sm:$0xff] %vm560_vm1, %v1571_v2  ;;  %v1640_v0 = vsel %vm560_vm1, %v1571_v2, 0.0  ;;  %v1678_v43 = vmul.f32 %v1571_v2, %v1571_v2  ;;  %v1572_v38 = vmax.f32 %v1547_v31, 0.0  ;;  %v1015_v34 = vadd.f32 %v1014_v60, %v2902_v53  ;;  %v1016_v5 = vpop.f32.mrb[73].mxu1  ;;  %v1488_v8 = vpop.f32.mrb[72].mxu0 }
 0x1a3   : > { %v1641_v52 = vadd.f32 %v1640_v0, %v1639_v33  ;;  %v1017_v48 = vpop.f32.mrb[74].mxu1  ;;  %v1490_v20 = vpop.f32.mrb[73].mxu0 }
 0x1a4   : > { %v1722_v56 = vsel %vm560_vm1, %v1678_v43, 0.0  ;;  %1597 = vst.msk [vmem:[%s2922_s9 + $0xa8] sm:$0xff] %vm560_vm1, %v1572_v38  ;;  %v1642_v59 = vsel %vm560_vm1, %v1572_v38, 0.0  ;;  %v1679_v58 = vmul.f32 %v1572_v38, %v1572_v38  ;;  %v1516_v13 = vadd.f32 %v1480_v10, %v1015_v34  ;;  %v1019_v37 = vpop.f32.mrb[75].mxu1  ;;  %v1491_v32 = vpop.f32.mrb[74].mxu0 }
 0x1a5   : > { %v1723_v61 = vadd.f32 %v1722_v56, %v1721_v18  ;;  %v1643_v6 = vadd.f32 %v1642_v59, %v1641_v52  ;;  %v1018_v53 = vadd.f32 %v1017_v48, %v2906_v39  ;;  %v1492_v50 = vpop.f32.mrb[75].mxu0 }
 0x1a6   : > { %v1724_v45 = vsel %vm560_vm1, %v1679_v58, 0.0  ;;  %v1548_v28 = vadd.f32 %v2916_v29, %v1516_v13 }
 0x1a7   : > { %v1725_v42 = vadd.f32 %v1724_v45, %v1723_v61  ;;  %v1517_v46 = vadd.f32 %v1483_v62, %v1018_v53 }
 0x1a8   : > { %v1573_v47 = vmax.f32 %v1548_v28, 0.0 }
 0x1a9   : > { %v1549_v51 = vadd.f32 %v2916_v29, %v1517_v46  ;;  %v1022_v24 = vpop.f32.mrb[76].mxu1 }
 0x1aa   : > { %1598 = vst.msk [vmem:[%s2922_s9 + $0xb0] sm:$0xff] %vm560_vm1, %v1573_v47  ;;  %v1644_v9 = vsel %vm560_vm1, %v1573_v47, 0.0  ;;  %v1680_v1 = vmul.f32 %v1573_v47, %v1573_v47  ;;  %v1023_v14 = vadd.f32 %v1022_v24, %v2910_v3  ;;  %v1024_v39 = vpop.f32.mrb[77].mxu1 }
 0x1ab   : > { %v1645_v21 = vadd.f32 %v1644_v9, %v1643_v6  ;;  %v1574_v15 = vmax.f32 %v1549_v51, 0.0  ;;  %v1025_v26 = vpop.f32.mrb[78].mxu1 }
 0x1ac   : > { %v1726_v54 = vsel %vm560_vm1, %v1680_v1, 0.0  ;;  %v1518_v35 = vadd.f32 %v1488_v8, %v1023_v14  ;;  %v1026_v16 = vpop.f32.mrb[79].mxu1 }
 0x1ad   : > { %v1727_v11 = vadd.f32 %v1726_v54, %v1725_v42  ;;  %1599 = vst.msk [vmem:[%s2922_s9 + $0xb8] sm:$0xff] %vm560_vm1, %v1574_v15  ;;  %v1646_v30 = vsel %vm560_vm1, %v1574_v15, 0.0  ;;  %v1681_v40 = vmul.f32 %v1574_v15, %v1574_v15 }
 0x1ae   : > { %v1647_v19 = vadd.f32 %v1646_v30, %v1645_v21  ;;  %v1550_v10 = vadd.f32 %v2916_v29, %v1518_v35 }
 0x1af   : > { %v1728_v3 = vsel %vm560_vm1, %v1681_v40, 0.0 }
 0x1b0   : > { %v1729_v41 = vadd.f32 %v1728_v3, %v1727_v11  ;;  %v1575_v55 = vmax.f32 %v1550_v10, 0.0 }
 0x1b2   : > { %1600 = vst.msk [vmem:[%s2922_s9 + $0xc0] sm:$0xff] %vm560_vm1, %v1575_v55  ;;  %v1648_v63 = vsel %vm560_vm1, %v1575_v55, 0.0  ;;  %v1682_v57 = vmul.f32 %v1575_v55, %v1575_v55 }
 0x1b3   : > { %v1649_v12 = vadd.f32 %v1648_v63, %v1647_v19 }
 0x1b4   : > { %v1730_v23 = vsel %vm560_vm1, %v1682_v57, 0.0 }
 0x1b5   : > { %v1650_v27 = vrot.slane %v1649_v12, 4  ;;  %v1731_v25 = vadd.f32 %v1730_v23, %v1729_v41 }
 0x1b7   : > { %v1651_v62 = vadd.f32 %v1650_v27, %v1649_v12  ;;  %v1732_v44 = vrot.slane %v1731_v25, 4 }
 0x1b9   : > { %v1652_v17 = vrot.slane %v1651_v62, 2  ;;  %v1733_v29 = vadd.f32 %v1732_v44, %v1731_v25 }
 0x1bb   : > { %v1653_v49 = vadd.f32 %v1652_v17, %v1651_v62  ;;  %v1734_v4 = vrot.slane %v1733_v29, 2 }
 0x1bd   : > { %v1654_v33 = vrot.slane %v1653_v49, 1  ;;  %v1735_v7 = vadd.f32 %v1734_v4, %v1733_v29 }
 0x1bf   : > { %v1655_v22 = vadd.f32 %v1654_v33, %v1653_v49  ;;  %v1736_v36 = vrot.slane %v1735_v7, 1 }
 0x1c1   : > { %1657 = vst.msk [vmem:[%s238_s12] sm:$0x1] %vm1656_vm3, %v1655_v22  ;;  %v1737_v18 = vadd.f32 %v1736_v36, %v1735_v7 }
 0x1c3   : > { %1738 = vst.msk [vmem:[%s241_s15] sm:$0x1] %vm1656_vm3, %v1737_v18 }
 0x1c4 PF: > { %s16_s18 = sadd.s32 1, %s2192_s18  }
 0x1c5   : > { %p13_p4 = scmp.ge.s32.totalorder %s16_s18, 4  }
 0x1c7   :  { %15 = sbr.rel (!%p13_p4) target bundleno = 1 (0x1), region = 88 }

// kernel: encoder_forward.14
= control target key start
LH: loop header
LB: loop body
LE: loop exit
PB: predicated region body
PF: predicated region fallthrough
CT: control target
= control target key end

     0   :  { %s1020_s18 = smov 0   ;;  %s1210_s0 = inlined_call_operand.vmem [shape: bf16[2,12,192], index: 0, kind: input, shape index: {}]   ;;  %s1211_s1 = inlined_call_operand.vmem [shape: bf16[3,192,128], index: 1, kind: input, shape index: {}]   ;;  %s1212_s2 = inlined_call_operand.vmem [shape: f32[1,128], index: 2, kind: input, shape index: {}]   ;;  %s1213_s3 = inlined_call_operand.vmem [shape: f32[2,8,128], index: 3, kind: output, shape index: {0}]   ;;  %s1214_s4 = inlined_call_operand.vmem [shape: f32[2,1,128], index: 4, kind: output, shape index: {1}]   ;;  %s1215_s5 = inlined_call_operand.vmem [shape: f32[2,1,128], index: 5, kind: output, shape index: {2}]  }
   0x1 LB: > { %s823_s19 = sadd.s32 4294967295, %s987_s18   ;;  %p827_p0 = scmp.ge.s32.totalorder %s987_s18, 1  ;;  %s987_s18 = sphi %s1020_s18, %s16_s18  }
   0x2   : > { %p192_p1 = scmp.lt.s32.totalorder %s987_s18, 3 }
   0x4   : > { %p193_p2 = pnand %p827_p0, %p192_p1 }
   0x5   : > { %v937_v0 = vld [vmem:[%s1211_s1 + $0x60] sm:$0xff] (!%p193_p2)   ;;  %v989_v1 = vmov (!%p193_p2), 0   ;;  %v939_v3 = vld [vmem:[%s1211_s1 + $0x68] sm:$0xff] (!%p193_p2)   ;;  %v941_v5 = vld [vmem:[%s1211_s1 + $0x70] sm:$0xff] (!%p193_p2)   ;;  %p225_p3 = scmp.lt.s32.totalorder (!%p193_p2), %s823_s19, 1  ;;  %vm376_vm0 = vcmask (!%p193_p2), 523264  }
   0x6   : > { %196 = sbr.rel (%p193_p2) target bundleno = 335 (0x14f), region = 32  ;;  %380 = vmatprep.subr.bf16.mxu0 (!%p193_p2), %v989_v1  ;;  %501 = vmatprep.subr.bf16.mxu1 (!%p193_p2), %v989_v1  ;;  %v938_v2 = vld [vmem:[%s1211_s1] sm:$0xff] (!%p193_p2)   ;;  %v940_v4 = vld [vmem:[%s1211_s1 + $0x8] sm:$0xff] (!%p193_p2)   ;;  %v942_v6 = vld [vmem:[%s1211_s1 + $0x10] sm:$0xff] (!%p193_p2)  }
   0x7   : > { %381 = vmatpush1.bf16.msra.mxu0 (!%p193_p2), %v937_v0  ;;  %502 = vmatpush1.bf16.msra.mxu1 (!%p193_p2), %v938_v2  ;;  %v943_v7 = vld [vmem:[%s1211_s1 + $0x78] sm:$0xff] (!%p193_p2)   ;;  %v945_v9 = vld [vmem:[%s1211_s1 + $0x80] sm:$0xff] (!%p193_p2)   ;;  %v947_v11 = vld [vmem:[%s1211_s1 + $0x88] sm:$0xff] (!%p193_p2)  }
   0x8   : > { %382 = vmatprep.subr.bf16.mxu0 (!%p193_p2), %v989_v1  ;;  %503 = vmatprep.subr.bf16.mxu1 (!%p193_p2), %v989_v1  ;;  %v944_v8 = vld [vmem:[%s1211_s1 + $0x18] sm:$0xff] (!%p193_p2)   ;;  %v946_v10 = vld [vmem:[%s1211_s1 + $0x20] sm:$0xff] (!%p193_p2)   ;;  %v948_v12 = vld [vmem:[%s1211_s1 + $0x28] sm:$0xff] (!%p193_p2)  }
   0x9   : > { %v949_v13 = vld [vmem:[%s1211_s1 + $0x90] sm:$0xff] (!%p193_p2)   ;;  %v951_v18 = vld [vmem:[%s1211_s1 + $0x98] sm:$0xff] (!%p193_p2)   ;;  %v953_v21 = vld [vmem:[%s1211_s1 + $0xa0] sm:$0xff] (!%p193_p2)  }
   0xa   : > { %v950_v14 = vld [vmem:[%s1211_s1 + $0x30] sm:$0xff] (!%p193_p2)   ;;  %v952_v19 = vld [vmem:[%s1211_s1 + $0x38] sm:$0xff] (!%p193_p2)   ;;  %v954_v22 = vld [vmem:[%s1211_s1 + $0x40] sm:$0xff] (!%p193_p2)  }
   0xb   : > { %383 = vmatpush1.bf16.msra.mxu0 (!%p193_p2), %v939_v3  ;;  %504 = vmatpush1.bf16.msra.mxu1 (!%p193_p2), %v940_v4  ;;  %v955_v23 = vld [vmem:[%s1211_s1 + $0xa8] sm:$0xff] (!%p193_p2)   ;;  %v957_v25 = vld [vmem:[%s1211_s1 + $0xb0] sm:$0xff] (!%p193_p2)   ;;  %v959_v28 = vld [vmem:[%s1211_s1 + $0xb8] sm:$0xff] (!%p193_p2)  }
   0xc   : > { %384 = vmatprep.subr.bf16.mxu0 (!%p193_p2), %v989_v1  ;;  %505 = vmatprep.subr.bf16.mxu1 (!%p193_p2), %v989_v1  ;;  %v956_v24 = vld [vmem:[%s1211_s1 + $0x48] sm:$0xff] (!%p193_p2)   ;;  %v958_v26 = vld [vmem:[%s1211_s1 + $0x50] sm:$0xff] (!%p193_p2)   ;;  %v960_v29 = vld [vmem:[%s1211_s1 + $0x58] sm:$0xff] (!%p193_p2)  }
   0xd   : > { %s1217_s19 = smov (!%p225_p3, %s823_s19), 1  ;;  %v966_v33 = vld [vmem:[%s1211_s1 + $0xc0] sm:$0xff]   ;;  %v967_v35 = vld [vmem:[%s1211_s1 + $0xc8] sm:$0xff]   ;;  %v968_v36 = vld [vmem:[%s1211_s1 + $0xd0] sm:$0xff]  }
   0xe   : > { %s927_s21 = sshll.u32 %s1217_s19, 4  ;;  %v969_v37 = vld [vmem:[%s1211_s1 + $0xd8] sm:$0xff]   ;;  %v970_v38 = vld [vmem:[%s1211_s1 + $0xe0] sm:$0xff]   ;;  %v971_v39 = vld [vmem:[%s1211_s1 + $0xe8] sm:$0xff]   ;;  %s830_s30 = sshll.u32 %s1217_s19, 3 }
   0xf   : > { %385 = vmatpush1.bf16.msra.mxu0 %v941_v5  ;;  %506 = vmatpush1.bf16.msra.mxu1 %v942_v6  ;;  %s1089_s26 = scalar_lea.vmem %s1210_s0, %s927_s21  ;;  %v972_v40 = vld [vmem:[%s1211_s1 + $0xf0] sm:$0xff]   ;;  %v973_v41 = vld [vmem:[%s1211_s1 + $0xf8] sm:$0xff]   ;;  %v974_v42 = vld [vmem:[%s1211_s1 + $0x100] sm:$0xff]   ;;  %s233_s8 = scalar_lea.vmem %s1213_s3, %s830_s30 }
  0x10   : > { %386 = vmatprep.subr.bf16.mxu0 %v989_v1  ;;  %507 = vmatprep.subr.bf16.mxu1 %v989_v1  ;;  %v241_v15 = vld [vmem:[%s1089_s26] sm:$0xff]  ;;  %v975_v43 = vld [vmem:[%s1211_s1 + $0x108] sm:$0xff]   ;;  %v976_v44 = vld [vmem:[%s1211_s1 + $0x110] sm:$0xff]   ;;  %s236_s11 = scalar_lea.vmem %s1214_s4, %s1217_s19  ;;  %s239_s14 = scalar_lea.vmem %s1215_s5, %s1217_s19 }
  0x11   : > { %v963_v16 = vld [vmem:[%s1089_s26 + $0x4] ss:$8 sps:$4 sm:$0x1e]   ;;  %v871_v17 = vcombine.high %v241_v15, %v241_v15  ;;  %v961_v27 = vld [vmem:[%s1089_s26] ss:$8 sps:$4 sm:$0x1e]   ;;  %v870_v32 = vcombine.low %v241_v15, %v241_v15 }
  0x12   : > { %v302_v20 = vrot.slane %v963_v16, 1  ;;  %v978_v30 = vld [vmem:[%s1089_s26 + $0x4] ss:$8 sps:$4 sm:$0x3c]   ;;  %v301_v31 = vrot.slane %v961_v27, 1  ;;  %v977_v46 = vld [vmem:[%s1211_s1 + $0x118] sm:$0xff]  }
  0x13   : > { %387 = vmatpush1.bf16.msra.mxu0 %v943_v7  ;;  %508 = vmatpush1.bf16.msra.mxu1 %v944_v8  ;;  %v577_v34 = vrot.slane %v978_v30, 2  ;;  %v980_v45 = vld [vmem:[%s1089_s26] ss:$8 sps:$4 sm:$0x3c]   ;;  %v924_v58 = vld [vmem:[%s1212_s2] ss:$0 sm:$0xff] }
  0x14   : > { %388 = vmatprep.subr.bf16.mxu0 %v989_v1  ;;  %509 = vmatprep.subr.bf16.mxu1 %v989_v1  ;;  %v576_v47 = vrot.slane %v980_v45, 2 }
  0x15   : > { %884 = vmatprep.mubr.msk.bf16.mxu1 %vm376_vm0, %v871_v17  ;;  %869 = vmatprep.mubr.msk.bf16.mxu0 %vm376_vm0, %v302_v20 }
  0x17   : > { %389 = vmatpush1.bf16.msra.mxu0 %v945_v9  ;;  %510 = vmatpush1.bf16.msra.mxu1 %v946_v10 }
  0x18   : > { %390 = vmatprep.subr.bf16.mxu0 %v989_v1  ;;  %511 = vmatprep.subr.bf16.mxu1 %v989_v1 }
  0x1b   : > { %391 = vmatpush1.bf16.msra.mxu0 %v947_v11  ;;  %512 = vmatpush1.bf16.msra.mxu1 %v948_v12 }
  0x1c   : > { %392 = vmatprep.subr.bf16.mxu0 %v989_v1  ;;  %513 = vmatprep.subr.bf16.mxu1 %v989_v1 }
  0x1f   : > { %393 = vmatpush1.bf16.msra.mxu0 %v949_v13  ;;  %514 = vmatpush1.bf16.msra.mxu1 %v950_v14 }
  0x20   : > { %394 = vmatprep.subr.bf16.mxu0 %v989_v1  ;;  %515 = vmatprep.subr.bf16.mxu1 %v989_v1 }
  0x23   : > { %395 = vmatpush1.bf16.msra.mxu0 %v951_v18  ;;  %516 = vmatpush1.bf16.msra.mxu1 %v952_v19 }
  0x24   : > { %396 = vmatprep.subr.bf16.mxu0 %v989_v1  ;;  %517 = vmatprep.subr.bf16.mxu1 %v989_v1 }
  0x27   : > { %397 = vmatpush1.bf16.msra.mxu0 %v953_v21  ;;  %518 = vmatpush1.bf16.msra.mxu1 %v954_v22 }
  0x28   : > { %398 = vmatprep.subr.bf16.mxu0 %v989_v1  ;;  %519 = vmatprep.subr.bf16.mxu1 %v989_v1 }
  0x2b   : > { %399 = vmatpush1.bf16.msra.mxu0 %v955_v23  ;;  %520 = vmatpush1.bf16.msra.mxu1 %v956_v24 }
  0x2c   : > { %400 = vmatprep.subr.bf16.mxu0 %v989_v1  ;;  %521 = vmatprep.subr.bf16.mxu1 %v989_v1 }
  0x2f   : > { %401 = vmatpush1.bf16.msra.mxu0 %v957_v25  ;;  %522 = vmatpush1.bf16.msra.mxu1 %v958_v26 }
  0x30   : > { %402 = vmatprep.subr.bf16.mxu0 %v989_v1  ;;  %523 = vmatprep.subr.bf16.mxu1 %v989_v1 }
  0x33   : > { %403 = vmatpush1.bf16.msra.mxu0 %v959_v28  ;;  %524 = vmatpush1.bf16.msra.mxu1 %v960_v29 }
  0x34   : > { %654 = vmatprep.subr.bf16.mxu0 %v989_v1 }
  0x36   : > { %413 = vmatmul.mubr.bf16.vlgmr.msra.gmra.mrb[0].mxu0 %v301_v31  ;;  %534 = vmatmul.mubr.bf16.vlgmr.msra.gmra.mrb[0].mxu1 %v870_v32 }
  0x37   : > { %655 = vmatpush1.bf16.msra.mxu0 %v966_v33  ;;  %923 = vmatprep.mubr.msk.bf16.mxu0 %vm376_vm0, %v577_v34 }
  0x38   : > { %656 = vmatprep.subr.bf16.mxu0 %v989_v1 }
  0x3b   : > { %657 = vmatpush1.bf16.msra.mxu0 %v967_v35 }
  0x3c   : > { %658 = vmatprep.subr.bf16.mxu0 %v989_v1 }
  0x3f   : > { %659 = vmatpush1.bf16.msra.mxu0 %v968_v36 }
  0x40   : > { %660 = vmatprep.subr.bf16.mxu0 %v989_v1 }
  0x43   : > { %661 = vmatpush1.bf16.msra.mxu0 %v969_v37 }
  0x44   : > { %662 = vmatprep.subr.bf16.mxu0 %v989_v1 }
  0x47   : > { %663 = vmatpush1.bf16.msra.mxu0 %v970_v38 }
  0x48   : > { %664 = vmatprep.subr.bf16.mxu0 %v989_v1 }
  0x4b   : > { %665 = vmatpush1.bf16.msra.mxu0 %v971_v39 }
  0x4c   : > { %666 = vmatprep.subr.bf16.mxu0 %v989_v1 }
  0x4f   : > { %667 = vmatpush1.bf16.msra.mxu0 %v972_v40 }
  0x50   : > { %668 = vmatprep.subr.bf16.mxu0 %v989_v1 }
  0x53   : > { %669 = vmatpush1.bf16.msra.mxu0 %v973_v41 }
  0x54   : > { %670 = vmatprep.subr.bf16.mxu0 %v989_v1 }
  0x57   : > { %671 = vmatpush1.bf16.msra.mxu0 %v974_v42 }
  0x58   : > { %672 = vmatprep.subr.bf16.mxu0 %v989_v1 }
  0x5b   : > { %673 = vmatpush1.bf16.msra.mxu0 %v975_v43 }
  0x5c   : > { %674 = vmatprep.subr.bf16.mxu0 %v989_v1 }
  0x5f   : > { %675 = vmatpush1.bf16.msra.mxu0 %v976_v44 }
  0x60   : > { %676 = vmatprep.subr.bf16.mxu0 %v989_v1 }
  0x63   : > { %677 = vmatpush1.bf16.msra.mxu0 %v977_v46 }
  0x66   : > { %687 = vmatmul.mubr.bf16.vlgmr.msra.gmra.mrb[4].mxu0 %v576_v47 }
 0x109   : > { %v414_v48 = vpop.f32.mrb[0].mxu0  ;;  %v535_v50 = vpop.f32.mrb[0].mxu1 }
 0x10a   : > { %v416_v49 = vpop.f32.mrb[1].mxu0  ;;  %v536_v51 = vadd.f32 %v535_v50, %v414_v48  ;;  %v537_v53 = vpop.f32.mrb[1].mxu1 }
 0x10b   : > { %v417_v52 = vpop.f32.mrb[2].mxu0  ;;  %v538_v55 = vpop.f32.mrb[2].mxu1 }
 0x10c   : > { %v418_v54 = vpop.f32.mrb[3].mxu0  ;;  %v539_v56 = vpop.f32.mrb[3].mxu1 }
 0x139   : > { %v688_v57 = vpop.f32.mrb[4].mxu0 }
 0x13a   : > { %v694_v59 = vadd.f32 %v688_v57, %v536_v51  ;;  %v690_v60 = vpop.f32.mrb[5].mxu0 }
 0x13b   : > { %v691_v61 = vpop.f32.mrb[6].mxu0 }
 0x13c   : > { %v702_v62 = vadd.f32 %v924_v58, %v694_v59  ;;  %v692_v63 = vpop.f32.mrb[7].mxu0 }
 0x13e   : > { %v703_v0 = vmax.f32 %v702_v62, 0.0 }
 0x140   : > { %704 = vst [vmem:[%s233_s8] sm:$0xff] %v703_v0  ;;  %v705_v1 = vrot.slane %v703_v0, 4  ;;  %v712_v2 = vmul.f32 %v703_v0, %v703_v0 }
 0x142   : > { %v706_v3 = vadd.f32 %v705_v1, %v703_v0  ;;  %v713_v4 = vrot.slane %v712_v2, 4 }
 0x144   : > { %v707_v5 = vrot.slane %v706_v3, 2  ;;  %v714_v6 = vadd.f32 %v713_v4, %v712_v2 }
 0x146   : > { %v708_v7 = vadd.f32 %v707_v5, %v706_v3  ;;  %v715_v8 = vrot.slane %v714_v6, 2 }
 0x148   : > { %v709_v9 = vrot.slane %v708_v7, 1  ;;  %v716_v10 = vadd.f32 %v715_v8, %v714_v6 }
 0x14a   : > { %v710_v11 = vadd.f32 %v709_v9, %v708_v7  ;;  %v717_v12 = vrot.slane %v716_v10, 1 }
 0x14c   : > { %711 = vst [vmem:[%s236_s11] sm:$0x1] %v710_v11  ;;  %v718_v13 = vadd.f32 %v717_v12, %v716_v10 }
 0x14e   : > { %719 = vst [vmem:[%s239_s14] sm:$0x1] %v718_v13 }
 0x14f PF: > { %s16_s18 = sadd.s32 1, %s987_s18  }
 0x150   : > { %p13_p4 = scmp.ge.s32.totalorder %s16_s18, 4  }
 0x152   :  { %15 = sbr.rel (!%p13_p4) target bundleno = 1 (0x1), region = 88 }

// kernel: encoder_forward.16
= control target key start
LH: loop header
LB: loop body
LE: loop exit
PB: predicated region body
PF: predicated region fallthrough
CT: control target
= control target key end

     0   :  { %s430_s12 = smov 0   ;;  %s432_s13 = smov 0   ;;  %s492_s0 = inlined_call_operand.vmem [shape: f32[2,4,2,128], index: 0, kind: input, shape index: {}]   ;;  %s493_s1 = inlined_call_operand.vmem [shape: f32[1,1,128], index: 1, kind: input, shape index: {}]   ;;  %s494_s2 = inlined_call_operand.vmem [shape: f32[1,1,128], index: 2, kind: input, shape index: {}]   ;;  %s495_s3 = inlined_call_operand.vmem [shape: f32[2,2,1,128], index: 3, kind: output, shape index: {}]  }
   0x1   :  { %s434_s14 = smov 0   ;;  %s436_s15 = smov 0  }
   0x2   :  { %s438_s16 = smov 0  }
   0x3 LB: > { %s22_s17 = sadd.s32 1, %s400_s14  ;;  %s25_s18 = sadd.s32 1, %s404_s15  ;;  %s408_s16 = sphi %s438_s16, %s13_s16   ;;  %s404_s15 = sphi %s436_s15, %s499_s15   ;;  %s400_s14 = sphi %s434_s14, %s498_s14   ;;  %s396_s13 = sphi %s432_s13, %s497_s13   ;;  %s392_s12 = sphi %s430_s12, %s496_s12  }
   0x4   : > { %p23_p0 = scmp.ge.s32.totalorder %s22_s17, 2  ;;  %p321_p1 = scmp.ge.s32.totalorder %s408_s16, 1 }
   0x5   : > { %p158_p2 = scmp.lt.s32.totalorder %s408_s16, 5 }
   0x6   : > { %s501_s17 = smov (%p23_p0, %s22_s17), 0  ;;  %s503_s18 = smov (!%p23_p0, %s25_s18), %s404_s15 }
   0x7   : > { %p159_p3 = pnand %p321_p1, %p158_p2  ;;  %p27_p4 = scmp.ge.s32.totalorder %s503_s18, 2 }
   0x8   : > { %s322_s19 = sshll.u32 (!%p159_p3), %s392_s12, 1  ;;  %p189_p5 = scmp.lt.s32.totalorder (!%p159_p3), %s396_s13, 1  ;;  %v326_v0 = vld [vmem:[%s493_s1] ss:$0 sm:$0xff] (!%p159_p3)  ;;  %vm225_vm0 = vcmask (!%p159_p3), 1041408  }
   0x9   : > { %s505_s18 = smov (%p27_p4, %s503_s18), 0  ;;  %162 = sbr.rel (%p159_p3) target bundleno = 43 (0x2b), region = 32 }
   0xa   : > { %p191_p6 = scmp.lt.s32.totalorder (!%p159_p3), %s322_s19, 3  ;;  %v327_v3 = vld [vmem:[%s494_s2] ss:$0 sm:$0xff] (!%p159_p3)  ;;  %p200_p7 = scmp.lt.s32.totalorder (!%p159_p3), %s392_s12, 1 }
  0x10   : > { %s507_s13 = smov (!%p189_p5, %s396_s13), 1  ;;  %s509_s19 = smov (!%p191_p6, %s322_s19), 3 }
  0x11   : > { %s323_s20 = sshll.u32 %s507_s13, 2  ;;  %s511_s12 = smov (!%p200_p7, %s392_s12), 1 }
  0x12   : > { %s194_s21 = sadd.s32 %s323_s20, %s509_s19  ;;  %s325_s30 = sshll.u32 %s507_s13, 1 }
  0x13   : > { %s324_s22 = sshll.u32 %s194_s21, 1  ;;  %s203_s4 = sadd.s32 %s325_s30, %s511_s12 }
  0x14   : > { %s196_s27 = scalar_lea.vmem %s492_s0, %s324_s22  ;;  %s204_s7 = scalar_lea.vmem %s495_s3, %s203_s4 }
  0x15   : > { %v205_v1 = vld [vmem:[%s196_s27] sm:$0x3]  ;;  %v206_v2 = vld [vmem:[%s196_s27 + $0x2] sm:$0x3] }
  0x16   : > { %v214_v4 = vmul.f32 %v326_v0, %v205_v1  ;;  %v215_v5 = vmul.f32 %v326_v0, %v206_v2 }
  0x18   : > { %v223_v6 = vadd.f32 %v327_v3, %v214_v4  ;;  %v224_v7 = vadd.f32 %v327_v3, %v215_v5 }
  0x1a   : > { %v226_v8 = vsel %vm225_vm0, %v223_v6, -inf  ;;  %v227_v9 = vsel %vm225_vm0, %v224_v7, -inf }
  0x1b   : > { %v228_v10 = vmax.f32 %v226_v8, %v227_v9 }
  0x1d   : > { %v229_v11 = vsel %vm225_vm0, %v228_v10, -inf }
  0x1e   : > { %v230_v12 = vrot.slane %v229_v11, 4 }
  0x20   : > { %v231_v13 = vmax.f32 %v229_v11, %v230_v12 }
  0x22   : > { %v232_v14 = vrot.slane %v231_v13, 2 }
  0x24   : > { %v233_v15 = vmax.f32 %v231_v13, %v232_v14 }
  0x26   : > { %v234_v16 = vrot.slane %v233_v15, 1 }
  0x28   : > { %v235_v17 = vmax.f32 %v233_v15, %v234_v16 }
  0x2a   : > { %236 = vst [vmem:[%s204_s7] sm:$0x1] %v235_v17 }
  0x2b PF: > { %s13_s16 = sadd.s32 1, %s408_s16   ;;  %s496_s12 = smov %s400_s14 }
  0x2c   : > { %p10_p8 = scmp.ge.s32.totalorder %s13_s16, 6   ;;  %s497_s13 = smov %s404_s15 }
  0x2d   : > { %s498_s14 = smov %s501_s17  ;;  %s499_s15 = smov %s505_s18 }
  0x2e   :  { %12 = sbr.rel (!%p10_p8) target bundleno = 3 (0x3), region = 62 }

// kernel: encoder_forward.15
= control target key start
LH: loop header
LB: loop body
LE: loop exit
PB: predicated region body
PF: predicated region fallthrough
CT: control target
= control target key end

     0   :  { %s1721_s18 = smov 0   ;;  %s2013_s0 = inlined_call_operand.vmem [shape: bf16[2,12,384], index: 0, kind: input, shape index: {}]   ;;  %s2014_s1 = inlined_call_operand.vmem [shape: bf16[3,384,128], index: 1, kind: input, shape index: {}]   ;;  %s2015_s2 = inlined_call_operand.vmem [shape: f32[1,128], index: 2, kind: input, shape index: {}]   ;;  %s2016_s3 = inlined_call_operand.vmem [shape: f32[2,8,128], index: 3, kind: output, shape index: {0}]   ;;  %s2017_s4 = inlined_call_operand.vmem [shape: f32[2,1,128], index: 4, kind: output, shape index: {1}]   ;;  %s2018_s5 = inlined_call_operand.vmem [shape: f32[2,1,128], index: 5, kind: output, shape index: {2}]  }
   0x1 LB: > { %s1247_s19 = sadd.s32 4294967295, %s1687_s18   ;;  %p1251_p0 = scmp.ge.s32.totalorder %s1687_s18, 1  ;;  %s1687_s18 = sphi %s1721_s18, %s16_s18  }
   0x2   : > { %p192_p1 = scmp.lt.s32.totalorder %s1687_s18, 3 }
   0x4   : > { %p193_p2 = pnand %p1251_p0, %p192_p1 }
   0x5   : > { %v1598_v0 = vld [vmem:[%s2014_s1 + $0x100] sm:$0xff] (!%p193_p2)   ;;  %v1689_v1 = vmov (!%p193_p2), 0.0   ;;  %v1601_v4 = vld [vmem:[%s2014_s1 + $0x108] sm:$0xff] (!%p193_p2)   ;;  %vm1690_vm0 = vmmov (!%p193_p2), 0   ;;  %v1604_v7 = vld [vmem:[%s2014_s1 + $0x110] sm:$0xff] (!%p193_p2)   ;;  %p225_p3 = scmp.lt.s32.totalorder (!%p193_p2), %s1247_s19, 1 }
   0x6   : > { %196 = sbr.rel (%p193_p2) target bundleno = 340 (0x154), region = 32  ;;  %1527 = vmatprep.subr.bf16.mxu1 (!%p193_p2), %v1689_v1  ;;  %v1599_v2 = vld [vmem:[%s2014_s1 + $0xc0] sm:$0xff] (!%p193_p2)   ;;  %1434 = vmatprep.subr.bf16.mxu0 (!%p193_p2), %v1598_v0  ;;  %v1602_v5 = vld [vmem:[%s2014_s1 + $0xc8] sm:$0xff] (!%p193_p2)   ;;  %v1605_v8 = vld [vmem:[%s2014_s1 + $0xd0] sm:$0xff] (!%p193_p2)  }
   0x7   : > { %v1600_v3 = vld [vmem:[%s2014_s1 + $0x140] sm:$0xff] (!%p193_p2)   ;;  %1435 = vmatpush3.bf16.msra.mxu0 (!%p193_p2), %v1599_v2  ;;  %1543 = vmatprep.mubr.msk.bf16.mxu1 (!%p193_p2), %vm1690_vm0, %v1689_v1  ;;  %v1603_v6 = vld [vmem:[%s2014_s1 + $0x148] sm:$0xff] (!%p193_p2)   ;;  %v1606_v9 = vld [vmem:[%s2014_s1 + $0x150] sm:$0xff] (!%p193_p2)  }
   0x8   : > { %1528 = vmatpush3.bf16.msra.mxu1 (!%p193_p2), %v1600_v3  ;;  %1436 = vmatprep.subr.bf16.mxu0 (!%p193_p2), %v1601_v4  ;;  %v1607_v10 = vld [vmem:[%s2014_s1 + $0x118] sm:$0xff] (!%p193_p2)   ;;  %v1610_v13 = vld [vmem:[%s2014_s1 + $0x120] sm:$0xff] (!%p193_p2)   ;;  %v1613_v16 = vld [vmem:[%s2014_s1 + $0x128] sm:$0xff] (!%p193_p2)  }
   0x9   : > { %1529 = vmatprep.subr.bf16.mxu1 (!%p193_p2), %v1689_v1  ;;  %v1608_v11 = vld [vmem:[%s2014_s1 + $0xd8] sm:$0xff] (!%p193_p2)   ;;  %v1611_v14 = vld [vmem:[%s2014_s1 + $0xe0] sm:$0xff] (!%p193_p2)   ;;  %v1614_v17 = vld [vmem:[%s2014_s1 + $0xe8] sm:$0xff] (!%p193_p2)  }
   0xa   : > { %v1609_v12 = vld [vmem:[%s2014_s1 + $0x158] sm:$0xff] (!%p193_p2)   ;;  %v1612_v15 = vld [vmem:[%s2014_s1 + $0x160] sm:$0xff] (!%p193_p2)   ;;  %v1615_v18 = vld [vmem:[%s2014_s1 + $0x168] sm:$0xff] (!%p193_p2)  }
   0xb   : > { %1437 = vmatpush3.bf16.msra.mxu0 (!%p193_p2), %v1602_v5  ;;  %v1616_v19 = vld [vmem:[%s2014_s1 + $0x130] sm:$0xff] (!%p193_p2)   ;;  %v1619_v22 = vld [vmem:[%s2014_s1 + $0x138] sm:$0xff] (!%p193_p2)   ;;  %v1625_v28 = vld [vmem:[%s2014_s1 + $0x40] sm:$0xff] (!%p193_p2)  }
   0xc   : > { %1530 = vmatpush3.bf16.msra.mxu1 (!%p193_p2), %v1603_v6  ;;  %1438 = vmatprep.subr.bf16.mxu0 (!%p193_p2), %v1604_v7  ;;  %v1617_v20 = vld [vmem:[%s2014_s1 + $0xf0] sm:$0xff] (!%p193_p2)   ;;  %v1620_v25 = vld [vmem:[%s2014_s1 + $0xf8] sm:$0xff] (!%p193_p2)   ;;  %v1627_v31 = vld [vmem:[%s2014_s1] sm:$0xff] (!%p193_p2)  }
   0xd   : > { %1531 = vmatprep.subr.bf16.mxu1 %v1689_v1  ;;  %s2020_s19 = smov (!%p225_p3, %s1247_s19), 1  ;;  %v1618_v21 = vld [vmem:[%s2014_s1 + $0x170] sm:$0xff]   ;;  %v1621_v26 = vld [vmem:[%s2014_s1 + $0x178] sm:$0xff]   ;;  %v1628_v33 = vld [vmem:[%s2014_s1 + $0x80] sm:$0xff]  }
   0xe   : > { %s1587_s6 = smul.u32 24, %s2020_s19  ;;  %v1629_v34 = vld [vmem:[%s2014_s1 + $0x48] sm:$0xff]   ;;  %v1632_v37 = vld [vmem:[%s2014_s1 + $0x50] sm:$0xff]   ;;  %v1635_v40 = vld [vmem:[%s2014_s1 + $0x58] sm:$0xff]   ;;  %s1253_s10 = sshll.u32 %s2020_s19, 3 }
   0xf   : > { %1439 = vmatpush3.bf16.msra.mxu0 %v1605_v8  ;;  %v1630_v35 = vld [vmem:[%s2014_s1 + $0x8] sm:$0xff]   ;;  %v1633_v38 = vld [vmem:[%s2014_s1 + $0x10] sm:$0xff]   ;;  %v1636_v41 = vld [vmem:[%s2014_s1 + $0x18] sm:$0xff]   ;;  %s233_s13 = scalar_lea.vmem %s2016_s3, %s1253_s10  ;;  %s236_s16 = scalar_lea.vmem %s2017_s4, %s2020_s19 }
  0x10   : > { %1532 = vmatpush3.bf16.msra.mxu1 %v1606_v9  ;;  %1440 = vmatprep.subr.bf16.mxu0 %v1607_v10  ;;  %s1810_s17 = scalar_lea.vmem %s2013_s0, %s1587_s6  ;;  %v1631_v36 = vld [vmem:[%s2014_s1 + $0x88] sm:$0xff]   ;;  %v1634_v39 = vld [vmem:[%s2014_s1 + $0x90] sm:$0xff]   ;;  %v1637_v42 = vld [vmem:[%s2014_s1 + $0x98] sm:$0xff]   ;;  %s239_s22 = scalar_lea.vmem %s2018_s5, %s2020_s19 }
  0x11   : > { %1533 = vmatprep.subr.bf16.mxu1 %v1689_v1  ;;  %v1622_v23 = vld [vmem:[%s1810_s17] ss:$12 sps:$4 sm:$0x1e]   ;;  %v1624_v24 = vld [vmem:[%s1810_s17 + $0x4] ss:$12 sps:$4 sm:$0x1e]  }
  0x12   : > { %v358_v27 = vrot.slane %v1624_v24, 1  ;;  %v1626_v29 = vld [vmem:[%s1810_s17 + $0x8] ss:$12 sps:$4 sm:$0x1e]   ;;  %v357_v30 = vrot.slane %v1622_v23, 1  ;;  %v1638_v43 = vld [vmem:[%s2014_s1 + $0x60] sm:$0xff]  }
  0x13   : > { %1441 = vmatpush3.bf16.msra.mxu0 %v1608_v11  ;;  %v359_v32 = vrot.slane %v1626_v29, 1  ;;  %v1639_v44 = vld [vmem:[%s2014_s1 + $0x20] sm:$0xff]   ;;  %v1641_v46 = vld [vmem:[%s2014_s1 + $0x68] sm:$0xff]   ;;  %v1644_v50 = vld [vmem:[%s2014_s1 + $0x70] sm:$0xff]  }
  0x14   : > { %1534 = vmatpush3.bf16.msra.mxu1 %v1609_v12  ;;  %1442 = vmatprep.subr.bf16.mxu0 %v1610_v13  ;;  %v1640_v45 = vld [vmem:[%s2014_s1 + $0xa0] sm:$0xff]   ;;  %v1642_v47 = vld [vmem:[%s2014_s1 + $0x28] sm:$0xff]   ;;  %v1645_v52 = vld [vmem:[%s2014_s1 + $0x30] sm:$0xff]  }
  0x15   : > { %1535 = vmatprep.subr.bf16.mxu1 %v1689_v1  ;;  %539 = vmatprep.mubr.bf16.mxu0 %v358_v27  ;;  %v241_v48 = vld [vmem:[%s1810_s17] sm:$0xff]  ;;  %v1643_v49 = vld [vmem:[%s2014_s1 + $0xa8] sm:$0xff]   ;;  %v1646_v53 = vld [vmem:[%s2014_s1 + $0xb0] sm:$0xff]  }
  0x16   : > { %v1330_v51 = vcombine.high %v241_v48, %v241_v48  ;;  %v1647_v54 = vld [vmem:[%s2014_s1 + $0x78] sm:$0xff]   ;;  %v1652_v57 = vld [vmem:[%s2014_s1 + $0x1c0] sm:$0xff]   ;;  %v1653_v58 = vld [vmem:[%s1810_s17 + $0x8] ss:$0 sps:$4 sm:$0xff]   ;;  %v1329_v59 = vcombine.low %v241_v48, %v241_v48 }
  0x17   : > { %1443 = vmatpush3.bf16.msra.mxu0 %v1611_v14  ;;  %v1648_v55 = vld [vmem:[%s2014_s1 + $0x38] sm:$0xff]   ;;  %v1654_v60 = vld [vmem:[%s2014_s1 + $0x180] sm:$0xff]   ;;  %v1656_v62 = vld [vmem:[%s2014_s1 + $0x1c8] sm:$0xff]  }
  0x18   : > { %1536 = vmatpush3.bf16.msra.mxu1 %v1612_v15  ;;  %1444 = vmatprep.subr.bf16.mxu0 %v1613_v16  ;;  %v1649_v56 = vld [vmem:[%s2014_s1 + $0xb8] sm:$0xff]   ;;  %v1655_v61 = vld [vmem:[%s2014_s1 + $0x200] sm:$0xff]   ;;  %v1657_v63 = vld [vmem:[%s2014_s1 + $0x188] sm:$0xff]  }
  0x19   : > { %1537 = vmatprep.subr.bf16.mxu1 %v1689_v1  ;;  %v1658_v0 = vld [vmem:[%s2014_s1 + $0x208] sm:$0xff]   ;;  %v1659_v2 = vld [vmem:[%s2014_s1 + $0x1d0] sm:$0xff]   ;;  %v1662_v5 = vld [vmem:[%s2014_s1 + $0x1d8] sm:$0xff]  }
  0x1a   : > { %v1660_v3 = vld [vmem:[%s2014_s1 + $0x190] sm:$0xff]   ;;  %v1663_v6 = vld [vmem:[%s2014_s1 + $0x198] sm:$0xff]   ;;  %v1665_v8 = vld [vmem:[%s2014_s1 + $0x1e0] sm:$0xff]  }
  0x1b   : > { %1445 = vmatpush3.bf16.msra.mxu0 %v1614_v17  ;;  %v1661_v4 = vld [vmem:[%s2014_s1 + $0x210] sm:$0xff]   ;;  %v1664_v7 = vld [vmem:[%s2014_s1 + $0x218] sm:$0xff]   ;;  %v1666_v10 = vld [vmem:[%s2014_s1 + $0x1a0] sm:$0xff]  }
  0x1c   : > { %1538 = vmatpush3.bf16.msra.mxu1 %v1615_v18  ;;  %1446 = vmatprep.subr.bf16.mxu0 %v1616_v19  ;;  %v1679_v9 = vld [vmem:[%s1810_s17 + $0x4] ss:$12 sps:$4 sm:$0x3c]   ;;  %v1668_v13 = vld [vmem:[%s2014_s1 + $0x1e8] sm:$0xff]   ;;  %v1674_v19 = vld [vmem:[%s2014_s1 + $0x1f8] sm:$0xff]  }
  0x1d   : > { %1539 = vmatprep.subr.bf16.mxu1 %v1689_v1  ;;  %v889_v11 = vrot.slane %v1679_v9, 2  ;;  %v1667_v12 = vld [vmem:[%s2014_s1 + $0x220] sm:$0xff]   ;;  %v1669_v14 = vld [vmem:[%s2014_s1 + $0x1a8] sm:$0xff]   ;;  %v1671_v16 = vld [vmem:[%s2014_s1 + $0x1f0] sm:$0xff]  }
  0x1e   : > { %v1670_v15 = vld [vmem:[%s2014_s1 + $0x228] sm:$0xff]   ;;  %v1672_v17 = vld [vmem:[%s2014_s1 + $0x1b0] sm:$0xff]   ;;  %v1676_v23 = vld [vmem:[%s2014_s1 + $0x238] sm:$0xff]  }
  0x1f   : > { %1447 = vmatpush3.bf16.msra.mxu0 %v1617_v20  ;;  %v1673_v18 = vld [vmem:[%s2014_s1 + $0x230] sm:$0xff]   ;;  %v1677_v20 = vld [vmem:[%s1810_s17] ss:$12 sps:$4 sm:$0x3c]  }
  0x20   : > { %1540 = vmatpush3.bf16.msra.mxu1 %v1618_v21  ;;  %1448 = vmatprep.subr.bf16.mxu0 %v1619_v22  ;;  %v1675_v21 = vld [vmem:[%s2014_s1 + $0x1b8] sm:$0xff]   ;;  %v1680_v22 = vld [vmem:[%s1810_s17 + $0x8] ss:$12 sps:$4 sm:$0x3c]   ;;  %v888_v24 = vrot.slane %v1677_v20, 2 }
  0x21   : > { %1541 = vmatprep.subr.bf16.mxu1 %v1689_v1 }
  0x23   : > { %1449 = vmatpush3.bf16.msra.mxu0 %v1620_v25  ;;  %v890_v25 = vrot.slane %v1680_v22, 2 }
  0x24   : > { %1542 = vmatpush3.bf16.msra.mxu1 %v1621_v26  ;;  %1465 = vmatprep.subr.bf16.mxu0 %v1625_v28 }
  0x25   : > { %1547 = vmatprep.subr.bf16.mxu1 %v1689_v1 }
  0x26   : > { %540 = vmatmul.mubr.bf16.vlgmr.msra.gmra.mrb[0].mxu0 %v357_v30 }
  0x27   : > { %1544 = vmatmul.mubr.bf16.vlgmr.msra.gmra.mrb[0].mxu1 %v359_v32  ;;  %1466 = vmatpush3.bf16.msra.mxu0 %v1627_v31 }
  0x28   : > { %1548 = vmatpush3.bf16.msra.mxu1 %v1628_v33  ;;  %1467 = vmatprep.subr.bf16.mxu0 %v1629_v34 }
  0x29   : > { %1549 = vmatprep.subr.bf16.mxu1 %v1689_v1  ;;  %1563 = vmatprep.mubr.msk.bf16.mxu1 %vm1690_vm0, %v1689_v1 }
  0x2a   : > { %774 = vmatprep.mubr.bf16.mxu0 %v1330_v51 }
  0x2b   : > { %1468 = vmatpush3.bf16.msra.mxu0 %v1630_v35 }
  0x2c   : > { %1550 = vmatpush3.bf16.msra.mxu1 %v1631_v36  ;;  %1469 = vmatprep.subr.bf16.mxu0 %v1632_v37 }
  0x2d   : > { %1551 = vmatprep.subr.bf16.mxu1 %v1689_v1 }
  0x2f   : > { %1470 = vmatpush3.bf16.msra.mxu0 %v1633_v38 }
  0x30   : > { %1552 = vmatpush3.bf16.msra.mxu1 %v1634_v39  ;;  %1471 = vmatprep.subr.bf16.mxu0 %v1635_v40 }
  0x31   : > { %1553 = vmatprep.subr.bf16.mxu1 %v1689_v1 }
  0x33   : > { %1472 = vmatpush3.bf16.msra.mxu0 %v1636_v41 }
  0x34   : > { %1554 = vmatpush3.bf16.msra.mxu1 %v1637_v42  ;;  %1473 = vmatprep.subr.bf16.mxu0 %v1638_v43 }
  0x35   : > { %1555 = vmatprep.subr.bf16.mxu1 %v1689_v1 }
  0x37   : > { %1474 = vmatpush3.bf16.msra.mxu0 %v1639_v44 }
  0x38   : > { %1556 = vmatpush3.bf16.msra.mxu1 %v1640_v45  ;;  %1475 = vmatprep.subr.bf16.mxu0 %v1641_v46 }
  0x39   : > { %1557 = vmatprep.subr.bf16.mxu1 %v1689_v1 }
  0x3b   : > { %1476 = vmatpush3.bf16.msra.mxu0 %v1642_v47 }
  0x3c   : > { %1558 = vmatpush3.bf16.msra.mxu1 %v1643_v49  ;;  %1477 = vmatprep.subr.bf16.mxu0 %v1644_v50 }
  0x3d   : > { %1559 = vmatprep.subr.bf16.mxu1 %v1689_v1 }
  0x3f   : > { %1478 = vmatpush3.bf16.msra.mxu0 %v1645_v52 }
  0x40   : > { %1560 = vmatpush3.bf16.msra.mxu1 %v1646_v53  ;;  %1479 = vmatprep.subr.bf16.mxu0 %v1647_v54 }
  0x41   : > { %1561 = vmatprep.subr.bf16.mxu1 %v1689_v1 }
  0x43   : > { %1480 = vmatpush3.bf16.msra.mxu0 %v1648_v55 }
  0x44   : > { %1562 = vmatpush3.bf16.msra.mxu1 %v1649_v56  ;;  %1496 = vmatprep.subr.bf16.mxu0 %v1652_v57  ;;  %v1431_v56 = vld [vmem:[%s2015_s2] ss:$0 sm:$0xff] }
  0x45   : > { %1567 = vmatprep.subr.bf16.mxu1 %v1689_v1 }
  0x46   : > { %775 = vmatmul.mubr.bf16.vlgmr.msra.gmra.mrb[4].mxu0 %v1329_v59 }
  0x47   : > { %1564 = vmatmul.mubr.bf16.vlgmr.msra.gmra.mrb[4].mxu1 %v1653_v58  ;;  %1497 = vmatpush3.bf16.msra.mxu0 %v1654_v60 }
  0x48   : > { %1568 = vmatpush3.bf16.msra.mxu1 %v1655_v61  ;;  %1498 = vmatprep.subr.bf16.mxu0 %v1656_v62 }
  0x49   : > { %1569 = vmatprep.subr.bf16.mxu1 %v1689_v1  ;;  %1583 = vmatprep.mubr.msk.bf16.mxu1 %vm1690_vm0, %v1689_v1 }
  0x4a   : > { %1070 = vmatprep.mubr.bf16.mxu0 %v889_v11 }
  0x4b   : > { %1499 = vmatpush3.bf16.msra.mxu0 %v1657_v63 }
  0x4c   : > { %1570 = vmatpush3.bf16.msra.mxu1 %v1658_v0  ;;  %1500 = vmatprep.subr.bf16.mxu0 %v1659_v2 }
  0x4d   : > { %1571 = vmatprep.subr.bf16.mxu1 %v1689_v1 }
  0x4f   : > { %1501 = vmatpush3.bf16.msra.mxu0 %v1660_v3 }
  0x50   : > { %1572 = vmatpush3.bf16.msra.mxu1 %v1661_v4  ;;  %1502 = vmatprep.subr.bf16.mxu0 %v1662_v5 }
  0x51   : > { %1573 = vmatprep.subr.bf16.mxu1 %v1689_v1 }
  0x53   : > { %1503 = vmatpush3.bf16.msra.mxu0 %v1663_v6 }
  0x54   : > { %1574 = vmatpush3.bf16.msra.mxu1 %v1664_v7  ;;  %1504 = vmatprep.subr.bf16.mxu0 %v1665_v8 }
  0x55   : > { %1575 = vmatprep.subr.bf16.mxu1 %v1689_v1 }
  0x57   : > { %1505 = vmatpush3.bf16.msra.mxu0 %v1666_v10 }
  0x58   : > { %1576 = vmatpush3.bf16.msra.mxu1 %v1667_v12  ;;  %1506 = vmatprep.subr.bf16.mxu0 %v1668_v13 }
  0x59   : > { %1577 = vmatprep.subr.bf16.mxu1 %v1689_v1 }
  0x5b   : > { %1507 = vmatpush3.bf16.msra.mxu0 %v1669_v14 }
  0x5c   : > { %1578 = vmatpush3.bf16.msra.mxu1 %v1670_v15  ;;  %1508 = vmatprep.subr.bf16.mxu0 %v1671_v16 }
  0x5d   : > { %1579 = vmatprep.subr.bf16.mxu1 %v1689_v1 }
  0x5f   : > { %1509 = vmatpush3.bf16.msra.mxu0 %v1672_v17 }
  0x60   : > { %1580 = vmatpush3.bf16.msra.mxu1 %v1673_v18  ;;  %1510 = vmatprep.subr.bf16.mxu0 %v1674_v19 }
  0x61   : > { %1581 = vmatprep.subr.bf16.mxu1 %v1689_v1 }
  0x63   : > { %1511 = vmatpush3.bf16.msra.mxu0 %v1675_v21 }
  0x64   : > { %1582 = vmatpush3.bf16.msra.mxu1 %v1676_v23 }
  0x66   : > { %1071 = vmatmul.mubr.bf16.vlgmr.msra.gmra.mrb[8].mxu0 %v888_v24 }
  0x67   : > { %1584 = vmatmul.mubr.bf16.vlgmr.msra.gmra.mrb[8].mxu1 %v890_v25 }
  0xf9   : > { %v1450_v26 = vpop.f32.mrb[0].mxu0 }
  0xfa   : > { %v1451_v27 = vpop.f32.mrb[1].mxu0  ;;  %v581_v28 = vpop.f32.mrb[0].mxu1 }
  0xfb   : > { %v1452_v29 = vadd.f32 %v1451_v27, %v1450_v26  ;;  %v1453_v30 = vpop.f32.mrb[2].mxu0  ;;  %v1545_v31 = vpop.f32.mrb[1].mxu1 }
  0xfc   : > { %v1454_v32 = vpop.f32.mrb[3].mxu0  ;;  %v584_v33 = vpop.f32.mrb[2].mxu1 }
  0xfd   : > { %v582_v34 = vadd.f32 %v1452_v29, %v581_v28  ;;  %v1546_v35 = vpop.f32.mrb[3].mxu1 }
 0x119   : > { %v1481_v36 = vpop.f32.mrb[4].mxu0 }
 0x11a   : > { %v1482_v37 = vpop.f32.mrb[5].mxu0  ;;  %v816_v38 = vpop.f32.mrb[4].mxu1 }
 0x11b   : > { %v1483_v1 = vadd.f32 %v1482_v37, %v1481_v36  ;;  %v1484_v39 = vpop.f32.mrb[6].mxu0  ;;  %v1565_v40 = vpop.f32.mrb[5].mxu1 }
 0x11c   : > { %v1485_v41 = vpop.f32.mrb[7].mxu0  ;;  %v819_v42 = vpop.f32.mrb[6].mxu1 }
 0x11d   : > { %v777_v43 = vadd.f32 %v1483_v1, %v582_v34  ;;  %v1566_v44 = vpop.f32.mrb[7].mxu1 }
 0x11f   : > { %v817_v45 = vadd.f32 %v816_v38, %v777_v43 }
 0x139   : > { %v1512_v46 = vpop.f32.mrb[8].mxu0 }
 0x13a   : > { %v1112_v47 = vpop.f32.mrb[8].mxu1  ;;  %v1513_v48 = vpop.f32.mrb[9].mxu0 }
 0x13b   : > { %v1514_v49 = vadd.f32 %v1513_v48, %v1512_v46  ;;  %v1585_v50 = vpop.f32.mrb[9].mxu1  ;;  %v1515_v51 = vpop.f32.mrb[10].mxu0 }
 0x13c   : > { %v1115_v52 = vpop.f32.mrb[10].mxu1  ;;  %v1516_v53 = vpop.f32.mrb[11].mxu0 }
 0x13d   : > { %v1113_v54 = vadd.f32 %v1514_v49, %v1112_v47  ;;  %v1586_v55 = vpop.f32.mrb[11].mxu1 }
 0x13f   : > { %v1118_v57 = vadd.f32 %v1113_v54, %v817_v45 }
 0x141   : > { %v1126_v58 = vadd.f32 %v1431_v56, %v1118_v57 }
 0x143   : > { %v1127_v59 = vmax.f32 %v1126_v58, 0.0 }
 0x145   : > { %1128 = vst [vmem:[%s233_s13] sm:$0xff] %v1127_v59  ;;  %v1129_v60 = vrot.slane %v1127_v59, 4  ;;  %v1136_v61 = vmul.f32 %v1127_v59, %v1127_v59 }
 0x147   : > { %v1130_v62 = vadd.f32 %v1129_v60, %v1127_v59  ;;  %v1137_v63 = vrot.slane %v1136_v61, 4 }
 0x149   : > { %v1131_v0 = vrot.slane %v1130_v62, 2  ;;  %v1138_v2 = vadd.f32 %v1137_v63, %v1136_v61 }
 0x14b   : > { %v1132_v3 = vadd.f32 %v1131_v0, %v1130_v62  ;;  %v1139_v4 = vrot.slane %v1138_v2, 2 }
 0x14d   : > { %v1133_v5 = vrot.slane %v1132_v3, 1  ;;  %v1140_v6 = vadd.f32 %v1139_v4, %v1138_v2 }
 0x14f   : > { %v1134_v7 = vadd.f32 %v1133_v5, %v1132_v3  ;;  %v1141_v8 = vrot.slane %v1140_v6, 1 }
 0x151   : > { %1135 = vst [vmem:[%s236_s16] sm:$0x1] %v1134_v7  ;;  %v1142_v9 = vadd.f32 %v1141_v8, %v1140_v6 }
 0x153   : > { %1143 = vst [vmem:[%s239_s22] sm:$0x1] %v1142_v9 }
 0x154 PF: > { %s16_s18 = sadd.s32 1, %s1687_s18  }
 0x155   : > { %p13_p4 = scmp.ge.s32.totalorder %s16_s18, 4  }
 0x157   :  { %15 = sbr.rel (!%p13_p4) target bundleno = 1 (0x1), region = 88 }

// kernel: encoder_forward.17
= control target key start
LH: loop header
LB: loop body
LE: loop exit
PB: predicated region body
PF: predicated region fallthrough
CT: control target
= control target key end

     0   :  { %11 = vsyncpa [#allocation3], 0  ;;  %s3002_s0 = inlined_call_operand.vmem [shape: bf16[2,4,384], index: 0, kind: input, shape index: {}]   ;;  %s3003_s1 = inlined_call_operand.vmem [shape: bf16[3,384,256], index: 1, kind: input, shape index: {}]   ;;  %s3004_s2 = inlined_call_operand.vmem [shape: f32[1,256], index: 2, kind: input, shape index: {}]   ;;  %s3005_s3 = inlined_call_operand.vmem [shape: f32[2,2,256], index: 3, kind: output, shape index: {0}]   ;;  %s3006_s4 = inlined_call_operand.hbm [shape: f32[2,1,256], index: 4, kind: output, shape index: {1}]   ;;  %s3007_s5 = inlined_call_operand.hbm [shape: f32[2,1,256], index: 5, kind: output, shape index: {2}]  }
   0x1   :  { %13 = vsyncpa [#allocation3 + $0x1], 0 }
   0x2   :  { %14 = vsyncpa [#allocation5], 0 }
   0x3   :  { %16 = vsyncpa [#allocation5 + $0x1], 0  ;;  %s2366_s18 = smov 0   ;;  %s2368_s19 = smov 0  }
   0x4   :  { %s2370_s20 = smov 0   ;;  %s2372_s21 = smov 0  }
   0x5 LB: > { %s2387_s22 = sadd.s32 4294967295, %s2329_s21   ;;  %s1707_s23 = sadd.s32 4294967294, %s2329_s21   ;;  %s2329_s21 = sphi %s2372_s21, %s3015_s21   ;;  %s2325_s20 = sphi %s2370_s20, %s3014_s20   ;;  %s2321_s19 = sphi %s2368_s19, %s3013_s19   ;;  %s2317_s18 = sphi %s2366_s18, %s3012_s18  }
   0x6   : > { %s2391_s24 = sadd.s32 1, %s2329_s21   ;;  %s123_s25 = sadd.s32 1, %s2325_s20 }
   0x7   : > { %s120_s26 = ssub.s32 %s2329_s21, %s2391_s24  ;;  %p133_p0 = scmp.ne.s32.totalorder %s2325_s20, %s2321_s19 }
   0x8   : > { %p121_p1 = scmp.eq.s32.totalorder %s120_s26, 0  ;;  %p134_p2 = scmp.eq.s32.totalorder %s2387_s22, 1 }
   0x9   : > { %p139_p3 = scmp.ne.s32.totalorder %s2321_s19, %s2317_s18  ;;  %p140_p4 = scmp.eq.s32.totalorder %s1707_s23, 1 }
   0xa   : > { %s2402_s27 = scalar_select %p121_p1, %s2325_s20, %s123_s25  }
   0xb   : > { %p2404_p5 = por %p134_p2, %p133_p0  ;;  %p2408_p6 = por %p140_p4, %p139_p3 }
   0xc   : > { %p1710_p7 = scmp.ge.s32.totalorder %s2329_s21, 1  ;;  %p198_p8 = scmp.lt.s32.totalorder %s2329_s21, 3 }
   0xe   : > { %p199_p9 = pnand %p1710_p7, %p198_p8 }
   0xf   : > { %v2016_v0 = vld [vmem:[%s3003_s1 + $0x184] ss:$8 sps:$4 sm:$0xff] (!%p199_p9)   ;;  %v2331_v2 = vmov (!%p199_p9), 0   ;;  %v2020_v3 = vld [vmem:[%s3003_s1 + $0x180] ss:$8 sps:$4 sm:$0xff] (!%p199_p9)   ;;  %p236_p10 = scmp.lt.s32.totalorder (!%p199_p9), %s2387_s22, 1  ;;  %v351_v23 = vlaneseq (!%p199_p9) }
  0x10   : > { %202 = sbr.rel (%p199_p9) target bundleno = 453 (0x1c5), region = 32  ;;  %v2018_v1 = vld [vmem:[%s3003_s1 + $0x284] ss:$8 sps:$4 sm:$0xff] (!%p199_p9)   ;;  %700 = vmatprep.mubr.bf16.mxu1 (!%p199_p9), %v2331_v2  ;;  %627 = vmatprep.subr.bf16.mxu0 (!%p199_p9), %v2016_v0  ;;  %v2021_v4 = vld [vmem:[%s3003_s1 + $0x280] ss:$8 sps:$4 sm:$0xff] (!%p199_p9)   ;;  %vm1476_vm0 = vcmask (!%p199_p9), 1041408  }
  0x11   : > { %668 = vmatprep.subr.bf16.mxu1 (!%p199_p9), %v2018_v1  ;;  %v2022_v5 = vld [vmem:[%s3003_s1 + $0x194] ss:$8 sps:$4 sm:$0xff] (!%p199_p9)   ;;  %628 = vmatpush1.bf16.msra.mxu0 (!%p199_p9), %v2020_v3  ;;  %v2026_v7 = vld [vmem:[%s3003_s1 + $0x190] ss:$8 sps:$4 sm:$0xff] (!%p199_p9)   ;;  %v2028_v9 = vld [vmem:[%s3003_s1 + $0x1a4] ss:$8 sps:$4 sm:$0xff] (!%p199_p9)  }
  0x12   : > { %669 = vmatpush1.bf16.msra.mxu1 (!%p199_p9), %v2021_v4  ;;  %v2024_v6 = vld [vmem:[%s3003_s1 + $0x294] ss:$8 sps:$4 sm:$0xff] (!%p199_p9)   ;;  %629 = vmatprep.subr.bf16.mxu0 (!%p199_p9), %v2022_v5  ;;  %v2027_v8 = vld [vmem:[%s3003_s1 + $0x290] ss:$8 sps:$4 sm:$0xff] (!%p199_p9)   ;;  %v2030_v10 = vld [vmem:[%s3003_s1 + $0x2a4] ss:$8 sps:$4 sm:$0xff] (!%p199_p9)  }
  0x13   : > { %670 = vmatprep.subr.bf16.mxu1 (!%p199_p9), %v2024_v6  ;;  %v2032_v11 = vld [vmem:[%s3003_s1 + $0x1a0] ss:$8 sps:$4 sm:$0xff] (!%p199_p9)   ;;  %v2034_v13 = vld [vmem:[%s3003_s1 + $0x1b4] ss:$8 sps:$4 sm:$0xff] (!%p199_p9)   ;;  %v2038_v15 = vld [vmem:[%s3003_s1 + $0x1b0] ss:$8 sps:$4 sm:$0xff] (!%p199_p9)  }
  0x14   : > { %v2033_v12 = vld [vmem:[%s3003_s1 + $0x2a0] ss:$8 sps:$4 sm:$0xff] (!%p199_p9)   ;;  %v2036_v14 = vld [vmem:[%s3003_s1 + $0x2b4] ss:$8 sps:$4 sm:$0xff] (!%p199_p9)   ;;  %v2039_v16 = vld [vmem:[%s3003_s1 + $0x2b0] ss:$8 sps:$4 sm:$0xff] (!%p199_p9)  }
  0x15   : > { %630 = vmatpush1.bf16.msra.mxu0 (!%p199_p9), %v2026_v7  ;;  %v2040_v17 = vld [vmem:[%s3003_s1 + $0x1c4] ss:$8 sps:$4 sm:$0xff] (!%p199_p9)   ;;  %v2044_v19 = vld [vmem:[%s3003_s1 + $0x1c0] ss:$8 sps:$4 sm:$0xff] (!%p199_p9)   ;;  %v2332_v21 = vmov (!%p199_p9), 1983009808  }
  0x16   : > { %671 = vmatpush1.bf16.msra.mxu1 (!%p199_p9), %v2027_v8  ;;  %631 = vmatprep.subr.bf16.mxu0 (!%p199_p9), %v2028_v9  ;;  %v2042_v18 = vld [vmem:[%s3003_s1 + $0x2c4] ss:$8 sps:$4 sm:$0xff] (!%p199_p9)   ;;  %v2045_v20 = vld [vmem:[%s3003_s1 + $0x2c0] ss:$8 sps:$4 sm:$0xff] (!%p199_p9)   ;;  %v349_v22 = vunpack.c.l.s4 (!%p199_p9), %v2332_v21  ;;  %v2046_v24 = vld [vmem:[%s3003_s1 + $0x1d4] ss:$8 sps:$4 sm:$0xff] (!%p199_p9)  }
  0x17   : > { %672 = vmatprep.subr.bf16.mxu1 %v2030_v10  ;;  %s2471_s9 = scalar_select %p236_p10, %s2387_s22, 1  ;;  %v2048_v25 = vld [vmem:[%s3003_s1 + $0x2d4] ss:$8 sps:$4 sm:$0xff]   ;;  %v2050_v26 = vld [vmem:[%s3003_s1 + $0x1d0] ss:$8 sps:$4 sm:$0xff]   ;;  %v2490_v28 = vshrl.u32 %v351_v23, 7 }
  0x18   : > { %v350_v27 = vunpack.c.0.s8 %v349_v22  ;;  %v2051_v29 = vld [vmem:[%s3003_s1 + $0x2d0] ss:$8 sps:$4 sm:$0xff]   ;;  %v2052_v30 = vld [vmem:[%s3003_s1 + $0x1e4] ss:$8 sps:$4 sm:$0xff]   ;;  %v2056_v32 = vld [vmem:[%s3003_s1 + $0x1e0] ss:$8 sps:$4 sm:$0xff]  }
  0x19   : > { %632 = vmatpush1.bf16.msra.mxu0 %v2032_v11  ;;  %s1968_s23 = smul.u32 6, %s2471_s9  ;;  %v2054_v31 = vld [vmem:[%s3003_s1 + $0x2e4] ss:$8 sps:$4 sm:$0xff]   ;;  %v2057_v33 = vld [vmem:[%s3003_s1 + $0x2e0] ss:$8 sps:$4 sm:$0xff]   ;;  %s1965_s7 = sshll.u32 %s2471_s9, 2 }
  0x1a   : > { %673 = vmatpush1.bf16.msra.mxu1 %v2033_v12  ;;  %633 = vmatprep.subr.bf16.mxu0 %v2034_v13  ;;  %v2058_v34 = vld [vmem:[%s3003_s1 + $0x1f4] ss:$8 sps:$4 sm:$0xff]   ;;  %v2516_v35 = vsub.s32 %v350_v27, %v2490_v28  ;;  %v2062_v40 = vld [vmem:[%s3003_s1 + $0x1f0] ss:$8 sps:$4 sm:$0xff]   ;;  %v2064_v44 = vld [vmem:[%s3003_s1 + $0x204] ss:$8 sps:$4 sm:$0xff]   ;;  %s245_s11 = scalar_lea.vmem %s3005_s3, %s1965_s7 }
  0x1b   : > { %674 = vmatprep.subr.bf16.mxu1 %v2036_v14  ;;  %s2504_s14 = scalar_lea.vmem %s3002_s0, %s1968_s23  ;;  %v2060_v37 = vld [vmem:[%s3003_s1 + $0x2f4] ss:$8 sps:$4 sm:$0xff]   ;;  %v2063_v43 = vld [vmem:[%s3003_s1 + $0x2f0] ss:$8 sps:$4 sm:$0xff]   ;;  %v2068_v45 = vld [vmem:[%s3003_s1 + $0x4] ss:$8 sps:$4 sm:$0xff]  }
  0x1c   : > { %v296_v36 = vld [vmem:[%s2504_s14] sm:$0x3f]  ;;  %v2071_v53 = vld [vmem:[%s3003_s1 + $0x214] ss:$8 sps:$4 sm:$0xff]   ;;  %v2073_v58 = vld [vmem:[%s3003_s1 + $0x10] ss:$8 sps:$4 sm:$0xff]  }
  0x1d   : > { %634 = vmatpush1.bf16.msra.mxu0 %v2038_v15  ;;  %v347_v38 = vcombine.high %v296_v36, %v296_v36  ;;  %v2523_v39 = vrot.slane %v296_v36, %v2516_v35  ;;  %v2066_v50 = vld [vmem:[%s3003_s1] ss:$8 sps:$4 sm:$0xff]   ;;  %v2075_v56 = vld [vmem:[%s3003_s1 + $0x14] ss:$8 sps:$4 sm:$0xff]   ;;  %v2076_v59 = vld [vmem:[%s3003_s1 + $0x210] ss:$8 sps:$4 sm:$0xff]  }
  0x1e   : > { %675 = vmatpush1.bf16.msra.mxu1 %v2039_v16  ;;  %635 = vmatprep.subr.bf16.mxu0 %v2040_v17  ;;  %v2069_v52 = vld [vmem:[%s3003_s1 + $0x200] ss:$8 sps:$4 sm:$0xff]   ;;  %v2077_v60 = vld [vmem:[%s3003_s1 + $0x224] ss:$8 sps:$4 sm:$0xff]   ;;  %v2083_v0 = vld [vmem:[%s3003_s1 + $0x234] ss:$8 sps:$4 sm:$0xff]  }
  0x1f   : > { %676 = vmatprep.subr.bf16.mxu1 %v2042_v18  ;;  %v361_v41 = vrot.slane %v347_v38, %v2516_v35  ;;  %v362_v42 = vcombine.high %v2523_v39, %v2523_v39  ;;  %v2081_v61 = vld [vmem:[%s3003_s1 + $0x24] ss:$8 sps:$4 sm:$0xff]   ;;  %v2079_v62 = vld [vmem:[%s3003_s1 + $0x20] ss:$8 sps:$4 sm:$0xff]   ;;  %v2087_v1 = vld [vmem:[%s3003_s1 + $0x34] ss:$8 sps:$4 sm:$0xff]  }
  0x20   : > { %v2082_v63 = vld [vmem:[%s3003_s1 + $0x220] ss:$8 sps:$4 sm:$0xff]   ;;  %v2085_v3 = vld [vmem:[%s3003_s1 + $0x30] ss:$8 sps:$4 sm:$0xff]   ;;  %v2089_v5 = vld [vmem:[%s3003_s1 + $0x244] ss:$8 sps:$4 sm:$0xff]  }
  0x21   : > { %636 = vmatpush1.bf16.msra.mxu0 %v2044_v19  ;;  %v378_v46 = vshrl.u32 %v361_v41, 16  ;;  %v380_v47 = vshll.u32 %v361_v41, 16  ;;  %v371_v48 = vshrl.u32 %v362_v42, 16  ;;  %v373_v49 = vshll.u32 %v362_v42, 16  ;;  %v2088_v4 = vld [vmem:[%s3003_s1 + $0x230] ss:$8 sps:$4 sm:$0xff]  }
  0x22   : > { %677 = vmatpush1.bf16.msra.mxu1 %v2045_v20  ;;  %637 = vmatprep.subr.bf16.mxu0 %v2046_v24  ;;  %v2093_v6 = vld [vmem:[%s3003_s1 + $0x44] ss:$8 sps:$4 sm:$0xff]   ;;  %v2091_v7 = vld [vmem:[%s3003_s1 + $0x40] ss:$8 sps:$4 sm:$0xff]   ;;  %v2095_v9 = vld [vmem:[%s3003_s1 + $0x254] ss:$8 sps:$4 sm:$0xff]  }
  0x23   : > { %678 = vmatprep.subr.bf16.mxu1 %v2048_v25  ;;  %v382_v51 = vrot.slane %v380_v47, 1  ;;  %v375_v54 = vrot.slane %v373_v49, 1  ;;  %v2094_v8 = vld [vmem:[%s3003_s1 + $0x240] ss:$8 sps:$4 sm:$0xff]   ;;  %v2099_v10 = vld [vmem:[%s3003_s1 + $0x54] ss:$8 sps:$4 sm:$0xff]  }
  0x24   : > { %v2097_v11 = vld [vmem:[%s3003_s1 + $0x50] ss:$8 sps:$4 sm:$0xff]   ;;  %v2101_v13 = vld [vmem:[%s3003_s1 + $0x264] ss:$8 sps:$4 sm:$0xff]   ;;  %v366_v15 = vshll.u32 %v2523_v39, 16  ;;  %v364_v20 = vshrl.u32 %v2523_v39, 16 }
  0x25   : > { %638 = vmatpush1.bf16.msra.mxu0 %v2050_v26  ;;  %v383_v55 = vor.u32 %v382_v51, %v378_v46  ;;  %v376_v57 = vor.u32 %v375_v54, %v371_v48  ;;  %v2100_v12 = vld [vmem:[%s3003_s1 + $0x250] ss:$8 sps:$4 sm:$0xff]   ;;  %v2105_v14 = vld [vmem:[%s3003_s1 + $0x64] ss:$8 sps:$4 sm:$0xff]   ;;  %v2103_v16 = vld [vmem:[%s3003_s1 + $0x60] ss:$8 sps:$4 sm:$0xff]  }
  0x26   : > { %679 = vmatpush1.bf16.msra.mxu1 %v2051_v29  ;;  %639 = vmatprep.subr.bf16.mxu0 %v2052_v30  ;;  %v2106_v17 = vld [vmem:[%s3003_s1 + $0x260] ss:$8 sps:$4 sm:$0xff]   ;;  %v2107_v18 = vld [vmem:[%s3003_s1 + $0x274] ss:$8 sps:$4 sm:$0xff]   ;;  %v368_v21 = vrot.slane %v366_v15, 1  ;;  %s2909_s9 = sand.u32 1, %s2321_s19  }
  0x27   : > { %680 = vmatprep.subr.bf16.mxu1 %v2054_v31  ;;  %659 = vmatprep.mubr.bf16.mxu0 %v376_v57  ;;  %v2111_v19 = vld [vmem:[%s3003_s1 + $0x74] ss:$8 sps:$4 sm:$0xff]   ;;  %v2109_v22 = vld [vmem:[%s3003_s1 + $0x70] ss:$8 sps:$4 sm:$0xff]   ;;  %v2115_v25 = vld [vmem:[%s3003_s1 + $0x84] ss:$8 sps:$4 sm:$0xff]  }
  0x28   : > { %v2112_v24 = vld [vmem:[%s3003_s1 + $0x270] ss:$8 sps:$4 sm:$0xff]   ;;  %v2118_v26 = vld [vmem:[%s3003_s1 + $0x104] ss:$8 sps:$4 sm:$0xff]   ;;  %v369_v27 = vor.u32 %v368_v21, %v364_v20  ;;  %v2113_v29 = vld [vmem:[%s3003_s1 + $0x80] ss:$8 sps:$4 sm:$0xff]  }
  0x29   : > { %640 = vmatpush1.bf16.msra.mxu0 %v2056_v32  ;;  %v2116_v30 = vld [vmem:[%s3003_s1 + $0x100] ss:$8 sps:$4 sm:$0xff]   ;;  %v2121_v31 = vld [vmem:[%s3003_s1 + $0x94] ss:$8 sps:$4 sm:$0xff]   ;;  %v2119_v36 = vld [vmem:[%s3003_s1 + $0x90] ss:$8 sps:$4 sm:$0xff]  }
  0x2a   : > { %681 = vmatpush1.bf16.msra.mxu1 %v2057_v33  ;;  %641 = vmatprep.subr.bf16.mxu0 %v2058_v34  ;;  %v2648_v32 = vld [vmem:[%s2504_s14] sm:$0x15]  ;;  %v2124_v33 = vld [vmem:[%s3003_s1 + $0x114] ss:$8 sps:$4 sm:$0xff]   ;;  %v2122_v38 = vld [vmem:[%s3003_s1 + $0x110] ss:$8 sps:$4 sm:$0xff]  }
  0x2b   : > { %682 = vmatprep.subr.bf16.mxu1 %v2060_v37  ;;  %v2655_v34 = vrot.slane %v2648_v32, %v2516_v35  ;;  %v2127_v39 = vld [vmem:[%s3003_s1 + $0xa4] ss:$8 sps:$4 sm:$0xff]   ;;  %v2125_v41 = vld [vmem:[%s3003_s1 + $0xa0] ss:$8 sps:$4 sm:$0xff]   ;;  %v2134_v46 = vld [vmem:[%s3003_s1 + $0x130] ss:$8 sps:$4 sm:$0xff]  }
  0x2c   : > { %v2128_v42 = vld [vmem:[%s3003_s1 + $0x120] ss:$8 sps:$4 sm:$0xff]   ;;  %v2139_v47 = vld [vmem:[%s3003_s1 + $0xc4] ss:$8 sps:$4 sm:$0xff]   ;;  %v2145_v51 = vld [vmem:[%s3003_s1 + $0xd4] ss:$8 sps:$4 sm:$0xff]  }
  0x2d   : > { %642 = vmatpush1.bf16.msra.mxu0 %v2062_v40  ;;  %v725_v37 = vcombine.high %v2655_v34, %v2655_v34  ;;  %v2130_v40 = vld [vmem:[%s3003_s1 + $0x124] ss:$8 sps:$4 sm:$0xff]   ;;  %v2137_v49 = vld [vmem:[%s3003_s1 + $0xc0] ss:$8 sps:$4 sm:$0xff]   ;;  %v2146_v54 = vld [vmem:[%s3003_s1 + $0x150] ss:$8 sps:$4 sm:$0xff]  }
  0x2e   : > { %683 = vmatpush1.bf16.msra.mxu1 %v2063_v43  ;;  %643 = vmatprep.subr.bf16.mxu0 %v2064_v44  ;;  %v2133_v43 = vld [vmem:[%s3003_s1 + $0xb4] ss:$8 sps:$4 sm:$0xff]   ;;  %v2142_v48 = vld [vmem:[%s3003_s1 + $0x144] ss:$8 sps:$4 sm:$0xff]   ;;  %v2149_v57 = vld [vmem:[%s3003_s1 + $0xe0] ss:$8 sps:$4 sm:$0xff]  }
  0x2f   : > { %969 = vmatprep.subr.bf16.mxu1 %v2068_v45  ;;  %v2136_v44 = vld [vmem:[%s3003_s1 + $0x134] ss:$8 sps:$4 sm:$0xff]   ;;  %v2131_v45 = vld [vmem:[%s3003_s1 + $0xb0] ss:$8 sps:$4 sm:$0xff]   ;;  %v2176_v21 = vld [vmem:[%s3003_s1 + $0x344] ss:$8 sps:$4 sm:$0xff]  }
  0x30   : > { %v2204_v20 = vld [vmem:[%s3003_s1 + $0x430] ss:$8 sps:$4 sm:$0xff]   ;;  %s1711_s12 = sshll.u32 %s2909_s9, 1  ;;  %s1966_s13 = sshll.u32 %s2387_s22, 5  ;;  %vm2915_vm1 = vcmp.lt.s32.totalorder %v351_v23, 256 }
  0x31   : > { %701 = vmatmul.mubr.bf16.vlgmr.msra.gmra.mrb[0].mxu1 %v383_v55  ;;  %644 = vmatpush1.bf16.msra.mxu0 %v2069_v52  ;;  %v2148_v52 = vld [vmem:[%s3003_s1 + $0x154] ss:$8 sps:$4 sm:$0xff]   ;;  %v2151_v55 = vld [vmem:[%s3003_s1 + $0xe4] ss:$8 sps:$4 sm:$0xff]   ;;  %s228_s15 = scalar_lea.vmem [#allocation2], %s1711_s12  ;;  %s2925_s22 = scalar_lea.hbm %s3006_s4, %s1966_s13 }
  0x32   : > { %970 = vmatpush1.bf16.msra.mxu1 %v2066_v50  ;;  %645 = vmatprep.subr.bf16.mxu0 %v2071_v53  ;;  %v2140_v50 = vld [vmem:[%s3003_s1 + $0x140] ss:$8 sps:$4 sm:$0xff]   ;;  %v2143_v53 = vld [vmem:[%s3003_s1 + $0xd0] ss:$8 sps:$4 sm:$0xff]   ;;  %s1577_s16 = sshll.u32 %s228_s15, 4  ;;  %s2934_s6 = scalar_lea.hbm %s3007_s5, %s1966_s13  ;;  %s2927_s16 = int_to_ptr.vmem [resolvable:$true] %s1577_s16 }
  0x33   : > { %971 = vmatprep.subr.bf16.mxu1 %v2075_v56  ;;  %1001 = vmatprep.mubr.bf16.mxu1 %v725_v37  ;;  %v2154_v56 = vld [vmem:[%s3003_s1 + $0x164] ss:$8 sps:$4 sm:$0xff]   ;;  %v2185_v37 = vld [vmem:[%s3003_s1 + $0x374] ss:$8 sps:$4 sm:$0xff]   ;;  %s1555_s7 = scalar_lea.sflag [#allocation3], %s2909_s9  ;;  %s2235_s8 = scalar_lea.vmem %s2927_s16, 32 }
  0x34   : > { %p2236_p11 = scmp.ne.s32.totalorder %s2927_s16, %s2235_s8  ;;  %s2334_s10 = smov [#allocation2]  }
  0x35   : > { %646 = vmatpush1.bf16.msra.mxu0 %v2076_v59  ;;  %v2157_v59 = vld [vmem:[%s3003_s1 + $0xf4] ss:$8 sps:$4 sm:$0xff]  }
  0x36   : > { %972 = vmatpush1.bf16.msra.mxu1 %v2073_v58  ;;  %647 = vmatprep.subr.bf16.mxu0 %v2077_v60  ;;  %v2152_v58 = vld [vmem:[%s3003_s1 + $0x160] ss:$8 sps:$4 sm:$0xff]   ;;  %v2160_v60 = vld [vmem:[%s3003_s1 + $0x174] ss:$8 sps:$4 sm:$0xff]   ;;  %p2237_p12 = pnand %p2236_p11, %p2404_p5 }
  0x37   : > { %973 = vmatprep.subr.bf16.mxu1 %v2081_v61  ;;  %v2155_v61 = vld [vmem:[%s3003_s1 + $0xf0] ss:$8 sps:$4 sm:$0xff]  }
  0x38   : > { %p2238_p13 = pneg %p2237_p12 }
  0x39   : > { %648 = vmatpush1.bf16.msra.mxu0 %v2082_v63  ;;  %v2158_v63 = vld [vmem:[%s3003_s1 + $0x170] ss:$8 sps:$4 sm:$0xff]  }
  0x3a   : > { %974 = vmatpush1.bf16.msra.mxu1 %v2079_v62  ;;  %649 = vmatprep.subr.bf16.mxu0 %v2083_v0  ;;  %v710_v62 = vcombine.high %v2648_v32, %v2648_v32  ;;  %v2164_v0 = vld [vmem:[%s3003_s1 + $0x304] ss:$8 sps:$4 sm:$0xff]  }
  0x3b   : > { %975 = vmatprep.subr.bf16.mxu1 %v2087_v1  ;;  %v2188_v1 = vld [vmem:[%s3003_s1 + $0x404] ss:$8 sps:$4 sm:$0xff]  }
  0x3c   : > { %v2224_v32 = vld [vmem:[%s3003_s1 + $0x464] ss:$8 sps:$4 sm:$0xff]  }
  0x3d   : > { %650 = vmatpush1.bf16.msra.mxu0 %v2088_v4  ;;  %v2162_v4 = vld [vmem:[%s3003_s1 + $0x300] ss:$8 sps:$4 sm:$0xff]  }
  0x3e   : > { %976 = vmatpush1.bf16.msra.mxu1 %v2085_v3  ;;  %651 = vmatprep.subr.bf16.mxu0 %v2089_v5  ;;  %v724_v3 = vrot.slane %v710_v62, %v2516_v35  ;;  %v2186_v5 = vld [vmem:[%s3003_s1 + $0x400] ss:$8 sps:$4 sm:$0xff]  }
  0x3f   : > { %977 = vmatprep.subr.bf16.mxu1 %v2093_v6  ;;  %v2167_v6 = vld [vmem:[%s3003_s1 + $0x314] ss:$8 sps:$4 sm:$0xff]  }
  0x41   : > { %652 = vmatpush1.bf16.msra.mxu0 %v2094_v8  ;;  %v1051_v8 = vld [vmem:[%s2504_s14] sm:$0x2a]  ;;  %s2919_s14 = scalar_lea.vmem [#allocation4], %s1711_s12 }
  0x42   : > { %978 = vmatpush1.bf16.msra.mxu1 %v2091_v7  ;;  %653 = vmatprep.subr.bf16.mxu0 %v2095_v9  ;;  %v2194_v7 = vld [vmem:[%s3003_s1 + $0x414] ss:$8 sps:$4 sm:$0xff]   ;;  %v2761_v9 = vrot.slane %v1051_v8, %v2516_v35  ;;  %s1591_s17 = sshll.u32 %s2919_s14, 4  ;;  %s2936_s17 = int_to_ptr.vmem [resolvable:$true] %s1591_s17 }
  0x43   : > { %979 = vmatprep.subr.bf16.mxu1 %v2099_v10  ;;  %v2165_v10 = vld [vmem:[%s3003_s1 + $0x310] ss:$8 sps:$4 sm:$0xff]  }
  0x45   : > { %654 = vmatpush1.bf16.msra.mxu0 %v2100_v12  ;;  %v1117_v12 = vcombine.high %v2761_v9, %v2761_v9 }
  0x46   : > { %980 = vmatpush1.bf16.msra.mxu1 %v2097_v11  ;;  %655 = vmatprep.subr.bf16.mxu0 %v2101_v13  ;;  %v2192_v11 = vld [vmem:[%s3003_s1 + $0x410] ss:$8 sps:$4 sm:$0xff]   ;;  %v2170_v13 = vld [vmem:[%s3003_s1 + $0x324] ss:$8 sps:$4 sm:$0xff]  }
  0x47   : > { %981 = vmatprep.subr.bf16.mxu1 %v2105_v14  ;;  %v2200_v14 = vld [vmem:[%s3003_s1 + $0x424] ss:$8 sps:$4 sm:$0xff]   ;;  %v1119_v15 = vrot.slane %v1117_v12, 1 }
  0x49   : > { %656 = vmatpush1.bf16.msra.mxu0 %v2106_v17  ;;  %v2198_v17 = vld [vmem:[%s3003_s1 + $0x420] ss:$8 sps:$4 sm:$0xff]  }
  0x4a   : > { %982 = vmatpush1.bf16.msra.mxu1 %v2103_v16  ;;  %657 = vmatprep.subr.bf16.mxu0 %v2107_v18  ;;  %v2168_v16 = vld [vmem:[%s3003_s1 + $0x320] ss:$8 sps:$4 sm:$0xff]   ;;  %v2173_v18 = vld [vmem:[%s3003_s1 + $0x334] ss:$8 sps:$4 sm:$0xff]  }
  0x4b   : > { %983 = vmatprep.subr.bf16.mxu1 %v2111_v19  ;;  %v2171_v19 = vld [vmem:[%s3003_s1 + $0x330] ss:$8 sps:$4 sm:$0xff]  }
  0x4d   : > { %658 = vmatpush1.bf16.msra.mxu0 %v2112_v24  ;;  %v2174_v24 = vld [vmem:[%s3003_s1 + $0x340] ss:$8 sps:$4 sm:$0xff]  }
  0x4e   : > { %984 = vmatpush1.bf16.msra.mxu1 %v2109_v22  ;;  %1010 = vmatprep.subr.bf16.mxu0 %v2118_v26  ;;  %v2212_v22 = vld [vmem:[%s3003_s1 + $0x444] ss:$8 sps:$4 sm:$0xff]   ;;  %v2179_v26 = vld [vmem:[%s3003_s1 + $0x354] ss:$8 sps:$4 sm:$0xff]  }
  0x4f   : > { %985 = vmatprep.subr.bf16.mxu1 %v2115_v25  ;;  %v2210_v25 = vld [vmem:[%s3003_s1 + $0x440] ss:$8 sps:$4 sm:$0xff]  }
  0x50   : > { %660 = vmatmul.mubr.bf16.vlgmr.msra.gmra.mrb[0].mxu0 %v369_v27  ;;  %v2218_v27 = vld [vmem:[%s3003_s1 + $0x454] ss:$8 sps:$4 sm:$0xff]  }
  0x51   : > { %1011 = vmatpush1.bf16.msra.mxu0 %v2116_v30  ;;  %1042 = vmatprep.mubr.bf16.mxu0 %v2331_v2  ;;  %v2216_v30 = vld [vmem:[%s3003_s1 + $0x450] ss:$8 sps:$4 sm:$0xff]  }
  0x52   : > { %986 = vmatpush1.bf16.msra.mxu1 %v2113_v29  ;;  %1012 = vmatprep.subr.bf16.mxu0 %v2124_v33  ;;  %v2177_v29 = vld [vmem:[%s3003_s1 + $0x350] ss:$8 sps:$4 sm:$0xff]   ;;  %v1102_v33 = vcombine.high %v1051_v8, %v1051_v8 }
  0x53   : > { %987 = vmatprep.subr.bf16.mxu1 %v2121_v31  ;;  %v2182_v31 = vld [vmem:[%s3003_s1 + $0x364] ss:$8 sps:$4 sm:$0xff]  }
  0x55   : > { %1013 = vmatpush1.bf16.msra.mxu0 %v2122_v38  ;;  %v2230_v38 = vld [vmem:[%s3003_s1 + $0x474] ss:$8 sps:$4 sm:$0xff]  }
  0x56   : > { %988 = vmatpush1.bf16.msra.mxu1 %v2119_v36  ;;  %1014 = vmatprep.subr.bf16.mxu0 %v2130_v40  ;;  %v2222_v36 = vld [vmem:[%s3003_s1 + $0x460] ss:$8 sps:$4 sm:$0xff]   ;;  %v2183_v40 = vld [vmem:[%s3003_s1 + $0x370] ss:$8 sps:$4 sm:$0xff]  }
  0x57   : > { %989 = vmatprep.subr.bf16.mxu1 %v2127_v39  ;;  %v1116_v39 = vrot.slane %v1102_v33, %v2516_v35  ;;  %v2189_v35 = vld [vmem:[%s3003_s1 + $0x380] ss:$8 sps:$4 sm:$0xff]  }
  0x59   : > { %1015 = vmatpush1.bf16.msra.mxu0 %v2128_v42  ;;  %v2191_v42 = vld [vmem:[%s3003_s1 + $0x384] ss:$8 sps:$4 sm:$0xff]  }
  0x5a   : > { %990 = vmatpush1.bf16.msra.mxu1 %v2125_v41  ;;  %1016 = vmatprep.subr.bf16.mxu0 %v2136_v44  ;;  %v2228_v41 = vld [vmem:[%s3003_s1 + $0x470] ss:$8 sps:$4 sm:$0xff]   ;;  %v2197_v44 = vld [vmem:[%s3003_s1 + $0x394] ss:$8 sps:$4 sm:$0xff]  }
  0x5b   : > { %991 = vmatprep.subr.bf16.mxu1 %v2133_v43  ;;  %v1120_v43 = vrot.slane %v1116_v39, 1 }
  0x5d   : > { %1017 = vmatpush1.bf16.msra.mxu0 %v2134_v46  ;;  %v2203_v46 = vld [vmem:[%s3003_s1 + $0x3a4] ss:$8 sps:$4 sm:$0xff]  }
  0x5e   : > { %992 = vmatpush1.bf16.msra.mxu1 %v2131_v45  ;;  %1018 = vmatprep.subr.bf16.mxu0 %v2142_v48  ;;  %v2195_v45 = vld [vmem:[%s3003_s1 + $0x390] ss:$8 sps:$4 sm:$0xff]   ;;  %v2209_v48 = vld [vmem:[%s3003_s1 + $0x3b4] ss:$8 sps:$4 sm:$0xff]  }
  0x5f   : > { %993 = vmatprep.subr.bf16.mxu1 %v2139_v47  ;;  %v2201_v47 = vld [vmem:[%s3003_s1 + $0x3a0] ss:$8 sps:$4 sm:$0xff]  }
  0x61   : > { %1019 = vmatpush1.bf16.msra.mxu0 %v2140_v50  ;;  %v2215_v50 = vld [vmem:[%s3003_s1 + $0x3c4] ss:$8 sps:$4 sm:$0xff]  }
  0x62   : > { %994 = vmatpush1.bf16.msra.mxu1 %v2137_v49  ;;  %1020 = vmatprep.subr.bf16.mxu0 %v2148_v52  ;;  %v2207_v49 = vld [vmem:[%s3003_s1 + $0x3b0] ss:$8 sps:$4 sm:$0xff]   ;;  %v2221_v52 = vld [vmem:[%s3003_s1 + $0x3d4] ss:$8 sps:$4 sm:$0xff]  }
  0x63   : > { %995 = vmatprep.subr.bf16.mxu1 %v2145_v51  ;;  %v2213_v51 = vld [vmem:[%s3003_s1 + $0x3c0] ss:$8 sps:$4 sm:$0xff]  }
  0x65   : > { %1021 = vmatpush1.bf16.msra.mxu0 %v2146_v54  ;;  %v2227_v54 = vld [vmem:[%s3003_s1 + $0x3e4] ss:$8 sps:$4 sm:$0xff]  }
  0x66   : > { %996 = vmatpush1.bf16.msra.mxu1 %v2143_v53  ;;  %1022 = vmatprep.subr.bf16.mxu0 %v2154_v56  ;;  %v2219_v53 = vld [vmem:[%s3003_s1 + $0x3d0] ss:$8 sps:$4 sm:$0xff]   ;;  %v2233_v56 = vld [vmem:[%s3003_s1 + $0x3f4] ss:$8 sps:$4 sm:$0xff]  }
  0x67   : > { %997 = vmatprep.subr.bf16.mxu1 %v2151_v55  ;;  %v2225_v55 = vld [vmem:[%s3003_s1 + $0x3e0] ss:$8 sps:$4 sm:$0xff]  }
  0x69   : > { %1023 = vmatpush1.bf16.msra.mxu0 %v2152_v58  ;;  %v1118_v58 = vrot.slane %v2761_v9, 1 }
  0x6a   : > { %998 = vmatpush1.bf16.msra.mxu1 %v2149_v57  ;;  %1024 = vmatprep.subr.bf16.mxu0 %v2160_v60  ;;  %v2231_v57 = vld [vmem:[%s3003_s1 + $0x3f0] ss:$8 sps:$4 sm:$0xff]  }
  0x6b   : > { %999 = vmatprep.subr.bf16.mxu1 %v2157_v59 }
  0x6d   : > { %1025 = vmatpush1.bf16.msra.mxu0 %v2158_v63 }
  0x6e   : > { %1000 = vmatpush1.bf16.msra.mxu1 %v2155_v61  ;;  %1364 = vmatprep.subr.bf16.mxu0 %v2164_v0 }
  0x6f   : > { %1405 = vmatprep.subr.bf16.mxu1 %v2188_v1 }
  0x70   : > { %1043 = vmatmul.mubr.bf16.vlgmr.msra.gmra.mrb[4].mxu0 %v724_v3 }
  0x71   : > { %1002 = vmatmul.mubr.bf16.vlgmr.msra.gmra.mrb[4].mxu1 %v2655_v34  ;;  %1365 = vmatpush1.bf16.msra.mxu0 %v2162_v4  ;;  %v2180_v34 = vld [vmem:[%s3003_s1 + $0x360] ss:$8 sps:$4 sm:$0xff]  }
  0x72   : > { %1406 = vmatpush1.bf16.msra.mxu1 %v2186_v5  ;;  %1366 = vmatprep.subr.bf16.mxu0 %v2167_v6 }
  0x73   : > { %1407 = vmatprep.subr.bf16.mxu1 %v2194_v7  ;;  %1437 = vmatprep.mubr.bf16.mxu1 %v2331_v2  ;;  %v2206_v2 = vld [vmem:[%s3003_s1 + $0x434] ss:$8 sps:$4 sm:$0xff]  }
  0x74   : > { %1396 = vmatprep.mubr.bf16.mxu0 %v1119_v15 }
  0x75   : > { %1367 = vmatpush1.bf16.msra.mxu0 %v2165_v10 }
  0x76   : > { %1408 = vmatpush1.bf16.msra.mxu1 %v2192_v11  ;;  %1368 = vmatprep.subr.bf16.mxu0 %v2170_v13 }
  0x77   : > { %1409 = vmatprep.subr.bf16.mxu1 %v2200_v14 }
  0x79   : > { %1369 = vmatpush1.bf16.msra.mxu0 %v2168_v16 }
  0x7a   : > { %1410 = vmatpush1.bf16.msra.mxu1 %v2198_v17  ;;  %1370 = vmatprep.subr.bf16.mxu0 %v2173_v18 }
  0x7b   : > { %1411 = vmatprep.subr.bf16.mxu1 %v2206_v2 }
  0x7d   : > { %1371 = vmatpush1.bf16.msra.mxu0 %v2171_v19 }
  0x7e   : > { %1412 = vmatpush1.bf16.msra.mxu1 %v2204_v20  ;;  %1372 = vmatprep.subr.bf16.mxu0 %v2176_v21  ;;  %v1452_v21 = vsub.s32 0, %v2490_v28 }
  0x7f   : > { %1413 = vmatprep.subr.bf16.mxu1 %v2212_v22  ;;  %v1448_v22 = vld [vmem:[%s3004_s2] sm:$0x3] }
  0x81   : > { %1373 = vmatpush1.bf16.msra.mxu0 %v2174_v24  ;;  %v1456_v24 = vsub.s32 1, %v2490_v28 }
  0x82   : > { %1414 = vmatpush1.bf16.msra.mxu1 %v2210_v25  ;;  %1374 = vmatprep.subr.bf16.mxu0 %v2179_v26 }
  0x83   : > { %1415 = vmatprep.subr.bf16.mxu1 %v2218_v27  ;;  %v1453_v27 = vrot.slane %v1448_v22, %v1452_v21 }
  0x85   : > { %1375 = vmatpush1.bf16.msra.mxu0 %v2177_v29 }
  0x86   : > { %1416 = vmatpush1.bf16.msra.mxu1 %v2216_v30  ;;  %1376 = vmatprep.subr.bf16.mxu0 %v2182_v31  ;;  %v1457_v31 = vrot.slane %v1448_v22, %v1456_v24 }
  0x87   : > { %1417 = vmatprep.subr.bf16.mxu1 %v2224_v32 }
  0x89   : > { %1377 = vmatpush1.bf16.msra.mxu0 %v2180_v34 }
  0x8a   : > { %1418 = vmatpush1.bf16.msra.mxu1 %v2222_v36  ;;  %1378 = vmatprep.subr.bf16.mxu0 %v2185_v37 }
  0x8b   : > { %1419 = vmatprep.subr.bf16.mxu1 %v2230_v38 }
  0x8d   : > { %1379 = vmatpush1.bf16.msra.mxu0 %v2183_v40 }
  0x8e   : > { %1420 = vmatpush1.bf16.msra.mxu1 %v2228_v41  ;;  %1380 = vmatprep.subr.bf16.mxu0 %v2191_v42 }
  0x91   : > { %1438 = vmatmul.mubr.bf16.vlgmr.msra.gmra.mrb[8].mxu1 %v1120_v43  ;;  %1381 = vmatpush1.bf16.msra.mxu0 %v2189_v35 }
  0x92   : > { %1382 = vmatprep.subr.bf16.mxu0 %v2197_v44 }
  0x95   : > { %1383 = vmatpush1.bf16.msra.mxu0 %v2195_v45 }
  0x96   : > { %1384 = vmatprep.subr.bf16.mxu0 %v2203_v46 }
  0x99   : > { %1385 = vmatpush1.bf16.msra.mxu0 %v2201_v47 }
  0x9a   : > { %1386 = vmatprep.subr.bf16.mxu0 %v2209_v48 }
  0x9d   : > { %1387 = vmatpush1.bf16.msra.mxu0 %v2207_v49 }
  0x9e   : > { %1388 = vmatprep.subr.bf16.mxu0 %v2215_v50 }
  0xa1   : > { %1389 = vmatpush1.bf16.msra.mxu0 %v2213_v51 }
  0xa2   : > { %1390 = vmatprep.subr.bf16.mxu0 %v2221_v52 }
  0xa5   : > { %1391 = vmatpush1.bf16.msra.mxu0 %v2219_v53  ;;  %v2333_v53 = vmov 1966171168  }
  0xa6   : > { %1392 = vmatprep.subr.bf16.mxu0 %v2227_v54  ;;  %v1495_v54 = vunpack.c.l.s4 %v2333_v53 }
  0xa9   : > { %1393 = vmatpush1.bf16.msra.mxu0 %v2225_v55 }
  0xaa   : > { %1394 = vmatprep.subr.bf16.mxu0 %v2233_v56 }
  0xad   : > { %1395 = vmatpush1.bf16.msra.mxu0 %v2231_v57 }
  0xb0   : > { %1397 = vmatmul.mubr.bf16.vlgmr.msra.gmra.mrb[8].mxu0 %v1118_v58 }
 0x104   : > { %v702_v59 = vpop.f32.mrb[0].mxu1 }
 0x105   : > { %v704_v60 = vpop.f32.mrb[1].mxu1 }
 0x106   : > { %v706_v61 = vpop.f32.mrb[2].mxu1 }
 0x107   : > { %v707_v62 = vpop.f32.mrb[3].mxu1 }
 0x123   : > { %v661_v63 = vpop.f32.mrb[0].mxu0 }
 0x124   : > { %v703_v0 = vadd.f32 %v702_v59, %v661_v63  ;;  %v663_v1 = vpop.f32.mrb[1].mxu0  ;;  %v1496_v63 = vunpack.c.0.s8 %v1495_v54 }
 0x125   : > { %v705_v3 = vadd.f32 %v704_v60, %v663_v1  ;;  %v665_v4 = vpop.f32.mrb[2].mxu0 }
 0x126   : > { %v666_v5 = vpop.f32.mrb[3].mxu0 }
 0x143   : > { %v1044_v7 = vpop.f32.mrb[4].mxu0 }
 0x144   : > { %v1003_v6 = vpop.f32.mrb[4].mxu1  ;;  %v1046_v11 = vpop.f32.mrb[5].mxu0 }
 0x145   : > { %v1004_v8 = vadd.f32 %v1003_v6, %v703_v0  ;;  %v1005_v10 = vpop.f32.mrb[5].mxu1  ;;  %v1048_v13 = vpop.f32.mrb[6].mxu0 }
 0x146   : > { %v1006_v12 = vadd.f32 %v1005_v10, %v705_v3  ;;  %v1007_v9 = vpop.f32.mrb[6].mxu1  ;;  %v1049_v15 = vpop.f32.mrb[7].mxu0 }
 0x147   : > { %v1045_v14 = vadd.f32 %v1044_v7, %v1004_v8  ;;  %v1008_v16 = vpop.f32.mrb[7].mxu1  ;;  %v1499_v8 = vsub.s32 %v1496_v63, %v2490_v28 }
 0x148   : > { %v1047_v17 = vadd.f32 %v1046_v11, %v1006_v12 }
 0x164   : > { %v1439_v18 = vpop.f32.mrb[8].mxu1 }
 0x165   : > { %v1441_v2 = vpop.f32.mrb[9].mxu1 }
 0x166   : > { %v1443_v19 = vpop.f32.mrb[10].mxu1 }
 0x167   : > { %v1444_v20 = vpop.f32.mrb[11].mxu1 }
 0x183   : > { %v1398_v25 = vpop.f32.mrb[8].mxu0 }
 0x184   : > { %v1440_v26 = vadd.f32 %v1439_v18, %v1398_v25  ;;  %v1400_v29 = vpop.f32.mrb[9].mxu0 }
 0x185   : > { %v1442_v30 = vadd.f32 %v1441_v2, %v1400_v29  ;;  %v1402_v32 = vpop.f32.mrb[10].mxu0 }
 0x186   : > { %v1446_v33 = vadd.f32 %v1440_v26, %v1045_v14  ;;  %v1403_v34 = vpop.f32.mrb[11].mxu0 }
 0x187   : > { %v1447_v36 = vadd.f32 %v1442_v30, %v1047_v17 }
 0x188   : > { %v1460_v37 = vadd.f32 %v1453_v27, %v1446_v33 }
 0x189   : > { %v1461_v38 = vadd.f32 %v1457_v31, %v1447_v36 }
 0x18a   : > { %v1462_v39 = vmax.f32 %v1460_v37, 0.0 }
 0x18b   : > { %v1463_v40 = vmax.f32 %v1461_v38, 0.0 }
 0x18c   : > { %v1477_v41 = vsel %vm1476_vm0, %v1462_v39, 0.0  ;;  %v1514_v42 = vmul.f32 %v1462_v39, %v1462_v39 }
 0x18d   : > { %v1478_v43 = vrot.slane %v1477_v41, 4  ;;  %v1466_v35 = vcombine.low %v1462_v39, %v1463_v40  ;;  %v1484_v44 = vsel %vm1476_vm0, %v1463_v40, 0.0  ;;  %v1515_v45 = vmul.f32 %v1463_v40, %v1463_v40 }
 0x18e   : > { %v1516_v46 = vsel %vm1476_vm0, %v1514_v42, 0.0  ;;  %v1485_v47 = vrot.slane %v1484_v44, 4 }
 0x18f   : > { %v1479_v48 = vadd.f32 %v1478_v43, %v1477_v41  ;;  %v1517_v49 = vrot.slane %v1516_v46, 4  ;;  %1956 = vst.sshfl [vmem:[%s245_s11] sm:$0x33 pattern:$0x76325410] %v1466_v35  ;;  %v1523_v50 = vsel %vm1476_vm0, %v1515_v45, 0.0  ;;  %s2239_s11 = sshll.u32 %s2334_s10, 4  ;;  %s2240_s11 = int_to_ptr.vmem [resolvable:$false] %s2239_s11 }
 0x190   : > { %v1486_v51 = vadd.f32 %v1485_v47, %v1484_v44  ;;  %v1524_v52 = vrot.slane %v1523_v50, 4  ;;  %s2241_s12 = scalar_lea.vmem %s2240_s11, 64  ;;  %p2242_p0 = scmp.lt.s32.totalorder %s2927_s16, %s2240_s11 }
 0x191   : > { %v1480_v55 = vrot.slane %v1479_v48, 2  ;;  %v1518_v56 = vadd.f32 %v1517_v49, %v1516_v46  ;;  %p2243_p1 = scmp.lt.s32.totalorder %s2241_s12, %s2235_s8 }
 0x192   : > { %v1487_v57 = vrot.slane %v1486_v51, 2  ;;  %v1525_v58 = vadd.f32 %v1524_v52, %v1523_v50 }
 0x193   : > { %v1481_v59 = vadd.f32 %v1480_v55, %v1479_v48  ;;  %v1519_v60 = vrot.slane %v1518_v56, 2  ;;  %p2244_p2 = por %p2243_p1, %p2242_p0 }
 0x194   : > { %v1488_v61 = vadd.f32 %v1487_v57, %v1486_v51  ;;  %v1526_v62 = vrot.slane %v1525_v58, 2 }
 0x195   : > { %v1482_v0 = vrot.slane %v1481_v59, 1  ;;  %v1520_v1 = vadd.f32 %v1519_v60, %v1518_v56  ;;  %p2245_p3 = pnand %p2244_p2, %p2238_p13 }
 0x196   : > { %v1489_v3 = vrot.slane %v1488_v61, 1  ;;  %v1527_v4 = vadd.f32 %v1526_v62, %v1525_v58 }
 0x197   : > { %v1483_v5 = vadd.f32 %v1482_v0, %v1481_v59  ;;  %v1521_v6 = vrot.slane %v1520_v1, 1 }
 0x198   : > { %v1490_v7 = vadd.f32 %v1489_v3, %v1488_v61  ;;  %v1528_v10 = vrot.slane %v1527_v4, 1 }
 0x199   : > { %v1522_v11 = vadd.f32 %v1521_v6, %v1520_v1 }
 0x19a   : > { %v1493_v12 = vcombine.low %v1483_v5, %v1490_v7  ;;  %v1529_v13 = vadd.f32 %v1528_v10, %v1527_v4 }
 0x19c   : > { %v1500_v9 = vrot.slane %v1493_v12, %v1499_v8  ;;  %v1532_v14 = vcombine.low %v1522_v11, %v1529_v13 }
 0x19e   : > { %v1507_v28 = vrot.slane %v1500_v9, %v1499_v8  ;;  %v1539_v16 = vrot.slane %v1532_v14, %v1499_v8 }
 0x1a0   : > { %1513 = vst.msk [vmem:[%s228_s15] sm:$0x3] %vm2915_vm1, %v1507_v28  ;;  %v1546_v23 = vrot.slane %v1539_v16, %v1499_v8 }
 0x1a1   : > { %2248 = shalt.err (!%p2245_p3)
}
 0x1a2   : > { %s2249_s13 = scalar_lea.hbm %s2925_s22, 32  ;;  %s2253_s26 = scalar_lea.hbm %s3006_s4, 64 }
 0x1a3   : > { %p2250_p4 = scmp.ne.s32.totalorder %s2925_s22, %s2249_s13  ;;  %p2254_p9 = scmp.lt.u32.totalorder %s2925_s22, %s3006_s4 }
 0x1a4   : > { %p2255_p10 = scmp.lt.u32.totalorder %s2253_s26, %s2249_s13  ;;  %p2257_p12 = scmp.lt.u32.totalorder %s2249_s13, %s2925_s22 }
 0x1a5   : > { %p2251_p7 = pnand %p2250_p4, %p2404_p5 }
 0x1a6   : > { %p2256_p11 = por %p2255_p10, %p2254_p9 }
 0x1a7   : > { %p2252_p8 = pneg %p2251_p7 }
 0x1a8   : > { %p2258_p13 = por %p2257_p12, %p2256_p11 }
 0x1aa   : > { %p2259_p0 = pnand %p2258_p13, %p2252_p8 }
 0x1ac   : > { %2262 = shalt.err (!%p2259_p0)
}
 0x1ad   : > { %1969 = dma.vmem_to_hbm [thread:$0]  (%p2404_p5), %s2927_s16, 32, %s2925_s22, %s1555_s7   ;;  %1548 = vst.msk [vmem:[%s2919_s14] sm:$0x3] %vm2915_vm1, %v1546_v23 }
 0x1ae   : > { %s1560_s8 = scalar_lea.sflag [#allocation5], %s2909_s9  ;;  %s2263_s10 = scalar_lea.vmem %s2936_s17, 32 }
 0x1af   : > { %p2264_p1 = scmp.ne.s32.totalorder %s2936_s17, %s2263_s10  ;;  %s2335_s11 = smov [#allocation4]  }
 0x1b0   : > { %s2267_s12 = sshll.u32 %s2335_s11, 4  ;;  %s2268_s12 = int_to_ptr.vmem [resolvable:$false] %s2267_s12 }
 0x1b1   : > { %p2265_p2 = pnand %p2264_p1, %p2404_p5  ;;  %s2269_s13 = scalar_lea.vmem %s2268_s12, 64 }
 0x1b2   : > { %p2270_p4 = scmp.lt.s32.totalorder %s2936_s17, %s2268_s12  ;;  %p2271_p7 = scmp.lt.s32.totalorder %s2269_s13, %s2263_s10 }
 0x1b3   : > { %p2266_p3 = pneg %p2265_p2 }
 0x1b4   : > { %p2272_p8 = por %p2271_p7, %p2270_p4 }
 0x1b6   : > { %p2273_p9 = pnand %p2272_p8, %p2266_p3 }
 0x1b8   : > { %2276 = shalt.err (!%p2273_p9)
}
 0x1b9   : > { %s2277_s9 = scalar_lea.hbm %s2934_s6, 32  ;;  %s2281_s22 = scalar_lea.hbm %s3007_s5, 64 }
 0x1ba   : > { %p2278_p10 = scmp.ne.s32.totalorder %s2934_s6, %s2277_s9  ;;  %p2282_p13 = scmp.lt.u32.totalorder %s2934_s6, %s3007_s5 }
 0x1bb   : > { %p2283_p0 = scmp.lt.u32.totalorder %s2281_s22, %s2277_s9  ;;  %p2285_p2 = scmp.lt.u32.totalorder %s2277_s9, %s2934_s6 }
 0x1bc   : > { %p2279_p11 = pnand %p2278_p10, %p2404_p5 }
 0x1bd   : > { %p2284_p1 = por %p2283_p0, %p2282_p13 }
 0x1be   : > { %p2280_p12 = pneg %p2279_p11 }
 0x1bf   : > { %p2286_p3 = por %p2285_p2, %p2284_p1 }
 0x1c1   : > { %p2287_p4 = pnand %p2286_p3, %p2280_p12 }
 0x1c3   : > { %2290 = shalt.err (!%p2287_p4)
}
 0x1c4   : > { %1970 = dma.vmem_to_hbm [thread:$0]  (%p2404_p5), %s2936_s17, 32, %s2934_s6, %s1560_s8  }
 0x1c5 PF: > { %p1980_p7 = scmp.ge.s32.totalorder %s2329_s21, 2  ;;  %s1611_s25 = sand.u32 1, %s2317_s18  }
 0x1c6   : > { %s1612_s26 = scalar_lea.sflag [#allocation3], %s1611_s25 }
 0x1c7   : > { %p1974_p8 = pnand %p1980_p7, %p2408_p6 }
 0x1c9   : > { %2308 = dma.done.wait (!%p1974_p8), %s1612_s26, 32  }
 0x1ca   : > { %2310 = vsyncadd (!%p1974_p8), %s1612_s26, 4294967264  ;;  %s1621_s30 = scalar_lea.sflag [#allocation5], %s1611_s25 }
 0x1cb   : > { %2312 = dma.done.wait (!%p1974_p8), %s1621_s30, 32  }
 0x1cc   : > { %2314 = vsyncadd (!%p1974_p8), %s1621_s30, 4294967264  ;;  %p19_p5 = scmp.ge.s32.totalorder %s2391_s24, 4   ;;  %s3012_s18 = smov %s2321_s19 }
 0x1cd   : > { %s3013_s19 = smov %s2325_s20  ;;  %s3014_s20 = smov %s2402_s27 }
 0x1ce   : > { %s3015_s21 = smov %s2391_s24  ;;  %21 = sbr.rel (!%p19_p5) target bundleno = 5 (0x5), region = 98 }
 0x1d5   :  { %1626 = vsyncpa [#allocation3], 1 }
 0x1d6   :  { %1628 = vsyncpa [#allocation3 + $0x1], 1 }
 0x1d7   :  { %1629 = vsyncpa [#allocation5], 1 }
 0x1d8   :  { %1631 = vsyncpa [#allocation5 + $0x1], 1 }

</bundles_post_ra>
